<compile_context>
chip_gen: v6e
topology: v6e:2x2x1
jax: 0.10.0
libtpu: 0.0.40
codegen_flags: <defaults>
</compile_context>

<pallas_src>
import functools

import jax
import jax.numpy as jnp
from jax import lax
from jax.experimental import pallas as pl
from jax.experimental.pallas import tpu as pltpu

# ----- constants hard-coded in the PyTorch __init__ -----
ENV_CHANNELS = 2640
OUT_ENV_CHANNELS = 512
VEL_CHANNELS = 3

_VMEM_LIMIT = 48 * 1024 * 1024   # <= v7x 64 MiB physical, > v5e 16 MiB scoped default


def _round_up(x, m):
    return ((x + m - 1) // m) * m


def _sigmoid(x):
    # tanh-form sigmoid: transcendental goes to the EUP slot, no VALU divide.
    return 0.5 * (jnp.tanh(0.5 * x) + 1.0)


def _bf16(x):
    return x.astype(jnp.bfloat16)


# =====================================================================================
# Kernel 1: fused environment MLP + layer-1 LSTM gate projection.
#   env   = relu(x @ W1 + b1) @ W2 + b2     (W1 zero-row-padded to the full x width, so
#                                             the env column slice is fused away)
#   gates = vr @ Wvr + env @ Wenv + b       (vr = [vel | rest] columns, concat'd once in
#                                             the wrapper; Wvr/Wenv = row blocks of W_ih)
# Row-tiled over the flattened (B*T, F) input, "parallel" over row tiles.  All matmuls use
# bf16 operands with f32 accumulation; the (M,512) env intermediate never leaves VMEM.
# =====================================================================================
def _env_gates_kernel(x_ref, vr_ref, w1_ref, b1_ref, w2_ref, b2_ref,
                      wenv_ref, wvr_ref, bg_ref, o_ref):
    h1 = jnp.dot(_bf16(x_ref[...]), w1_ref[...],
                 preferred_element_type=jnp.float32) + b1_ref[...]
    h1 = jnp.maximum(h1, 0.0)
    env = jnp.dot(_bf16(h1), w2_ref[...],
                  preferred_element_type=jnp.float32) + b2_ref[...]
    acc = jnp.dot(_bf16(env), wenv_ref[...], preferred_element_type=jnp.float32)
    acc = acc + jnp.dot(_bf16(vr_ref[...]), wvr_ref[...],
                        preferred_element_type=jnp.float32)
    o_ref[...] = (acc + bg_ref[...]).astype(o_ref.dtype)


def fused_env_gates(xf, vr, w1_full, b1, w2, b2, w_env, w_vr, b_gates, *, tm=512):
    M, F = xf.shape
    Kvr = vr.shape[1]
    G = w_env.shape[1]
    H1 = w1_full.shape[1]
    tm = min(tm, _round_up(M, 8))
    M_pad = _round_up(M, tm)
    if M_pad != M:
        pad = ((0, M_pad - M), (0, 0))
        xf = jnp.pad(xf, pad)
        vr = jnp.pad(vr, pad)
    # TODO(synk): the constant-index-map weight blocks below would benefit from
    #             pipeline_mode=pl.Buffered(1) (single-buffering halves their VMEM);
    #             left default-buffered for portability across jax versions.
    out = pl.pallas_call(
        _env_gates_kernel,
        out_shape=jax.ShapeDtypeStruct((M_pad, G), jnp.float32),
        grid=(M_pad // tm,),
        in_specs=[
            pl.BlockSpec((tm, F), lambda i: (i, 0)),
            pl.BlockSpec((tm, Kvr), lambda i: (i, 0)),
            pl.BlockSpec((F, H1), lambda i: (0, 0)),
            pl.BlockSpec((1, H1), lambda i: (0, 0)),
            pl.BlockSpec((H1, H1), lambda i: (0, 0)),
            pl.BlockSpec((1, H1), lambda i: (0, 0)),
            pl.BlockSpec((H1, G), lambda i: (0, 0)),
            pl.BlockSpec((Kvr, G), lambda i: (0, 0)),
            pl.BlockSpec((1, G), lambda i: (0, 0)),
        ],
        out_specs=pl.BlockSpec((tm, G), lambda i: (i, 0)),
        compiler_params=pltpu.CompilerParams(
            dimension_semantics=("parallel",),
            vmem_limit_bytes=_VMEM_LIMIT,
        ),
    )(xf, vr, w1_full, b1, w2, b2, w_env, w_vr, b_gates)
    return out[:M]


# =====================================================================================
# Kernel 2: LSTM recurrence with fused epilogue projection.
# The input-projection gates (x @ W_ih + b) are precomputed; each grid step processes one
# (bblk, tblk) batch/time block (statically unrolled over tblk).  Per timestep only the
# small h @ W_hh matmuls run, one per gate (column block of W_hh) so live vector data stays
# at (bblk, H).  After updating h the step immediately projects it with W_next (the NEXT
# layer's W_ih, or the final hidden->out Linear), so per-layer hidden states never
# round-trip HBM.  Gate order i, f, g, o (PyTorch).  Batch-block axis "parallel" (v7x dual
# TensorCore), time axis "arbitrary"; h/c live in f32 VMEM scratch across time blocks.
# NOTE: padded tail timesteps run the cell on zero gates; outputs are sliced off, but the
#       (never exposed) final h/c would be past the valid range.
# =====================================================================================
def _lstm_fused_kernel(gx_ref, whh_ref, wnext_ref, bnext_ref, o_ref, h_scr, c_scr):
    @pl.when(pl.program_id(1) == 0)
    def _():
        h_scr[...] = jnp.zeros_like(h_scr)
        c_scr[...] = jnp.zeros_like(c_scr)

    h = h_scr[...]                       # (bblk, H) f32
    c = c_scr[...]                       # (bblk, H) f32
    H = h_scr.shape[1]
    tblk = gx_ref.shape[1]

    for t in range(tblk):                # static unroll over the time block
        hb = _bf16(h)

        def gate_pre(k, t=t, hb=hb):     # per-gate: caps live data at (bblk, H)
            return gx_ref[:, t, k * H:(k + 1) * H] + jnp.dot(
                hb, whh_ref[:, k * H:(k + 1) * H],
                preferred_element_type=jnp.float32)

        # TODO(synk): on v6e/v7x these nonlinearities could run in bf16 (~2x EUP) if the
        #             recurrence profiles EUP-bound; kept f32 (v5e EUP has no bf16).
        i_g = _sigmoid(gate_pre(0))
        f_g = _sigmoid(gate_pre(1))
        g_g = jnp.tanh(gate_pre(2))
        o_g = _sigmoid(gate_pre(3))
        c = f_g * c + i_g * g_g
        h = o_g * jnp.tanh(c)
        # fused epilogue: next layer's gates (or the final Linear) for this timestep;
        # the MXU is otherwise idle here, so this matmul is nearly free.
        o_ref[:, t, :] = (jnp.dot(_bf16(h), wnext_ref[...],
                                  preferred_element_type=jnp.float32)
                          + bnext_ref[...]).astype(o_ref.dtype)

    h_scr[...] = h
    c_scr[...] = c


def lstm_recurrence_fused(gates_btg, whh, wnext, bnext, *, tblk=16, bblk=None):
    B, T, G = gates_btg.shape
    H = whh.shape[0]
    N = wnext.shape[1]
    tblk = min(tblk, _round_up(T, 8))
    T_pad = _round_up(T, tblk)
    if T_pad != T:
        gates_btg = jnp.pad(gates_btg, ((0, 0), (0, T_pad - T), (0, 0)))
    if bblk is None:
        # split batch over the two v7x TensorCores when each half stays a multiple of 8
        bblk = B // 2 if B % 16 == 0 else B
    out = pl.pallas_call(
        _lstm_fused_kernel,
        out_shape=jax.ShapeDtypeStruct((B, T_pad, N), jnp.float32),
        grid=(B // bblk, T_pad // tblk),
        in_specs=[
            pl.BlockSpec((bblk, tblk, G), lambda b, t: (b, t, 0)),
            pl.BlockSpec((H, G), lambda b, t: (0, 0)),
            pl.BlockSpec((H, N), lambda b, t: (0, 0)),
            pl.BlockSpec((1, N), lambda b, t: (0, 0)),
        ],
        out_specs=pl.BlockSpec((bblk, tblk, N), lambda b, t: (b, t, 0)),
        scratch_shapes=[
            pltpu.VMEM((bblk, H), jnp.float32),
            pltpu.VMEM((bblk, H), jnp.float32),
        ],
        compiler_params=pltpu.CompilerParams(
            dimension_semantics=("parallel", "arbitrary"),
            vmem_limit_bytes=_VMEM_LIMIT,
        ),
    )(gates_btg, _bf16(whh), _bf16(wnext), bnext)
    return out[:, :T]


# =====================================================================================
# Parameter init (deterministic, PyTorch-like U(-1/sqrt(fan), 1/sqrt(fan)))
# =====================================================================================
def init_params(key, in_channels, cond_channels, hidden_channels, out_channels, num_layers):
    cond_adj = cond_channels - ENV_CHANNELS + OUT_ENV_CHANNELS
    lstm_in = in_channels + cond_adj
    keys = iter(jax.random.split(key, 6 + 3 * num_layers))

    def unif(k, shape, fan_in):
        bound = 1.0 / float(fan_in) ** 0.5
        return jax.random.uniform(k, shape, jnp.float32, -bound, bound)

    params = {
        "env_w1": unif(next(keys), (ENV_CHANNELS, OUT_ENV_CHANNELS), ENV_CHANNELS),
        "env_b1": unif(next(keys), (1, OUT_ENV_CHANNELS), ENV_CHANNELS),
        "env_w2": unif(next(keys), (OUT_ENV_CHANNELS, OUT_ENV_CHANNELS), OUT_ENV_CHANNELS),
        "env_b2": unif(next(keys), (1, OUT_ENV_CHANNELS), OUT_ENV_CHANNELS),
        "out_w": unif(next(keys), (hidden_channels, out_channels), hidden_channels),
        "out_b": unif(next(keys), (1, out_channels), hidden_channels),
        "lstm_layers": [],
    }
    d = lstm_in
    for _ in range(num_layers):
        params["lstm_layers"].append({
            "wih": unif(next(keys), (d, 4 * hidden_channels), hidden_channels),
            "whh": unif(next(keys), (hidden_channels, 4 * hidden_channels), hidden_channels),
            "b": unif(next(keys), (1, 4 * hidden_channels), hidden_channels),
        })
        d = hidden_channels
    return params


# =====================================================================================
# Forward pass (Pallas-backed).  No HBM transposes, no env slice/pad copies; the only
# wrapper-side data movement is the tiny (M, ~26) [vel|rest] concat and weight prep.
# NOTE: matching the PyTorch forward literally, vel = x[..., :3] overlaps the env slice
#       x[..., :2640] and columns 2640:2643 are never consumed.
# =====================================================================================
def condition_encoder_lstm_forward(params, x):
    B, T, F = x.shape
    M = B * T
    xf = x.reshape(M, F)

    layer0 = params["lstm_layers"][0]
    wih0 = layer0["wih"]                                             # (d_in, 4H) f32
    # split layer-1 W_ih into its env rows and its [vel | rest] rows (concat fused away)
    w_env = wih0[VEL_CHANNELS:VEL_CHANNELS + OUT_ENV_CHANNELS]
    w_vr = jnp.concatenate(
        [wih0[:VEL_CHANNELS], wih0[VEL_CHANNELS + OUT_ENV_CHANNELS:]], axis=0)
    # env W1 zero-row-padded to the full x width, so the kernel reads x directly
    w1_full = jnp.pad(params["env_w1"], ((0, F - ENV_CHANNELS), (0, 0)))
    # [vel | rest] columns: tiny (M, ~26) concat, replaces two sub-K matmuls
    vr = jnp.concatenate(
        [xf[:, :VEL_CHANNELS], xf[:, VEL_CHANNELS + ENV_CHANNELS:]], axis=-1)

    gates = fused_env_gates(
        xf, vr, _bf16(w1_full), params["env_b1"], _bf16(params["env_w2"]),
        params["env_b2"], _bf16(w_env), _bf16(w_vr), layer0["b"])    # (M, 4H) f32

    H = layer0["whh"].shape[0]
    cur = gates.reshape(B, T, 4 * H)                                 # batch-major, free
    layers = params["lstm_layers"]
    for l, layer in enumerate(layers):
        if l + 1 < len(layers):
            wnext, bnext = layers[l + 1]["wih"], layers[l + 1]["b"]
        else:
            wnext, bnext = params["out_w"], params["out_b"]
        cur = lstm_recurrence_fused(cur, layer["whh"], wnext, bnext)  # (B, T, ·)
    return cur                                                        # (B, T, out)


# =====================================================================================
# Pure-JAX reference mirroring the kernels' bf16-operand / f32-accumulate matmuls
# =====================================================================================
def reference_forward(params, x):
    def mm(a, w):
        return jnp.dot(a.astype(jnp.bfloat16), w.astype(jnp.bfloat16),
                       preferred_element_type=jnp.float32)

    B, T, F = x.shape
    xf = x.reshape(B * T, F)
    env = jnp.maximum(mm(xf[:, :ENV_CHANNELS], params["env_w1"]) + params["env_b1"], 0.0)
    env = mm(env, params["env_w2"]) + params["env_b2"]
    lstm_in = jnp.concatenate(
        [xf[:, :VEL_CHANNELS], env, xf[:, VEL_CHANNELS + ENV_CHANNELS:]], axis=-1)
    seq = lstm_in.reshape(B, T, -1).transpose(1, 0, 2)   # (T, B, D)
    for layer in params["lstm_layers"]:
        H = layer["whh"].shape[0]

        def step(carry, x_t, layer=layer, H=H):
            hh, cc = carry
            gates = mm(x_t, layer["wih"]) + mm(hh, layer["whh"]) + layer["b"]
            i_g = _sigmoid(gates[:, :H])
            f_g = _sigmoid(gates[:, H:2 * H])
            g_g = jnp.tanh(gates[:, 2 * H:3 * H])
            o_g = _sigmoid(gates[:, 3 * H:])
            cc = f_g * cc + i_g * g_g
            hh = o_g * jnp.tanh(cc)
            return (hh, cc), hh

        init = (jnp.zeros((B, H), jnp.float32), jnp.zeros((B, H), jnp.float32))
        _, seq = lax.scan(step, init, seq)
    out = mm(seq.reshape(T * B, -1), params["out_w"]) + params["out_b"]
    return out.reshape(T, B, -1).transpose(1, 0, 2)


# =====================================================================================
if __name__ == "__main__":
    # Small shapes consistent with the module constants.
    B, T = 2, 8
    in_channels = 10
    cond_channels = ENV_CHANNELS + VEL_CHANNELS + 13     # 2656 (>= vel + env)
    hidden_channels = 32
    out_channels = 16
    num_layers = 2
    total_feats = in_channels + cond_channels            # 2666

    key = jax.random.PRNGKey(0)
    k_params, k_x = jax.random.split(key)
    params = init_params(k_params, in_channels, cond_channels, hidden_channels,
                         out_channels, num_layers)
    x = jax.random.normal(k_x, (B, T, total_feats), dtype=jnp.float32)

    fwd = jax.jit(functools.partial(condition_encoder_lstm_forward, params))
    out = jax.block_until_ready(fwd(x))
    assert out.shape == (B, T, out_channels), out.shape

    ref = jax.block_until_ready(reference_forward(params, x))
    err = float(jnp.max(jnp.abs(out - ref)))
    assert jnp.allclose(out, ref, rtol=2e-2, atol=2e-2), err

    print("KERNEL_OK")
</pallas_src>

<mosaic_0001>
module attributes {stable_mosaic.version = 11 : i64} {
  func.func @_env_gates_kernel(%arg0: i32, %arg1: memref<16x2666xf32, #tpu.memory_space<vmem>>, %arg2: memref<16x26xf32, #tpu.memory_space<vmem>>, %arg3: memref<2666x512xbf16, #tpu.memory_space<vmem>>, %arg4: memref<1x512xf32, #tpu.memory_space<vmem>>, %arg5: memref<512x512xbf16, #tpu.memory_space<vmem>>, %arg6: memref<1x512xf32, #tpu.memory_space<vmem>>, %arg7: memref<512x128xbf16, #tpu.memory_space<vmem>>, %arg8: memref<26x128xbf16, #tpu.memory_space<vmem>>, %arg9: memref<1x128xf32, #tpu.memory_space<vmem>>, %arg10: memref<16x128xf32, #tpu.memory_space<vmem>>) attributes {dimension_semantics = [#tpu.dimension_semantics<parallel>], iteration_bounds = array<i64: 1>, scalar_prefetch = 0 : i64, scratch_operands = 0 : i64, tpu.core_type = #tpu.core_type<tc>, window_params = [{transform_indices = @transform_0, window_bounds = array<i64: 16, 2666>}, {transform_indices = @transform_1, window_bounds = array<i64: 16, 26>}, {pipeline_mode = #tpu.pipeline_mode<synchronous>, transform_indices = @transform_2, window_bounds = array<i64: 2666, 512>}, {pipeline_mode = #tpu.pipeline_mode<synchronous>, transform_indices = @transform_3, window_bounds = array<i64: 1, 512>}, {pipeline_mode = #tpu.pipeline_mode<synchronous>, transform_indices = @transform_4, window_bounds = array<i64: 512, 512>}, {pipeline_mode = #tpu.pipeline_mode<synchronous>, transform_indices = @transform_5, window_bounds = array<i64: 1, 512>}, {pipeline_mode = #tpu.pipeline_mode<synchronous>, transform_indices = @transform_6, window_bounds = array<i64: 512, 128>}, {pipeline_mode = #tpu.pipeline_mode<synchronous>, transform_indices = @transform_7, window_bounds = array<i64: 26, 128>}, {pipeline_mode = #tpu.pipeline_mode<synchronous>, transform_indices = @transform_8, window_bounds = array<i64: 1, 128>}, {transform_indices = @transform_9, window_bounds = array<i64: 16, 128>}]} {
    %c0 = arith.constant 0 : index
    %c0_0 = arith.constant 0 : index
    %0 = vector.load %arg1[%c0, %c0_0] : memref<16x2666xf32, #tpu.memory_space<vmem>>, vector<16x2666xf32>
    %1 = arith.truncf %0 : vector<16x2666xf32> to vector<16x2666xbf16>
    %c0_1 = arith.constant 0 : index
    %c0_2 = arith.constant 0 : index
    %2 = vector.load %arg3[%c0_1, %c0_2] : memref<2666x512xbf16, #tpu.memory_space<vmem>>, vector<2666x512xbf16>
    %cst = arith.constant dense<0.000000e+00> : vector<16x512xf32>
    %3 = tpu.matmul %1, %2, %cst {dimension_numbers = #tpu.dot_dimension_numbers<[1], [0], [0], [1], [0, 0, 1, 1], [], []>} : vector<16x2666xbf16>, vector<2666x512xbf16>, vector<16x512xf32> -> vector<16x512xf32>
    %c0_3 = arith.constant 0 : index
    %c0_4 = arith.constant 0 : index
    %4 = vector.load %arg4[%c0_3, %c0_4] : memref<1x512xf32, #tpu.memory_space<vmem>>, vector<1x512xf32>
    %5 = vector.broadcast %4 : vector<1x512xf32> to vector<16x512xf32>
    %6 = arith.addf %3, %5 : vector<16x512xf32>
    %cst_5 = arith.constant 0.000000e+00 : f32
    %7 = vector.broadcast %cst_5 : f32 to vector<16x512xf32>
    %8 = arith.maximumf %6, %7 : vector<16x512xf32>
    %9 = arith.truncf %8 : vector<16x512xf32> to vector<16x512xbf16>
    %c0_6 = arith.constant 0 : index
    %c0_7 = arith.constant 0 : index
    %10 = vector.load %arg5[%c0_6, %c0_7] : memref<512x512xbf16, #tpu.memory_space<vmem>>, vector<512x512xbf16>
    %cst_8 = arith.constant dense<0.000000e+00> : vector<16x512xf32>
    %11 = tpu.matmul %9, %10, %cst_8 {dimension_numbers = #tpu.dot_dimension_numbers<[1], [0], [0], [1], [0, 0, 1, 1], [], []>} : vector<16x512xbf16>, vector<512x512xbf16>, vector<16x512xf32> -> vector<16x512xf32>
    %c0_9 = arith.constant 0 : index
    %c0_10 = arith.constant 0 : index
    %12 = vector.load %arg6[%c0_9, %c0_10] : memref<1x512xf32, #tpu.memory_space<vmem>>, vector<1x512xf32>
    %13 = vector.broadcast %12 : vector<1x512xf32> to vector<16x512xf32>
    %14 = arith.addf %11, %13 : vector<16x512xf32>
    %15 = arith.truncf %14 : vector<16x512xf32> to vector<16x512xbf16>
    %c0_11 = arith.constant 0 : index
    %c0_12 = arith.constant 0 : index
    %16 = vector.load %arg7[%c0_11, %c0_12] : memref<512x128xbf16, #tpu.memory_space<vmem>>, vector<512x128xbf16>
    %cst_13 = arith.constant dense<0.000000e+00> : vector<16x128xf32>
    %17 = tpu.matmul %15, %16, %cst_13 {dimension_numbers = #tpu.dot_dimension_numbers<[1], [0], [0], [1], [0, 0, 1, 1], [], []>} : vector<16x512xbf16>, vector<512x128xbf16>, vector<16x128xf32> -> vector<16x128xf32>
    %c0_14 = arith.constant 0 : index
    %c0_15 = arith.constant 0 : index
    %18 = vector.load %arg2[%c0_14, %c0_15] : memref<16x26xf32, #tpu.memory_space<vmem>>, vector<16x26xf32>
    %19 = arith.truncf %18 : vector<16x26xf32> to vector<16x26xbf16>
    %c0_16 = arith.constant 0 : index
    %c0_17 = arith.constant 0 : index
    %20 = vector.load %arg8[%c0_16, %c0_17] : memref<26x128xbf16, #tpu.memory_space<vmem>>, vector<26x128xbf16>
    %cst_18 = arith.constant dense<0.000000e+00> : vector<16x128xf32>
    %21 = tpu.matmul %19, %20, %cst_18 {dimension_numbers = #tpu.dot_dimension_numbers<[1], [0], [0], [1], [0, 0, 1, 1], [], []>} : vector<16x26xbf16>, vector<26x128xbf16>, vector<16x128xf32> -> vector<16x128xf32>
    %22 = arith.addf %17, %21 : vector<16x128xf32>
    %c0_19 = arith.constant 0 : index
    %c0_20 = arith.constant 0 : index
    %23 = vector.load %arg9[%c0_19, %c0_20] : memref<1x128xf32, #tpu.memory_space<vmem>>, vector<1x128xf32>
    %24 = vector.broadcast %23 : vector<1x128xf32> to vector<16x128xf32>
    %25 = arith.addf %22, %24 : vector<16x128xf32>
    %c0_21 = arith.constant 0 : index
    %c0_22 = arith.constant 0 : index
    %26 = vector.load %arg10[%c0_21, %c0_22] : memref<16x128xf32, #tpu.memory_space<vmem>>, vector<16x128xf32>
    tpu.vector_store %arg10[%c0_21, %c0_22], %25 {strides = array<i32>} : memref<16x128xf32, #tpu.memory_space<vmem>>, vector<16x128xf32>,
    return
  }
  func.func @transform_0(%arg0: i32) -> (i32, i32) {
    %c0_i32 = arith.constant 0 : i32
    %c0_i32_0 = arith.constant 0 : i32
    return %arg0, %c0_i32 : i32, i32
  }
  func.func @transform_1(%arg0: i32) -> (i32, i32) {
    %c0_i32 = arith.constant 0 : i32
    %c0_i32_0 = arith.constant 0 : i32
    return %arg0, %c0_i32 : i32, i32
  }
  func.func @transform_2(%arg0: i32) -> (i32, i32) {
    %c0_i32 = arith.constant 0 : i32
    %c0_i32_0 = arith.constant 0 : i32
    %c0_i32_1 = arith.constant 0 : i32
    return %c0_i32, %c0_i32_0 : i32, i32
  }
  func.func @transform_3(%arg0: i32) -> (i32, i32) {
    %c0_i32 = arith.constant 0 : i32
    %c0_i32_0 = arith.constant 0 : i32
    %c0_i32_1 = arith.constant 0 : i32
    return %c0_i32, %c0_i32_0 : i32, i32
  }
  func.func @transform_4(%arg0: i32) -> (i32, i32) {
    %c0_i32 = arith.constant 0 : i32
    %c0_i32_0 = arith.constant 0 : i32
    %c0_i32_1 = arith.constant 0 : i32
    return %c0_i32, %c0_i32_0 : i32, i32
  }
  func.func @transform_5(%arg0: i32) -> (i32, i32) {
    %c0_i32 = arith.constant 0 : i32
    %c0_i32_0 = arith.constant 0 : i32
    %c0_i32_1 = arith.constant 0 : i32
    return %c0_i32, %c0_i32_0 : i32, i32
  }
  func.func @transform_6(%arg0: i32) -> (i32, i32) {
    %c0_i32 = arith.constant 0 : i32
    %c0_i32_0 = arith.constant 0 : i32
    %c0_i32_1 = arith.constant 0 : i32
    return %c0_i32, %c0_i32_0 : i32, i32
  }
  func.func @transform_7(%arg0: i32) -> (i32, i32) {
    %c0_i32 = arith.constant 0 : i32
    %c0_i32_0 = arith.constant 0 : i32
    %c0_i32_1 = arith.constant 0 : i32
    return %c0_i32, %c0_i32_0 : i32, i32
  }
  func.func @transform_8(%arg0: i32) -> (i32, i32) {
    %c0_i32 = arith.constant 0 : i32
    %c0_i32_0 = arith.constant 0 : i32
    %c0_i32_1 = arith.constant 0 : i32
    return %c0_i32, %c0_i32_0 : i32, i32
  }
  func.func @transform_9(%arg0: i32) -> (i32, i32) {
    %c0_i32 = arith.constant 0 : i32
    %c0_i32_0 = arith.constant 0 : i32
    return %arg0, %c0_i32 : i32, i32
  }
}

module attributes {stable_mosaic.version = 11 : i64} {
  func.func @_lstm_fused_kernel(%arg0: i32, %arg1: i32, %arg2: memref<2x8x128xf32, #tpu.memory_space<vmem>>, %arg3: memref<32x128xbf16, #tpu.memory_space<vmem>>, %arg4: memref<32x16xbf16, #tpu.memory_space<vmem>>, %arg5: memref<1x16xf32, #tpu.memory_space<vmem>>, %arg6: memref<2x8x16xf32, #tpu.memory_space<vmem>>, %arg7: memref<2x32xf32, #tpu.memory_space<vmem>>, %arg8: memref<2x32xf32, #tpu.memory_space<vmem>>) attributes {dimension_semantics = [#tpu.dimension_semantics<parallel>, #tpu.dimension_semantics<arbitrary>], iteration_bounds = array<i64: 1, 1>, scalar_prefetch = 0 : i64, scratch_operands = 2 : i64, tpu.core_type = #tpu.core_type<tc>, window_params = [{transform_indices = @transform_0, window_bounds = array<i64: 2, 8, 128>}, {pipeline_mode = #tpu.pipeline_mode<synchronous>, transform_indices = @transform_1, window_bounds = array<i64: 32, 128>}, {pipeline_mode = #tpu.pipeline_mode<synchronous>, transform_indices = @transform_2, window_bounds = array<i64: 32, 16>}, {pipeline_mode = #tpu.pipeline_mode<synchronous>, transform_indices = @transform_3, window_bounds = array<i64: 1, 16>}, {transform_indices = @transform_4, window_bounds = array<i64: 2, 8, 16>}]} {
    %c0_i32 = arith.constant 0 : i32
    %0 = arith.cmpi eq, %arg1, %c0_i32 : i32
    %1 = arith.extui %0 : i1 to i32
    %c0_i32_0 = arith.constant 0 : i32
    %2 = arith.cmpi ne, %1, %c0_i32_0 : i32
    scf.if %2 {
      %cst_325 = arith.constant 0.000000e+00 : f32
      %463 = vector.broadcast %cst_325 : f32 to vector<2x32xf32>
      %c0_326 = arith.constant 0 : index
      %c0_327 = arith.constant 0 : index
      %464 = vector.load %arg7[%c0_326, %c0_327] : memref<2x32xf32, #tpu.memory_space<vmem>>, vector<2x32xf32>
      tpu.vector_store %arg7[%c0_326, %c0_327], %463 {strides = array<i32>} : memref<2x32xf32, #tpu.memory_space<vmem>>, vector<2x32xf32>,
      %cst_328 = arith.constant 0.000000e+00 : f32
      %465 = vector.broadcast %cst_328 : f32 to vector<2x32xf32>
      %c0_329 = arith.constant 0 : index
      %c0_330 = arith.constant 0 : index
      %466 = vector.load %arg8[%c0_329, %c0_330] : memref<2x32xf32, #tpu.memory_space<vmem>>, vector<2x32xf32>
      tpu.vector_store %arg8[%c0_329, %c0_330], %465 {strides = array<i32>} : memref<2x32xf32, #tpu.memory_space<vmem>>, vector<2x32xf32>,
    } else {
    }
    %c0 = arith.constant 0 : index
    %c0_1 = arith.constant 0 : index
    %3 = vector.load %arg7[%c0, %c0_1] : memref<2x32xf32, #tpu.memory_space<vmem>>, vector<2x32xf32>
    %c0_2 = arith.constant 0 : index
    %c0_3 = arith.constant 0 : index
    %4 = vector.load %arg8[%c0_2, %c0_3] : memref<2x32xf32, #tpu.memory_space<vmem>>, vector<2x32xf32>
    %5 = arith.truncf %3 : vector<2x32xf32> to vector<2x32xbf16>
    %c0_4 = arith.constant 0 : index
    %c0_5 = arith.constant 0 : index
    %c0_6 = arith.constant 0 : index
    %6 = vector.load %arg2[%c0_4, %c0_5, %c0_6] : memref<2x8x128xf32, #tpu.memory_space<vmem>>, vector<2x1x32xf32>
    %7 = vector.shape_cast %6 : vector<2x1x32xf32> to vector<2x32xf32>
    %c0_7 = arith.constant 0 : index
    %c0_8 = arith.constant 0 : index
    %8 = vector.load %arg3[%c0_7, %c0_8] : memref<32x128xbf16, #tpu.memory_space<vmem>>, vector<32x32xbf16>
    %cst = arith.constant dense<0.000000e+00> : vector<2x32xf32>
    %9 = tpu.matmul %5, %8, %cst {dimension_numbers = #tpu.dot_dimension_numbers<[1], [0], [0], [1], [0, 0, 1, 1], [], []>} : vector<2x32xbf16>, vector<32x32xbf16>, vector<2x32xf32> -> vector<2x32xf32>
    %10 = arith.addf %7, %9 : vector<2x32xf32>
    %cst_9 = arith.constant 5.000000e-01 : f32
    %11 = vector.broadcast %cst_9 : f32 to vector<2x32xf32>
    %12 = arith.mulf %11, %10 : vector<2x32xf32>
    %13 = math.tanh %12 : vector<2x32xf32>
    %cst_10 = arith.constant 1.000000e+00 : f32
    %14 = vector.broadcast %cst_10 : f32 to vector<2x32xf32>
    %15 = arith.addf %13, %14 : vector<2x32xf32>
    %cst_11 = arith.constant 5.000000e-01 : f32
    %16 = vector.broadcast %cst_11 : f32 to vector<2x32xf32>
    %17 = arith.mulf %16, %15 : vector<2x32xf32>
    %c0_12 = arith.constant 0 : index
    %c0_13 = arith.constant 0 : index
    %c32 = arith.constant 32 : index
    %18 = vector.load %arg2[%c0_12, %c0_13, %c32] : memref<2x8x128xf32, #tpu.memory_space<vmem>>, vector<2x1x32xf32>
    %19 = vector.shape_cast %18 : vector<2x1x32xf32> to vector<2x32xf32>
    %c0_14 = arith.constant 0 : index
    %c32_15 = arith.constant 32 : index
    %20 = vector.load %arg3[%c0_14, %c32_15] : memref<32x128xbf16, #tpu.memory_space<vmem>>, vector<32x32xbf16>
    %cst_16 = arith.constant dense<0.000000e+00> : vector<2x32xf32>
    %21 = tpu.matmul %5, %20, %cst_16 {dimension_numbers = #tpu.dot_dimension_numbers<[1], [0], [0], [1], [0, 0, 1, 1], [], []>} : vector<2x32xbf16>, vector<32x32xbf16>, vector<2x32xf32> -> vector<2x32xf32>
    %22 = arith.addf %19, %21 : vector<2x32xf32>
    %cst_17 = arith.constant 5.000000e-01 : f32
    %23 = vector.broadcast %cst_17 : f32 to vector<2x32xf32>
    %24 = arith.mulf %23, %22 : vector<2x32xf32>
    %25 = math.tanh %24 : vector<2x32xf32>
    %cst_18 = arith.constant 1.000000e+00 : f32
    %26 = vector.broadcast %cst_18 : f32 to vector<2x32xf32>
    %27 = arith.addf %25, %26 : vector<2x32xf32>
    %cst_19 = arith.constant 5.000000e-01 : f32
    %28 = vector.broadcast %cst_19 : f32 to vector<2x32xf32>
    %29 = arith.mulf %28, %27 : vector<2x32xf32>
    %c0_20 = arith.constant 0 : index
    %c0_21 = arith.constant 0 : index
    %c64 = arith.constant 64 : index
    %30 = vector.load %arg2[%c0_20, %c0_21, %c64] : memref<2x8x128xf32, #tpu.memory_space<vmem>>, vector<2x1x32xf32>
    %31 = vector.shape_cast %30 : vector<2x1x32xf32> to vector<2x32xf32>
    %c0_22 = arith.constant 0 : index
    %c64_23 = arith.constant 64 : index
    %32 = vector.load %arg3[%c0_22, %c64_23] : memref<32x128xbf16, #tpu.memory_space<vmem>>, vector<32x32xbf16>
    %cst_24 = arith.constant dense<0.000000e+00> : vector<2x32xf32>
    %33 = tpu.matmul %5, %32, %cst_24 {dimension_numbers = #tpu.dot_dimension_numbers<[1], [0], [0], [1], [0, 0, 1, 1], [], []>} : vector<2x32xbf16>, vector<32x32xbf16>, vector<2x32xf32> -> vector<2x32xf32>
    %34 = arith.addf %31, %33 : vector<2x32xf32>
    %35 = math.tanh %34 : vector<2x32xf32>
    %c0_25 = arith.constant 0 : index
    %c0_26 = arith.constant 0 : index
    %c96 = arith.constant 96 : index
    %36 = vector.load %arg2[%c0_25, %c0_26, %c96] : memref<2x8x128xf32, #tpu.memory_space<vmem>>, vector<2x1x32xf32>
    %37 = vector.shape_cast %36 : vector<2x1x32xf32> to vector<2x32xf32>
    %c0_27 = arith.constant 0 : index
    %c96_28 = arith.constant 96 : index
    %38 = vector.load %arg3[%c0_27, %c96_28] : memref<32x128xbf16, #tpu.memory_space<vmem>>, vector<32x32xbf16>
    %cst_29 = arith.constant dense<0.000000e+00> : vector<2x32xf32>
    %39 = tpu.matmul %5, %38, %cst_29 {dimension_numbers = #tpu.dot_dimension_numbers<[1], [0], [0], [1], [0, 0, 1, 1], [], []>} : vector<2x32xbf16>, vector<32x32xbf16>, vector<2x32xf32> -> vector<2x32xf32>
    %40 = arith.addf %37, %39 : vector<2x32xf32>
    %cst_30 = arith.constant 5.000000e-01 : f32
    %41 = vector.broadcast %cst_30 : f32 to vector<2x32xf32>
    %42 = arith.mulf %41, %40 : vector<2x32xf32>
    %43 = math.tanh %42 : vector<2x32xf32>
    %cst_31 = arith.constant 1.000000e+00 : f32
    %44 = vector.broadcast %cst_31 : f32 to vector<2x32xf32>
    %45 = arith.addf %43, %44 : vector<2x32xf32>
    %cst_32 = arith.constant 5.000000e-01 : f32
    %46 = vector.broadcast %cst_32 : f32 to vector<2x32xf32>
    %47 = arith.mulf %46, %45 : vector<2x32xf32>
    %48 = arith.mulf %29, %4 : vector<2x32xf32>
    %49 = arith.mulf %17, %35 : vector<2x32xf32>
    %50 = arith.addf %48, %49 : vector<2x32xf32>
    %51 = math.tanh %50 : vector<2x32xf32>
    %52 = arith.mulf %47, %51 : vector<2x32xf32>
    %53 = arith.truncf %52 : vector<2x32xf32> to vector<2x32xbf16>
    %c0_33 = arith.constant 0 : index
    %c0_34 = arith.constant 0 : index
    %54 = vector.load %arg4[%c0_33, %c0_34] : memref<32x16xbf16, #tpu.memory_space<vmem>>, vector<32x16xbf16>
    %cst_35 = arith.constant dense<0.000000e+00> : vector<2x16xf32>
    %55 = tpu.matmul %53, %54, %cst_35 {dimension_numbers = #tpu.dot_dimension_numbers<[1], [0], [0], [1], [0, 0, 1, 1], [], []>} : vector<2x32xbf16>, vector<32x16xbf16>, vector<2x16xf32> -> vector<2x16xf32>
    %c0_36 = arith.constant 0 : index
    %c0_37 = arith.constant 0 : index
    %56 = vector.load %arg5[%c0_36, %c0_37] : memref<1x16xf32, #tpu.memory_space<vmem>>, vector<1x16xf32>
    %57 = vector.broadcast %56 : vector<1x16xf32> to vector<2x16xf32>
    %58 = arith.addf %55, %57 : vector<2x16xf32>
    %c0_38 = arith.constant 0 : index
    %c0_39 = arith.constant 0 : index
    %c0_40 = arith.constant 0 : index
    %59 = vector.load %arg6[%c0_38, %c0_39, %c0_40] : memref<2x8x16xf32, #tpu.memory_space<vmem>>, vector<2x1x16xf32>
    %60 = vector.shape_cast %59 : vector<2x1x16xf32> to vector<2x16xf32>
    %61 = vector.shape_cast %58 : vector<2x16xf32> to vector<2x1x16xf32>
    tpu.vector_store %arg6[%c0_38, %c0_39, %c0_40], %61 {strides = array<i32>} : memref<2x8x16xf32, #tpu.memory_space<vmem>>, vector<2x1x16xf32>,
    %62 = arith.truncf %52 : vector<2x32xf32> to vector<2x32xbf16>
    %c0_41 = arith.constant 0 : index
    %c1 = arith.constant 1 : index
    %c0_42 = arith.constant 0 : index
    %63 = vector.load %arg2[%c0_41, %c1, %c0_42] : memref<2x8x128xf32, #tpu.memory_space<vmem>>, vector<2x1x32xf32>
    %64 = vector.shape_cast %63 : vector<2x1x32xf32> to vector<2x32xf32>
    %c0_43 = arith.constant 0 : index
    %c0_44 = arith.constant 0 : index
    %65 = vector.load %arg3[%c0_43, %c0_44] : memref<32x128xbf16, #tpu.memory_space<vmem>>, vector<32x32xbf16>
    %cst_45 = arith.constant dense<0.000000e+00> : vector<2x32xf32>
    %66 = tpu.matmul %62, %65, %cst_45 {dimension_numbers = #tpu.dot_dimension_numbers<[1], [0], [0], [1], [0, 0, 1, 1], [], []>} : vector<2x32xbf16>, vector<32x32xbf16>, vector<2x32xf32> -> vector<2x32xf32>
    %67 = arith.addf %64, %66 : vector<2x32xf32>
    %cst_46 = arith.constant 5.000000e-01 : f32
    %68 = vector.broadcast %cst_46 : f32 to vector<2x32xf32>
    %69 = arith.mulf %68, %67 : vector<2x32xf32>
    %70 = math.tanh %69 : vector<2x32xf32>
    %cst_47 = arith.constant 1.000000e+00 : f32
    %71 = vector.broadcast %cst_47 : f32 to vector<2x32xf32>
    %72 = arith.addf %70, %71 : vector<2x32xf32>
    %cst_48 = arith.constant 5.000000e-01 : f32
    %73 = vector.broadcast %cst_48 : f32 to vector<2x32xf32>
    %74 = arith.mulf %73, %72 : vector<2x32xf32>
    %c0_49 = arith.constant 0 : index
    %c1_50 = arith.constant 1 : index
    %c32_51 = arith.constant 32 : index
    %75 = vector.load %arg2[%c0_49, %c1_50, %c32_51] : memref<2x8x128xf32, #tpu.memory_space<vmem>>, vector<2x1x32xf32>
    %76 = vector.shape_cast %75 : vector<2x1x32xf32> to vector<2x32xf32>
    %c0_52 = arith.constant 0 : index
    %c32_53 = arith.constant 32 : index
    %77 = vector.load %arg3[%c0_52, %c32_53] : memref<32x128xbf16, #tpu.memory_space<vmem>>, vector<32x32xbf16>
    %cst_54 = arith.constant dense<0.000000e+00> : vector<2x32xf32>
    %78 = tpu.matmul %62, %77, %cst_54 {dimension_numbers = #tpu.dot_dimension_numbers<[1], [0], [0], [1], [0, 0, 1, 1], [], []>} : vector<2x32xbf16>, vector<32x32xbf16>, vector<2x32xf32> -> vector<2x32xf32>
    %79 = arith.addf %76, %78 : vector<2x32xf32>
    %cst_55 = arith.constant 5.000000e-01 : f32
    %80 = vector.broadcast %cst_55 : f32 to vector<2x32xf32>
    %81 = arith.mulf %80, %79 : vector<2x32xf32>
    %82 = math.tanh %81 : vector<2x32xf32>
    %cst_56 = arith.constant 1.000000e+00 : f32
    %83 = vector.broadcast %cst_56 : f32 to vector<2x32xf32>
    %84 = arith.addf %82, %83 : vector<2x32xf32>
    %cst_57 = arith.constant 5.000000e-01 : f32
    %85 = vector.broadcast %cst_57 : f32 to vector<2x32xf32>
    %86 = arith.mulf %85, %84 : vector<2x32xf32>
    %c0_58 = arith.constant 0 : index
    %c1_59 = arith.constant 1 : index
    %c64_60 = arith.constant 64 : index
    %87 = vector.load %arg2[%c0_58, %c1_59, %c64_60] : memref<2x8x128xf32, #tpu.memory_space<vmem>>, vector<2x1x32xf32>
    %88 = vector.shape_cast %87 : vector<2x1x32xf32> to vector<2x32xf32>
    %c0_61 = arith.constant 0 : index
    %c64_62 = arith.constant 64 : index
    %89 = vector.load %arg3[%c0_61, %c64_62] : memref<32x128xbf16, #tpu.memory_space<vmem>>, vector<32x32xbf16>
    %cst_63 = arith.constant dense<0.000000e+00> : vector<2x32xf32>
    %90 = tpu.matmul %62, %89, %cst_63 {dimension_numbers = #tpu.dot_dimension_numbers<[1], [0], [0], [1], [0, 0, 1, 1], [], []>} : vector<2x32xbf16>, vector<32x32xbf16>, vector<2x32xf32> -> vector<2x32xf32>
    %91 = arith.addf %88, %90 : vector<2x32xf32>
    %92 = math.tanh %91 : vector<2x32xf32>
    %c0_64 = arith.constant 0 : index
    %c1_65 = arith.constant 1 : index
    %c96_66 = arith.constant 96 : index
    %93 = vector.load %arg2[%c0_64, %c1_65, %c96_66] : memref<2x8x128xf32, #tpu.memory_space<vmem>>, vector<2x1x32xf32>
    %94 = vector.shape_cast %93 : vector<2x1x32xf32> to vector<2x32xf32>
    %c0_67 = arith.constant 0 : index
    %c96_68 = arith.constant 96 : index
    %95 = vector.load %arg3[%c0_67, %c96_68] : memref<32x128xbf16, #tpu.memory_space<vmem>>, vector<32x32xbf16>
    %cst_69 = arith.constant dense<0.000000e+00> : vector<2x32xf32>
    %96 = tpu.matmul %62, %95, %cst_69 {dimension_numbers = #tpu.dot_dimension_numbers<[1], [0], [0], [1], [0, 0, 1, 1], [], []>} : vector<2x32xbf16>, vector<32x32xbf16>, vector<2x32xf32> -> vector<2x32xf32>
    %97 = arith.addf %94, %96 : vector<2x32xf32>
    %cst_70 = arith.constant 5.000000e-01 : f32
    %98 = vector.broadcast %cst_70 : f32 to vector<2x32xf32>
    %99 = arith.mulf %98, %97 : vector<2x32xf32>
    %100 = math.tanh %99 : vector<2x32xf32>
    %cst_71 = arith.constant 1.000000e+00 : f32
    %101 = vector.broadcast %cst_71 : f32 to vector<2x32xf32>
    %102 = arith.addf %100, %101 : vector<2x32xf32>
    %cst_72 = arith.constant 5.000000e-01 : f32
    %103 = vector.broadcast %cst_72 : f32 to vector<2x32xf32>
    %104 = arith.mulf %103, %102 : vector<2x32xf32>
    %105 = arith.mulf %86, %50 : vector<2x32xf32>
    %106 = arith.mulf %74, %92 : vector<2x32xf32>
    %107 = arith.addf %105, %106 : vector<2x32xf32>
    %108 = math.tanh %107 : vector<2x32xf32>
    %109 = arith.mulf %104, %108 : vector<2x32xf32>
    %110 = arith.truncf %109 : vector<2x32xf32> to vector<2x32xbf16>
    %c0_73 = arith.constant 0 : index
    %c0_74 = arith.constant 0 : index
    %111 = vector.load %arg4[%c0_73, %c0_74] : memref<32x16xbf16, #tpu.memory_space<vmem>>, vector<32x16xbf16>
    %cst_75 = arith.constant dense<0.000000e+00> : vector<2x16xf32>
    %112 = tpu.matmul %110, %111, %cst_75 {dimension_numbers = #tpu.dot_dimension_numbers<[1], [0], [0], [1], [0, 0, 1, 1], [], []>} : vector<2x32xbf16>, vector<32x16xbf16>, vector<2x16xf32> -> vector<2x16xf32>
    %c0_76 = arith.constant 0 : index
    %c0_77 = arith.constant 0 : index
    %113 = vector.load %arg5[%c0_76, %c0_77] : memref<1x16xf32, #tpu.memory_space<vmem>>, vector<1x16xf32>
    %114 = vector.broadcast %113 : vector<1x16xf32> to vector<2x16xf32>
    %115 = arith.addf %112, %114 : vector<2x16xf32>
    %c0_78 = arith.constant 0 : index
    %c1_79 = arith.constant 1 : index
    %c0_80 = arith.constant 0 : index
    %116 = vector.load %arg6[%c0_78, %c1_79, %c0_80] : memref<2x8x16xf32, #tpu.memory_space<vmem>>, vector<2x1x16xf32>
    %117 = vector.shape_cast %116 : vector<2x1x16xf32> to vector<2x16xf32>
    %118 = vector.shape_cast %115 : vector<2x16xf32> to vector<2x1x16xf32>
    tpu.vector_store %arg6[%c0_78, %c1_79, %c0_80], %118 {strides = array<i32>} : memref<2x8x16xf32, #tpu.memory_space<vmem>>, vector<2x1x16xf32>,
    %119 = arith.truncf %109 : vector<2x32xf32> to vector<2x32xbf16>
    %c0_81 = arith.constant 0 : index
    %c2 = arith.constant 2 : index
    %c0_82 = arith.constant 0 : index
    %120 = vector.load %arg2[%c0_81, %c2, %c0_82] : memref<2x8x128xf32, #tpu.memory_space<vmem>>, vector<2x1x32xf32>
    %121 = vector.shape_cast %120 : vector<2x1x32xf32> to vector<2x32xf32>
    %c0_83 = arith.constant 0 : index
    %c0_84 = arith.constant 0 : index
    %122 = vector.load %arg3[%c0_83, %c0_84] : memref<32x128xbf16, #tpu.memory_space<vmem>>, vector<32x32xbf16>
    %cst_85 = arith.constant dense<0.000000e+00> : vector<2x32xf32>
    %123 = tpu.matmul %119, %122, %cst_85 {dimension_numbers = #tpu.dot_dimension_numbers<[1], [0], [0], [1], [0, 0, 1, 1], [], []>} : vector<2x32xbf16>, vector<32x32xbf16>, vector<2x32xf32> -> vector<2x32xf32>
    %124 = arith.addf %121, %123 : vector<2x32xf32>
    %cst_86 = arith.constant 5.000000e-01 : f32
    %125 = vector.broadcast %cst_86 : f32 to vector<2x32xf32>
    %126 = arith.mulf %125, %124 : vector<2x32xf32>
    %127 = math.tanh %126 : vector<2x32xf32>
    %cst_87 = arith.constant 1.000000e+00 : f32
    %128 = vector.broadcast %cst_87 : f32 to vector<2x32xf32>
    %129 = arith.addf %127, %128 : vector<2x32xf32>
    %cst_88 = arith.constant 5.000000e-01 : f32
    %130 = vector.broadcast %cst_88 : f32 to vector<2x32xf32>
    %131 = arith.mulf %130, %129 : vector<2x32xf32>
    %c0_89 = arith.constant 0 : index
    %c2_90 = arith.constant 2 : index
    %c32_91 = arith.constant 32 : index
    %132 = vector.load %arg2[%c0_89, %c2_90, %c32_91] : memref<2x8x128xf32, #tpu.memory_space<vmem>>, vector<2x1x32xf32>
    %133 = vector.shape_cast %132 : vector<2x1x32xf32> to vector<2x32xf32>
    %c0_92 = arith.constant 0 : index
    %c32_93 = arith.constant 32 : index
    %134 = vector.load %arg3[%c0_92, %c32_93] : memref<32x128xbf16, #tpu.memory_space<vmem>>, vector<32x32xbf16>
    %cst_94 = arith.constant dense<0.000000e+00> : vector<2x32xf32>
    %135 = tpu.matmul %119, %134, %cst_94 {dimension_numbers = #tpu.dot_dimension_numbers<[1], [0], [0], [1], [0, 0, 1, 1], [], []>} : vector<2x32xbf16>, vector<32x32xbf16>, vector<2x32xf32> -> vector<2x32xf32>
    %136 = arith.addf %133, %135 : vector<2x32xf32>
    %cst_95 = arith.constant 5.000000e-01 : f32
    %137 = vector.broadcast %cst_95 : f32 to vector<2x32xf32>
    %138 = arith.mulf %137, %136 : vector<2x32xf32>
    %139 = math.tanh %138 : vector<2x32xf32>
    %cst_96 = arith.constant 1.000000e+00 : f32
    %140 = vector.broadcast %cst_96 : f32 to vector<2x32xf32>
    %141 = arith.addf %139, %140 : vector<2x32xf32>
    %cst_97 = arith.constant 5.000000e-01 : f32
    %142 = vector.broadcast %cst_97 : f32 to vector<2x32xf32>
    %143 = arith.mulf %142, %141 : vector<2x32xf32>
    %c0_98 = arith.constant 0 : index
    %c2_99 = arith.constant 2 : index
    %c64_100 = arith.constant 64 : index
    %144 = vector.load %arg2[%c0_98, %c2_99, %c64_100] : memref<2x8x128xf32, #tpu.memory_space<vmem>>, vector<2x1x32xf32>
    %145 = vector.shape_cast %144 : vector<2x1x32xf32> to vector<2x32xf32>
    %c0_101 = arith.constant 0 : index
    %c64_102 = arith.constant 64 : index
    %146 = vector.load %arg3[%c0_101, %c64_102] : memref<32x128xbf16, #tpu.memory_space<vmem>>, vector<32x32xbf16>
    %cst_103 = arith.constant dense<0.000000e+00> : vector<2x32xf32>
    %147 = tpu.matmul %119, %146, %cst_103 {dimension_numbers = #tpu.dot_dimension_numbers<[1], [0], [0], [1], [0, 0, 1, 1], [], []>} : vector<2x32xbf16>, vector<32x32xbf16>, vector<2x32xf32> -> vector<2x32xf32>
    %148 = arith.addf %145, %147 : vector<2x32xf32>
    %149 = math.tanh %148 : vector<2x32xf32>
    %c0_104 = arith.constant 0 : index
    %c2_105 = arith.constant 2 : index
    %c96_106 = arith.constant 96 : index
    %150 = vector.load %arg2[%c0_104, %c2_105, %c96_106] : memref<2x8x128xf32, #tpu.memory_space<vmem>>, vector<2x1x32xf32>
    %151 = vector.shape_cast %150 : vector<2x1x32xf32> to vector<2x32xf32>
    %c0_107 = arith.constant 0 : index
    %c96_108 = arith.constant 96 : index
    %152 = vector.load %arg3[%c0_107, %c96_108] : memref<32x128xbf16, #tpu.memory_space<vmem>>, vector<32x32xbf16>
    %cst_109 = arith.constant dense<0.000000e+00> : vector<2x32xf32>
    %153 = tpu.matmul %119, %152, %cst_109 {dimension_numbers = #tpu.dot_dimension_numbers<[1], [0], [0], [1], [0, 0, 1, 1], [], []>} : vector<2x32xbf16>, vector<32x32xbf16>, vector<2x32xf32> -> vector<2x32xf32>
    %154 = arith.addf %151, %153 : vector<2x32xf32>
    %cst_110 = arith.constant 5.000000e-01 : f32
    %155 = vector.broadcast %cst_110 : f32 to vector<2x32xf32>
    %156 = arith.mulf %155, %154 : vector<2x32xf32>
    %157 = math.tanh %156 : vector<2x32xf32>
    %cst_111 = arith.constant 1.000000e+00 : f32
    %158 = vector.broadcast %cst_111 : f32 to vector<2x32xf32>
    %159 = arith.addf %157, %158 : vector<2x32xf32>
    %cst_112 = arith.constant 5.000000e-01 : f32
    %160 = vector.broadcast %cst_112 : f32 to vector<2x32xf32>
    %161 = arith.mulf %160, %159 : vector<2x32xf32>
    %162 = arith.mulf %143, %107 : vector<2x32xf32>
    %163 = arith.mulf %131, %149 : vector<2x32xf32>
    %164 = arith.addf %162, %163 : vector<2x32xf32>
    %165 = math.tanh %164 : vector<2x32xf32>
    %166 = arith.mulf %161, %165 : vector<2x32xf32>
    %167 = arith.truncf %166 : vector<2x32xf32> to vector<2x32xbf16>
    %c0_113 = arith.constant 0 : index
    %c0_114 = arith.constant 0 : index
    %168 = vector.load %arg4[%c0_113, %c0_114] : memref<32x16xbf16, #tpu.memory_space<vmem>>, vector<32x16xbf16>
    %cst_115 = arith.constant dense<0.000000e+00> : vector<2x16xf32>
    %169 = tpu.matmul %167, %168, %cst_115 {dimension_numbers = #tpu.dot_dimension_numbers<[1], [0], [0], [1], [0, 0, 1, 1], [], []>} : vector<2x32xbf16>, vector<32x16xbf16>, vector<2x16xf32> -> vector<2x16xf32>
    %c0_116 = arith.constant 0 : index
    %c0_117 = arith.constant 0 : index
    %170 = vector.load %arg5[%c0_116, %c0_117] : memref<1x16xf32, #tpu.memory_space<vmem>>, vector<1x16xf32>
    %171 = vector.broadcast %170 : vector<1x16xf32> to vector<2x16xf32>
    %172 = arith.addf %169, %171 : vector<2x16xf32>
    %c0_118 = arith.constant 0 : index
    %c2_119 = arith.constant 2 : index
    %c0_120 = arith.constant 0 : index
    %173 = vector.load %arg6[%c0_118, %c2_119, %c0_120] : memref<2x8x16xf32, #tpu.memory_space<vmem>>, vector<2x1x16xf32>
    %174 = vector.shape_cast %173 : vector<2x1x16xf32> to vector<2x16xf32>
    %175 = vector.shape_cast %172 : vector<2x16xf32> to vector<2x1x16xf32>
    tpu.vector_store %arg6[%c0_118, %c2_119, %c0_120], %175 {strides = array<i32>} : memref<2x8x16xf32, #tpu.memory_space<vmem>>, vector<2x1x16xf32>,
    %176 = arith.truncf %166 : vector<2x32xf32> to vector<2x32xbf16>
    %c0_121 = arith.constant 0 : index
    %c3 = arith.constant 3 : index
    %c0_122 = arith.constant 0 : index
    %177 = vector.load %arg2[%c0_121, %c3, %c0_122] : memref<2x8x128xf32, #tpu.memory_space<vmem>>, vector<2x1x32xf32>
    %178 = vector.shape_cast %177 : vector<2x1x32xf32> to vector<2x32xf32>
    %c0_123 = arith.constant 0 : index
    %c0_124 = arith.constant 0 : index
    %179 = vector.load %arg3[%c0_123, %c0_124] : memref<32x128xbf16, #tpu.memory_space<vmem>>, vector<32x32xbf16>
    %cst_125 = arith.constant dense<0.000000e+00> : vector<2x32xf32>
    %180 = tpu.matmul %176, %179, %cst_125 {dimension_numbers = #tpu.dot_dimension_numbers<[1], [0], [0], [1], [0, 0, 1, 1], [], []>} : vector<2x32xbf16>, vector<32x32xbf16>, vector<2x32xf32> -> vector<2x32xf32>
    %181 = arith.addf %178, %180 : vector<2x32xf32>
    %cst_126 = arith.constant 5.000000e-01 : f32
    %182 = vector.broadcast %cst_126 : f32 to vector<2x32xf32>
    %183 = arith.mulf %182, %181 : vector<2x32xf32>
    %184 = math.tanh %183 : vector<2x32xf32>
    %cst_127 = arith.constant 1.000000e+00 : f32
    %185 = vector.broadcast %cst_127 : f32 to vector<2x32xf32>
    %186 = arith.addf %184, %185 : vector<2x32xf32>
    %cst_128 = arith.constant 5.000000e-01 : f32
    %187 = vector.broadcast %cst_128 : f32 to vector<2x32xf32>
    %188 = arith.mulf %187, %186 : vector<2x32xf32>
    %c0_129 = arith.constant 0 : index
    %c3_130 = arith.constant 3 : index
    %c32_131 = arith.constant 32 : index
    %189 = vector.load %arg2[%c0_129, %c3_130, %c32_131] : memref<2x8x128xf32, #tpu.memory_space<vmem>>, vector<2x1x32xf32>
    %190 = vector.shape_cast %189 : vector<2x1x32xf32> to vector<2x32xf32>
    %c0_132 = arith.constant 0 : index
    %c32_133 = arith.constant 32 : index
    %191 = vector.load %arg3[%c0_132, %c32_133] : memref<32x128xbf16, #tpu.memory_space<vmem>>, vector<32x32xbf16>
    %cst_134 = arith.constant dense<0.000000e+00> : vector<2x32xf32>
    %192 = tpu.matmul %176, %191, %cst_134 {dimension_numbers = #tpu.dot_dimension_numbers<[1], [0], [0], [1], [0, 0, 1, 1], [], []>} : vector<2x32xbf16>, vector<32x32xbf16>, vector<2x32xf32> -> vector<2x32xf32>
    %193 = arith.addf %190, %192 : vector<2x32xf32>
    %cst_135 = arith.constant 5.000000e-01 : f32
    %194 = vector.broadcast %cst_135 : f32 to vector<2x32xf32>
    %195 = arith.mulf %194, %193 : vector<2x32xf32>
    %196 = math.tanh %195 : vector<2x32xf32>
    %cst_136 = arith.constant 1.000000e+00 : f32
    %197 = vector.broadcast %cst_136 : f32 to vector<2x32xf32>
    %198 = arith.addf %196, %197 : vector<2x32xf32>
    %cst_137 = arith.constant 5.000000e-01 : f32
    %199 = vector.broadcast %cst_137 : f32 to vector<2x32xf32>
    %200 = arith.mulf %199, %198 : vector<2x32xf32>
    %c0_138 = arith.constant 0 : index
    %c3_139 = arith.constant 3 : index
    %c64_140 = arith.constant 64 : index
    %201 = vector.load %arg2[%c0_138, %c3_139, %c64_140] : memref<2x8x128xf32, #tpu.memory_space<vmem>>, vector<2x1x32xf32>
    %202 = vector.shape_cast %201 : vector<2x1x32xf32> to vector<2x32xf32>
    %c0_141 = arith.constant 0 : index
    %c64_142 = arith.constant 64 : index
    %203 = vector.load %arg3[%c0_141, %c64_142] : memref<32x128xbf16, #tpu.memory_space<vmem>>, vector<32x32xbf16>
    %cst_143 = arith.constant dense<0.000000e+00> : vector<2x32xf32>
    %204 = tpu.matmul %176, %203, %cst_143 {dimension_numbers = #tpu.dot_dimension_numbers<[1], [0], [0], [1], [0, 0, 1, 1], [], []>} : vector<2x32xbf16>, vector<32x32xbf16>, vector<2x32xf32> -> vector<2x32xf32>
    %205 = arith.addf %202, %204 : vector<2x32xf32>
    %206 = math.tanh %205 : vector<2x32xf32>
    %c0_144 = arith.constant 0 : index
    %c3_145 = arith.constant 3 : index
    %c96_146 = arith.constant 96 : index
    %207 = vector.load %arg2[%c0_144, %c3_145, %c96_146] : memref<2x8x128xf32, #tpu.memory_space<vmem>>, vector<2x1x32xf32>
    %208 = vector.shape_cast %207 : vector<2x1x32xf32> to vector<2x32xf32>
    %c0_147 = arith.constant 0 : index
    %c96_148 = arith.constant 96 : index
    %209 = vector.load %arg3[%c0_147, %c96_148] : memref<32x128xbf16, #tpu.memory_space<vmem>>, vector<32x32xbf16>
    %cst_149 = arith.constant dense<0.000000e+00> : vector<2x32xf32>
    %210 = tpu.matmul %176, %209, %cst_149 {dimension_numbers = #tpu.dot_dimension_numbers<[1], [0], [0], [1], [0, 0, 1, 1], [], []>} : vector<2x32xbf16>, vector<32x32xbf16>, vector<2x32xf32> -> vector<2x32xf32>
    %211 = arith.addf %208, %210 : vector<2x32xf32>
    %cst_150 = arith.constant 5.000000e-01 : f32
    %212 = vector.broadcast %cst_150 : f32 to vector<2x32xf32>
    %213 = arith.mulf %212, %211 : vector<2x32xf32>
    %214 = math.tanh %213 : vector<2x32xf32>
    %cst_151 = arith.constant 1.000000e+00 : f32
    %215 = vector.broadcast %cst_151 : f32 to vector<2x32xf32>
    %216 = arith.addf %214, %215 : vector<2x32xf32>
    %cst_152 = arith.constant 5.000000e-01 : f32
    %217 = vector.broadcast %cst_152 : f32 to vector<2x32xf32>
    %218 = arith.mulf %217, %216 : vector<2x32xf32>
    %219 = arith.mulf %200, %164 : vector<2x32xf32>
    %220 = arith.mulf %188, %206 : vector<2x32xf32>
    %221 = arith.addf %219, %220 : vector<2x32xf32>
    %222 = math.tanh %221 : vector<2x32xf32>
    %223 = arith.mulf %218, %222 : vector<2x32xf32>
    %224 = arith.truncf %223 : vector<2x32xf32> to vector<2x32xbf16>
    %c0_153 = arith.constant 0 : index
    %c0_154 = arith.constant 0 : index
    %225 = vector.load %arg4[%c0_153, %c0_154] : memref<32x16xbf16, #tpu.memory_space<vmem>>, vector<32x16xbf16>
    %cst_155 = arith.constant dense<0.000000e+00> : vector<2x16xf32>
    %226 = tpu.matmul %224, %225, %cst_155 {dimension_numbers = #tpu.dot_dimension_numbers<[1], [0], [0], [1], [0, 0, 1, 1], [], []>} : vector<2x32xbf16>, vector<32x16xbf16>, vector<2x16xf32> -> vector<2x16xf32>
    %c0_156 = arith.constant 0 : index
    %c0_157 = arith.constant 0 : index
    %227 = vector.load %arg5[%c0_156, %c0_157] : memref<1x16xf32, #tpu.memory_space<vmem>>, vector<1x16xf32>
    %228 = vector.broadcast %227 : vector<1x16xf32> to vector<2x16xf32>
    %229 = arith.addf %226, %228 : vector<2x16xf32>
    %c0_158 = arith.constant 0 : index
    %c3_159 = arith.constant 3 : index
    %c0_160 = arith.constant 0 : index
    %230 = vector.load %arg6[%c0_158, %c3_159, %c0_160] : memref<2x8x16xf32, #tpu.memory_space<vmem>>, vector<2x1x16xf32>
    %231 = vector.shape_cast %230 : vector<2x1x16xf32> to vector<2x16xf32>
    %232 = vector.shape_cast %229 : vector<2x16xf32> to vector<2x1x16xf32>
    tpu.vector_store %arg6[%c0_158, %c3_159, %c0_160], %232 {strides = array<i32>} : memref<2x8x16xf32, #tpu.memory_space<vmem>>, vector<2x1x16xf32>,
    %233 = arith.truncf %223 : vector<2x32xf32> to vector<2x32xbf16>
    %c0_161 = arith.constant 0 : index
    %c4 = arith.constant 4 : index
    %c0_162 = arith.constant 0 : index
    %234 = vector.load %arg2[%c0_161, %c4, %c0_162] : memref<2x8x128xf32, #tpu.memory_space<vmem>>, vector<2x1x32xf32>
    %235 = vector.shape_cast %234 : vector<2x1x32xf32> to vector<2x32xf32>
    %c0_163 = arith.constant 0 : index
    %c0_164 = arith.constant 0 : index
    %236 = vector.load %arg3[%c0_163, %c0_164] : memref<32x128xbf16, #tpu.memory_space<vmem>>, vector<32x32xbf16>
    %cst_165 = arith.constant dense<0.000000e+00> : vector<2x32xf32>
    %237 = tpu.matmul %233, %236, %cst_165 {dimension_numbers = #tpu.dot_dimension_numbers<[1], [0], [0], [1], [0, 0, 1, 1], [], []>} : vector<2x32xbf16>, vector<32x32xbf16>, vector<2x32xf32> -> vector<2x32xf32>
    %238 = arith.addf %235, %237 : vector<2x32xf32>
    %cst_166 = arith.constant 5.000000e-01 : f32
    %239 = vector.broadcast %cst_166 : f32 to vector<2x32xf32>
    %240 = arith.mulf %239, %238 : vector<2x32xf32>
    %241 = math.tanh %240 : vector<2x32xf32>
    %cst_167 = arith.constant 1.000000e+00 : f32
    %242 = vector.broadcast %cst_167 : f32 to vector<2x32xf32>
    %243 = arith.addf %241, %242 : vector<2x32xf32>
    %cst_168 = arith.constant 5.000000e-01 : f32
    %244 = vector.broadcast %cst_168 : f32 to vector<2x32xf32>
    %245 = arith.mulf %244, %243 : vector<2x32xf32>
    %c0_169 = arith.constant 0 : index
    %c4_170 = arith.constant 4 : index
    %c32_171 = arith.constant 32 : index
    %246 = vector.load %arg2[%c0_169, %c4_170, %c32_171] : memref<2x8x128xf32, #tpu.memory_space<vmem>>, vector<2x1x32xf32>
    %247 = vector.shape_cast %246 : vector<2x1x32xf32> to vector<2x32xf32>
    %c0_172 = arith.constant 0 : index
    %c32_173 = arith.constant 32 : index
    %248 = vector.load %arg3[%c0_172, %c32_173] : memref<32x128xbf16, #tpu.memory_space<vmem>>, vector<32x32xbf16>
    %cst_174 = arith.constant dense<0.000000e+00> : vector<2x32xf32>
    %249 = tpu.matmul %233, %248, %cst_174 {dimension_numbers = #tpu.dot_dimension_numbers<[1], [0], [0], [1], [0, 0, 1, 1], [], []>} : vector<2x32xbf16>, vector<32x32xbf16>, vector<2x32xf32> -> vector<2x32xf32>
    %250 = arith.addf %247, %249 : vector<2x32xf32>
    %cst_175 = arith.constant 5.000000e-01 : f32
    %251 = vector.broadcast %cst_175 : f32 to vector<2x32xf32>
    %252 = arith.mulf %251, %250 : vector<2x32xf32>
    %253 = math.tanh %252 : vector<2x32xf32>
    %cst_176 = arith.constant 1.000000e+00 : f32
    %254 = vector.broadcast %cst_176 : f32 to vector<2x32xf32>
    %255 = arith.addf %253, %254 : vector<2x32xf32>
    %cst_177 = arith.constant 5.000000e-01 : f32
    %256 = vector.broadcast %cst_177 : f32 to vector<2x32xf32>
    %257 = arith.mulf %256, %255 : vector<2x32xf32>
    %c0_178 = arith.constant 0 : index
    %c4_179 = arith.constant 4 : index
    %c64_180 = arith.constant 64 : index
    %258 = vector.load %arg2[%c0_178, %c4_179, %c64_180] : memref<2x8x128xf32, #tpu.memory_space<vmem>>, vector<2x1x32xf32>
    %259 = vector.shape_cast %258 : vector<2x1x32xf32> to vector<2x32xf32>
    %c0_181 = arith.constant 0 : index
    %c64_182 = arith.constant 64 : index
    %260 = vector.load %arg3[%c0_181, %c64_182] : memref<32x128xbf16, #tpu.memory_space<vmem>>, vector<32x32xbf16>
    %cst_183 = arith.constant dense<0.000000e+00> : vector<2x32xf32>
    %261 = tpu.matmul %233, %260, %cst_183 {dimension_numbers = #tpu.dot_dimension_numbers<[1], [0], [0], [1], [0, 0, 1, 1], [], []>} : vector<2x32xbf16>, vector<32x32xbf16>, vector<2x32xf32> -> vector<2x32xf32>
    %262 = arith.addf %259, %261 : vector<2x32xf32>
    %263 = math.tanh %262 : vector<2x32xf32>
    %c0_184 = arith.constant 0 : index
    %c4_185 = arith.constant 4 : index
    %c96_186 = arith.constant 96 : index
    %264 = vector.load %arg2[%c0_184, %c4_185, %c96_186] : memref<2x8x128xf32, #tpu.memory_space<vmem>>, vector<2x1x32xf32>
    %265 = vector.shape_cast %264 : vector<2x1x32xf32> to vector<2x32xf32>
    %c0_187 = arith.constant 0 : index
    %c96_188 = arith.constant 96 : index
    %266 = vector.load %arg3[%c0_187, %c96_188] : memref<32x128xbf16, #tpu.memory_space<vmem>>, vector<32x32xbf16>
    %cst_189 = arith.constant dense<0.000000e+00> : vector<2x32xf32>
    %267 = tpu.matmul %233, %266, %cst_189 {dimension_numbers = #tpu.dot_dimension_numbers<[1], [0], [0], [1], [0, 0, 1, 1], [], []>} : vector<2x32xbf16>, vector<32x32xbf16>, vector<2x32xf32> -> vector<2x32xf32>
    %268 = arith.addf %265, %267 : vector<2x32xf32>
    %cst_190 = arith.constant 5.000000e-01 : f32
    %269 = vector.broadcast %cst_190 : f32 to vector<2x32xf32>
    %270 = arith.mulf %269, %268 : vector<2x32xf32>
    %271 = math.tanh %270 : vector<2x32xf32>
    %cst_191 = arith.constant 1.000000e+00 : f32
    %272 = vector.broadcast %cst_191 : f32 to vector<2x32xf32>
    %273 = arith.addf %271, %272 : vector<2x32xf32>
    %cst_192 = arith.constant 5.000000e-01 : f32
    %274 = vector.broadcast %cst_192 : f32 to vector<2x32xf32>
    %275 = arith.mulf %274, %273 : vector<2x32xf32>
    %276 = arith.mulf %257, %221 : vector<2x32xf32>
    %277 = arith.mulf %245, %263 : vector<2x32xf32>
    %278 = arith.addf %276, %277 : vector<2x32xf32>
    %279 = math.tanh %278 : vector<2x32xf32>
    %280 = arith.mulf %275, %279 : vector<2x32xf32>
    %281 = arith.truncf %280 : vector<2x32xf32> to vector<2x32xbf16>
    %c0_193 = arith.constant 0 : index
    %c0_194 = arith.constant 0 : index
    %282 = vector.load %arg4[%c0_193, %c0_194] : memref<32x16xbf16, #tpu.memory_space<vmem>>, vector<32x16xbf16>
    %cst_195 = arith.constant dense<0.000000e+00> : vector<2x16xf32>
    %283 = tpu.matmul %281, %282, %cst_195 {dimension_numbers = #tpu.dot_dimension_numbers<[1], [0], [0], [1], [0, 0, 1, 1], [], []>} : vector<2x32xbf16>, vector<32x16xbf16>, vector<2x16xf32> -> vector<2x16xf32>
    %c0_196 = arith.constant 0 : index
    %c0_197 = arith.constant 0 : index
    %284 = vector.load %arg5[%c0_196, %c0_197] : memref<1x16xf32, #tpu.memory_space<vmem>>, vector<1x16xf32>
    %285 = vector.broadcast %284 : vector<1x16xf32> to vector<2x16xf32>
    %286 = arith.addf %283, %285 : vector<2x16xf32>
    %c0_198 = arith.constant 0 : index
    %c4_199 = arith.constant 4 : index
    %c0_200 = arith.constant 0 : index
    %287 = vector.load %arg6[%c0_198, %c4_199, %c0_200] : memref<2x8x16xf32, #tpu.memory_space<vmem>>, vector<2x1x16xf32>
    %288 = vector.shape_cast %287 : vector<2x1x16xf32> to vector<2x16xf32>
    %289 = vector.shape_cast %286 : vector<2x16xf32> to vector<2x1x16xf32>
    tpu.vector_store %arg6[%c0_198, %c4_199, %c0_200], %289 {strides = array<i32>} : memref<2x8x16xf32, #tpu.memory_space<vmem>>, vector<2x1x16xf32>,
    %290 = arith.truncf %280 : vector<2x32xf32> to vector<2x32xbf16>
    %c0_201 = arith.constant 0 : index
    %c5 = arith.constant 5 : index
    %c0_202 = arith.constant 0 : index
    %291 = vector.load %arg2[%c0_201, %c5, %c0_202] : memref<2x8x128xf32, #tpu.memory_space<vmem>>, vector<2x1x32xf32>
    %292 = vector.shape_cast %291 : vector<2x1x32xf32> to vector<2x32xf32>
    %c0_203 = arith.constant 0 : index
    %c0_204 = arith.constant 0 : index
    %293 = vector.load %arg3[%c0_203, %c0_204] : memref<32x128xbf16, #tpu.memory_space<vmem>>, vector<32x32xbf16>
    %cst_205 = arith.constant dense<0.000000e+00> : vector<2x32xf32>
    %294 = tpu.matmul %290, %293, %cst_205 {dimension_numbers = #tpu.dot_dimension_numbers<[1], [0], [0], [1], [0, 0, 1, 1], [], []>} : vector<2x32xbf16>, vector<32x32xbf16>, vector<2x32xf32> -> vector<2x32xf32>
    %295 = arith.addf %292, %294 : vector<2x32xf32>
    %cst_206 = arith.constant 5.000000e-01 : f32
    %296 = vector.broadcast %cst_206 : f32 to vector<2x32xf32>
    %297 = arith.mulf %296, %295 : vector<2x32xf32>
    %298 = math.tanh %297 : vector<2x32xf32>
    %cst_207 = arith.constant 1.000000e+00 : f32
    %299 = vector.broadcast %cst_207 : f32 to vector<2x32xf32>
    %300 = arith.addf %298, %299 : vector<2x32xf32>
    %cst_208 = arith.constant 5.000000e-01 : f32
    %301 = vector.broadcast %cst_208 : f32 to vector<2x32xf32>
    %302 = arith.mulf %301, %300 : vector<2x32xf32>
    %c0_209 = arith.constant 0 : index
    %c5_210 = arith.constant 5 : index
    %c32_211 = arith.constant 32 : index
    %303 = vector.load %arg2[%c0_209, %c5_210, %c32_211] : memref<2x8x128xf32, #tpu.memory_space<vmem>>, vector<2x1x32xf32>
    %304 = vector.shape_cast %303 : vector<2x1x32xf32> to vector<2x32xf32>
    %c0_212 = arith.constant 0 : index
    %c32_213 = arith.constant 32 : index
    %305 = vector.load %arg3[%c0_212, %c32_213] : memref<32x128xbf16, #tpu.memory_space<vmem>>, vector<32x32xbf16>
    %cst_214 = arith.constant dense<0.000000e+00> : vector<2x32xf32>
    %306 = tpu.matmul %290, %305, %cst_214 {dimension_numbers = #tpu.dot_dimension_numbers<[1], [0], [0], [1], [0, 0, 1, 1], [], []>} : vector<2x32xbf16>, vector<32x32xbf16>, vector<2x32xf32> -> vector<2x32xf32>
    %307 = arith.addf %304, %306 : vector<2x32xf32>
    %cst_215 = arith.constant 5.000000e-01 : f32
    %308 = vector.broadcast %cst_215 : f32 to vector<2x32xf32>
    %309 = arith.mulf %308, %307 : vector<2x32xf32>
    %310 = math.tanh %309 : vector<2x32xf32>
    %cst_216 = arith.constant 1.000000e+00 : f32
    %311 = vector.broadcast %cst_216 : f32 to vector<2x32xf32>
    %312 = arith.addf %310, %311 : vector<2x32xf32>
    %cst_217 = arith.constant 5.000000e-01 : f32
    %313 = vector.broadcast %cst_217 : f32 to vector<2x32xf32>
    %314 = arith.mulf %313, %312 : vector<2x32xf32>
    %c0_218 = arith.constant 0 : index
    %c5_219 = arith.constant 5 : index
    %c64_220 = arith.constant 64 : index
    %315 = vector.load %arg2[%c0_218, %c5_219, %c64_220] : memref<2x8x128xf32, #tpu.memory_space<vmem>>, vector<2x1x32xf32>
    %316 = vector.shape_cast %315 : vector<2x1x32xf32> to vector<2x32xf32>
    %c0_221 = arith.constant 0 : index
    %c64_222 = arith.constant 64 : index
    %317 = vector.load %arg3[%c0_221, %c64_222] : memref<32x128xbf16, #tpu.memory_space<vmem>>, vector<32x32xbf16>
    %cst_223 = arith.constant dense<0.000000e+00> : vector<2x32xf32>
    %318 = tpu.matmul %290, %317, %cst_223 {dimension_numbers = #tpu.dot_dimension_numbers<[1], [0], [0], [1], [0, 0, 1, 1], [], []>} : vector<2x32xbf16>, vector<32x32xbf16>, vector<2x32xf32> -> vector<2x32xf32>
    %319 = arith.addf %316, %318 : vector<2x32xf32>
    %320 = math.tanh %319 : vector<2x32xf32>
    %c0_224 = arith.constant 0 : index
    %c5_225 = arith.constant 5 : index
    %c96_226 = arith.constant 96 : index
    %321 = vector.load %arg2[%c0_224, %c5_225, %c96_226] : memref<2x8x128xf32, #tpu.memory_space<vmem>>, vector<2x1x32xf32>
    %322 = vector.shape_cast %321 : vector<2x1x32xf32> to vector<2x32xf32>
    %c0_227 = arith.constant 0 : index
    %c96_228 = arith.constant 96 : index
    %323 = vector.load %arg3[%c0_227, %c96_228] : memref<32x128xbf16, #tpu.memory_space<vmem>>, vector<32x32xbf16>
    %cst_229 = arith.constant dense<0.000000e+00> : vector<2x32xf32>
    %324 = tpu.matmul %290, %323, %cst_229 {dimension_numbers = #tpu.dot_dimension_numbers<[1], [0], [0], [1], [0, 0, 1, 1], [], []>} : vector<2x32xbf16>, vector<32x32xbf16>, vector<2x32xf32> -> vector<2x32xf32>
    %325 = arith.addf %322, %324 : vector<2x32xf32>
    %cst_230 = arith.constant 5.000000e-01 : f32
    %326 = vector.broadcast %cst_230 : f32 to vector<2x32xf32>
    %327 = arith.mulf %326, %325 : vector<2x32xf32>
    %328 = math.tanh %327 : vector<2x32xf32>
    %cst_231 = arith.constant 1.000000e+00 : f32
    %329 = vector.broadcast %cst_231 : f32 to vector<2x32xf32>
    %330 = arith.addf %328, %329 : vector<2x32xf32>
    %cst_232 = arith.constant 5.000000e-01 : f32
    %331 = vector.broadcast %cst_232 : f32 to vector<2x32xf32>
    %332 = arith.mulf %331, %330 : vector<2x32xf32>
    %333 = arith.mulf %314, %278 : vector<2x32xf32>
    %334 = arith.mulf %302, %320 : vector<2x32xf32>
    %335 = arith.addf %333, %334 : vector<2x32xf32>
    %336 = math.tanh %335 : vector<2x32xf32>
    %337 = arith.mulf %332, %336 : vector<2x32xf32>
    %338 = arith.truncf %337 : vector<2x32xf32> to vector<2x32xbf16>
    %c0_233 = arith.constant 0 : index
    %c0_234 = arith.constant 0 : index
    %339 = vector.load %arg4[%c0_233, %c0_234] : memref<32x16xbf16, #tpu.memory_space<vmem>>, vector<32x16xbf16>
    %cst_235 = arith.constant dense<0.000000e+00> : vector<2x16xf32>
    %340 = tpu.matmul %338, %339, %cst_235 {dimension_numbers = #tpu.dot_dimension_numbers<[1], [0], [0], [1], [0, 0, 1, 1], [], []>} : vector<2x32xbf16>, vector<32x16xbf16>, vector<2x16xf32> -> vector<2x16xf32>
    %c0_236 = arith.constant 0 : index
    %c0_237 = arith.constant 0 : index
    %341 = vector.load %arg5[%c0_236, %c0_237] : memref<1x16xf32, #tpu.memory_space<vmem>>, vector<1x16xf32>
    %342 = vector.broadcast %341 : vector<1x16xf32> to vector<2x16xf32>
    %343 = arith.addf %340, %342 : vector<2x16xf32>
    %c0_238 = arith.constant 0 : index
    %c5_239 = arith.constant 5 : index
    %c0_240 = arith.constant 0 : index
    %344 = vector.load %arg6[%c0_238, %c5_239, %c0_240] : memref<2x8x16xf32, #tpu.memory_space<vmem>>, vector<2x1x16xf32>
    %345 = vector.shape_cast %344 : vector<2x1x16xf32> to vector<2x16xf32>
    %346 = vector.shape_cast %343 : vector<2x16xf32> to vector<2x1x16xf32>
    tpu.vector_store %arg6[%c0_238, %c5_239, %c0_240], %346 {strides = array<i32>} : memref<2x8x16xf32, #tpu.memory_space<vmem>>, vector<2x1x16xf32>,
    %347 = arith.truncf %337 : vector<2x32xf32> to vector<2x32xbf16>
    %c0_241 = arith.constant 0 : index
    %c6 = arith.constant 6 : index
    %c0_242 = arith.constant 0 : index
    %348 = vector.load %arg2[%c0_241, %c6, %c0_242] : memref<2x8x128xf32, #tpu.memory_space<vmem>>, vector<2x1x32xf32>
    %349 = vector.shape_cast %348 : vector<2x1x32xf32> to vector<2x32xf32>
    %c0_243 = arith.constant 0 : index
    %c0_244 = arith.constant 0 : index
    %350 = vector.load %arg3[%c0_243, %c0_244] : memref<32x128xbf16, #tpu.memory_space<vmem>>, vector<32x32xbf16>
    %cst_245 = arith.constant dense<0.000000e+00> : vector<2x32xf32>
    %351 = tpu.matmul %347, %350, %cst_245 {dimension_numbers = #tpu.dot_dimension_numbers<[1], [0], [0], [1], [0, 0, 1, 1], [], []>} : vector<2x32xbf16>, vector<32x32xbf16>, vector<2x32xf32> -> vector<2x32xf32>
    %352 = arith.addf %349, %351 : vector<2x32xf32>
    %cst_246 = arith.constant 5.000000e-01 : f32
    %353 = vector.broadcast %cst_246 : f32 to vector<2x32xf32>
    %354 = arith.mulf %353, %352 : vector<2x32xf32>
    %355 = math.tanh %354 : vector<2x32xf32>
    %cst_247 = arith.constant 1.000000e+00 : f32
    %356 = vector.broadcast %cst_247 : f32 to vector<2x32xf32>
    %357 = arith.addf %355, %356 : vector<2x32xf32>
    %cst_248 = arith.constant 5.000000e-01 : f32
    %358 = vector.broadcast %cst_248 : f32 to vector<2x32xf32>
    %359 = arith.mulf %358, %357 : vector<2x32xf32>
    %c0_249 = arith.constant 0 : index
    %c6_250 = arith.constant 6 : index
    %c32_251 = arith.constant 32 : index
    %360 = vector.load %arg2[%c0_249, %c6_250, %c32_251] : memref<2x8x128xf32, #tpu.memory_space<vmem>>, vector<2x1x32xf32>
    %361 = vector.shape_cast %360 : vector<2x1x32xf32> to vector<2x32xf32>
    %c0_252 = arith.constant 0 : index
    %c32_253 = arith.constant 32 : index
    %362 = vector.load %arg3[%c0_252, %c32_253] : memref<32x128xbf16, #tpu.memory_space<vmem>>, vector<32x32xbf16>
    %cst_254 = arith.constant dense<0.000000e+00> : vector<2x32xf32>
    %363 = tpu.matmul %347, %362, %cst_254 {dimension_numbers = #tpu.dot_dimension_numbers<[1], [0], [0], [1], [0, 0, 1, 1], [], []>} : vector<2x32xbf16>, vector<32x32xbf16>, vector<2x32xf32> -> vector<2x32xf32>
    %364 = arith.addf %361, %363 : vector<2x32xf32>
    %cst_255 = arith.constant 5.000000e-01 : f32
    %365 = vector.broadcast %cst_255 : f32 to vector<2x32xf32>
    %366 = arith.mulf %365, %364 : vector<2x32xf32>
    %367 = math.tanh %366 : vector<2x32xf32>
    %cst_256 = arith.constant 1.000000e+00 : f32
    %368 = vector.broadcast %cst_256 : f32 to vector<2x32xf32>
    %369 = arith.addf %367, %368 : vector<2x32xf32>
    %cst_257 = arith.constant 5.000000e-01 : f32
    %370 = vector.broadcast %cst_257 : f32 to vector<2x32xf32>
    %371 = arith.mulf %370, %369 : vector<2x32xf32>
    %c0_258 = arith.constant 0 : index
    %c6_259 = arith.constant 6 : index
    %c64_260 = arith.constant 64 : index
    %372 = vector.load %arg2[%c0_258, %c6_259, %c64_260] : memref<2x8x128xf32, #tpu.memory_space<vmem>>, vector<2x1x32xf32>
    %373 = vector.shape_cast %372 : vector<2x1x32xf32> to vector<2x32xf32>
    %c0_261 = arith.constant 0 : index
    %c64_262 = arith.constant 64 : index
    %374 = vector.load %arg3[%c0_261, %c64_262] : memref<32x128xbf16, #tpu.memory_space<vmem>>, vector<32x32xbf16>
    %cst_263 = arith.constant dense<0.000000e+00> : vector<2x32xf32>
    %375 = tpu.matmul %347, %374, %cst_263 {dimension_numbers = #tpu.dot_dimension_numbers<[1], [0], [0], [1], [0, 0, 1, 1], [], []>} : vector<2x32xbf16>, vector<32x32xbf16>, vector<2x32xf32> -> vector<2x32xf32>
    %376 = arith.addf %373, %375 : vector<2x32xf32>
    %377 = math.tanh %376 : vector<2x32xf32>
    %c0_264 = arith.constant 0 : index
    %c6_265 = arith.constant 6 : index
    %c96_266 = arith.constant 96 : index
    %378 = vector.load %arg2[%c0_264, %c6_265, %c96_266] : memref<2x8x128xf32, #tpu.memory_space<vmem>>, vector<2x1x32xf32>
    %379 = vector.shape_cast %378 : vector<2x1x32xf32> to vector<2x32xf32>
    %c0_267 = arith.constant 0 : index
    %c96_268 = arith.constant 96 : index
    %380 = vector.load %arg3[%c0_267, %c96_268] : memref<32x128xbf16, #tpu.memory_space<vmem>>, vector<32x32xbf16>
    %cst_269 = arith.constant dense<0.000000e+00> : vector<2x32xf32>
    %381 = tpu.matmul %347, %380, %cst_269 {dimension_numbers = #tpu.dot_dimension_numbers<[1], [0], [0], [1], [0, 0, 1, 1], [], []>} : vector<2x32xbf16>, vector<32x32xbf16>, vector<2x32xf32> -> vector<2x32xf32>
    %382 = arith.addf %379, %381 : vector<2x32xf32>
    %cst_270 = arith.constant 5.000000e-01 : f32
    %383 = vector.broadcast %cst_270 : f32 to vector<2x32xf32>
    %384 = arith.mulf %383, %382 : vector<2x32xf32>
    %385 = math.tanh %384 : vector<2x32xf32>
    %cst_271 = arith.constant 1.000000e+00 : f32
    %386 = vector.broadcast %cst_271 : f32 to vector<2x32xf32>
    %387 = arith.addf %385, %386 : vector<2x32xf32>
    %cst_272 = arith.constant 5.000000e-01 : f32
    %388 = vector.broadcast %cst_272 : f32 to vector<2x32xf32>
    %389 = arith.mulf %388, %387 : vector<2x32xf32>
    %390 = arith.mulf %371, %335 : vector<2x32xf32>
    %391 = arith.mulf %359, %377 : vector<2x32xf32>
    %392 = arith.addf %390, %391 : vector<2x32xf32>
    %393 = math.tanh %392 : vector<2x32xf32>
    %394 = arith.mulf %389, %393 : vector<2x32xf32>
    %395 = arith.truncf %394 : vector<2x32xf32> to vector<2x32xbf16>
    %c0_273 = arith.constant 0 : index
    %c0_274 = arith.constant 0 : index
    %396 = vector.load %arg4[%c0_273, %c0_274] : memref<32x16xbf16, #tpu.memory_space<vmem>>, vector<32x16xbf16>
    %cst_275 = arith.constant dense<0.000000e+00> : vector<2x16xf32>
    %397 = tpu.matmul %395, %396, %cst_275 {dimension_numbers = #tpu.dot_dimension_numbers<[1], [0], [0], [1], [0, 0, 1, 1], [], []>} : vector<2x32xbf16>, vector<32x16xbf16>, vector<2x16xf32> -> vector<2x16xf32>
    %c0_276 = arith.constant 0 : index
    %c0_277 = arith.constant 0 : index
    %398 = vector.load %arg5[%c0_276, %c0_277] : memref<1x16xf32, #tpu.memory_space<vmem>>, vector<1x16xf32>
    %399 = vector.broadcast %398 : vector<1x16xf32> to vector<2x16xf32>
    %400 = arith.addf %397, %399 : vector<2x16xf32>
    %c0_278 = arith.constant 0 : index
    %c6_279 = arith.constant 6 : index
    %c0_280 = arith.constant 0 : index
    %401 = vector.load %arg6[%c0_278, %c6_279, %c0_280] : memref<2x8x16xf32, #tpu.memory_space<vmem>>, vector<2x1x16xf32>
    %402 = vector.shape_cast %401 : vector<2x1x16xf32> to vector<2x16xf32>
    %403 = vector.shape_cast %400 : vector<2x16xf32> to vector<2x1x16xf32>
    tpu.vector_store %arg6[%c0_278, %c6_279, %c0_280], %403 {strides = array<i32>} : memref<2x8x16xf32, #tpu.memory_space<vmem>>, vector<2x1x16xf32>,
    %404 = arith.truncf %394 : vector<2x32xf32> to vector<2x32xbf16>
    %c0_281 = arith.constant 0 : index
    %c7 = arith.constant 7 : index
    %c0_282 = arith.constant 0 : index
    %405 = vector.load %arg2[%c0_281, %c7, %c0_282] : memref<2x8x128xf32, #tpu.memory_space<vmem>>, vector<2x1x32xf32>
    %406 = vector.shape_cast %405 : vector<2x1x32xf32> to vector<2x32xf32>
    %c0_283 = arith.constant 0 : index
    %c0_284 = arith.constant 0 : index
    %407 = vector.load %arg3[%c0_283, %c0_284] : memref<32x128xbf16, #tpu.memory_space<vmem>>, vector<32x32xbf16>
    %cst_285 = arith.constant dense<0.000000e+00> : vector<2x32xf32>
    %408 = tpu.matmul %404, %407, %cst_285 {dimension_numbers = #tpu.dot_dimension_numbers<[1], [0], [0], [1], [0, 0, 1, 1], [], []>} : vector<2x32xbf16>, vector<32x32xbf16>, vector<2x32xf32> -> vector<2x32xf32>
    %409 = arith.addf %406, %408 : vector<2x32xf32>
    %cst_286 = arith.constant 5.000000e-01 : f32
    %410 = vector.broadcast %cst_286 : f32 to vector<2x32xf32>
    %411 = arith.mulf %410, %409 : vector<2x32xf32>
    %412 = math.tanh %411 : vector<2x32xf32>
    %cst_287 = arith.constant 1.000000e+00 : f32
    %413 = vector.broadcast %cst_287 : f32 to vector<2x32xf32>
    %414 = arith.addf %412, %413 : vector<2x32xf32>
    %cst_288 = arith.constant 5.000000e-01 : f32
    %415 = vector.broadcast %cst_288 : f32 to vector<2x32xf32>
    %416 = arith.mulf %415, %414 : vector<2x32xf32>
    %c0_289 = arith.constant 0 : index
    %c7_290 = arith.constant 7 : index
    %c32_291 = arith.constant 32 : index
    %417 = vector.load %arg2[%c0_289, %c7_290, %c32_291] : memref<2x8x128xf32, #tpu.memory_space<vmem>>, vector<2x1x32xf32>
    %418 = vector.shape_cast %417 : vector<2x1x32xf32> to vector<2x32xf32>
    %c0_292 = arith.constant 0 : index
    %c32_293 = arith.constant 32 : index
    %419 = vector.load %arg3[%c0_292, %c32_293] : memref<32x128xbf16, #tpu.memory_space<vmem>>, vector<32x32xbf16>
    %cst_294 = arith.constant dense<0.000000e+00> : vector<2x32xf32>
    %420 = tpu.matmul %404, %419, %cst_294 {dimension_numbers = #tpu.dot_dimension_numbers<[1], [0], [0], [1], [0, 0, 1, 1], [], []>} : vector<2x32xbf16>, vector<32x32xbf16>, vector<2x32xf32> -> vector<2x32xf32>
    %421 = arith.addf %418, %420 : vector<2x32xf32>
    %cst_295 = arith.constant 5.000000e-01 : f32
    %422 = vector.broadcast %cst_295 : f32 to vector<2x32xf32>
    %423 = arith.mulf %422, %421 : vector<2x32xf32>
    %424 = math.tanh %423 : vector<2x32xf32>
    %cst_296 = arith.constant 1.000000e+00 : f32
    %425 = vector.broadcast %cst_296 : f32 to vector<2x32xf32>
    %426 = arith.addf %424, %425 : vector<2x32xf32>
    %cst_297 = arith.constant 5.000000e-01 : f32
    %427 = vector.broadcast %cst_297 : f32 to vector<2x32xf32>
    %428 = arith.mulf %427, %426 : vector<2x32xf32>
    %c0_298 = arith.constant 0 : index
    %c7_299 = arith.constant 7 : index
    %c64_300 = arith.constant 64 : index
    %429 = vector.load %arg2[%c0_298, %c7_299, %c64_300] : memref<2x8x128xf32, #tpu.memory_space<vmem>>, vector<2x1x32xf32>
    %430 = vector.shape_cast %429 : vector<2x1x32xf32> to vector<2x32xf32>
    %c0_301 = arith.constant 0 : index
    %c64_302 = arith.constant 64 : index
    %431 = vector.load %arg3[%c0_301, %c64_302] : memref<32x128xbf16, #tpu.memory_space<vmem>>, vector<32x32xbf16>
    %cst_303 = arith.constant dense<0.000000e+00> : vector<2x32xf32>
    %432 = tpu.matmul %404, %431, %cst_303 {dimension_numbers = #tpu.dot_dimension_numbers<[1], [0], [0], [1], [0, 0, 1, 1], [], []>} : vector<2x32xbf16>, vector<32x32xbf16>, vector<2x32xf32> -> vector<2x32xf32>
    %433 = arith.addf %430, %432 : vector<2x32xf32>
    %434 = math.tanh %433 : vector<2x32xf32>
    %c0_304 = arith.constant 0 : index
    %c7_305 = arith.constant 7 : index
    %c96_306 = arith.constant 96 : index
    %435 = vector.load %arg2[%c0_304, %c7_305, %c96_306] : memref<2x8x128xf32, #tpu.memory_space<vmem>>, vector<2x1x32xf32>
    %436 = vector.shape_cast %435 : vector<2x1x32xf32> to vector<2x32xf32>
    %c0_307 = arith.constant 0 : index
    %c96_308 = arith.constant 96 : index
    %437 = vector.load %arg3[%c0_307, %c96_308] : memref<32x128xbf16, #tpu.memory_space<vmem>>, vector<32x32xbf16>
    %cst_309 = arith.constant dense<0.000000e+00> : vector<2x32xf32>
    %438 = tpu.matmul %404, %437, %cst_309 {dimension_numbers = #tpu.dot_dimension_numbers<[1], [0], [0], [1], [0, 0, 1, 1], [], []>} : vector<2x32xbf16>, vector<32x32xbf16>, vector<2x32xf32> -> vector<2x32xf32>
    %439 = arith.addf %436, %438 : vector<2x32xf32>
    %cst_310 = arith.constant 5.000000e-01 : f32
    %440 = vector.broadcast %cst_310 : f32 to vector<2x32xf32>
    %441 = arith.mulf %440, %439 : vector<2x32xf32>
    %442 = math.tanh %441 : vector<2x32xf32>
    %cst_311 = arith.constant 1.000000e+00 : f32
    %443 = vector.broadcast %cst_311 : f32 to vector<2x32xf32>
    %444 = arith.addf %442, %443 : vector<2x32xf32>
    %cst_312 = arith.constant 5.000000e-01 : f32
    %445 = vector.broadcast %cst_312 : f32 to vector<2x32xf32>
    %446 = arith.mulf %445, %444 : vector<2x32xf32>
    %447 = arith.mulf %428, %392 : vector<2x32xf32>
    %448 = arith.mulf %416, %434 : vector<2x32xf32>
    %449 = arith.addf %447, %448 : vector<2x32xf32>
    %450 = math.tanh %449 : vector<2x32xf32>
    %451 = arith.mulf %446, %450 : vector<2x32xf32>
    %452 = arith.truncf %451 : vector<2x32xf32> to vector<2x32xbf16>
    %c0_313 = arith.constant 0 : index
    %c0_314 = arith.constant 0 : index
    %453 = vector.load %arg4[%c0_313, %c0_314] : memref<32x16xbf16, #tpu.memory_space<vmem>>, vector<32x16xbf16>
    %cst_315 = arith.constant dense<0.000000e+00> : vector<2x16xf32>
    %454 = tpu.matmul %452, %453, %cst_315 {dimension_numbers = #tpu.dot_dimension_numbers<[1], [0], [0], [1], [0, 0, 1, 1], [], []>} : vector<2x32xbf16>, vector<32x16xbf16>, vector<2x16xf32> -> vector<2x16xf32>
    %c0_316 = arith.constant 0 : index
    %c0_317 = arith.constant 0 : index
    %455 = vector.load %arg5[%c0_316, %c0_317] : memref<1x16xf32, #tpu.memory_space<vmem>>, vector<1x16xf32>
    %456 = vector.broadcast %455 : vector<1x16xf32> to vector<2x16xf32>
    %457 = arith.addf %454, %456 : vector<2x16xf32>
    %c0_318 = arith.constant 0 : index
    %c7_319 = arith.constant 7 : index
    %c0_320 = arith.constant 0 : index
    %458 = vector.load %arg6[%c0_318, %c7_319, %c0_320] : memref<2x8x16xf32, #tpu.memory_space<vmem>>, vector<2x1x16xf32>
    %459 = vector.shape_cast %458 : vector<2x1x16xf32> to vector<2x16xf32>
    %460 = vector.shape_cast %457 : vector<2x16xf32> to vector<2x1x16xf32>
    tpu.vector_store %arg6[%c0_318, %c7_319, %c0_320], %460 {strides = array<i32>} : memref<2x8x16xf32, #tpu.memory_space<vmem>>, vector<2x1x16xf32>,
    %c0_321 = arith.constant 0 : index
    %c0_322 = arith.constant 0 : index
    %461 = vector.load %arg7[%c0_321, %c0_322] : memref<2x32xf32, #tpu.memory_space<vmem>>, vector<2x32xf32>
    tpu.vector_store %arg7[%c0_321, %c0_322], %451 {strides = array<i32>} : memref<2x32xf32, #tpu.memory_space<vmem>>, vector<2x32xf32>,
    %c0_323 = arith.constant 0 : index
    %c0_324 = arith.constant 0 : index
    %462 = vector.load %arg8[%c0_323, %c0_324] : memref<2x32xf32, #tpu.memory_space<vmem>>, vector<2x32xf32>
    tpu.vector_store %arg8[%c0_323, %c0_324], %449 {strides = array<i32>} : memref<2x32xf32, #tpu.memory_space<vmem>>, vector<2x32xf32>,
    return
  }
  func.func @transform_0(%arg0: i32, %arg1: i32) -> (i32, i32, i32) {
    %c0_i32 = arith.constant 0 : i32
    %c0_i32_0 = arith.constant 0 : i32
    return %arg0, %arg1, %c0_i32 : i32, i32, i32
  }
  func.func @transform_1(%arg0: i32, %arg1: i32) -> (i32, i32) {
    %c0_i32 = arith.constant 0 : i32
    %c0_i32_0 = arith.constant 0 : i32
    %c0_i32_1 = arith.constant 0 : i32
    return %c0_i32, %c0_i32_0 : i32, i32
  }
  func.func @transform_2(%arg0: i32, %arg1: i32) -> (i32, i32) {
    %c0_i32 = arith.constant 0 : i32
    %c0_i32_0 = arith.constant 0 : i32
    %c0_i32_1 = arith.constant 0 : i32
    return %c0_i32, %c0_i32_0 : i32, i32
  }
  func.func @transform_3(%arg0: i32, %arg1: i32) -> (i32, i32) {
    %c0_i32 = arith.constant 0 : i32
    %c0_i32_0 = arith.constant 0 : i32
    %c0_i32_1 = arith.constant 0 : i32
    return %c0_i32, %c0_i32_0 : i32, i32
  }
  func.func @transform_4(%arg0: i32, %arg1: i32) -> (i32, i32, i32) {
    %c0_i32 = arith.constant 0 : i32
    %c0_i32_0 = arith.constant 0 : i32
    return %arg0, %arg1, %c0_i32 : i32, i32, i32
  }
}

module attributes {stable_mosaic.version = 11 : i64} {
  func.func @_lstm_fused_kernel(%arg0: i32, %arg1: i32, %arg2: memref<2x8x128xf32, #tpu.memory_space<vmem>>, %arg3: memref<32x128xbf16, #tpu.memory_space<vmem>>, %arg4: memref<32x128xbf16, #tpu.memory_space<vmem>>, %arg5: memref<1x128xf32, #tpu.memory_space<vmem>>, %arg6: memref<2x8x128xf32, #tpu.memory_space<vmem>>, %arg7: memref<2x32xf32, #tpu.memory_space<vmem>>, %arg8: memref<2x32xf32, #tpu.memory_space<vmem>>) attributes {dimension_semantics = [#tpu.dimension_semantics<parallel>, #tpu.dimension_semantics<arbitrary>], iteration_bounds = array<i64: 1, 1>, scalar_prefetch = 0 : i64, scratch_operands = 2 : i64, tpu.core_type = #tpu.core_type<tc>, window_params = [{transform_indices = @transform_0, window_bounds = array<i64: 2, 8, 128>}, {pipeline_mode = #tpu.pipeline_mode<synchronous>, transform_indices = @transform_1, window_bounds = array<i64: 32, 128>}, {pipeline_mode = #tpu.pipeline_mode<synchronous>, transform_indices = @transform_2, window_bounds = array<i64: 32, 128>}, {pipeline_mode = #tpu.pipeline_mode<synchronous>, transform_indices = @transform_3, window_bounds = array<i64: 1, 128>}, {transform_indices = @transform_4, window_bounds = array<i64: 2, 8, 128>}]} {
    %c0_i32 = arith.constant 0 : i32
    %0 = arith.cmpi eq, %arg1, %c0_i32 : i32
    %1 = arith.extui %0 : i1 to i32
    %c0_i32_0 = arith.constant 0 : i32
    %2 = arith.cmpi ne, %1, %c0_i32_0 : i32
    scf.if %2 {
      %cst_325 = arith.constant 0.000000e+00 : f32
      %463 = vector.broadcast %cst_325 : f32 to vector<2x32xf32>
      %c0_326 = arith.constant 0 : index
      %c0_327 = arith.constant 0 : index
      %464 = vector.load %arg7[%c0_326, %c0_327] : memref<2x32xf32, #tpu.memory_space<vmem>>, vector<2x32xf32>
      tpu.vector_store %arg7[%c0_326, %c0_327], %463 {strides = array<i32>} : memref<2x32xf32, #tpu.memory_space<vmem>>, vector<2x32xf32>,
      %cst_328 = arith.constant 0.000000e+00 : f32
      %465 = vector.broadcast %cst_328 : f32 to vector<2x32xf32>
      %c0_329 = arith.constant 0 : index
      %c0_330 = arith.constant 0 : index
      %466 = vector.load %arg8[%c0_329, %c0_330] : memref<2x32xf32, #tpu.memory_space<vmem>>, vector<2x32xf32>
      tpu.vector_store %arg8[%c0_329, %c0_330], %465 {strides = array<i32>} : memref<2x32xf32, #tpu.memory_space<vmem>>, vector<2x32xf32>,
    } else {
    }
    %c0 = arith.constant 0 : index
    %c0_1 = arith.constant 0 : index
    %3 = vector.load %arg7[%c0, %c0_1] : memref<2x32xf32, #tpu.memory_space<vmem>>, vector<2x32xf32>
    %c0_2 = arith.constant 0 : index
    %c0_3 = arith.constant 0 : index
    %4 = vector.load %arg8[%c0_2, %c0_3] : memref<2x32xf32, #tpu.memory_space<vmem>>, vector<2x32xf32>
    %5 = arith.truncf %3 : vector<2x32xf32> to vector<2x32xbf16>
    %c0_4 = arith.constant 0 : index
    %c0_5 = arith.constant 0 : index
    %c0_6 = arith.constant 0 : index
    %6 = vector.load %arg2[%c0_4, %c0_5, %c0_6] : memref<2x8x128xf32, #tpu.memory_space<vmem>>, vector<2x1x32xf32>
    %7 = vector.shape_cast %6 : vector<2x1x32xf32> to vector<2x32xf32>
    %c0_7 = arith.constant 0 : index
    %c0_8 = arith.constant 0 : index
    %8 = vector.load %arg3[%c0_7, %c0_8] : memref<32x128xbf16, #tpu.memory_space<vmem>>, vector<32x32xbf16>
    %cst = arith.constant dense<0.000000e+00> : vector<2x32xf32>
    %9 = tpu.matmul %5, %8, %cst {dimension_numbers = #tpu.dot_dimension_numbers<[1], [0], [0], [1], [0, 0, 1, 1], [], []>} : vector<2x32xbf16>, vector<32x32xbf16>, vector<2x32xf32> -> vector<2x32xf32>
    %10 = arith.addf %7, %9 : vector<2x32xf32>
    %cst_9 = arith.constant 5.000000e-01 : f32
    %11 = vector.broadcast %cst_9 : f32 to vector<2x32xf32>
    %12 = arith.mulf %11, %10 : vector<2x32xf32>
    %13 = math.tanh %12 : vector<2x32xf32>
    %cst_10 = arith.constant 1.000000e+00 : f32
    %14 = vector.broadcast %cst_10 : f32 to vector<2x32xf32>
    %15 = arith.addf %13, %14 : vector<2x32xf32>
    %cst_11 = arith.constant 5.000000e-01 : f32
    %16 = vector.broadcast %cst_11 : f32 to vector<2x32xf32>
    %17 = arith.mulf %16, %15 : vector<2x32xf32>
    %c0_12 = arith.constant 0 : index
    %c0_13 = arith.constant 0 : index
    %c32 = arith.constant 32 : index
    %18 = vector.load %arg2[%c0_12, %c0_13, %c32] : memref<2x8x128xf32, #tpu.memory_space<vmem>>, vector<2x1x32xf32>
    %19 = vector.shape_cast %18 : vector<2x1x32xf32> to vector<2x32xf32>
    %c0_14 = arith.constant 0 : index
    %c32_15 = arith.constant 32 : index
    %20 = vector.load %arg3[%c0_14, %c32_15] : memref<32x128xbf16, #tpu.memory_space<vmem>>, vector<32x32xbf16>
    %cst_16 = arith.constant dense<0.000000e+00> : vector<2x32xf32>
    %21 = tpu.matmul %5, %20, %cst_16 {dimension_numbers = #tpu.dot_dimension_numbers<[1], [0], [0], [1], [0, 0, 1, 1], [], []>} : vector<2x32xbf16>, vector<32x32xbf16>, vector<2x32xf32> -> vector<2x32xf32>
    %22 = arith.addf %19, %21 : vector<2x32xf32>
    %cst_17 = arith.constant 5.000000e-01 : f32
    %23 = vector.broadcast %cst_17 : f32 to vector<2x32xf32>
    %24 = arith.mulf %23, %22 : vector<2x32xf32>
    %25 = math.tanh %24 : vector<2x32xf32>
    %cst_18 = arith.constant 1.000000e+00 : f32
    %26 = vector.broadcast %cst_18 : f32 to vector<2x32xf32>
    %27 = arith.addf %25, %26 : vector<2x32xf32>
    %cst_19 = arith.constant 5.000000e-01 : f32
    %28 = vector.broadcast %cst_19 : f32 to vector<2x32xf32>
    %29 = arith.mulf %28, %27 : vector<2x32xf32>
    %c0_20 = arith.constant 0 : index
    %c0_21 = arith.constant 0 : index
    %c64 = arith.constant 64 : index
    %30 = vector.load %arg2[%c0_20, %c0_21, %c64] : memref<2x8x128xf32, #tpu.memory_space<vmem>>, vector<2x1x32xf32>
    %31 = vector.shape_cast %30 : vector<2x1x32xf32> to vector<2x32xf32>
    %c0_22 = arith.constant 0 : index
    %c64_23 = arith.constant 64 : index
    %32 = vector.load %arg3[%c0_22, %c64_23] : memref<32x128xbf16, #tpu.memory_space<vmem>>, vector<32x32xbf16>
    %cst_24 = arith.constant dense<0.000000e+00> : vector<2x32xf32>
    %33 = tpu.matmul %5, %32, %cst_24 {dimension_numbers = #tpu.dot_dimension_numbers<[1], [0], [0], [1], [0, 0, 1, 1], [], []>} : vector<2x32xbf16>, vector<32x32xbf16>, vector<2x32xf32> -> vector<2x32xf32>
    %34 = arith.addf %31, %33 : vector<2x32xf32>
    %35 = math.tanh %34 : vector<2x32xf32>
    %c0_25 = arith.constant 0 : index
    %c0_26 = arith.constant 0 : index
    %c96 = arith.constant 96 : index
    %36 = vector.load %arg2[%c0_25, %c0_26, %c96] : memref<2x8x128xf32, #tpu.memory_space<vmem>>, vector<2x1x32xf32>
    %37 = vector.shape_cast %36 : vector<2x1x32xf32> to vector<2x32xf32>
    %c0_27 = arith.constant 0 : index
    %c96_28 = arith.constant 96 : index
    %38 = vector.load %arg3[%c0_27, %c96_28] : memref<32x128xbf16, #tpu.memory_space<vmem>>, vector<32x32xbf16>
    %cst_29 = arith.constant dense<0.000000e+00> : vector<2x32xf32>
    %39 = tpu.matmul %5, %38, %cst_29 {dimension_numbers = #tpu.dot_dimension_numbers<[1], [0], [0], [1], [0, 0, 1, 1], [], []>} : vector<2x32xbf16>, vector<32x32xbf16>, vector<2x32xf32> -> vector<2x32xf32>
    %40 = arith.addf %37, %39 : vector<2x32xf32>
    %cst_30 = arith.constant 5.000000e-01 : f32
    %41 = vector.broadcast %cst_30 : f32 to vector<2x32xf32>
    %42 = arith.mulf %41, %40 : vector<2x32xf32>
    %43 = math.tanh %42 : vector<2x32xf32>
    %cst_31 = arith.constant 1.000000e+00 : f32
    %44 = vector.broadcast %cst_31 : f32 to vector<2x32xf32>
    %45 = arith.addf %43, %44 : vector<2x32xf32>
    %cst_32 = arith.constant 5.000000e-01 : f32
    %46 = vector.broadcast %cst_32 : f32 to vector<2x32xf32>
    %47 = arith.mulf %46, %45 : vector<2x32xf32>
    %48 = arith.mulf %29, %4 : vector<2x32xf32>
    %49 = arith.mulf %17, %35 : vector<2x32xf32>
    %50 = arith.addf %48, %49 : vector<2x32xf32>
    %51 = math.tanh %50 : vector<2x32xf32>
    %52 = arith.mulf %47, %51 : vector<2x32xf32>
    %53 = arith.truncf %52 : vector<2x32xf32> to vector<2x32xbf16>
    %c0_33 = arith.constant 0 : index
    %c0_34 = arith.constant 0 : index
    %54 = vector.load %arg4[%c0_33, %c0_34] : memref<32x128xbf16, #tpu.memory_space<vmem>>, vector<32x128xbf16>
    %cst_35 = arith.constant dense<0.000000e+00> : vector<2x128xf32>
    %55 = tpu.matmul %53, %54, %cst_35 {dimension_numbers = #tpu.dot_dimension_numbers<[1], [0], [0], [1], [0, 0, 1, 1], [], []>} : vector<2x32xbf16>, vector<32x128xbf16>, vector<2x128xf32> -> vector<2x128xf32>
    %c0_36 = arith.constant 0 : index
    %c0_37 = arith.constant 0 : index
    %56 = vector.load %arg5[%c0_36, %c0_37] : memref<1x128xf32, #tpu.memory_space<vmem>>, vector<1x128xf32>
    %57 = vector.broadcast %56 : vector<1x128xf32> to vector<2x128xf32>
    %58 = arith.addf %55, %57 : vector<2x128xf32>
    %c0_38 = arith.constant 0 : index
    %c0_39 = arith.constant 0 : index
    %c0_40 = arith.constant 0 : index
    %59 = vector.load %arg6[%c0_38, %c0_39, %c0_40] : memref<2x8x128xf32, #tpu.memory_space<vmem>>, vector<2x1x128xf32>
    %60 = vector.shape_cast %59 : vector<2x1x128xf32> to vector<2x128xf32>
    %61 = vector.shape_cast %58 : vector<2x128xf32> to vector<2x1x128xf32>
    tpu.vector_store %arg6[%c0_38, %c0_39, %c0_40], %61 {strides = array<i32>} : memref<2x8x128xf32, #tpu.memory_space<vmem>>, vector<2x1x128xf32>,
    %62 = arith.truncf %52 : vector<2x32xf32> to vector<2x32xbf16>
    %c0_41 = arith.constant 0 : index
    %c1 = arith.constant 1 : index
    %c0_42 = arith.constant 0 : index
    %63 = vector.load %arg2[%c0_41, %c1, %c0_42] : memref<2x8x128xf32, #tpu.memory_space<vmem>>, vector<2x1x32xf32>
    %64 = vector.shape_cast %63 : vector<2x1x32xf32> to vector<2x32xf32>
    %c0_43 = arith.constant 0 : index
    %c0_44 = arith.constant 0 : index
    %65 = vector.load %arg3[%c0_43, %c0_44] : memref<32x128xbf16, #tpu.memory_space<vmem>>, vector<32x32xbf16>
    %cst_45 = arith.constant dense<0.000000e+00> : vector<2x32xf32>
    %66 = tpu.matmul %62, %65, %cst_45 {dimension_numbers = #tpu.dot_dimension_numbers<[1], [0], [0], [1], [0, 0, 1, 1], [], []>} : vector<2x32xbf16>, vector<32x32xbf16>, vector<2x32xf32> -> vector<2x32xf32>
    %67 = arith.addf %64, %66 : vector<2x32xf32>
    %cst_46 = arith.constant 5.000000e-01 : f32
    %68 = vector.broadcast %cst_46 : f32 to vector<2x32xf32>
    %69 = arith.mulf %68, %67 : vector<2x32xf32>
    %70 = math.tanh %69 : vector<2x32xf32>
    %cst_47 = arith.constant 1.000000e+00 : f32
    %71 = vector.broadcast %cst_47 : f32 to vector<2x32xf32>
    %72 = arith.addf %70, %71 : vector<2x32xf32>
    %cst_48 = arith.constant 5.000000e-01 : f32
    %73 = vector.broadcast %cst_48 : f32 to vector<2x32xf32>
    %74 = arith.mulf %73, %72 : vector<2x32xf32>
    %c0_49 = arith.constant 0 : index
    %c1_50 = arith.constant 1 : index
    %c32_51 = arith.constant 32 : index
    %75 = vector.load %arg2[%c0_49, %c1_50, %c32_51] : memref<2x8x128xf32, #tpu.memory_space<vmem>>, vector<2x1x32xf32>
    %76 = vector.shape_cast %75 : vector<2x1x32xf32> to vector<2x32xf32>
    %c0_52 = arith.constant 0 : index
    %c32_53 = arith.constant 32 : index
    %77 = vector.load %arg3[%c0_52, %c32_53] : memref<32x128xbf16, #tpu.memory_space<vmem>>, vector<32x32xbf16>
    %cst_54 = arith.constant dense<0.000000e+00> : vector<2x32xf32>
    %78 = tpu.matmul %62, %77, %cst_54 {dimension_numbers = #tpu.dot_dimension_numbers<[1], [0], [0], [1], [0, 0, 1, 1], [], []>} : vector<2x32xbf16>, vector<32x32xbf16>, vector<2x32xf32> -> vector<2x32xf32>
    %79 = arith.addf %76, %78 : vector<2x32xf32>
    %cst_55 = arith.constant 5.000000e-01 : f32
    %80 = vector.broadcast %cst_55 : f32 to vector<2x32xf32>
    %81 = arith.mulf %80, %79 : vector<2x32xf32>
    %82 = math.tanh %81 : vector<2x32xf32>
    %cst_56 = arith.constant 1.000000e+00 : f32
    %83 = vector.broadcast %cst_56 : f32 to vector<2x32xf32>
    %84 = arith.addf %82, %83 : vector<2x32xf32>
    %cst_57 = arith.constant 5.000000e-01 : f32
    %85 = vector.broadcast %cst_57 : f32 to vector<2x32xf32>
    %86 = arith.mulf %85, %84 : vector<2x32xf32>
    %c0_58 = arith.constant 0 : index
    %c1_59 = arith.constant 1 : index
    %c64_60 = arith.constant 64 : index
    %87 = vector.load %arg2[%c0_58, %c1_59, %c64_60] : memref<2x8x128xf32, #tpu.memory_space<vmem>>, vector<2x1x32xf32>
    %88 = vector.shape_cast %87 : vector<2x1x32xf32> to vector<2x32xf32>
    %c0_61 = arith.constant 0 : index
    %c64_62 = arith.constant 64 : index
    %89 = vector.load %arg3[%c0_61, %c64_62] : memref<32x128xbf16, #tpu.memory_space<vmem>>, vector<32x32xbf16>
    %cst_63 = arith.constant dense<0.000000e+00> : vector<2x32xf32>
    %90 = tpu.matmul %62, %89, %cst_63 {dimension_numbers = #tpu.dot_dimension_numbers<[1], [0], [0], [1], [0, 0, 1, 1], [], []>} : vector<2x32xbf16>, vector<32x32xbf16>, vector<2x32xf32> -> vector<2x32xf32>
    %91 = arith.addf %88, %90 : vector<2x32xf32>
    %92 = math.tanh %91 : vector<2x32xf32>
    %c0_64 = arith.constant 0 : index
    %c1_65 = arith.constant 1 : index
    %c96_66 = arith.constant 96 : index
    %93 = vector.load %arg2[%c0_64, %c1_65, %c96_66] : memref<2x8x128xf32, #tpu.memory_space<vmem>>, vector<2x1x32xf32>
    %94 = vector.shape_cast %93 : vector<2x1x32xf32> to vector<2x32xf32>
    %c0_67 = arith.constant 0 : index
    %c96_68 = arith.constant 96 : index
    %95 = vector.load %arg3[%c0_67, %c96_68] : memref<32x128xbf16, #tpu.memory_space<vmem>>, vector<32x32xbf16>
    %cst_69 = arith.constant dense<0.000000e+00> : vector<2x32xf32>
    %96 = tpu.matmul %62, %95, %cst_69 {dimension_numbers = #tpu.dot_dimension_numbers<[1], [0], [0], [1], [0, 0, 1, 1], [], []>} : vector<2x32xbf16>, vector<32x32xbf16>, vector<2x32xf32> -> vector<2x32xf32>
    %97 = arith.addf %94, %96 : vector<2x32xf32>
    %cst_70 = arith.constant 5.000000e-01 : f32
    %98 = vector.broadcast %cst_70 : f32 to vector<2x32xf32>
    %99 = arith.mulf %98, %97 : vector<2x32xf32>
    %100 = math.tanh %99 : vector<2x32xf32>
    %cst_71 = arith.constant 1.000000e+00 : f32
    %101 = vector.broadcast %cst_71 : f32 to vector<2x32xf32>
    %102 = arith.addf %100, %101 : vector<2x32xf32>
    %cst_72 = arith.constant 5.000000e-01 : f32
    %103 = vector.broadcast %cst_72 : f32 to vector<2x32xf32>
    %104 = arith.mulf %103, %102 : vector<2x32xf32>
    %105 = arith.mulf %86, %50 : vector<2x32xf32>
    %106 = arith.mulf %74, %92 : vector<2x32xf32>
    %107 = arith.addf %105, %106 : vector<2x32xf32>
    %108 = math.tanh %107 : vector<2x32xf32>
    %109 = arith.mulf %104, %108 : vector<2x32xf32>
    %110 = arith.truncf %109 : vector<2x32xf32> to vector<2x32xbf16>
    %c0_73 = arith.constant 0 : index
    %c0_74 = arith.constant 0 : index
    %111 = vector.load %arg4[%c0_73, %c0_74] : memref<32x128xbf16, #tpu.memory_space<vmem>>, vector<32x128xbf16>
    %cst_75 = arith.constant dense<0.000000e+00> : vector<2x128xf32>
    %112 = tpu.matmul %110, %111, %cst_75 {dimension_numbers = #tpu.dot_dimension_numbers<[1], [0], [0], [1], [0, 0, 1, 1], [], []>} : vector<2x32xbf16>, vector<32x128xbf16>, vector<2x128xf32> -> vector<2x128xf32>
    %c0_76 = arith.constant 0 : index
    %c0_77 = arith.constant 0 : index
    %113 = vector.load %arg5[%c0_76, %c0_77] : memref<1x128xf32, #tpu.memory_space<vmem>>, vector<1x128xf32>
    %114 = vector.broadcast %113 : vector<1x128xf32> to vector<2x128xf32>
    %115 = arith.addf %112, %114 : vector<2x128xf32>
    %c0_78 = arith.constant 0 : index
    %c1_79 = arith.constant 1 : index
    %c0_80 = arith.constant 0 : index
    %116 = vector.load %arg6[%c0_78, %c1_79, %c0_80] : memref<2x8x128xf32, #tpu.memory_space<vmem>>, vector<2x1x128xf32>
    %117 = vector.shape_cast %116 : vector<2x1x128xf32> to vector<2x128xf32>
    %118 = vector.shape_cast %115 : vector<2x128xf32> to vector<2x1x128xf32>
    tpu.vector_store %arg6[%c0_78, %c1_79, %c0_80], %118 {strides = array<i32>} : memref<2x8x128xf32, #tpu.memory_space<vmem>>, vector<2x1x128xf32>,
    %119 = arith.truncf %109 : vector<2x32xf32> to vector<2x32xbf16>
    %c0_81 = arith.constant 0 : index
    %c2 = arith.constant 2 : index
    %c0_82 = arith.constant 0 : index
    %120 = vector.load %arg2[%c0_81, %c2, %c0_82] : memref<2x8x128xf32, #tpu.memory_space<vmem>>, vector<2x1x32xf32>
    %121 = vector.shape_cast %120 : vector<2x1x32xf32> to vector<2x32xf32>
    %c0_83 = arith.constant 0 : index
    %c0_84 = arith.constant 0 : index
    %122 = vector.load %arg3[%c0_83, %c0_84] : memref<32x128xbf16, #tpu.memory_space<vmem>>, vector<32x32xbf16>
    %cst_85 = arith.constant dense<0.000000e+00> : vector<2x32xf32>
    %123 = tpu.matmul %119, %122, %cst_85 {dimension_numbers = #tpu.dot_dimension_numbers<[1], [0], [0], [1], [0, 0, 1, 1], [], []>} : vector<2x32xbf16>, vector<32x32xbf16>, vector<2x32xf32> -> vector<2x32xf32>
    %124 = arith.addf %121, %123 : vector<2x32xf32>
    %cst_86 = arith.constant 5.000000e-01 : f32
    %125 = vector.broadcast %cst_86 : f32 to vector<2x32xf32>
    %126 = arith.mulf %125, %124 : vector<2x32xf32>
    %127 = math.tanh %126 : vector<2x32xf32>
    %cst_87 = arith.constant 1.000000e+00 : f32
    %128 = vector.broadcast %cst_87 : f32 to vector<2x32xf32>
    %129 = arith.addf %127, %128 : vector<2x32xf32>
    %cst_88 = arith.constant 5.000000e-01 : f32
    %130 = vector.broadcast %cst_88 : f32 to vector<2x32xf32>
    %131 = arith.mulf %130, %129 : vector<2x32xf32>
    %c0_89 = arith.constant 0 : index
    %c2_90 = arith.constant 2 : index
    %c32_91 = arith.constant 32 : index
    %132 = vector.load %arg2[%c0_89, %c2_90, %c32_91] : memref<2x8x128xf32, #tpu.memory_space<vmem>>, vector<2x1x32xf32>
    %133 = vector.shape_cast %132 : vector<2x1x32xf32> to vector<2x32xf32>
    %c0_92 = arith.constant 0 : index
    %c32_93 = arith.constant 32 : index
    %134 = vector.load %arg3[%c0_92, %c32_93] : memref<32x128xbf16, #tpu.memory_space<vmem>>, vector<32x32xbf16>
    %cst_94 = arith.constant dense<0.000000e+00> : vector<2x32xf32>
    %135 = tpu.matmul %119, %134, %cst_94 {dimension_numbers = #tpu.dot_dimension_numbers<[1], [0], [0], [1], [0, 0, 1, 1], [], []>} : vector<2x32xbf16>, vector<32x32xbf16>, vector<2x32xf32> -> vector<2x32xf32>
    %136 = arith.addf %133, %135 : vector<2x32xf32>
    %cst_95 = arith.constant 5.000000e-01 : f32
    %137 = vector.broadcast %cst_95 : f32 to vector<2x32xf32>
    %138 = arith.mulf %137, %136 : vector<2x32xf32>
    %139 = math.tanh %138 : vector<2x32xf32>
    %cst_96 = arith.constant 1.000000e+00 : f32
    %140 = vector.broadcast %cst_96 : f32 to vector<2x32xf32>
    %141 = arith.addf %139, %140 : vector<2x32xf32>
    %cst_97 = arith.constant 5.000000e-01 : f32
    %142 = vector.broadcast %cst_97 : f32 to vector<2x32xf32>
    %143 = arith.mulf %142, %141 : vector<2x32xf32>
    %c0_98 = arith.constant 0 : index
    %c2_99 = arith.constant 2 : index
    %c64_100 = arith.constant 64 : index
    %144 = vector.load %arg2[%c0_98, %c2_99, %c64_100] : memref<2x8x128xf32, #tpu.memory_space<vmem>>, vector<2x1x32xf32>
    %145 = vector.shape_cast %144 : vector<2x1x32xf32> to vector<2x32xf32>
    %c0_101 = arith.constant 0 : index
    %c64_102 = arith.constant 64 : index
    %146 = vector.load %arg3[%c0_101, %c64_102] : memref<32x128xbf16, #tpu.memory_space<vmem>>, vector<32x32xbf16>
    %cst_103 = arith.constant dense<0.000000e+00> : vector<2x32xf32>
    %147 = tpu.matmul %119, %146, %cst_103 {dimension_numbers = #tpu.dot_dimension_numbers<[1], [0], [0], [1], [0, 0, 1, 1], [], []>} : vector<2x32xbf16>, vector<32x32xbf16>, vector<2x32xf32> -> vector<2x32xf32>
    %148 = arith.addf %145, %147 : vector<2x32xf32>
    %149 = math.tanh %148 : vector<2x32xf32>
    %c0_104 = arith.constant 0 : index
    %c2_105 = arith.constant 2 : index
    %c96_106 = arith.constant 96 : index
    %150 = vector.load %arg2[%c0_104, %c2_105, %c96_106] : memref<2x8x128xf32, #tpu.memory_space<vmem>>, vector<2x1x32xf32>
    %151 = vector.shape_cast %150 : vector<2x1x32xf32> to vector<2x32xf32>
    %c0_107 = arith.constant 0 : index
    %c96_108 = arith.constant 96 : index
    %152 = vector.load %arg3[%c0_107, %c96_108] : memref<32x128xbf16, #tpu.memory_space<vmem>>, vector<32x32xbf16>
    %cst_109 = arith.constant dense<0.000000e+00> : vector<2x32xf32>
    %153 = tpu.matmul %119, %152, %cst_109 {dimension_numbers = #tpu.dot_dimension_numbers<[1], [0], [0], [1], [0, 0, 1, 1], [], []>} : vector<2x32xbf16>, vector<32x32xbf16>, vector<2x32xf32> -> vector<2x32xf32>
    %154 = arith.addf %151, %153 : vector<2x32xf32>
    %cst_110 = arith.constant 5.000000e-01 : f32
    %155 = vector.broadcast %cst_110 : f32 to vector<2x32xf32>
    %156 = arith.mulf %155, %154 : vector<2x32xf32>
    %157 = math.tanh %156 : vector<2x32xf32>
    %cst_111 = arith.constant 1.000000e+00 : f32
    %158 = vector.broadcast %cst_111 : f32 to vector<2x32xf32>
    %159 = arith.addf %157, %158 : vector<2x32xf32>
    %cst_112 = arith.constant 5.000000e-01 : f32
    %160 = vector.broadcast %cst_112 : f32 to vector<2x32xf32>
    %161 = arith.mulf %160, %159 : vector<2x32xf32>
    %162 = arith.mulf %143, %107 : vector<2x32xf32>
    %163 = arith.mulf %131, %149 : vector<2x32xf32>
    %164 = arith.addf %162, %163 : vector<2x32xf32>
    %165 = math.tanh %164 : vector<2x32xf32>
    %166 = arith.mulf %161, %165 : vector<2x32xf32>
    %167 = arith.truncf %166 : vector<2x32xf32> to vector<2x32xbf16>
    %c0_113 = arith.constant 0 : index
    %c0_114 = arith.constant 0 : index
    %168 = vector.load %arg4[%c0_113, %c0_114] : memref<32x128xbf16, #tpu.memory_space<vmem>>, vector<32x128xbf16>
    %cst_115 = arith.constant dense<0.000000e+00> : vector<2x128xf32>
    %169 = tpu.matmul %167, %168, %cst_115 {dimension_numbers = #tpu.dot_dimension_numbers<[1], [0], [0], [1], [0, 0, 1, 1], [], []>} : vector<2x32xbf16>, vector<32x128xbf16>, vector<2x128xf32> -> vector<2x128xf32>
    %c0_116 = arith.constant 0 : index
    %c0_117 = arith.constant 0 : index
    %170 = vector.load %arg5[%c0_116, %c0_117] : memref<1x128xf32, #tpu.memory_space<vmem>>, vector<1x128xf32>
    %171 = vector.broadcast %170 : vector<1x128xf32> to vector<2x128xf32>
    %172 = arith.addf %169, %171 : vector<2x128xf32>
    %c0_118 = arith.constant 0 : index
    %c2_119 = arith.constant 2 : index
    %c0_120 = arith.constant 0 : index
    %173 = vector.load %arg6[%c0_118, %c2_119, %c0_120] : memref<2x8x128xf32, #tpu.memory_space<vmem>>, vector<2x1x128xf32>
    %174 = vector.shape_cast %173 : vector<2x1x128xf32> to vector<2x128xf32>
    %175 = vector.shape_cast %172 : vector<2x128xf32> to vector<2x1x128xf32>
    tpu.vector_store %arg6[%c0_118, %c2_119, %c0_120], %175 {strides = array<i32>} : memref<2x8x128xf32, #tpu.memory_space<vmem>>, vector<2x1x128xf32>,
    %176 = arith.truncf %166 : vector<2x32xf32> to vector<2x32xbf16>
    %c0_121 = arith.constant 0 : index
    %c3 = arith.constant 3 : index
    %c0_122 = arith.constant 0 : index
    %177 = vector.load %arg2[%c0_121, %c3, %c0_122] : memref<2x8x128xf32, #tpu.memory_space<vmem>>, vector<2x1x32xf32>
    %178 = vector.shape_cast %177 : vector<2x1x32xf32> to vector<2x32xf32>
    %c0_123 = arith.constant 0 : index
    %c0_124 = arith.constant 0 : index
    %179 = vector.load %arg3[%c0_123, %c0_124] : memref<32x128xbf16, #tpu.memory_space<vmem>>, vector<32x32xbf16>
    %cst_125 = arith.constant dense<0.000000e+00> : vector<2x32xf32>
    %180 = tpu.matmul %176, %179, %cst_125 {dimension_numbers = #tpu.dot_dimension_numbers<[1], [0], [0], [1], [0, 0, 1, 1], [], []>} : vector<2x32xbf16>, vector<32x32xbf16>, vector<2x32xf32> -> vector<2x32xf32>
    %181 = arith.addf %178, %180 : vector<2x32xf32>
    %cst_126 = arith.constant 5.000000e-01 : f32
    %182 = vector.broadcast %cst_126 : f32 to vector<2x32xf32>
    %183 = arith.mulf %182, %181 : vector<2x32xf32>
    %184 = math.tanh %183 : vector<2x32xf32>
    %cst_127 = arith.constant 1.000000e+00 : f32
    %185 = vector.broadcast %cst_127 : f32 to vector<2x32xf32>
    %186 = arith.addf %184, %185 : vector<2x32xf32>
    %cst_128 = arith.constant 5.000000e-01 : f32
    %187 = vector.broadcast %cst_128 : f32 to vector<2x32xf32>
    %188 = arith.mulf %187, %186 : vector<2x32xf32>
    %c0_129 = arith.constant 0 : index
    %c3_130 = arith.constant 3 : index
    %c32_131 = arith.constant 32 : index
    %189 = vector.load %arg2[%c0_129, %c3_130, %c32_131] : memref<2x8x128xf32, #tpu.memory_space<vmem>>, vector<2x1x32xf32>
    %190 = vector.shape_cast %189 : vector<2x1x32xf32> to vector<2x32xf32>
    %c0_132 = arith.constant 0 : index
    %c32_133 = arith.constant 32 : index
    %191 = vector.load %arg3[%c0_132, %c32_133] : memref<32x128xbf16, #tpu.memory_space<vmem>>, vector<32x32xbf16>
    %cst_134 = arith.constant dense<0.000000e+00> : vector<2x32xf32>
    %192 = tpu.matmul %176, %191, %cst_134 {dimension_numbers = #tpu.dot_dimension_numbers<[1], [0], [0], [1], [0, 0, 1, 1], [], []>} : vector<2x32xbf16>, vector<32x32xbf16>, vector<2x32xf32> -> vector<2x32xf32>
    %193 = arith.addf %190, %192 : vector<2x32xf32>
    %cst_135 = arith.constant 5.000000e-01 : f32
    %194 = vector.broadcast %cst_135 : f32 to vector<2x32xf32>
    %195 = arith.mulf %194, %193 : vector<2x32xf32>
    %196 = math.tanh %195 : vector<2x32xf32>
    %cst_136 = arith.constant 1.000000e+00 : f32
    %197 = vector.broadcast %cst_136 : f32 to vector<2x32xf32>
    %198 = arith.addf %196, %197 : vector<2x32xf32>
    %cst_137 = arith.constant 5.000000e-01 : f32
    %199 = vector.broadcast %cst_137 : f32 to vector<2x32xf32>
    %200 = arith.mulf %199, %198 : vector<2x32xf32>
    %c0_138 = arith.constant 0 : index
    %c3_139 = arith.constant 3 : index
    %c64_140 = arith.constant 64 : index
    %201 = vector.load %arg2[%c0_138, %c3_139, %c64_140] : memref<2x8x128xf32, #tpu.memory_space<vmem>>, vector<2x1x32xf32>
    %202 = vector.shape_cast %201 : vector<2x1x32xf32> to vector<2x32xf32>
    %c0_141 = arith.constant 0 : index
    %c64_142 = arith.constant 64 : index
    %203 = vector.load %arg3[%c0_141, %c64_142] : memref<32x128xbf16, #tpu.memory_space<vmem>>, vector<32x32xbf16>
    %cst_143 = arith.constant dense<0.000000e+00> : vector<2x32xf32>
    %204 = tpu.matmul %176, %203, %cst_143 {dimension_numbers = #tpu.dot_dimension_numbers<[1], [0], [0], [1], [0, 0, 1, 1], [], []>} : vector<2x32xbf16>, vector<32x32xbf16>, vector<2x32xf32> -> vector<2x32xf32>
    %205 = arith.addf %202, %204 : vector<2x32xf32>
    %206 = math.tanh %205 : vector<2x32xf32>
    %c0_144 = arith.constant 0 : index
    %c3_145 = arith.constant 3 : index
    %c96_146 = arith.constant 96 : index
    %207 = vector.load %arg2[%c0_144, %c3_145, %c96_146] : memref<2x8x128xf32, #tpu.memory_space<vmem>>, vector<2x1x32xf32>
    %208 = vector.shape_cast %207 : vector<2x1x32xf32> to vector<2x32xf32>
    %c0_147 = arith.constant 0 : index
    %c96_148 = arith.constant 96 : index
    %209 = vector.load %arg3[%c0_147, %c96_148] : memref<32x128xbf16, #tpu.memory_space<vmem>>, vector<32x32xbf16>
    %cst_149 = arith.constant dense<0.000000e+00> : vector<2x32xf32>
    %210 = tpu.matmul %176, %209, %cst_149 {dimension_numbers = #tpu.dot_dimension_numbers<[1], [0], [0], [1], [0, 0, 1, 1], [], []>} : vector<2x32xbf16>, vector<32x32xbf16>, vector<2x32xf32> -> vector<2x32xf32>
    %211 = arith.addf %208, %210 : vector<2x32xf32>
    %cst_150 = arith.constant 5.000000e-01 : f32
    %212 = vector.broadcast %cst_150 : f32 to vector<2x32xf32>
    %213 = arith.mulf %212, %211 : vector<2x32xf32>
    %214 = math.tanh %213 : vector<2x32xf32>
    %cst_151 = arith.constant 1.000000e+00 : f32
    %215 = vector.broadcast %cst_151 : f32 to vector<2x32xf32>
    %216 = arith.addf %214, %215 : vector<2x32xf32>
    %cst_152 = arith.constant 5.000000e-01 : f32
    %217 = vector.broadcast %cst_152 : f32 to vector<2x32xf32>
    %218 = arith.mulf %217, %216 : vector<2x32xf32>
    %219 = arith.mulf %200, %164 : vector<2x32xf32>
    %220 = arith.mulf %188, %206 : vector<2x32xf32>
    %221 = arith.addf %219, %220 : vector<2x32xf32>
    %222 = math.tanh %221 : vector<2x32xf32>
    %223 = arith.mulf %218, %222 : vector<2x32xf32>
    %224 = arith.truncf %223 : vector<2x32xf32> to vector<2x32xbf16>
    %c0_153 = arith.constant 0 : index
    %c0_154 = arith.constant 0 : index
    %225 = vector.load %arg4[%c0_153, %c0_154] : memref<32x128xbf16, #tpu.memory_space<vmem>>, vector<32x128xbf16>
    %cst_155 = arith.constant dense<0.000000e+00> : vector<2x128xf32>
    %226 = tpu.matmul %224, %225, %cst_155 {dimension_numbers = #tpu.dot_dimension_numbers<[1], [0], [0], [1], [0, 0, 1, 1], [], []>} : vector<2x32xbf16>, vector<32x128xbf16>, vector<2x128xf32> -> vector<2x128xf32>
    %c0_156 = arith.constant 0 : index
    %c0_157 = arith.constant 0 : index
    %227 = vector.load %arg5[%c0_156, %c0_157] : memref<1x128xf32, #tpu.memory_space<vmem>>, vector<1x128xf32>
    %228 = vector.broadcast %227 : vector<1x128xf32> to vector<2x128xf32>
    %229 = arith.addf %226, %228 : vector<2x128xf32>
    %c0_158 = arith.constant 0 : index
    %c3_159 = arith.constant 3 : index
    %c0_160 = arith.constant 0 : index
    %230 = vector.load %arg6[%c0_158, %c3_159, %c0_160] : memref<2x8x128xf32, #tpu.memory_space<vmem>>, vector<2x1x128xf32>
    %231 = vector.shape_cast %230 : vector<2x1x128xf32> to vector<2x128xf32>
    %232 = vector.shape_cast %229 : vector<2x128xf32> to vector<2x1x128xf32>
    tpu.vector_store %arg6[%c0_158, %c3_159, %c0_160], %232 {strides = array<i32>} : memref<2x8x128xf32, #tpu.memory_space<vmem>>, vector<2x1x128xf32>,
    %233 = arith.truncf %223 : vector<2x32xf32> to vector<2x32xbf16>
    %c0_161 = arith.constant 0 : index
    %c4 = arith.constant 4 : index
    %c0_162 = arith.constant 0 : index
    %234 = vector.load %arg2[%c0_161, %c4, %c0_162] : memref<2x8x128xf32, #tpu.memory_space<vmem>>, vector<2x1x32xf32>
    %235 = vector.shape_cast %234 : vector<2x1x32xf32> to vector<2x32xf32>
    %c0_163 = arith.constant 0 : index
    %c0_164 = arith.constant 0 : index
    %236 = vector.load %arg3[%c0_163, %c0_164] : memref<32x128xbf16, #tpu.memory_space<vmem>>, vector<32x32xbf16>
    %cst_165 = arith.constant dense<0.000000e+00> : vector<2x32xf32>
    %237 = tpu.matmul %233, %236, %cst_165 {dimension_numbers = #tpu.dot_dimension_numbers<[1], [0], [0], [1], [0, 0, 1, 1], [], []>} : vector<2x32xbf16>, vector<32x32xbf16>, vector<2x32xf32> -> vector<2x32xf32>
    %238 = arith.addf %235, %237 : vector<2x32xf32>
    %cst_166 = arith.constant 5.000000e-01 : f32
    %239 = vector.broadcast %cst_166 : f32 to vector<2x32xf32>
    %240 = arith.mulf %239, %238 : vector<2x32xf32>
    %241 = math.tanh %240 : vector<2x32xf32>
    %cst_167 = arith.constant 1.000000e+00 : f32
    %242 = vector.broadcast %cst_167 : f32 to vector<2x32xf32>
    %243 = arith.addf %241, %242 : vector<2x32xf32>
    %cst_168 = arith.constant 5.000000e-01 : f32
    %244 = vector.broadcast %cst_168 : f32 to vector<2x32xf32>
    %245 = arith.mulf %244, %243 : vector<2x32xf32>
    %c0_169 = arith.constant 0 : index
    %c4_170 = arith.constant 4 : index
    %c32_171 = arith.constant 32 : index
    %246 = vector.load %arg2[%c0_169, %c4_170, %c32_171] : memref<2x8x128xf32, #tpu.memory_space<vmem>>, vector<2x1x32xf32>
    %247 = vector.shape_cast %246 : vector<2x1x32xf32> to vector<2x32xf32>
    %c0_172 = arith.constant 0 : index
    %c32_173 = arith.constant 32 : index
    %248 = vector.load %arg3[%c0_172, %c32_173] : memref<32x128xbf16, #tpu.memory_space<vmem>>, vector<32x32xbf16>
    %cst_174 = arith.constant dense<0.000000e+00> : vector<2x32xf32>
    %249 = tpu.matmul %233, %248, %cst_174 {dimension_numbers = #tpu.dot_dimension_numbers<[1], [0], [0], [1], [0, 0, 1, 1], [], []>} : vector<2x32xbf16>, vector<32x32xbf16>, vector<2x32xf32> -> vector<2x32xf32>
    %250 = arith.addf %247, %249 : vector<2x32xf32>
    %cst_175 = arith.constant 5.000000e-01 : f32
    %251 = vector.broadcast %cst_175 : f32 to vector<2x32xf32>
    %252 = arith.mulf %251, %250 : vector<2x32xf32>
    %253 = math.tanh %252 : vector<2x32xf32>
    %cst_176 = arith.constant 1.000000e+00 : f32
    %254 = vector.broadcast %cst_176 : f32 to vector<2x32xf32>
    %255 = arith.addf %253, %254 : vector<2x32xf32>
    %cst_177 = arith.constant 5.000000e-01 : f32
    %256 = vector.broadcast %cst_177 : f32 to vector<2x32xf32>
    %257 = arith.mulf %256, %255 : vector<2x32xf32>
    %c0_178 = arith.constant 0 : index
    %c4_179 = arith.constant 4 : index
    %c64_180 = arith.constant 64 : index
    %258 = vector.load %arg2[%c0_178, %c4_179, %c64_180] : memref<2x8x128xf32, #tpu.memory_space<vmem>>, vector<2x1x32xf32>
    %259 = vector.shape_cast %258 : vector<2x1x32xf32> to vector<2x32xf32>
    %c0_181 = arith.constant 0 : index
    %c64_182 = arith.constant 64 : index
    %260 = vector.load %arg3[%c0_181, %c64_182] : memref<32x128xbf16, #tpu.memory_space<vmem>>, vector<32x32xbf16>
    %cst_183 = arith.constant dense<0.000000e+00> : vector<2x32xf32>
    %261 = tpu.matmul %233, %260, %cst_183 {dimension_numbers = #tpu.dot_dimension_numbers<[1], [0], [0], [1], [0, 0, 1, 1], [], []>} : vector<2x32xbf16>, vector<32x32xbf16>, vector<2x32xf32> -> vector<2x32xf32>
    %262 = arith.addf %259, %261 : vector<2x32xf32>
    %263 = math.tanh %262 : vector<2x32xf32>
    %c0_184 = arith.constant 0 : index
    %c4_185 = arith.constant 4 : index
    %c96_186 = arith.constant 96 : index
    %264 = vector.load %arg2[%c0_184, %c4_185, %c96_186] : memref<2x8x128xf32, #tpu.memory_space<vmem>>, vector<2x1x32xf32>
    %265 = vector.shape_cast %264 : vector<2x1x32xf32> to vector<2x32xf32>
    %c0_187 = arith.constant 0 : index
    %c96_188 = arith.constant 96 : index
    %266 = vector.load %arg3[%c0_187, %c96_188] : memref<32x128xbf16, #tpu.memory_space<vmem>>, vector<32x32xbf16>
    %cst_189 = arith.constant dense<0.000000e+00> : vector<2x32xf32>
    %267 = tpu.matmul %233, %266, %cst_189 {dimension_numbers = #tpu.dot_dimension_numbers<[1], [0], [0], [1], [0, 0, 1, 1], [], []>} : vector<2x32xbf16>, vector<32x32xbf16>, vector<2x32xf32> -> vector<2x32xf32>
    %268 = arith.addf %265, %267 : vector<2x32xf32>
    %cst_190 = arith.constant 5.000000e-01 : f32
    %269 = vector.broadcast %cst_190 : f32 to vector<2x32xf32>
    %270 = arith.mulf %269, %268 : vector<2x32xf32>
    %271 = math.tanh %270 : vector<2x32xf32>
    %cst_191 = arith.constant 1.000000e+00 : f32
    %272 = vector.broadcast %cst_191 : f32 to vector<2x32xf32>
    %273 = arith.addf %271, %272 : vector<2x32xf32>
    %cst_192 = arith.constant 5.000000e-01 : f32
    %274 = vector.broadcast %cst_192 : f32 to vector<2x32xf32>
    %275 = arith.mulf %274, %273 : vector<2x32xf32>
    %276 = arith.mulf %257, %221 : vector<2x32xf32>
    %277 = arith.mulf %245, %263 : vector<2x32xf32>
    %278 = arith.addf %276, %277 : vector<2x32xf32>
    %279 = math.tanh %278 : vector<2x32xf32>
    %280 = arith.mulf %275, %279 : vector<2x32xf32>
    %281 = arith.truncf %280 : vector<2x32xf32> to vector<2x32xbf16>
    %c0_193 = arith.constant 0 : index
    %c0_194 = arith.constant 0 : index
    %282 = vector.load %arg4[%c0_193, %c0_194] : memref<32x128xbf16, #tpu.memory_space<vmem>>, vector<32x128xbf16>
    %cst_195 = arith.constant dense<0.000000e+00> : vector<2x128xf32>
    %283 = tpu.matmul %281, %282, %cst_195 {dimension_numbers = #tpu.dot_dimension_numbers<[1], [0], [0], [1], [0, 0, 1, 1], [], []>} : vector<2x32xbf16>, vector<32x128xbf16>, vector<2x128xf32> -> vector<2x128xf32>
    %c0_196 = arith.constant 0 : index
    %c0_197 = arith.constant 0 : index
    %284 = vector.load %arg5[%c0_196, %c0_197] : memref<1x128xf32, #tpu.memory_space<vmem>>, vector<1x128xf32>
    %285 = vector.broadcast %284 : vector<1x128xf32> to vector<2x128xf32>
    %286 = arith.addf %283, %285 : vector<2x128xf32>
    %c0_198 = arith.constant 0 : index
    %c4_199 = arith.constant 4 : index
    %c0_200 = arith.constant 0 : index
    %287 = vector.load %arg6[%c0_198, %c4_199, %c0_200] : memref<2x8x128xf32, #tpu.memory_space<vmem>>, vector<2x1x128xf32>
    %288 = vector.shape_cast %287 : vector<2x1x128xf32> to vector<2x128xf32>
    %289 = vector.shape_cast %286 : vector<2x128xf32> to vector<2x1x128xf32>
    tpu.vector_store %arg6[%c0_198, %c4_199, %c0_200], %289 {strides = array<i32>} : memref<2x8x128xf32, #tpu.memory_space<vmem>>, vector<2x1x128xf32>,
    %290 = arith.truncf %280 : vector<2x32xf32> to vector<2x32xbf16>
    %c0_201 = arith.constant 0 : index
    %c5 = arith.constant 5 : index
    %c0_202 = arith.constant 0 : index
    %291 = vector.load %arg2[%c0_201, %c5, %c0_202] : memref<2x8x128xf32, #tpu.memory_space<vmem>>, vector<2x1x32xf32>
    %292 = vector.shape_cast %291 : vector<2x1x32xf32> to vector<2x32xf32>
    %c0_203 = arith.constant 0 : index
    %c0_204 = arith.constant 0 : index
    %293 = vector.load %arg3[%c0_203, %c0_204] : memref<32x128xbf16, #tpu.memory_space<vmem>>, vector<32x32xbf16>
    %cst_205 = arith.constant dense<0.000000e+00> : vector<2x32xf32>
    %294 = tpu.matmul %290, %293, %cst_205 {dimension_numbers = #tpu.dot_dimension_numbers<[1], [0], [0], [1], [0, 0, 1, 1], [], []>} : vector<2x32xbf16>, vector<32x32xbf16>, vector<2x32xf32> -> vector<2x32xf32>
    %295 = arith.addf %292, %294 : vector<2x32xf32>
    %cst_206 = arith.constant 5.000000e-01 : f32
    %296 = vector.broadcast %cst_206 : f32 to vector<2x32xf32>
    %297 = arith.mulf %296, %295 : vector<2x32xf32>
    %298 = math.tanh %297 : vector<2x32xf32>
    %cst_207 = arith.constant 1.000000e+00 : f32
    %299 = vector.broadcast %cst_207 : f32 to vector<2x32xf32>
    %300 = arith.addf %298, %299 : vector<2x32xf32>
    %cst_208 = arith.constant 5.000000e-01 : f32
    %301 = vector.broadcast %cst_208 : f32 to vector<2x32xf32>
    %302 = arith.mulf %301, %300 : vector<2x32xf32>
    %c0_209 = arith.constant 0 : index
    %c5_210 = arith.constant 5 : index
    %c32_211 = arith.constant 32 : index
    %303 = vector.load %arg2[%c0_209, %c5_210, %c32_211] : memref<2x8x128xf32, #tpu.memory_space<vmem>>, vector<2x1x32xf32>
    %304 = vector.shape_cast %303 : vector<2x1x32xf32> to vector<2x32xf32>
    %c0_212 = arith.constant 0 : index
    %c32_213 = arith.constant 32 : index
    %305 = vector.load %arg3[%c0_212, %c32_213] : memref<32x128xbf16, #tpu.memory_space<vmem>>, vector<32x32xbf16>
    %cst_214 = arith.constant dense<0.000000e+00> : vector<2x32xf32>
    %306 = tpu.matmul %290, %305, %cst_214 {dimension_numbers = #tpu.dot_dimension_numbers<[1], [0], [0], [1], [0, 0, 1, 1], [], []>} : vector<2x32xbf16>, vector<32x32xbf16>, vector<2x32xf32> -> vector<2x32xf32>
    %307 = arith.addf %304, %306 : vector<2x32xf32>
    %cst_215 = arith.constant 5.000000e-01 : f32
    %308 = vector.broadcast %cst_215 : f32 to vector<2x32xf32>
    %309 = arith.mulf %308, %307 : vector<2x32xf32>
    %310 = math.tanh %309 : vector<2x32xf32>
    %cst_216 = arith.constant 1.000000e+00 : f32
    %311 = vector.broadcast %cst_216 : f32 to vector<2x32xf32>
    %312 = arith.addf %310, %311 : vector<2x32xf32>
    %cst_217 = arith.constant 5.000000e-01 : f32
    %313 = vector.broadcast %cst_217 : f32 to vector<2x32xf32>
    %314 = arith.mulf %313, %312 : vector<2x32xf32>
    %c0_218 = arith.constant 0 : index
    %c5_219 = arith.constant 5 : index
    %c64_220 = arith.constant 64 : index
    %315 = vector.load %arg2[%c0_218, %c5_219, %c64_220] : memref<2x8x128xf32, #tpu.memory_space<vmem>>, vector<2x1x32xf32>
    %316 = vector.shape_cast %315 : vector<2x1x32xf32> to vector<2x32xf32>
    %c0_221 = arith.constant 0 : index
    %c64_222 = arith.constant 64 : index
    %317 = vector.load %arg3[%c0_221, %c64_222] : memref<32x128xbf16, #tpu.memory_space<vmem>>, vector<32x32xbf16>
    %cst_223 = arith.constant dense<0.000000e+00> : vector<2x32xf32>
    %318 = tpu.matmul %290, %317, %cst_223 {dimension_numbers = #tpu.dot_dimension_numbers<[1], [0], [0], [1], [0, 0, 1, 1], [], []>} : vector<2x32xbf16>, vector<32x32xbf16>, vector<2x32xf32> -> vector<2x32xf32>
    %319 = arith.addf %316, %318 : vector<2x32xf32>
    %320 = math.tanh %319 : vector<2x32xf32>
    %c0_224 = arith.constant 0 : index
    %c5_225 = arith.constant 5 : index
    %c96_226 = arith.constant 96 : index
    %321 = vector.load %arg2[%c0_224, %c5_225, %c96_226] : memref<2x8x128xf32, #tpu.memory_space<vmem>>, vector<2x1x32xf32>
    %322 = vector.shape_cast %321 : vector<2x1x32xf32> to vector<2x32xf32>
    %c0_227 = arith.constant 0 : index
    %c96_228 = arith.constant 96 : index
    %323 = vector.load %arg3[%c0_227, %c96_228] : memref<32x128xbf16, #tpu.memory_space<vmem>>, vector<32x32xbf16>
    %cst_229 = arith.constant dense<0.000000e+00> : vector<2x32xf32>
    %324 = tpu.matmul %290, %323, %cst_229 {dimension_numbers = #tpu.dot_dimension_numbers<[1], [0], [0], [1], [0, 0, 1, 1], [], []>} : vector<2x32xbf16>, vector<32x32xbf16>, vector<2x32xf32> -> vector<2x32xf32>
    %325 = arith.addf %322, %324 : vector<2x32xf32>
    %cst_230 = arith.constant 5.000000e-01 : f32
    %326 = vector.broadcast %cst_230 : f32 to vector<2x32xf32>
    %327 = arith.mulf %326, %325 : vector<2x32xf32>
    %328 = math.tanh %327 : vector<2x32xf32>
    %cst_231 = arith.constant 1.000000e+00 : f32
    %329 = vector.broadcast %cst_231 : f32 to vector<2x32xf32>
    %330 = arith.addf %328, %329 : vector<2x32xf32>
    %cst_232 = arith.constant 5.000000e-01 : f32
    %331 = vector.broadcast %cst_232 : f32 to vector<2x32xf32>
    %332 = arith.mulf %331, %330 : vector<2x32xf32>
    %333 = arith.mulf %314, %278 : vector<2x32xf32>
    %334 = arith.mulf %302, %320 : vector<2x32xf32>
    %335 = arith.addf %333, %334 : vector<2x32xf32>
    %336 = math.tanh %335 : vector<2x32xf32>
    %337 = arith.mulf %332, %336 : vector<2x32xf32>
    %338 = arith.truncf %337 : vector<2x32xf32> to vector<2x32xbf16>
    %c0_233 = arith.constant 0 : index
    %c0_234 = arith.constant 0 : index
    %339 = vector.load %arg4[%c0_233, %c0_234] : memref<32x128xbf16, #tpu.memory_space<vmem>>, vector<32x128xbf16>
    %cst_235 = arith.constant dense<0.000000e+00> : vector<2x128xf32>
    %340 = tpu.matmul %338, %339, %cst_235 {dimension_numbers = #tpu.dot_dimension_numbers<[1], [0], [0], [1], [0, 0, 1, 1], [], []>} : vector<2x32xbf16>, vector<32x128xbf16>, vector<2x128xf32> -> vector<2x128xf32>
    %c0_236 = arith.constant 0 : index
    %c0_237 = arith.constant 0 : index
    %341 = vector.load %arg5[%c0_236, %c0_237] : memref<1x128xf32, #tpu.memory_space<vmem>>, vector<1x128xf32>
    %342 = vector.broadcast %341 : vector<1x128xf32> to vector<2x128xf32>
    %343 = arith.addf %340, %342 : vector<2x128xf32>
    %c0_238 = arith.constant 0 : index
    %c5_239 = arith.constant 5 : index
    %c0_240 = arith.constant 0 : index
    %344 = vector.load %arg6[%c0_238, %c5_239, %c0_240] : memref<2x8x128xf32, #tpu.memory_space<vmem>>, vector<2x1x128xf32>
    %345 = vector.shape_cast %344 : vector<2x1x128xf32> to vector<2x128xf32>
    %346 = vector.shape_cast %343 : vector<2x128xf32> to vector<2x1x128xf32>
    tpu.vector_store %arg6[%c0_238, %c5_239, %c0_240], %346 {strides = array<i32>} : memref<2x8x128xf32, #tpu.memory_space<vmem>>, vector<2x1x128xf32>,
    %347 = arith.truncf %337 : vector<2x32xf32> to vector<2x32xbf16>
    %c0_241 = arith.constant 0 : index
    %c6 = arith.constant 6 : index
    %c0_242 = arith.constant 0 : index
    %348 = vector.load %arg2[%c0_241, %c6, %c0_242] : memref<2x8x128xf32, #tpu.memory_space<vmem>>, vector<2x1x32xf32>
    %349 = vector.shape_cast %348 : vector<2x1x32xf32> to vector<2x32xf32>
    %c0_243 = arith.constant 0 : index
    %c0_244 = arith.constant 0 : index
    %350 = vector.load %arg3[%c0_243, %c0_244] : memref<32x128xbf16, #tpu.memory_space<vmem>>, vector<32x32xbf16>
    %cst_245 = arith.constant dense<0.000000e+00> : vector<2x32xf32>
    %351 = tpu.matmul %347, %350, %cst_245 {dimension_numbers = #tpu.dot_dimension_numbers<[1], [0], [0], [1], [0, 0, 1, 1], [], []>} : vector<2x32xbf16>, vector<32x32xbf16>, vector<2x32xf32> -> vector<2x32xf32>
    %352 = arith.addf %349, %351 : vector<2x32xf32>
    %cst_246 = arith.constant 5.000000e-01 : f32
    %353 = vector.broadcast %cst_246 : f32 to vector<2x32xf32>
    %354 = arith.mulf %353, %352 : vector<2x32xf32>
    %355 = math.tanh %354 : vector<2x32xf32>
    %cst_247 = arith.constant 1.000000e+00 : f32
    %356 = vector.broadcast %cst_247 : f32 to vector<2x32xf32>
    %357 = arith.addf %355, %356 : vector<2x32xf32>
    %cst_248 = arith.constant 5.000000e-01 : f32
    %358 = vector.broadcast %cst_248 : f32 to vector<2x32xf32>
    %359 = arith.mulf %358, %357 : vector<2x32xf32>
    %c0_249 = arith.constant 0 : index
    %c6_250 = arith.constant 6 : index
    %c32_251 = arith.constant 32 : index
    %360 = vector.load %arg2[%c0_249, %c6_250, %c32_251] : memref<2x8x128xf32, #tpu.memory_space<vmem>>, vector<2x1x32xf32>
    %361 = vector.shape_cast %360 : vector<2x1x32xf32> to vector<2x32xf32>
    %c0_252 = arith.constant 0 : index
    %c32_253 = arith.constant 32 : index
    %362 = vector.load %arg3[%c0_252, %c32_253] : memref<32x128xbf16, #tpu.memory_space<vmem>>, vector<32x32xbf16>
    %cst_254 = arith.constant dense<0.000000e+00> : vector<2x32xf32>
    %363 = tpu.matmul %347, %362, %cst_254 {dimension_numbers = #tpu.dot_dimension_numbers<[1], [0], [0], [1], [0, 0, 1, 1], [], []>} : vector<2x32xbf16>, vector<32x32xbf16>, vector<2x32xf32> -> vector<2x32xf32>
    %364 = arith.addf %361, %363 : vector<2x32xf32>
    %cst_255 = arith.constant 5.000000e-01 : f32
    %365 = vector.broadcast %cst_255 : f32 to vector<2x32xf32>
    %366 = arith.mulf %365, %364 : vector<2x32xf32>
    %367 = math.tanh %366 : vector<2x32xf32>
    %cst_256 = arith.constant 1.000000e+00 : f32
    %368 = vector.broadcast %cst_256 : f32 to vector<2x32xf32>
    %369 = arith.addf %367, %368 : vector<2x32xf32>
    %cst_257 = arith.constant 5.000000e-01 : f32
    %370 = vector.broadcast %cst_257 : f32 to vector<2x32xf32>
    %371 = arith.mulf %370, %369 : vector<2x32xf32>
    %c0_258 = arith.constant 0 : index
    %c6_259 = arith.constant 6 : index
    %c64_260 = arith.constant 64 : index
    %372 = vector.load %arg2[%c0_258, %c6_259, %c64_260] : memref<2x8x128xf32, #tpu.memory_space<vmem>>, vector<2x1x32xf32>
    %373 = vector.shape_cast %372 : vector<2x1x32xf32> to vector<2x32xf32>
    %c0_261 = arith.constant 0 : index
    %c64_262 = arith.constant 64 : index
    %374 = vector.load %arg3[%c0_261, %c64_262] : memref<32x128xbf16, #tpu.memory_space<vmem>>, vector<32x32xbf16>
    %cst_263 = arith.constant dense<0.000000e+00> : vector<2x32xf32>
    %375 = tpu.matmul %347, %374, %cst_263 {dimension_numbers = #tpu.dot_dimension_numbers<[1], [0], [0], [1], [0, 0, 1, 1], [], []>} : vector<2x32xbf16>, vector<32x32xbf16>, vector<2x32xf32> -> vector<2x32xf32>
    %376 = arith.addf %373, %375 : vector<2x32xf32>
    %377 = math.tanh %376 : vector<2x32xf32>
    %c0_264 = arith.constant 0 : index
    %c6_265 = arith.constant 6 : index
    %c96_266 = arith.constant 96 : index
    %378 = vector.load %arg2[%c0_264, %c6_265, %c96_266] : memref<2x8x128xf32, #tpu.memory_space<vmem>>, vector<2x1x32xf32>
    %379 = vector.shape_cast %378 : vector<2x1x32xf32> to vector<2x32xf32>
    %c0_267 = arith.constant 0 : index
    %c96_268 = arith.constant 96 : index
    %380 = vector.load %arg3[%c0_267, %c96_268] : memref<32x128xbf16, #tpu.memory_space<vmem>>, vector<32x32xbf16>
    %cst_269 = arith.constant dense<0.000000e+00> : vector<2x32xf32>
    %381 = tpu.matmul %347, %380, %cst_269 {dimension_numbers = #tpu.dot_dimension_numbers<[1], [0], [0], [1], [0, 0, 1, 1], [], []>} : vector<2x32xbf16>, vector<32x32xbf16>, vector<2x32xf32> -> vector<2x32xf32>
    %382 = arith.addf %379, %381 : vector<2x32xf32>
    %cst_270 = arith.constant 5.000000e-01 : f32
    %383 = vector.broadcast %cst_270 : f32 to vector<2x32xf32>
    %384 = arith.mulf %383, %382 : vector<2x32xf32>
    %385 = math.tanh %384 : vector<2x32xf32>
    %cst_271 = arith.constant 1.000000e+00 : f32
    %386 = vector.broadcast %cst_271 : f32 to vector<2x32xf32>
    %387 = arith.addf %385, %386 : vector<2x32xf32>
    %cst_272 = arith.constant 5.000000e-01 : f32
    %388 = vector.broadcast %cst_272 : f32 to vector<2x32xf32>
    %389 = arith.mulf %388, %387 : vector<2x32xf32>
    %390 = arith.mulf %371, %335 : vector<2x32xf32>
    %391 = arith.mulf %359, %377 : vector<2x32xf32>
    %392 = arith.addf %390, %391 : vector<2x32xf32>
    %393 = math.tanh %392 : vector<2x32xf32>
    %394 = arith.mulf %389, %393 : vector<2x32xf32>
    %395 = arith.truncf %394 : vector<2x32xf32> to vector<2x32xbf16>
    %c0_273 = arith.constant 0 : index
    %c0_274 = arith.constant 0 : index
    %396 = vector.load %arg4[%c0_273, %c0_274] : memref<32x128xbf16, #tpu.memory_space<vmem>>, vector<32x128xbf16>
    %cst_275 = arith.constant dense<0.000000e+00> : vector<2x128xf32>
    %397 = tpu.matmul %395, %396, %cst_275 {dimension_numbers = #tpu.dot_dimension_numbers<[1], [0], [0], [1], [0, 0, 1, 1], [], []>} : vector<2x32xbf16>, vector<32x128xbf16>, vector<2x128xf32> -> vector<2x128xf32>
    %c0_276 = arith.constant 0 : index
    %c0_277 = arith.constant 0 : index
    %398 = vector.load %arg5[%c0_276, %c0_277] : memref<1x128xf32, #tpu.memory_space<vmem>>, vector<1x128xf32>
    %399 = vector.broadcast %398 : vector<1x128xf32> to vector<2x128xf32>
    %400 = arith.addf %397, %399 : vector<2x128xf32>
    %c0_278 = arith.constant 0 : index
    %c6_279 = arith.constant 6 : index
    %c0_280 = arith.constant 0 : index
    %401 = vector.load %arg6[%c0_278, %c6_279, %c0_280] : memref<2x8x128xf32, #tpu.memory_space<vmem>>, vector<2x1x128xf32>
    %402 = vector.shape_cast %401 : vector<2x1x128xf32> to vector<2x128xf32>
    %403 = vector.shape_cast %400 : vector<2x128xf32> to vector<2x1x128xf32>
    tpu.vector_store %arg6[%c0_278, %c6_279, %c0_280], %403 {strides = array<i32>} : memref<2x8x128xf32, #tpu.memory_space<vmem>>, vector<2x1x128xf32>,
    %404 = arith.truncf %394 : vector<2x32xf32> to vector<2x32xbf16>
    %c0_281 = arith.constant 0 : index
    %c7 = arith.constant 7 : index
    %c0_282 = arith.constant 0 : index
    %405 = vector.load %arg2[%c0_281, %c7, %c0_282] : memref<2x8x128xf32, #tpu.memory_space<vmem>>, vector<2x1x32xf32>
    %406 = vector.shape_cast %405 : vector<2x1x32xf32> to vector<2x32xf32>
    %c0_283 = arith.constant 0 : index
    %c0_284 = arith.constant 0 : index
    %407 = vector.load %arg3[%c0_283, %c0_284] : memref<32x128xbf16, #tpu.memory_space<vmem>>, vector<32x32xbf16>
    %cst_285 = arith.constant dense<0.000000e+00> : vector<2x32xf32>
    %408 = tpu.matmul %404, %407, %cst_285 {dimension_numbers = #tpu.dot_dimension_numbers<[1], [0], [0], [1], [0, 0, 1, 1], [], []>} : vector<2x32xbf16>, vector<32x32xbf16>, vector<2x32xf32> -> vector<2x32xf32>
    %409 = arith.addf %406, %408 : vector<2x32xf32>
    %cst_286 = arith.constant 5.000000e-01 : f32
    %410 = vector.broadcast %cst_286 : f32 to vector<2x32xf32>
    %411 = arith.mulf %410, %409 : vector<2x32xf32>
    %412 = math.tanh %411 : vector<2x32xf32>
    %cst_287 = arith.constant 1.000000e+00 : f32
    %413 = vector.broadcast %cst_287 : f32 to vector<2x32xf32>
    %414 = arith.addf %412, %413 : vector<2x32xf32>
    %cst_288 = arith.constant 5.000000e-01 : f32
    %415 = vector.broadcast %cst_288 : f32 to vector<2x32xf32>
    %416 = arith.mulf %415, %414 : vector<2x32xf32>
    %c0_289 = arith.constant 0 : index
    %c7_290 = arith.constant 7 : index
    %c32_291 = arith.constant 32 : index
    %417 = vector.load %arg2[%c0_289, %c7_290, %c32_291] : memref<2x8x128xf32, #tpu.memory_space<vmem>>, vector<2x1x32xf32>
    %418 = vector.shape_cast %417 : vector<2x1x32xf32> to vector<2x32xf32>
    %c0_292 = arith.constant 0 : index
    %c32_293 = arith.constant 32 : index
    %419 = vector.load %arg3[%c0_292, %c32_293] : memref<32x128xbf16, #tpu.memory_space<vmem>>, vector<32x32xbf16>
    %cst_294 = arith.constant dense<0.000000e+00> : vector<2x32xf32>
    %420 = tpu.matmul %404, %419, %cst_294 {dimension_numbers = #tpu.dot_dimension_numbers<[1], [0], [0], [1], [0, 0, 1, 1], [], []>} : vector<2x32xbf16>, vector<32x32xbf16>, vector<2x32xf32> -> vector<2x32xf32>
    %421 = arith.addf %418, %420 : vector<2x32xf32>
    %cst_295 = arith.constant 5.000000e-01 : f32
    %422 = vector.broadcast %cst_295 : f32 to vector<2x32xf32>
    %423 = arith.mulf %422, %421 : vector<2x32xf32>
    %424 = math.tanh %423 : vector<2x32xf32>
    %cst_296 = arith.constant 1.000000e+00 : f32
    %425 = vector.broadcast %cst_296 : f32 to vector<2x32xf32>
    %426 = arith.addf %424, %425 : vector<2x32xf32>
    %cst_297 = arith.constant 5.000000e-01 : f32
    %427 = vector.broadcast %cst_297 : f32 to vector<2x32xf32>
    %428 = arith.mulf %427, %426 : vector<2x32xf32>
    %c0_298 = arith.constant 0 : index
    %c7_299 = arith.constant 7 : index
    %c64_300 = arith.constant 64 : index
    %429 = vector.load %arg2[%c0_298, %c7_299, %c64_300] : memref<2x8x128xf32, #tpu.memory_space<vmem>>, vector<2x1x32xf32>
    %430 = vector.shape_cast %429 : vector<2x1x32xf32> to vector<2x32xf32>
    %c0_301 = arith.constant 0 : index
    %c64_302 = arith.constant 64 : index
    %431 = vector.load %arg3[%c0_301, %c64_302] : memref<32x128xbf16, #tpu.memory_space<vmem>>, vector<32x32xbf16>
    %cst_303 = arith.constant dense<0.000000e+00> : vector<2x32xf32>
    %432 = tpu.matmul %404, %431, %cst_303 {dimension_numbers = #tpu.dot_dimension_numbers<[1], [0], [0], [1], [0, 0, 1, 1], [], []>} : vector<2x32xbf16>, vector<32x32xbf16>, vector<2x32xf32> -> vector<2x32xf32>
    %433 = arith.addf %430, %432 : vector<2x32xf32>
    %434 = math.tanh %433 : vector<2x32xf32>
    %c0_304 = arith.constant 0 : index
    %c7_305 = arith.constant 7 : index
    %c96_306 = arith.constant 96 : index
    %435 = vector.load %arg2[%c0_304, %c7_305, %c96_306] : memref<2x8x128xf32, #tpu.memory_space<vmem>>, vector<2x1x32xf32>
    %436 = vector.shape_cast %435 : vector<2x1x32xf32> to vector<2x32xf32>
    %c0_307 = arith.constant 0 : index
    %c96_308 = arith.constant 96 : index
    %437 = vector.load %arg3[%c0_307, %c96_308] : memref<32x128xbf16, #tpu.memory_space<vmem>>, vector<32x32xbf16>
    %cst_309 = arith.constant dense<0.000000e+00> : vector<2x32xf32>
    %438 = tpu.matmul %404, %437, %cst_309 {dimension_numbers = #tpu.dot_dimension_numbers<[1], [0], [0], [1], [0, 0, 1, 1], [], []>} : vector<2x32xbf16>, vector<32x32xbf16>, vector<2x32xf32> -> vector<2x32xf32>
    %439 = arith.addf %436, %438 : vector<2x32xf32>
    %cst_310 = arith.constant 5.000000e-01 : f32
    %440 = vector.broadcast %cst_310 : f32 to vector<2x32xf32>
    %441 = arith.mulf %440, %439 : vector<2x32xf32>
    %442 = math.tanh %441 : vector<2x32xf32>
    %cst_311 = arith.constant 1.000000e+00 : f32
    %443 = vector.broadcast %cst_311 : f32 to vector<2x32xf32>
    %444 = arith.addf %442, %443 : vector<2x32xf32>
    %cst_312 = arith.constant 5.000000e-01 : f32
    %445 = vector.broadcast %cst_312 : f32 to vector<2x32xf32>
    %446 = arith.mulf %445, %444 : vector<2x32xf32>
    %447 = arith.mulf %428, %392 : vector<2x32xf32>
    %448 = arith.mulf %416, %434 : vector<2x32xf32>
    %449 = arith.addf %447, %448 : vector<2x32xf32>
    %450 = math.tanh %449 : vector<2x32xf32>
    %451 = arith.mulf %446, %450 : vector<2x32xf32>
    %452 = arith.truncf %451 : vector<2x32xf32> to vector<2x32xbf16>
    %c0_313 = arith.constant 0 : index
    %c0_314 = arith.constant 0 : index
    %453 = vector.load %arg4[%c0_313, %c0_314] : memref<32x128xbf16, #tpu.memory_space<vmem>>, vector<32x128xbf16>
    %cst_315 = arith.constant dense<0.000000e+00> : vector<2x128xf32>
    %454 = tpu.matmul %452, %453, %cst_315 {dimension_numbers = #tpu.dot_dimension_numbers<[1], [0], [0], [1], [0, 0, 1, 1], [], []>} : vector<2x32xbf16>, vector<32x128xbf16>, vector<2x128xf32> -> vector<2x128xf32>
    %c0_316 = arith.constant 0 : index
    %c0_317 = arith.constant 0 : index
    %455 = vector.load %arg5[%c0_316, %c0_317] : memref<1x128xf32, #tpu.memory_space<vmem>>, vector<1x128xf32>
    %456 = vector.broadcast %455 : vector<1x128xf32> to vector<2x128xf32>
    %457 = arith.addf %454, %456 : vector<2x128xf32>
    %c0_318 = arith.constant 0 : index
    %c7_319 = arith.constant 7 : index
    %c0_320 = arith.constant 0 : index
    %458 = vector.load %arg6[%c0_318, %c7_319, %c0_320] : memref<2x8x128xf32, #tpu.memory_space<vmem>>, vector<2x1x128xf32>
    %459 = vector.shape_cast %458 : vector<2x1x128xf32> to vector<2x128xf32>
    %460 = vector.shape_cast %457 : vector<2x128xf32> to vector<2x1x128xf32>
    tpu.vector_store %arg6[%c0_318, %c7_319, %c0_320], %460 {strides = array<i32>} : memref<2x8x128xf32, #tpu.memory_space<vmem>>, vector<2x1x128xf32>,
    %c0_321 = arith.constant 0 : index
    %c0_322 = arith.constant 0 : index
    %461 = vector.load %arg7[%c0_321, %c0_322] : memref<2x32xf32, #tpu.memory_space<vmem>>, vector<2x32xf32>
    tpu.vector_store %arg7[%c0_321, %c0_322], %451 {strides = array<i32>} : memref<2x32xf32, #tpu.memory_space<vmem>>, vector<2x32xf32>,
    %c0_323 = arith.constant 0 : index
    %c0_324 = arith.constant 0 : index
    %462 = vector.load %arg8[%c0_323, %c0_324] : memref<2x32xf32, #tpu.memory_space<vmem>>, vector<2x32xf32>
    tpu.vector_store %arg8[%c0_323, %c0_324], %449 {strides = array<i32>} : memref<2x32xf32, #tpu.memory_space<vmem>>, vector<2x32xf32>,
    return
  }
  func.func @transform_0(%arg0: i32, %arg1: i32) -> (i32, i32, i32) {
    %c0_i32 = arith.constant 0 : i32
    %c0_i32_0 = arith.constant 0 : i32
    return %arg0, %arg1, %c0_i32 : i32, i32, i32
  }
  func.func @transform_1(%arg0: i32, %arg1: i32) -> (i32, i32) {
    %c0_i32 = arith.constant 0 : i32
    %c0_i32_0 = arith.constant 0 : i32
    %c0_i32_1 = arith.constant 0 : i32
    return %c0_i32, %c0_i32_0 : i32, i32
  }
  func.func @transform_2(%arg0: i32, %arg1: i32) -> (i32, i32) {
    %c0_i32 = arith.constant 0 : i32
    %c0_i32_0 = arith.constant 0 : i32
    %c0_i32_1 = arith.constant 0 : i32
    return %c0_i32, %c0_i32_0 : i32, i32
  }
  func.func @transform_3(%arg0: i32, %arg1: i32) -> (i32, i32) {
    %c0_i32 = arith.constant 0 : i32
    %c0_i32_0 = arith.constant 0 : i32
    %c0_i32_1 = arith.constant 0 : i32
    return %c0_i32, %c0_i32_0 : i32, i32
  }
  func.func @transform_4(%arg0: i32, %arg1: i32) -> (i32, i32, i32) {
    %c0_i32 = arith.constant 0 : i32
    %c0_i32_0 = arith.constant 0 : i32
    return %arg0, %arg1, %c0_i32 : i32, i32, i32
  }
}

</mosaic_0001>

<bundles_post_ra>
// kernel: condition_encoder_lstm_forward.4
= control target key start
LH: loop header
LB: loop body
LE: loop exit
PB: predicated region body
PF: predicated region fallthrough
CT: control target
= control target key end

     0   :  { %vm22_vm0 = vcmask 254976   ;;  %v3964_v1 = vmov 0.0   ;;  %vm3965_vm1 = vmmov 0   ;;  %s3966_s17 = smov 64   ;;  %vm46_vm2 = vcmask 261120   ;;  %s3967_s20 = smov 96   ;;  %s4739_s1 = inlined_call_operand.vmem [shape: bf16[32,128], index: 1, kind: input, shape index: {}]   ;;  %s4740_s0 = inlined_call_operand.vmem [shape: f32[2,8,128], index: 0, kind: input, shape index: {}]   ;;  %s4741_s2 = inlined_call_operand.vmem [shape: bf16[32,128], index: 2, kind: input, shape index: {}]   ;;  %s4742_s3 = inlined_call_operand.vmem [shape: f32[1,128], index: 3, kind: input, shape index: {}]   ;;  %s4743_s4 = inlined_call_operand.vmem [shape: f32[2,8,128], index: 4, kind: output, shape index: {}]  }
   0x1   :  { %v3772_v0 = vld [vmem:[%s4739_s1 + $0x8] sm:$0xff]   ;;  %3446 = vmatprep.subr.bf16.mxu0 %v3964_v1  ;;  %3450 = vmatprep.mubr.msk.bf16.mxu0 %vm3965_vm1, %v3964_v1  ;;  %23 = vst.msk [vmem:[#allocation2] sm:$0x3] %vm22_vm0, %v3964_v1  ;;  %24 = vst.msk [vmem:[#allocation3] sm:$0x3] %vm22_vm0, %v3964_v1  ;;  %v3773_v2 = vld [vmem:[%s4739_s1] sm:$0xff]  }
   0x2   :  { %3454 = vmatprep.subr.bf16.mxu1 %v3964_v1  ;;  %3458 = vmatprep.mubr.msk.bf16.mxu1 %vm3965_vm1, %v3964_v1  ;;  %s3968_s21 = smov 32   ;;  %v4042_v24 = vld [vmem:[%s4740_s0] sm:$0x1]  ;;  %v4048_v27 = vld [vmem:[%s4740_s0 + $0x8] sm:$0x1]  ;;  %vm350_vm3 = vcmask 1041409  }
   0x3   :  { %170 = vrot.lane.b32.xlu0 %v3772_v0, %s3966_s17  ;;  %3447 = vmatpush3.bf16.msra.mxu0 %v3772_v0 }
   0x4   :  { %3448 = vmatprep.subr.bf16.mxu0 %v3964_v1  ;;  %106 = vrot.lane.b32.xlu1 %v3772_v0, %s3967_s20 }
   0x7   :  { %168 = vrot.lane.b32.xlu0 %v3773_v2, %s3966_s17  ;;  %3449 = vmatpush3.bf16.msra.mxu0 %v3773_v2 }
   0x8   :  { %v25_v3 = vld [vmem:[#allocation2] sm:$0x3]  ;;  %3462 = vmatprep.subr.bf16.mxu0 %v3964_v1  ;;  %104 = vrot.lane.b32.xlu1 %v3773_v2, %s3967_s20  ;;  %v26_v36 = vld [vmem:[#allocation3] sm:$0x3] }
   0x9   :  { %v27_v4 = vpack.c.bf16 %v25_v3, %v25_v3  ;;  %v291_v38 = vrot.slane %v26_v36, 1 }
   0xb   :  { %3451 = vmatmul.mubr.msk.bf16.vlgmr.msra.gmra.mxu0 %vm46_vm2, %v27_v4  ;;  %228 = vrot.lane.b32.xlu0 %v3772_v0, %s3968_s21 }
   0xc   :  { %3466 = vmatprep.mubr.msk.bf16.mxu0 %vm3965_vm1, %v3964_v1  ;;  %226 = vrot.lane.b32.xlu1 %v3773_v2, %s3968_s21 }
  0x75   :  { %v171_v5 = vpop.permute.xlu0 %170 }
  0x76   :  { %3463 = vmatpush3.bf16.msra.mxu0 %v171_v5  ;;  %v107_v7 = vpop.permute.xlu1 %106 }
  0x77   :  { %3464 = vmatprep.subr.bf16.mxu0 %v3964_v1  ;;  %3455 = vmatpush3.bf16.msra.mxu1 %v107_v7 }
  0x78   :  { %3456 = vmatprep.subr.bf16.mxu1 %v3964_v1 }
  0x79   :  { %v169_v6 = vpop.permute.xlu0 %168 }
  0x7a   :  { %3465 = vmatpush3.bf16.msra.mxu0 %v169_v6  ;;  %v105_v8 = vpop.permute.xlu1 %104 }
  0x7b   :  { %3478 = vmatprep.subr.bf16.mxu0 %v3964_v1  ;;  %3457 = vmatpush3.bf16.msra.mxu1 %v105_v8 }
  0x7c   :  { %3470 = vmatprep.subr.bf16.mxu1 %v3964_v1 }
  0x7d   :  { %3467 = vmatmul.mubr.msk.bf16.vlgmr.msra.gmra.mxu0 %vm46_vm2, %v27_v4  ;;  %v229_v9 = vpop.permute.xlu0 %228 }
  0x7e   :  { %3482 = vmatprep.mubr.msk.bf16.mxu0 %vm3965_vm1, %v3964_v1  ;;  %3459 = vmatmul.mubr.msk.bf16.vlgmr.msra.gmra.mxu1 %vm46_vm2, %v27_v4  ;;  %v227_v13 = vpop.permute.xlu1 %226 }
  0x7f   :  { %3471 = vmatpush3.bf16.msra.mxu1 %v229_v9  ;;  %3474 = vmatprep.mubr.msk.bf16.mxu1 %vm3965_vm1, %v3964_v1 }
  0x80   :  { %3472 = vmatprep.subr.bf16.mxu1 %v3964_v1 }
  0x83   :  { %3473 = vmatpush3.bf16.msra.mxu1 %v227_v13 }
  0x84   :  { %3486 = vmatprep.subr.bf16.mxu1 %v3964_v1 }
  0x86   :  { %3475 = vmatmul.mubr.msk.bf16.vlgmr.msra.gmra.mxu1 %vm46_vm2, %v27_v4 }
  0x87   :  { %3490 = vmatprep.mubr.msk.bf16.mxu1 %vm3965_vm1, %v3964_v1 }
  0xcb   :  { %v84_v10 = vpop.f32.mrf.mxu0 }
  0xcc   :  { %v91_v39 = vrot.slane %v84_v10, 1  ;;  %v94_v40 = vadd.f32 %v84_v10, %v4042_v24 }
  0xcd   :  { %v3452_v11 = vpop.f32.mrf.mxu0 }
  0xce   :  { %v95_v41 = vadd.f32 %v91_v39, %v4048_v27  ;;  %v96_v42 = vmul.f32 0.5, %v94_v40 }
  0xcf   :  { %v87_v12 = vpop.f32.mrf.mxu0 }
  0xd0   :  { %v97_v43 = vmul.f32 0.5, %v95_v41  ;;  %v3774_v12 = vld [vmem:[%s4739_s1 + $0x8] sm:$0xff]  }
  0xd1   :  { %v3453_v14 = vpop.f32.mrf.mxu0  ;;  %3487 = vmatpush3.bf16.msra.mxu1 %v3774_v12 }
  0xd2   :  { %3488 = vmatprep.subr.bf16.mxu1 %v3964_v1  ;;  %v3775_v14 = vld [vmem:[%s4739_s1] sm:$0xff]  }
  0xd5   :  { %3489 = vmatpush3.bf16.msra.mxu1 %v3775_v14 }
  0xd6   :  { %3502 = vmatprep.subr.bf16.mxu1 %v3964_v1 }
 0x13d   :  { %v208_v15 = vpop.f32.mrf.mxu0 }
 0x13e   :  { %v215_v16 = vrot.slane %v208_v15, 1  ;;  %216 = vrot.lane.b32.xlu1 %v208_v15, %s3966_s17  ;;  %v144_v20 = vpop.f32.mrf.mxu1 }
 0x13f   :  { %v3468_v17 = vpop.f32.mrf.mxu0  ;;  %v151_v35 = vrot.slane %v144_v20, 1 }
 0x140   :  { %218 = vrot.lane.b32.xlu0 %v215_v16, %s3966_s17  ;;  %v3460_v21 = vpop.f32.mrf.mxu1  ;;  %v3776_v16 = vld [vmem:[%s4741_s2 + $0x8] sm:$0xff]   ;;  %v3777_v17 = vld [vmem:[%s4741_s2] sm:$0xff]  }
 0x141   :  { %v211_v18 = vpop.f32.mrf.mxu0  ;;  %3479 = vmatpush3.bf16.msra.mxu0 %v3776_v16 }
 0x142   :  { %v147_v22 = vpop.f32.mrf.mxu1  ;;  %3480 = vmatprep.subr.bf16.mxu0 %v3964_v1 }
 0x143   :  { %v3469_v19 = vpop.f32.mrf.mxu0 }
 0x144   :  { %v3461_v23 = vpop.f32.mrf.mxu1 }
 0x145   :  { %3481 = vmatpush3.bf16.msra.mxu0 %v3777_v17 }
 0x146   :  { %v266_v30 = vpop.f32.mrf.mxu1  ;;  %3494 = vmatprep.subr.bf16.mxu0 %v3964_v1 }
 0x147   :  { %v273_v54 = vrot.slane %v266_v30, 1 }
 0x148   :  { %v3476_v32 = vpop.f32.mrf.mxu1 }
 0x14a   :  { %v269_v34 = vpop.f32.mrf.mxu1 }
 0x14c   :  { %v3477_v37 = vpop.f32.mrf.mxu1 }
 0x1b0   :  { %v217_v25 = vpop.permute.xlu1 %216 }
 0x1b1   :  { %v222_v26 = vadd.f32 %v217_v25, %v4042_v24 }
 0x1b2   :  { %v219_v28 = vpop.permute.xlu0 %218 }
 0x1b3   :  { %3804 = vtanh.f32 %v222_v26  ;;  %v223_v29 = vadd.f32 %v219_v28, %v4048_v27 }
 0x1b5   :  { %3806 = vtanh.f32 %v223_v29 }
 0x1b6   :  { %3808 = vtanh.f32 %v96_v42 }
 0x1b7   :  { %3810 = vtanh.f32 %v97_v43 }
 0x1c0   :  { %v3805_v31 = vpop.eup %3804 }
 0x1c1   :  { %302 = vrot.lane.b32.xlu1 %v3805_v31, %s3966_s17 }
 0x1c2   :  { %v3807_v33 = vpop.eup %3806 }
 0x1c3   :  { %304 = vrot.lane.b32.xlu0 %v3807_v33, %s3966_s17  ;;  %v3809_v44 = vpop.eup %3808 }
 0x1c4   :  { %v3811_v45 = vpop.eup %3810  ;;  %v100_v46 = vadd.f32 1.0, %v3809_v44 }
 0x1c5   :  { %152 = vrot.lane.b32.xlu1 %v144_v20, %s3968_s21  ;;  %v101_v47 = vadd.f32 1.0, %v3811_v45 }
 0x1c6   :  { %v102_v48 = vmul.f32 0.5, %v100_v46 }
 0x1c7   :  { %154 = vrot.lane.b32.xlu0 %v151_v35, %s3968_s21  ;;  %v103_v51 = vmul.f32 0.5, %v101_v47 }
 0x1c9   :  { %292 = vrot.lane.b32.xlu1 %v26_v36, %s3968_s21 }
 0x1cb   :  { %294 = vrot.lane.b32.xlu0 %v291_v38, %s3968_s21 }
 0x233   :  { %v303_v49 = vpop.permute.xlu1 %302 }
 0x234   :  { %v308_v50 = vmul.f32 %v303_v49, %v102_v48  ;;  %v3969_v48 = vmov 1966171168  }
 0x235   :  { %v305_v52 = vpop.permute.xlu0 %304  ;;  %v412_v49 = vunpack.c.l.s4 %v3969_v48 }
 0x236   :  { %v309_v53 = vmul.f32 %v305_v52, %v103_v51  ;;  %312 = vrot.lane.b32.xlu1 %v308_v50, %s3968_s21  ;;  %v414_v50 = vlaneseq }
 0x237   :  { %v153_v55 = vpop.permute.xlu1 %152  ;;  %v413_v51 = vunpack.c.0.s8 %v412_v49 }
 0x238   :  { %314 = vrot.lane.b32.xlu0 %v309_v53, %s3968_s21  ;;  %v158_v56 = vadd.f32 %v153_v55, %v4042_v24  ;;  %v415_v52 = vshrl.u32 %v414_v50, 7  ;;  %v4123_v53 = vld [vmem:[%s4742_s3] ss:$0 sm:$0xff] }
 0x239   :  { %v155_v57 = vpop.permute.xlu0 %154 }
 0x23a   :  { %274 = vrot.lane.b32.xlu1 %v266_v30, %s3967_s20  ;;  %v160_v58 = vmul.f32 0.5, %v158_v56  ;;  %v159_v59 = vadd.f32 %v155_v57, %v4048_v27 }
 0x23b   :  { %v293_v3 = vpop.permute.xlu1 %292 }
 0x23c   :  { %276 = vrot.lane.b32.xlu0 %v273_v54, %s3967_s20  ;;  %3812 = vtanh.f32 %v160_v58  ;;  %v161_v60 = vmul.f32 0.5, %v159_v59  ;;  %v4125_v54 = vsub.s32 %v413_v51, %v415_v52 }
 0x23d   :  { %v295_v4 = vpop.permute.xlu0 %294 }
 0x23e   :  { %3814 = vtanh.f32 %v161_v60 }
 0x249   :  { %v3813_v61 = vpop.eup %3812 }
 0x24a   :  { %v164_v62 = vadd.f32 1.0, %v3813_v61 }
 0x24b   :  { %v3815_v63 = vpop.eup %3814 }
 0x24c   :  { %v166_v0 = vmul.f32 0.5, %v164_v62  ;;  %v165_v2 = vadd.f32 1.0, %v3815_v63 }
 0x24e   :  { %v298_v5 = vmul.f32 %v293_v3, %v166_v0  ;;  %v167_v6 = vmul.f32 0.5, %v165_v2 }
 0x250   :  { %v299_v8 = vmul.f32 %v295_v4, %v167_v6 }
 0x2a8   :  { %v313_v7 = vpop.permute.xlu1 %312 }
 0x2a9   :  { %v4065_v9 = vadd.f32 %v313_v7, %v298_v5 }
 0x2aa   :  { %v315_v10 = vpop.permute.xlu0 %314 }
 0x2ab   :  { %3816 = vtanh.f32 %v4065_v9  ;;  %v4068_v11 = vadd.f32 %v315_v10, %v299_v8 }
 0x2ac   :  { %v275_v18 = vpop.permute.xlu1 %274 }
 0x2ad   :  { %3818 = vtanh.f32 %v4068_v11  ;;  %v280_v20 = vadd.f32 %v275_v18, %v4042_v24  ;;  %v4140_v18 = vld [vmem:[%s4740_s0 + $0x1] sm:$0x1] }
 0x2ae   :  { %v277_v19 = vpop.permute.xlu0 %276 }
 0x2af   :  { %v281_v21 = vadd.f32 %v277_v19, %v4048_v27  ;;  %v282_v22 = vmul.f32 0.5, %v280_v20 }
 0x2b1   :  { %v283_v23 = vmul.f32 0.5, %v281_v21  ;;  %3820 = vtanh.f32 %v282_v22  ;;  %v4146_v21 = vld [vmem:[%s4740_s0 + $0x9] sm:$0x1] }
 0x2b3   :  { %3822 = vtanh.f32 %v283_v23 }
 0x2b8   :  { %v3817_v13 = vpop.eup %3816 }
 0x2b9   :  { %324 = vrot.lane.b32.xlu1 %v3817_v13, %s3966_s17 }
 0x2ba   :  { %v3819_v15 = vpop.eup %3818 }
 0x2bb   :  { %326 = vrot.lane.b32.xlu0 %v3819_v15, %s3966_s17 }
 0x2bd   :  { %575 = vrot.lane.b32.xlu1 %v3774_v12, %s3966_s17 }
 0x2be   :  { %v3821_v25 = vpop.eup %3820 }
 0x2bf   :  { %v286_v28 = vadd.f32 1.0, %v3821_v25 }
 0x2c0   :  { %v3823_v26 = vpop.eup %3822 }
 0x2c1   :  { %511 = vrot.lane.b32.xlu1 %v3774_v12, %s3967_s20  ;;  %v287_v29 = vadd.f32 1.0, %v3823_v26  ;;  %v288_v30 = vmul.f32 0.5, %v286_v28 }
 0x2c3   :  { %v289_v31 = vmul.f32 0.5, %v287_v29 }
 0x2c5   :  { %633 = vrot.lane.b32.xlu1 %v3774_v12, %s3968_s21 }
 0x32b   :  { %v325_v32 = vpop.permute.xlu1 %324 }
 0x32c   :  { %v330_v33 = vmul.f32 %v325_v32, %v288_v30 }
 0x32d   :  { %v327_v34 = vpop.permute.xlu0 %326 }
 0x32e   :  { %v331_v35 = vmul.f32 %v327_v34, %v289_v31  ;;  %v332_v36 = vpack.c.bf16 %v330_v33, %v330_v33 }
 0x32f   :  { %v576_v41 = vpop.permute.xlu1 %575 }
 0x330   :  { %v333_v37 = vpack.c.bf16 %v331_v35, %v331_v35  ;;  %v347_v24 = vunpack.c.l.b16 %v332_v36 }
 0x332   :  { %v348_v38 = vunpack.c.l.b16 %v333_v37 }
 0x333   :  { %v512_v42 = vpop.permute.xlu1 %511 }
 0x334   :  { %v349_v27 = vrot.slane %v348_v38, 7 }
 0x336   :  { %v351_v39 = vsel %vm350_vm3, %v349_v27, %v347_v24 }
 0x337   :  { %v352_v40 = vpack.c.b16 %v351_v39, %v351_v39  ;;  %v634_v46 = vpop.permute.xlu1 %633 }
 0x339   :  { %353 = vrot.lane.b32.xlu0 %v352_v40, %s3968_s21 }
 0x33d   :  { %573 = vrot.lane.b32.xlu0 %v3775_v14, %s3966_s17 }
 0x341   :  { %509 = vrot.lane.b32.xlu0 %v3775_v14, %s3967_s20 }
 0x345   :  { %631 = vrot.lane.b32.xlu0 %v3775_v14, %s3968_s21 }
 0x3ab   :  { %v354_v43 = vpop.permute.xlu0 %353 }
 0x3ac   :  { %3483 = vmatmul.mubr.msk.bf16.vlgmr.msra.gmra.mxu0 %vm46_vm2, %v354_v43  ;;  %3491 = vmatmul.mubr.msk.bf16.vlgmr.msra.gmra.mxu1 %vm46_vm2, %v354_v43 }
 0x3ad   :  { %3503 = vmatpush3.bf16.msra.mxu1 %v576_v41  ;;  %3495 = vmatpush3.bf16.msra.mxu0 %v512_v42 }
 0x3ae   :  { %3504 = vmatprep.subr.bf16.mxu1 %v3964_v1  ;;  %3506 = vmatprep.mubr.msk.bf16.mxu1 %vm3965_vm1, %v3964_v1 }
 0x3af   :  { %v574_v44 = vpop.permute.xlu0 %573  ;;  %3496 = vmatprep.subr.bf16.mxu0 %v3964_v1  ;;  %3498 = vmatprep.mubr.msk.bf16.mxu0 %vm3965_vm1, %v3964_v1 }
 0x3b1   :  { %3505 = vmatpush3.bf16.msra.mxu1 %v574_v44 }
 0x3b2   :  { %3518 = vmatprep.subr.bf16.mxu1 %v3964_v1 }
 0x3b3   :  { %v510_v45 = vpop.permute.xlu0 %509 }
 0x3b4   :  { %3497 = vmatpush3.bf16.msra.mxu0 %v510_v45  ;;  %3507 = vmatmul.mubr.msk.bf16.vlgmr.msra.gmra.mxu1 %vm46_vm2, %v354_v43 }
 0x3b5   :  { %3510 = vmatprep.subr.bf16.mxu0 %v3964_v1  ;;  %3522 = vmatprep.mubr.msk.bf16.mxu1 %vm3965_vm1, %v3964_v1 }
 0x3b7   :  { %3499 = vmatmul.mubr.msk.bf16.vlgmr.msra.gmra.mxu0 %vm46_vm2, %v354_v43  ;;  %v632_v47 = vpop.permute.xlu0 %631 }
 0x3b8   :  { %3511 = vmatpush3.bf16.msra.mxu0 %v634_v46  ;;  %3514 = vmatprep.mubr.msk.bf16.mxu0 %vm3965_vm1, %v3964_v1 }
 0x3b9   :  { %3512 = vmatprep.subr.bf16.mxu0 %v3964_v1 }
 0x3bc   :  { %3513 = vmatpush3.bf16.msra.mxu0 %v632_v47 }
 0x3bd   :  { %3526 = vmatprep.subr.bf16.mxu0 %v3964_v1 }
 0x3bf   :  { %3515 = vmatmul.mubr.msk.bf16.vlgmr.msra.gmra.mxu0 %vm46_vm2, %v354_v43 }
 0x3c0   :  { %3530 = vmatprep.mubr.msk.bf16.mxu0 %vm3965_vm1, %v3964_v1 }
 0x46c   :  { %v404_v55 = vpop.f32.mrf.mxu0  ;;  %v489_v56 = vpop.f32.mrf.mxu1 }
 0x46d   :  { %v405_v57 = vadd.f32 %v4123_v53, %v404_v55  ;;  %v496_v29 = vrot.slane %v489_v56, 1  ;;  %v499_v30 = vadd.f32 %v489_v56, %v4140_v18 }
 0x46e   :  { %v3484_v58 = vpop.f32.mrf.mxu0  ;;  %v3492_v59 = vpop.f32.mrf.mxu1 }
 0x46f   :  { %v417_v60 = vrot.slane %v405_v57, %v4125_v54  ;;  %v500_v31 = vadd.f32 %v496_v29, %v4146_v21  ;;  %v501_v32 = vmul.f32 0.5, %v499_v30 }
 0x470   :  { %v407_v61 = vpop.f32.mrf.mxu0  ;;  %v492_v62 = vpop.f32.mrf.mxu1 }
 0x471   :  { %v418_v63 = vcombine.high %v417_v60, %v417_v60  ;;  %3240 = vst.sshfl [vmem:[%s4743_s4] sm:$0x1 pattern:$0x73625140] %v417_v60  ;;  %v502_v33 = vmul.f32 0.5, %v500_v31 }
 0x472   :  { %v3485_v0 = vpop.f32.mrf.mxu0  ;;  %v3493_v2 = vpop.f32.mrf.mxu1 }
 0x473   :  { %3241 = vst.sshfl [vmem:[%s4743_s4 + $0x8] sm:$0x1 pattern:$0x73625140] %v418_v63  ;;  %v3778_v63 = vld [vmem:[%s4739_s1 + $0x8] sm:$0xff]  }
 0x474   :  { %v613_v3 = vpop.f32.mrf.mxu1  ;;  %3527 = vmatpush3.bf16.msra.mxu0 %v3778_v63  ;;  %v3780_v2 = vld [vmem:[%s4741_s2 + $0x8] sm:$0xff]  }
 0x475   :  { %v620_v4 = vrot.slane %v613_v3, 1  ;;  %621 = vrot.lane.b32.xlu0 %v613_v3, %s3966_s17  ;;  %3528 = vmatprep.subr.bf16.mxu0 %v3964_v1  ;;  %v3781_v3 = vld [vmem:[%s4741_s2] sm:$0xff]  }
 0x476   :  { %v3508_v5 = vpop.f32.mrf.mxu1  ;;  %3519 = vmatpush3.bf16.msra.mxu1 %v3780_v2  ;;  %v4237_v2 = vld [vmem:[%s4740_s0 + $0xa] sm:$0x1] }
 0x477   :  { %623 = vrot.lane.b32.xlu1 %v620_v4, %s3966_s17  ;;  %v549_v6 = vpop.f32.mrf.mxu0  ;;  %3520 = vmatprep.subr.bf16.mxu1 %v3964_v1 }
 0x478   :  { %v616_v7 = vpop.f32.mrf.mxu1  ;;  %v556_v28 = vrot.slane %v549_v6, 1 }
 0x479   :  { %v3500_v8 = vpop.f32.mrf.mxu0 }
 0x47a   :  { %v3509_v10 = vpop.f32.mrf.mxu1  ;;  %3521 = vmatpush3.bf16.msra.mxu1 %v3781_v3 }
 0x47b   :  { %v552_v12 = vpop.f32.mrf.mxu0  ;;  %3534 = vmatprep.subr.bf16.mxu1 %v3964_v1 }
 0x47d   :  { %v3501_v13 = vpop.f32.mrf.mxu0 }
 0x47f   :  { %v671_v14 = vpop.f32.mrf.mxu0 }
 0x480   :  { %v678_v42 = vrot.slane %v671_v14, 1 }
 0x481   :  { %v3516_v15 = vpop.f32.mrf.mxu0 }
 0x483   :  { %v674_v16 = vpop.f32.mrf.mxu0 }
 0x485   :  { %v3517_v17 = vpop.f32.mrf.mxu0 }
 0x4e7   :  { %v622_v19 = vpop.permute.xlu0 %621 }
 0x4e8   :  { %v627_v20 = vadd.f32 %v622_v19, %v4140_v18 }
 0x4e9   :  { %v624_v22 = vpop.permute.xlu1 %623 }
 0x4ea   :  { %3824 = vtanh.f32 %v627_v20  ;;  %v628_v23 = vadd.f32 %v624_v22, %v4146_v21 }
 0x4ec   :  { %3826 = vtanh.f32 %v628_v23 }
 0x4ed   :  { %3828 = vtanh.f32 %v501_v32 }
 0x4ee   :  { %3830 = vtanh.f32 %v502_v33 }
 0x4f7   :  { %v3825_v25 = vpop.eup %3824 }
 0x4f8   :  { %699 = vrot.lane.b32.xlu0 %v3825_v25, %s3966_s17 }
 0x4f9   :  { %v3827_v26 = vpop.eup %3826 }
 0x4fa   :  { %701 = vrot.lane.b32.xlu1 %v3827_v26, %s3966_s17  ;;  %v3829_v34 = vpop.eup %3828 }
 0x4fb   :  { %v3831_v35 = vpop.eup %3830  ;;  %v505_v36 = vadd.f32 1.0, %v3829_v34 }
 0x4fc   :  { %557 = vrot.lane.b32.xlu0 %v549_v6, %s3968_s21  ;;  %v506_v37 = vadd.f32 1.0, %v3831_v35 }
 0x4fd   :  { %v507_v38 = vmul.f32 0.5, %v505_v36 }
 0x4fe   :  { %559 = vrot.lane.b32.xlu1 %v556_v28, %s3968_s21  ;;  %v508_v39 = vmul.f32 0.5, %v506_v37 }
 0x56a   :  { %v700_v24 = vpop.permute.xlu0 %699 }
 0x56b   :  { %v705_v27 = vmul.f32 %v700_v24, %v507_v38 }
 0x56c   :  { %v702_v40 = vpop.permute.xlu1 %701 }
 0x56d   :  { %v706_v41 = vmul.f32 %v702_v40, %v508_v39  ;;  %709 = vrot.lane.b32.xlu0 %v705_v27, %s3968_s21 }
 0x56e   :  { %v558_v43 = vpop.permute.xlu0 %557 }
 0x56f   :  { %711 = vrot.lane.b32.xlu1 %v706_v41, %s3968_s21  ;;  %v563_v45 = vadd.f32 %v558_v43, %v4140_v18 }
 0x570   :  { %v560_v44 = vpop.permute.xlu1 %559 }
 0x571   :  { %679 = vrot.lane.b32.xlu0 %v671_v14, %s3967_s20  ;;  %v564_v46 = vadd.f32 %v560_v44, %v4146_v21  ;;  %v565_v47 = vmul.f32 0.5, %v563_v45 }
 0x573   :  { %681 = vrot.lane.b32.xlu1 %v678_v42, %s3967_s20  ;;  %v566_v48 = vmul.f32 0.5, %v564_v46  ;;  %3832 = vtanh.f32 %v565_v47 }
 0x575   :  { %3834 = vtanh.f32 %v566_v48 }
 0x580   :  { %v3833_v49 = vpop.eup %3832 }
 0x581   :  { %v569_v51 = vadd.f32 1.0, %v3833_v49 }
 0x582   :  { %v3835_v50 = vpop.eup %3834 }
 0x583   :  { %v570_v52 = vadd.f32 1.0, %v3835_v50  ;;  %v571_v55 = vmul.f32 0.5, %v569_v51 }
 0x585   :  { %v572_v56 = vmul.f32 0.5, %v570_v52  ;;  %v695_v57 = vmul.f32 %v571_v55, %v4065_v9 }
 0x587   :  { %v696_v60 = vmul.f32 %v572_v56, %v4068_v11  ;;  %v3779_v11 = vld [vmem:[%s4739_s1] sm:$0xff]  }
 0x588   :  { %3529 = vmatpush3.bf16.msra.mxu0 %v3779_v11 }
 0x589   :  { %3542 = vmatprep.subr.bf16.mxu0 %v3964_v1 }
 0x5df   :  { %v710_v58 = vpop.permute.xlu0 %709 }
 0x5e0   :  { %v4162_v59 = vadd.f32 %v710_v58, %v695_v57 }
 0x5e1   :  { %v712_v61 = vpop.permute.xlu1 %711 }
 0x5e2   :  { %3836 = vtanh.f32 %v4162_v59  ;;  %v4166_v62 = vadd.f32 %v712_v61, %v696_v60 }
 0x5e3   :  { %v680_v4 = vpop.permute.xlu0 %679 }
 0x5e4   :  { %3838 = vtanh.f32 %v4166_v62  ;;  %v685_v6 = vadd.f32 %v680_v4, %v4140_v18 }
 0x5e5   :  { %v682_v5 = vpop.permute.xlu1 %681 }
 0x5e6   :  { %v686_v7 = vadd.f32 %v682_v5, %v4146_v21  ;;  %v687_v8 = vmul.f32 0.5, %v685_v6 }
 0x5e8   :  { %v688_v10 = vmul.f32 0.5, %v686_v7  ;;  %3840 = vtanh.f32 %v687_v8 }
 0x5ea   :  { %3842 = vtanh.f32 %v688_v10 }
 0x5ef   :  { %v3837_v9 = vpop.eup %3836 }
 0x5f0   :  { %721 = vrot.lane.b32.xlu0 %v3837_v9, %s3966_s17  ;;  %v4231_v9 = vld [vmem:[%s4740_s0 + $0x2] sm:$0x1] }
 0x5f1   :  { %v3839_v0 = vpop.eup %3838 }
 0x5f2   :  { %723 = vrot.lane.b32.xlu1 %v3839_v0, %s3966_s17 }
 0x5f4   :  { %971 = vrot.lane.b32.xlu0 %v3778_v63, %s3966_s17 }
 0x5f5   :  { %v3841_v12 = vpop.eup %3840 }
 0x5f6   :  { %v691_v14 = vadd.f32 1.0, %v3841_v12 }
 0x5f7   :  { %v3843_v13 = vpop.eup %3842 }
 0x5f8   :  { %907 = vrot.lane.b32.xlu0 %v3778_v63, %s3967_s20  ;;  %v692_v15 = vadd.f32 1.0, %v3843_v13  ;;  %v693_v16 = vmul.f32 0.5, %v691_v14 }
 0x5fa   :  { %v694_v20 = vmul.f32 0.5, %v692_v15 }
 0x5fc   :  { %1029 = vrot.lane.b32.xlu0 %v3778_v63, %s3968_s21 }
 0x662   :  { %v722_v17 = vpop.permute.xlu0 %721 }
 0x663   :  { %v727_v19 = vmul.f32 %v722_v17, %v693_v16 }
 0x664   :  { %v724_v22 = vpop.permute.xlu1 %723 }
 0x665   :  { %v728_v23 = vmul.f32 %v724_v22, %v694_v20  ;;  %v729_v25 = vpack.c.bf16 %v727_v19, %v727_v19 }
 0x666   :  { %v972_v31 = vpop.permute.xlu0 %971 }
 0x667   :  { %v730_v26 = vpack.c.bf16 %v728_v23, %v728_v23  ;;  %v744_v18 = vunpack.c.l.b16 %v729_v25 }
 0x669   :  { %v745_v28 = vunpack.c.l.b16 %v730_v26 }
 0x66a   :  { %v908_v32 = vpop.permute.xlu0 %907 }
 0x66b   :  { %v746_v29 = vrot.slane %v745_v28, 7 }
 0x66d   :  { %v747_v21 = vsel %vm350_vm3, %v746_v29, %v744_v18 }
 0x66e   :  { %v748_v30 = vpack.c.b16 %v747_v21, %v747_v21  ;;  %v1030_v36 = vpop.permute.xlu0 %1029 }
 0x670   :  { %749 = vrot.lane.b32.xlu1 %v748_v30, %s3968_s21 }
 0x674   :  { %969 = vrot.lane.b32.xlu1 %v3779_v11, %s3966_s17 }
 0x678   :  { %905 = vrot.lane.b32.xlu1 %v3779_v11, %s3967_s20 }
 0x67c   :  { %1027 = vrot.lane.b32.xlu1 %v3779_v11, %s3968_s21 }
 0x6e2   :  { %v750_v33 = vpop.permute.xlu1 %749 }
 0x6e3   :  { %3523 = vmatmul.mubr.msk.bf16.vlgmr.msra.gmra.mxu1 %vm46_vm2, %v750_v33  ;;  %3531 = vmatmul.mubr.msk.bf16.vlgmr.msra.gmra.mxu0 %vm46_vm2, %v750_v33 }
 0x6e4   :  { %3543 = vmatpush3.bf16.msra.mxu0 %v972_v31  ;;  %3535 = vmatpush3.bf16.msra.mxu1 %v908_v32 }
 0x6e5   :  { %3544 = vmatprep.subr.bf16.mxu0 %v3964_v1  ;;  %3536 = vmatprep.subr.bf16.mxu1 %v3964_v1 }
 0x6e6   :  { %v970_v34 = vpop.permute.xlu1 %969  ;;  %3546 = vmatprep.mubr.msk.bf16.mxu0 %vm3965_vm1, %v3964_v1  ;;  %3538 = vmatprep.mubr.msk.bf16.mxu1 %vm3965_vm1, %v3964_v1 }
 0x6e8   :  { %3545 = vmatpush3.bf16.msra.mxu0 %v970_v34 }
 0x6e9   :  { %3558 = vmatprep.subr.bf16.mxu0 %v3964_v1 }
 0x6ea   :  { %v906_v35 = vpop.permute.xlu1 %905 }
 0x6eb   :  { %3537 = vmatpush3.bf16.msra.mxu1 %v906_v35  ;;  %3547 = vmatmul.mubr.msk.bf16.vlgmr.msra.gmra.mxu0 %vm46_vm2, %v750_v33 }
 0x6ec   :  { %3550 = vmatprep.subr.bf16.mxu1 %v3964_v1  ;;  %3562 = vmatprep.mubr.msk.bf16.mxu0 %vm3965_vm1, %v3964_v1 }
 0x6ee   :  { %3539 = vmatmul.mubr.msk.bf16.vlgmr.msra.gmra.mxu1 %vm46_vm2, %v750_v33  ;;  %v1028_v37 = vpop.permute.xlu1 %1027 }
 0x6ef   :  { %3551 = vmatpush3.bf16.msra.mxu1 %v1030_v36  ;;  %3554 = vmatprep.mubr.msk.bf16.mxu1 %vm3965_vm1, %v3964_v1 }
 0x6f0   :  { %3552 = vmatprep.subr.bf16.mxu1 %v3964_v1 }
 0x6f3   :  { %3553 = vmatpush3.bf16.msra.mxu1 %v1028_v37 }
 0x6f4   :  { %3566 = vmatprep.subr.bf16.mxu1 %v3964_v1 }
 0x6f6   :  { %3555 = vmatmul.mubr.msk.bf16.vlgmr.msra.gmra.mxu1 %vm46_vm2, %v750_v33 }
 0x6f7   :  { %3570 = vmatprep.mubr.msk.bf16.mxu1 %vm3965_vm1, %v3964_v1 }
 0x7a3   :  { %v800_v38 = vpop.f32.mrf.mxu1  ;;  %v885_v24 = vpop.f32.mrf.mxu0 }
 0x7a4   :  { %v801_v27 = vadd.f32 %v4123_v53, %v800_v38  ;;  %v892_v8 = vrot.slane %v885_v24, 1  ;;  %v895_v10 = vadd.f32 %v885_v24, %v4231_v9 }
 0x7a5   :  { %v3524_v39 = vpop.f32.mrf.mxu1  ;;  %v3532_v40 = vpop.f32.mrf.mxu0 }
 0x7a6   :  { %v813_v41 = vrot.slane %v801_v27, %v4125_v54  ;;  %v896_v12 = vadd.f32 %v892_v8, %v4237_v2  ;;  %v897_v13 = vmul.f32 0.5, %v895_v10 }
 0x7a7   :  { %v803_v42 = vpop.f32.mrf.mxu1  ;;  %v888_v43 = vpop.f32.mrf.mxu0 }
 0x7a8   :  { %v814_v44 = vcombine.high %v813_v41, %v813_v41  ;;  %3252 = vst.sshfl [vmem:[%s4743_s4 + $0x1] sm:$0x1 pattern:$0x73625140] %v813_v41  ;;  %v898_v14 = vmul.f32 0.5, %v896_v12 }
 0x7a9   :  { %v3525_v45 = vpop.f32.mrf.mxu1  ;;  %v3533_v46 = vpop.f32.mrf.mxu0 }
 0x7aa   :  { %3253 = vst.sshfl [vmem:[%s4743_s4 + $0x9] sm:$0x1 pattern:$0x73625140] %v814_v44  ;;  %v3782_v44 = vld [vmem:[%s4739_s1 + $0x8] sm:$0xff]  }
 0x7ab   :  { %v1009_v47 = vpop.f32.mrf.mxu0  ;;  %3567 = vmatpush3.bf16.msra.mxu1 %v3782_v44  ;;  %v3784_v46 = vld [vmem:[%s4741_s2 + $0x8] sm:$0xff]  }
 0x7ac   :  { %v1016_v48 = vrot.slane %v1009_v47, 1  ;;  %1017 = vrot.lane.b32.xlu1 %v1009_v47, %s3966_s17  ;;  %3568 = vmatprep.subr.bf16.mxu1 %v3964_v1  ;;  %v3785_v47 = vld [vmem:[%s4741_s2] sm:$0xff]  }
 0x7ad   :  { %v3548_v49 = vpop.f32.mrf.mxu0  ;;  %3559 = vmatpush3.bf16.msra.mxu0 %v3784_v46  ;;  %v4328_v46 = vld [vmem:[%s4740_s0 + $0xb] sm:$0x1] }
 0x7ae   :  { %1019 = vrot.lane.b32.xlu0 %v1016_v48, %s3966_s17  ;;  %v945_v50 = vpop.f32.mrf.mxu1  ;;  %3560 = vmatprep.subr.bf16.mxu0 %v3964_v1 }
 0x7af   :  { %v1012_v51 = vpop.f32.mrf.mxu0  ;;  %v952_v7 = vrot.slane %v945_v50, 1 }
 0x7b0   :  { %v3540_v52 = vpop.f32.mrf.mxu1 }
 0x7b1   :  { %v3549_v55 = vpop.f32.mrf.mxu0  ;;  %3561 = vmatpush3.bf16.msra.mxu0 %v3785_v47 }
 0x7b2   :  { %v948_v56 = vpop.f32.mrf.mxu1  ;;  %3574 = vmatprep.subr.bf16.mxu0 %v3964_v1 }
 0x7b4   :  { %v3541_v57 = vpop.f32.mrf.mxu1 }
 0x7b6   :  { %v1067_v58 = vpop.f32.mrf.mxu1 }
 0x7b7   :  { %v1074_v18 = vrot.slane %v1067_v58, 1 }
 0x7b8   :  { %v3556_v60 = vpop.f32.mrf.mxu1 }
 0x7ba   :  { %v1070_v61 = vpop.f32.mrf.mxu1 }
 0x7bc   :  { %v3557_v63 = vpop.f32.mrf.mxu1 }
 0x81e   :  { %v1018_v11 = vpop.permute.xlu1 %1017 }
 0x81f   :  { %v1023_v0 = vadd.f32 %v1018_v11, %v4231_v9 }
 0x820   :  { %v1020_v3 = vpop.permute.xlu0 %1019 }
 0x821   :  { %3844 = vtanh.f32 %v1023_v0  ;;  %v1024_v4 = vadd.f32 %v1020_v3, %v4237_v2 }
 0x823   :  { %3846 = vtanh.f32 %v1024_v4 }
 0x824   :  { %3848 = vtanh.f32 %v897_v13 }
 0x825   :  { %3850 = vtanh.f32 %v898_v14 }
 0x82e   :  { %v3845_v5 = vpop.eup %3844 }
 0x82f   :  { %1095 = vrot.lane.b32.xlu1 %v3845_v5, %s3966_s17 }
 0x830   :  { %v3847_v6 = vpop.eup %3846 }
 0x831   :  { %1097 = vrot.lane.b32.xlu0 %v3847_v6, %s3966_s17  ;;  %v3849_v15 = vpop.eup %3848 }
 0x832   :  { %v3851_v16 = vpop.eup %3850  ;;  %v901_v17 = vadd.f32 1.0, %v3849_v15 }
 0x833   :  { %953 = vrot.lane.b32.xlu1 %v945_v50, %s3968_s21  ;;  %v902_v19 = vadd.f32 1.0, %v3851_v16 }
 0x834   :  { %v903_v20 = vmul.f32 0.5, %v901_v17 }
 0x835   :  { %955 = vrot.lane.b32.xlu0 %v952_v7, %s3968_s21  ;;  %v904_v25 = vmul.f32 0.5, %v902_v19 }
 0x8a1   :  { %v1096_v22 = vpop.permute.xlu1 %1095 }
 0x8a2   :  { %v1101_v23 = vmul.f32 %v1096_v22, %v903_v20 }
 0x8a3   :  { %v1098_v26 = vpop.permute.xlu0 %1097 }
 0x8a4   :  { %v1102_v28 = vmul.f32 %v1098_v26, %v904_v25  ;;  %1105 = vrot.lane.b32.xlu1 %v1101_v23, %s3968_s21 }
 0x8a5   :  { %v954_v29 = vpop.permute.xlu1 %953 }
 0x8a6   :  { %1107 = vrot.lane.b32.xlu0 %v1102_v28, %s3968_s21  ;;  %v959_v30 = vadd.f32 %v954_v29, %v4231_v9 }
 0x8a7   :  { %v956_v21 = vpop.permute.xlu0 %955 }
 0x8a8   :  { %1075 = vrot.lane.b32.xlu1 %v1067_v58, %s3967_s20  ;;  %v960_v31 = vadd.f32 %v956_v21, %v4237_v2  ;;  %v961_v32 = vmul.f32 0.5, %v959_v30 }
 0x8aa   :  { %1077 = vrot.lane.b32.xlu0 %v1074_v18, %s3967_s20  ;;  %v962_v33 = vmul.f32 0.5, %v960_v31  ;;  %3852 = vtanh.f32 %v961_v32 }
 0x8ac   :  { %3854 = vtanh.f32 %v962_v33 }
 0x8b7   :  { %v3853_v34 = vpop.eup %3852 }
 0x8b8   :  { %v965_v36 = vadd.f32 1.0, %v3853_v34 }
 0x8b9   :  { %v3855_v35 = vpop.eup %3854 }
 0x8ba   :  { %v966_v37 = vadd.f32 1.0, %v3855_v35  ;;  %v967_v38 = vmul.f32 0.5, %v965_v36 }
 0x8bc   :  { %v968_v24 = vmul.f32 0.5, %v966_v37  ;;  %v1091_v27 = vmul.f32 %v967_v38, %v4162_v59 }
 0x8be   :  { %v1092_v41 = vmul.f32 %v968_v24, %v4166_v62  ;;  %v3783_v62 = vld [vmem:[%s4739_s1] sm:$0xff]  }
 0x8bf   :  { %3569 = vmatpush3.bf16.msra.mxu1 %v3783_v62 }
 0x8c0   :  { %3582 = vmatprep.subr.bf16.mxu1 %v3964_v1 }
 0x916   :  { %v1106_v39 = vpop.permute.xlu1 %1105 }
 0x917   :  { %v4253_v40 = vadd.f32 %v1106_v39, %v1091_v27 }
 0x918   :  { %v1108_v42 = vpop.permute.xlu0 %1107 }
 0x919   :  { %3856 = vtanh.f32 %v4253_v40  ;;  %v4257_v43 = vadd.f32 %v1108_v42, %v1092_v41 }
 0x91a   :  { %v1076_v48 = vpop.permute.xlu1 %1075 }
 0x91b   :  { %3858 = vtanh.f32 %v4257_v43  ;;  %v1081_v50 = vadd.f32 %v1076_v48, %v4231_v9 }
 0x91c   :  { %v1078_v49 = vpop.permute.xlu0 %1077 }
 0x91d   :  { %v1082_v51 = vadd.f32 %v1078_v49, %v4237_v2  ;;  %v1083_v52 = vmul.f32 0.5, %v1081_v50 }
 0x91f   :  { %v1084_v55 = vmul.f32 0.5, %v1082_v51  ;;  %3860 = vtanh.f32 %v1083_v52 }
 0x921   :  { %3862 = vtanh.f32 %v1084_v55 }
 0x926   :  { %v3857_v59 = vpop.eup %3856 }
 0x927   :  { %1117 = vrot.lane.b32.xlu1 %v3857_v59, %s3966_s17  ;;  %v4322_v59 = vld [vmem:[%s4740_s0 + $0x3] sm:$0x1] }
 0x928   :  { %v3859_v45 = vpop.eup %3858 }
 0x929   :  { %1119 = vrot.lane.b32.xlu0 %v3859_v45, %s3966_s17 }
 0x92b   :  { %1367 = vrot.lane.b32.xlu1 %v3782_v44, %s3966_s17 }
 0x92c   :  { %v3861_v56 = vpop.eup %3860 }
 0x92d   :  { %v1087_v58 = vadd.f32 1.0, %v3861_v56 }
 0x92e   :  { %v3863_v57 = vpop.eup %3862 }
 0x92f   :  { %1303 = vrot.lane.b32.xlu1 %v3782_v44, %s3967_s20  ;;  %v1088_v60 = vadd.f32 1.0, %v3863_v57  ;;  %v1089_v61 = vmul.f32 0.5, %v1087_v58 }
 0x931   :  { %v1090_v0 = vmul.f32 0.5, %v1088_v60 }
 0x933   :  { %1425 = vrot.lane.b32.xlu1 %v3782_v44, %s3968_s21 }
 0x999   :  { %v1118_v63 = vpop.permute.xlu1 %1117 }
 0x99a   :  { %v1123_v11 = vmul.f32 %v1118_v63, %v1089_v61 }
 0x99b   :  { %v1120_v3 = vpop.permute.xlu0 %1119 }
 0x99c   :  { %v1124_v4 = vmul.f32 %v1120_v3, %v1090_v0  ;;  %v1125_v5 = vpack.c.bf16 %v1123_v11, %v1123_v11 }
 0x99d   :  { %v1368_v12 = vpop.permute.xlu1 %1367 }
 0x99e   :  { %v1126_v6 = vpack.c.bf16 %v1124_v4, %v1124_v4  ;;  %v1140_v9 = vunpack.c.l.b16 %v1125_v5 }
 0x9a0   :  { %v1141_v7 = vunpack.c.l.b16 %v1126_v6 }
 0x9a1   :  { %v1304_v13 = vpop.permute.xlu1 %1303 }
 0x9a2   :  { %v1142_v8 = vrot.slane %v1141_v7, 7 }
 0x9a4   :  { %v1143_v2 = vsel %vm350_vm3, %v1142_v8, %v1140_v9 }
 0x9a5   :  { %v1144_v10 = vpack.c.b16 %v1143_v2, %v1143_v2  ;;  %v1426_v17 = vpop.permute.xlu1 %1425 }
 0x9a7   :  { %1145 = vrot.lane.b32.xlu0 %v1144_v10, %s3968_s21 }
 0x9ab   :  { %1365 = vrot.lane.b32.xlu0 %v3783_v62, %s3966_s17 }
 0x9af   :  { %1301 = vrot.lane.b32.xlu0 %v3783_v62, %s3967_s20 }
 0x9b3   :  { %1423 = vrot.lane.b32.xlu0 %v3783_v62, %s3968_s21 }
 0xa19   :  { %v1146_v14 = vpop.permute.xlu0 %1145 }
 0xa1a   :  { %3563 = vmatmul.mubr.msk.bf16.vlgmr.msra.gmra.mxu0 %vm46_vm2, %v1146_v14  ;;  %3571 = vmatmul.mubr.msk.bf16.vlgmr.msra.gmra.mxu1 %vm46_vm2, %v1146_v14 }
 0xa1b   :  { %3583 = vmatpush3.bf16.msra.mxu1 %v1368_v12  ;;  %3575 = vmatpush3.bf16.msra.mxu0 %v1304_v13 }
 0xa1c   :  { %3584 = vmatprep.subr.bf16.mxu1 %v3964_v1  ;;  %3586 = vmatprep.mubr.msk.bf16.mxu1 %vm3965_vm1, %v3964_v1 }
 0xa1d   :  { %v1366_v15 = vpop.permute.xlu0 %1365  ;;  %3576 = vmatprep.subr.bf16.mxu0 %v3964_v1  ;;  %3578 = vmatprep.mubr.msk.bf16.mxu0 %vm3965_vm1, %v3964_v1 }
 0xa1f   :  { %3585 = vmatpush3.bf16.msra.mxu1 %v1366_v15 }
 0xa20   :  { %3598 = vmatprep.subr.bf16.mxu1 %v3964_v1 }
 0xa21   :  { %v1302_v16 = vpop.permute.xlu0 %1301 }
 0xa22   :  { %3577 = vmatpush3.bf16.msra.mxu0 %v1302_v16  ;;  %3587 = vmatmul.mubr.msk.bf16.vlgmr.msra.gmra.mxu1 %vm46_vm2, %v1146_v14 }
 0xa23   :  { %3590 = vmatprep.subr.bf16.mxu0 %v3964_v1  ;;  %3602 = vmatprep.mubr.msk.bf16.mxu1 %vm3965_vm1, %v3964_v1 }
 0xa25   :  { %3579 = vmatmul.mubr.msk.bf16.vlgmr.msra.gmra.mxu0 %vm46_vm2, %v1146_v14  ;;  %v1424_v19 = vpop.permute.xlu0 %1423 }
 0xa26   :  { %3591 = vmatpush3.bf16.msra.mxu0 %v1426_v17  ;;  %3594 = vmatprep.mubr.msk.bf16.mxu0 %vm3965_vm1, %v3964_v1 }
 0xa27   :  { %3592 = vmatprep.subr.bf16.mxu0 %v3964_v1 }
 0xa2a   :  { %3593 = vmatpush3.bf16.msra.mxu0 %v1424_v19 }
 0xa2b   :  { %3606 = vmatprep.subr.bf16.mxu0 %v3964_v1 }
 0xa2d   :  { %3595 = vmatmul.mubr.msk.bf16.vlgmr.msra.gmra.mxu0 %vm46_vm2, %v1146_v14 }
 0xa2e   :  { %3610 = vmatprep.mubr.msk.bf16.mxu0 %vm3965_vm1, %v3964_v1 }
 0xada   :  { %v1196_v20 = vpop.f32.mrf.mxu0  ;;  %v1281_v22 = vpop.f32.mrf.mxu1 }
 0xadb   :  { %v1197_v23 = vadd.f32 %v4123_v53, %v1196_v20  ;;  %v1288_v52 = vrot.slane %v1281_v22, 1  ;;  %v1291_v55 = vadd.f32 %v1281_v22, %v4322_v59 }
 0xadc   :  { %v3564_v25 = vpop.f32.mrf.mxu0  ;;  %v3572_v26 = vpop.f32.mrf.mxu1 }
 0xadd   :  { %v1209_v28 = vrot.slane %v1197_v23, %v4125_v54  ;;  %v1292_v56 = vadd.f32 %v1288_v52, %v4328_v46  ;;  %v1293_v57 = vmul.f32 0.5, %v1291_v55 }
 0xade   :  { %v1199_v18 = vpop.f32.mrf.mxu0  ;;  %v1284_v29 = vpop.f32.mrf.mxu1 }
 0xadf   :  { %v1210_v21 = vcombine.high %v1209_v28, %v1209_v28  ;;  %3264 = vst.sshfl [vmem:[%s4743_s4 + $0x2] sm:$0x1 pattern:$0x73625140] %v1209_v28  ;;  %v1294_v58 = vmul.f32 0.5, %v1292_v56 }
 0xae0   :  { %v3565_v30 = vpop.f32.mrf.mxu0  ;;  %v3573_v31 = vpop.f32.mrf.mxu1 }
 0xae1   :  { %3265 = vst.sshfl [vmem:[%s4743_s4 + $0xa] sm:$0x1 pattern:$0x73625140] %v1210_v21  ;;  %v3786_v21 = vld [vmem:[%s4739_s1 + $0x8] sm:$0xff]  }
 0xae2   :  { %v1405_v32 = vpop.f32.mrf.mxu1  ;;  %3607 = vmatpush3.bf16.msra.mxu0 %v3786_v21  ;;  %v3788_v31 = vld [vmem:[%s4741_s2 + $0x8] sm:$0xff]  }
 0xae3   :  { %v1412_v33 = vrot.slane %v1405_v32, 1  ;;  %1413 = vrot.lane.b32.xlu0 %v1405_v32, %s3966_s17  ;;  %3608 = vmatprep.subr.bf16.mxu0 %v3964_v1  ;;  %v3789_v32 = vld [vmem:[%s4741_s2] sm:$0xff]  }
 0xae4   :  { %v3588_v34 = vpop.f32.mrf.mxu1  ;;  %3599 = vmatpush3.bf16.msra.mxu1 %v3788_v31 }
 0xae5   :  { %1415 = vrot.lane.b32.xlu1 %v1412_v33, %s3966_s17  ;;  %v1341_v35 = vpop.f32.mrf.mxu0  ;;  %3600 = vmatprep.subr.bf16.mxu1 %v3964_v1 }
 0xae6   :  { %v1408_v36 = vpop.f32.mrf.mxu1  ;;  %v1348_v51 = vrot.slane %v1341_v35, 1 }
 0xae7   :  { %v3580_v37 = vpop.f32.mrf.mxu0 }
 0xae8   :  { %v3589_v38 = vpop.f32.mrf.mxu1  ;;  %3601 = vmatpush3.bf16.msra.mxu1 %v3789_v32 }
 0xae9   :  { %v1344_v24 = vpop.f32.mrf.mxu0  ;;  %3614 = vmatprep.subr.bf16.mxu1 %v3964_v1 }
 0xaeb   :  { %v3581_v27 = vpop.f32.mrf.mxu0 }
 0xaed   :  { %v1463_v39 = vpop.f32.mrf.mxu0 }
 0xaee   :  { %v1470_v9 = vrot.slane %v1463_v39, 1 }
 0xaef   :  { %v3596_v41 = vpop.f32.mrf.mxu0 }
 0xaf1   :  { %v1466_v42 = vpop.f32.mrf.mxu0 }
 0xaf3   :  { %v3597_v44 = vpop.f32.mrf.mxu0 }
 0xb55   :  { %v1414_v62 = vpop.permute.xlu0 %1413 }
 0xb56   :  { %v1419_v45 = vadd.f32 %v1414_v62, %v4322_v59 }
 0xb57   :  { %v1416_v47 = vpop.permute.xlu1 %1415 }
 0xb58   :  { %3864 = vtanh.f32 %v1419_v45  ;;  %v1420_v48 = vadd.f32 %v1416_v47, %v4328_v46 }
 0xb5a   :  { %3866 = vtanh.f32 %v1420_v48 }
 0xb5b   :  { %3868 = vtanh.f32 %v1293_v57 }
 0xb5c   :  { %3870 = vtanh.f32 %v1294_v58 }
 0xb65   :  { %v3865_v49 = vpop.eup %3864 }
 0xb66   :  { %1491 = vrot.lane.b32.xlu0 %v3865_v49, %s3966_s17 }
 0xb67   :  { %v3867_v50 = vpop.eup %3866 }
 0xb68   :  { %1493 = vrot.lane.b32.xlu1 %v3867_v50, %s3966_s17  ;;  %v3869_v60 = vpop.eup %3868 }
 0xb69   :  { %v3871_v61 = vpop.eup %3870  ;;  %v1297_v63 = vadd.f32 1.0, %v3869_v60 }
 0xb6a   :  { %1349 = vrot.lane.b32.xlu0 %v1341_v35, %s3968_s21  ;;  %v1298_v11 = vadd.f32 1.0, %v3871_v61 }
 0xb6b   :  { %v1299_v0 = vmul.f32 0.5, %v1297_v63 }
 0xb6c   :  { %1351 = vrot.lane.b32.xlu1 %v1348_v51, %s3968_s21  ;;  %v1300_v5 = vmul.f32 0.5, %v1298_v11 }
 0xbd8   :  { %v1492_v3 = vpop.permute.xlu0 %1491 }
 0xbd9   :  { %v1497_v4 = vmul.f32 %v1492_v3, %v1299_v0 }
 0xbda   :  { %v1494_v6 = vpop.permute.xlu1 %1493 }
 0xbdb   :  { %v1498_v7 = vmul.f32 %v1494_v6, %v1300_v5  ;;  %1501 = vrot.lane.b32.xlu0 %v1497_v4, %s3968_s21 }
 0xbdc   :  { %v1350_v8 = vpop.permute.xlu0 %1349 }
 0xbdd   :  { %1503 = vrot.lane.b32.xlu1 %v1498_v7, %s3968_s21  ;;  %v1355_v10 = vadd.f32 %v1350_v8, %v4322_v59 }
 0xbde   :  { %v1352_v2 = vpop.permute.xlu1 %1351 }
 0xbdf   :  { %1471 = vrot.lane.b32.xlu0 %v1463_v39, %s3967_s20  ;;  %v1356_v12 = vadd.f32 %v1352_v2, %v4328_v46  ;;  %v1357_v13 = vmul.f32 0.5, %v1355_v10 }
 0xbe1   :  { %1473 = vrot.lane.b32.xlu1 %v1470_v9, %s3967_s20  ;;  %v1358_v14 = vmul.f32 0.5, %v1356_v12  ;;  %3872 = vtanh.f32 %v1357_v13 }
 0xbe3   :  { %3874 = vtanh.f32 %v1358_v14 }
 0xbee   :  { %v3873_v15 = vpop.eup %3872 }
 0xbef   :  { %v1361_v17 = vadd.f32 1.0, %v3873_v15 }
 0xbf0   :  { %v3875_v16 = vpop.eup %3874 }
 0xbf1   :  { %v1362_v19 = vadd.f32 1.0, %v3875_v16  ;;  %v1363_v20 = vmul.f32 0.5, %v1361_v17 }
 0xbf3   :  { %v1364_v22 = vmul.f32 0.5, %v1362_v19  ;;  %v1487_v23 = vmul.f32 %v1363_v20, %v4253_v40 }
 0xbf5   :  { %v1488_v28 = vmul.f32 %v1364_v22, %v4257_v43  ;;  %v3787_v43 = vld [vmem:[%s4739_s1] sm:$0xff]  }
 0xbf6   :  { %3609 = vmatpush3.bf16.msra.mxu0 %v3787_v43 }
 0xbf7   :  { %3622 = vmatprep.subr.bf16.mxu0 %v3964_v1 }
 0xc4d   :  { %v1502_v25 = vpop.permute.xlu0 %1501 }
 0xc4e   :  { %v4344_v26 = vadd.f32 %v1502_v25, %v1487_v23 }
 0xc4f   :  { %v1504_v18 = vpop.permute.xlu1 %1503 }
 0xc50   :  { %3876 = vtanh.f32 %v4344_v26  ;;  %v4348_v29 = vadd.f32 %v1504_v18, %v1488_v28 }
 0xc51   :  { %v1472_v33 = vpop.permute.xlu0 %1471 }
 0xc52   :  { %3878 = vtanh.f32 %v4348_v29  ;;  %v1477_v35 = vadd.f32 %v1472_v33, %v4322_v59 }
 0xc53   :  { %v1474_v34 = vpop.permute.xlu1 %1473 }
 0xc54   :  { %v1478_v36 = vadd.f32 %v1474_v34, %v4328_v46  ;;  %v1479_v37 = vmul.f32 0.5, %v1477_v35 }
 0xc56   :  { %v1480_v38 = vmul.f32 0.5, %v1478_v36  ;;  %3880 = vtanh.f32 %v1479_v37 }
 0xc58   :  { %3882 = vtanh.f32 %v1480_v38 }
 0xc5d   :  { %v3877_v40 = vpop.eup %3876 }
 0xc5e   :  { %1513 = vrot.lane.b32.xlu0 %v3877_v40, %s3966_s17 }
 0xc5f   :  { %v3879_v30 = vpop.eup %3878 }
 0xc60   :  { %1515 = vrot.lane.b32.xlu1 %v3879_v30, %s3966_s17  ;;  %v4419_v30 = vld [vmem:[%s4740_s0 + $0xc] sm:$0x1] }
 0xc62   :  { %1763 = vrot.lane.b32.xlu0 %v3786_v21, %s3966_s17 }
 0xc63   :  { %v3881_v24 = vpop.eup %3880 }
 0xc64   :  { %v1483_v39 = vadd.f32 1.0, %v3881_v24 }
 0xc65   :  { %v3883_v27 = vpop.eup %3882 }
 0xc66   :  { %1699 = vrot.lane.b32.xlu0 %v3786_v21, %s3967_s20  ;;  %v1484_v41 = vadd.f32 1.0, %v3883_v27  ;;  %v1485_v42 = vmul.f32 0.5, %v1483_v39 }
 0xc68   :  { %v1486_v45 = vmul.f32 0.5, %v1484_v41 }
 0xc6a   :  { %1821 = vrot.lane.b32.xlu0 %v3786_v21, %s3968_s21  ;;  %v4413_v21 = vld [vmem:[%s4740_s0 + $0x4] sm:$0x1] }
 0xcd0   :  { %v1514_v44 = vpop.permute.xlu0 %1513 }
 0xcd1   :  { %v1519_v62 = vmul.f32 %v1514_v44, %v1485_v42 }
 0xcd2   :  { %v1516_v47 = vpop.permute.xlu1 %1515 }
 0xcd3   :  { %v1520_v48 = vmul.f32 %v1516_v47, %v1486_v45  ;;  %v1521_v49 = vpack.c.bf16 %v1519_v62, %v1519_v62 }
 0xcd4   :  { %v1764_v56 = vpop.permute.xlu0 %1763 }
 0xcd5   :  { %v1522_v50 = vpack.c.bf16 %v1520_v48, %v1520_v48  ;;  %v1536_v59 = vunpack.c.l.b16 %v1521_v49 }
 0xcd7   :  { %v1537_v51 = vunpack.c.l.b16 %v1522_v50 }
 0xcd8   :  { %v1700_v57 = vpop.permute.xlu0 %1699 }
 0xcd9   :  { %v1538_v52 = vrot.slane %v1537_v51, 7 }
 0xcdb   :  { %v1539_v46 = vsel %vm350_vm3, %v1538_v52, %v1536_v59 }
 0xcdc   :  { %v1540_v55 = vpack.c.b16 %v1539_v46, %v1539_v46  ;;  %v1822_v63 = vpop.permute.xlu0 %1821 }
 0xcde   :  { %1541 = vrot.lane.b32.xlu1 %v1540_v55, %s3968_s21 }
 0xce2   :  { %1761 = vrot.lane.b32.xlu1 %v3787_v43, %s3966_s17 }
 0xce6   :  { %1697 = vrot.lane.b32.xlu1 %v3787_v43, %s3967_s20 }
 0xcea   :  { %1819 = vrot.lane.b32.xlu1 %v3787_v43, %s3968_s21 }
 0xd50   :  { %v1542_v58 = vpop.permute.xlu1 %1541 }
 0xd51   :  { %3603 = vmatmul.mubr.msk.bf16.vlgmr.msra.gmra.mxu1 %vm46_vm2, %v1542_v58  ;;  %3611 = vmatmul.mubr.msk.bf16.vlgmr.msra.gmra.mxu0 %vm46_vm2, %v1542_v58 }
 0xd52   :  { %3623 = vmatpush3.bf16.msra.mxu0 %v1764_v56  ;;  %3615 = vmatpush3.bf16.msra.mxu1 %v1700_v57 }
 0xd53   :  { %3624 = vmatprep.subr.bf16.mxu0 %v3964_v1  ;;  %3616 = vmatprep.subr.bf16.mxu1 %v3964_v1 }
 0xd54   :  { %v1762_v60 = vpop.permute.xlu1 %1761  ;;  %3626 = vmatprep.mubr.msk.bf16.mxu0 %vm3965_vm1, %v3964_v1  ;;  %3618 = vmatprep.mubr.msk.bf16.mxu1 %vm3965_vm1, %v3964_v1 }
 0xd56   :  { %3625 = vmatpush3.bf16.msra.mxu0 %v1762_v60 }
 0xd57   :  { %3638 = vmatprep.subr.bf16.mxu0 %v3964_v1 }
 0xd58   :  { %v1698_v61 = vpop.permute.xlu1 %1697 }
 0xd59   :  { %3617 = vmatpush3.bf16.msra.mxu1 %v1698_v61  ;;  %3627 = vmatmul.mubr.msk.bf16.vlgmr.msra.gmra.mxu0 %vm46_vm2, %v1542_v58 }
 0xd5a   :  { %3630 = vmatprep.subr.bf16.mxu1 %v3964_v1  ;;  %3642 = vmatprep.mubr.msk.bf16.mxu0 %vm3965_vm1, %v3964_v1 }
 0xd5c   :  { %3619 = vmatmul.mubr.msk.bf16.vlgmr.msra.gmra.mxu1 %vm46_vm2, %v1542_v58  ;;  %v1820_v11 = vpop.permute.xlu1 %1819 }
 0xd5d   :  { %3631 = vmatpush3.bf16.msra.mxu1 %v1822_v63  ;;  %3634 = vmatprep.mubr.msk.bf16.mxu1 %vm3965_vm1, %v3964_v1 }
 0xd5e   :  { %3632 = vmatprep.subr.bf16.mxu1 %v3964_v1 }
 0xd61   :  { %3633 = vmatpush3.bf16.msra.mxu1 %v1820_v11 }
 0xd62   :  { %3646 = vmatprep.subr.bf16.mxu1 %v3964_v1 }
 0xd64   :  { %3635 = vmatmul.mubr.msk.bf16.vlgmr.msra.gmra.mxu1 %vm46_vm2, %v1542_v58 }
 0xd65   :  { %3650 = vmatprep.mubr.msk.bf16.mxu1 %vm3965_vm1, %v3964_v1 }
 0xe11   :  { %v1592_v0 = vpop.f32.mrf.mxu1  ;;  %v1677_v3 = vpop.f32.mrf.mxu0 }
 0xe12   :  { %v1593_v4 = vadd.f32 %v4123_v53, %v1592_v0  ;;  %v1684_v36 = vrot.slane %v1677_v3, 1  ;;  %v1687_v37 = vadd.f32 %v1677_v3, %v4413_v21 }
 0xe13   :  { %v3604_v5 = vpop.f32.mrf.mxu1  ;;  %v3612_v6 = vpop.f32.mrf.mxu0 }
 0xe14   :  { %v1605_v7 = vrot.slane %v1593_v4, %v4125_v54  ;;  %v1688_v38 = vadd.f32 %v1684_v36, %v4419_v30  ;;  %v1689_v24 = vmul.f32 0.5, %v1687_v37 }
 0xe15   :  { %v1595_v9 = vpop.f32.mrf.mxu1  ;;  %v1680_v8 = vpop.f32.mrf.mxu0 }
 0xe16   :  { %v1606_v2 = vcombine.high %v1605_v7, %v1605_v7  ;;  %3276 = vst.sshfl [vmem:[%s4743_s4 + $0x3] sm:$0x1 pattern:$0x73625140] %v1605_v7  ;;  %v1690_v27 = vmul.f32 0.5, %v1688_v38  ;;  %v3790_v8 = vld [vmem:[%s4739_s1 + $0x8] sm:$0xff]  }
 0xe17   :  { %v3605_v10 = vpop.f32.mrf.mxu1  ;;  %v3613_v12 = vpop.f32.mrf.mxu0  ;;  %3647 = vmatpush3.bf16.msra.mxu1 %v3790_v8 }
 0xe18   :  { %3277 = vst.sshfl [vmem:[%s4743_s4 + $0xb] sm:$0x1 pattern:$0x73625140] %v1606_v2  ;;  %3648 = vmatprep.subr.bf16.mxu1 %v3964_v1  ;;  %v3792_v10 = vld [vmem:[%s4741_s2 + $0x8] sm:$0xff]   ;;  %v3793_v12 = vld [vmem:[%s4741_s2] sm:$0xff]  }
 0xe19   :  { %v1801_v13 = vpop.f32.mrf.mxu0  ;;  %3639 = vmatpush3.bf16.msra.mxu0 %v3792_v10  ;;  %v4515_v10 = vld [vmem:[%s4740_s0 + $0xd] sm:$0x1] }
 0xe1a   :  { %v1808_v14 = vrot.slane %v1801_v13, 1  ;;  %1809 = vrot.lane.b32.xlu1 %v1801_v13, %s3966_s17  ;;  %3640 = vmatprep.subr.bf16.mxu0 %v3964_v1 }
 0xe1b   :  { %v3628_v53 = vpop.f32.mrf.mxu0 }
 0xe1c   :  { %1811 = vrot.lane.b32.xlu0 %v1808_v14, %s3966_s17  ;;  %v1737_v15 = vpop.f32.mrf.mxu1 }
 0xe1d   :  { %v1804_v16 = vpop.f32.mrf.mxu0  ;;  %v1744_v35 = vrot.slane %v1737_v15, 1  ;;  %3641 = vmatpush3.bf16.msra.mxu0 %v3793_v12 }
 0xe1e   :  { %v3620_v17 = vpop.f32.mrf.mxu1  ;;  %3654 = vmatprep.subr.bf16.mxu0 %v3964_v1 }
 0xe1f   :  { %v3629_v19 = vpop.f32.mrf.mxu0 }
 0xe20   :  { %v1740_v20 = vpop.f32.mrf.mxu1 }
 0xe22   :  { %v3621_v22 = vpop.f32.mrf.mxu1 }
 0xe24   :  { %v1859_v23 = vpop.f32.mrf.mxu1 }
 0xe25   :  { %v1866_v51 = vrot.slane %v1859_v23, 1 }
 0xe26   :  { %v3636_v25 = vpop.f32.mrf.mxu1 }
 0xe28   :  { %v1862_v28 = vpop.f32.mrf.mxu1 }
 0xe2a   :  { %v3637_v18 = vpop.f32.mrf.mxu1 }
 0xe8c   :  { %v1810_v40 = vpop.permute.xlu1 %1809 }
 0xe8d   :  { %v1815_v43 = vadd.f32 %v1810_v40, %v4413_v21 }
 0xe8e   :  { %v1812_v31 = vpop.permute.xlu0 %1811 }
 0xe8f   :  { %3884 = vtanh.f32 %v1815_v43  ;;  %v1816_v32 = vadd.f32 %v1812_v31, %v4419_v30 }
 0xe91   :  { %3886 = vtanh.f32 %v1816_v32 }
 0xe92   :  { %3888 = vtanh.f32 %v1689_v24 }
 0xe93   :  { %3890 = vtanh.f32 %v1690_v27 }
 0xe9c   :  { %v3885_v33 = vpop.eup %3884 }
 0xe9d   :  { %1887 = vrot.lane.b32.xlu1 %v3885_v33, %s3966_s17 }
 0xe9e   :  { %v3887_v34 = vpop.eup %3886 }
 0xe9f   :  { %1889 = vrot.lane.b32.xlu0 %v3887_v34, %s3966_s17  ;;  %v3889_v39 = vpop.eup %3888 }
 0xea0   :  { %v3891_v41 = vpop.eup %3890  ;;  %v1693_v42 = vadd.f32 1.0, %v3889_v39 }
 0xea1   :  { %1745 = vrot.lane.b32.xlu1 %v1737_v15, %s3968_s21  ;;  %v1694_v44 = vadd.f32 1.0, %v3891_v41 }
 0xea2   :  { %v1695_v62 = vmul.f32 0.5, %v1693_v42 }
 0xea3   :  { %1747 = vrot.lane.b32.xlu0 %v1744_v35, %s3968_s21  ;;  %v1696_v48 = vmul.f32 0.5, %v1694_v44  ;;  %v4494_v44 = vld [vmem:[%s4742_s3] ss:$0 sm:$0xff] }
 0xf0f   :  { %v1888_v45 = vpop.permute.xlu1 %1887 }
 0xf10   :  { %v1893_v47 = vmul.f32 %v1888_v45, %v1695_v62 }
 0xf11   :  { %v1890_v49 = vpop.permute.xlu0 %1889 }
 0xf12   :  { %v1894_v50 = vmul.f32 %v1890_v49, %v1696_v48  ;;  %1897 = vrot.lane.b32.xlu1 %v1893_v47, %s3968_s21 }
 0xf13   :  { %v1746_v59 = vpop.permute.xlu1 %1745 }
 0xf14   :  { %1899 = vrot.lane.b32.xlu0 %v1894_v50, %s3968_s21  ;;  %v1751_v46 = vadd.f32 %v1746_v59, %v4413_v21 }
 0xf15   :  { %v1748_v52 = vpop.permute.xlu0 %1747 }
 0xf16   :  { %1867 = vrot.lane.b32.xlu1 %v1859_v23, %s3967_s20  ;;  %v1752_v55 = vadd.f32 %v1748_v52, %v4419_v30  ;;  %v1753_v56 = vmul.f32 0.5, %v1751_v46 }
 0xf18   :  { %1869 = vrot.lane.b32.xlu0 %v1866_v51, %s3967_s20  ;;  %v1754_v57 = vmul.f32 0.5, %v1752_v55  ;;  %3892 = vtanh.f32 %v1753_v56 }
 0xf1a   :  { %3894 = vtanh.f32 %v1754_v57 }
 0xf25   :  { %v3893_v58 = vpop.eup %3892 }
 0xf26   :  { %v1757_v61 = vadd.f32 1.0, %v3893_v58 }
 0xf27   :  { %v3895_v60 = vpop.eup %3894 }
 0xf28   :  { %v1758_v63 = vadd.f32 1.0, %v3895_v60  ;;  %v1759_v11 = vmul.f32 0.5, %v1757_v61 }
 0xf2a   :  { %v1760_v0 = vmul.f32 0.5, %v1758_v63  ;;  %v1883_v3 = vmul.f32 %v1759_v11, %v4344_v26 }
 0xf2c   :  { %v1884_v6 = vmul.f32 %v1760_v0, %v4348_v29  ;;  %v3791_v29 = vld [vmem:[%s4739_s1] sm:$0xff]  }
 0xf2d   :  { %3649 = vmatpush3.bf16.msra.mxu1 %v3791_v29 }
 0xf2e   :  { %3662 = vmatprep.subr.bf16.mxu1 %v3964_v1 }
 0xf84   :  { %v1898_v4 = vpop.permute.xlu1 %1897 }
 0xf85   :  { %v4435_v5 = vadd.f32 %v1898_v4, %v1883_v3 }
 0xf86   :  { %v1900_v7 = vpop.permute.xlu0 %1899 }
 0xf87   :  { %3896 = vtanh.f32 %v4435_v5  ;;  %v4439_v9 = vadd.f32 %v1900_v7, %v1884_v6 }
 0xf88   :  { %v1868_v13 = vpop.permute.xlu1 %1867 }
 0xf89   :  { %3898 = vtanh.f32 %v4439_v9  ;;  %v1873_v53 = vadd.f32 %v1868_v13, %v4413_v21 }
 0xf8a   :  { %v1870_v14 = vpop.permute.xlu0 %1869 }
 0xf8b   :  { %v1874_v15 = vadd.f32 %v1870_v14, %v4419_v30  ;;  %v1875_v16 = vmul.f32 0.5, %v1873_v53 }
 0xf8d   :  { %v1876_v17 = vmul.f32 0.5, %v1874_v15  ;;  %3900 = vtanh.f32 %v1875_v16 }
 0xf8f   :  { %3902 = vtanh.f32 %v1876_v17 }
 0xf94   :  { %v3897_v26 = vpop.eup %3896 }
 0xf95   :  { %1909 = vrot.lane.b32.xlu1 %v3897_v26, %s3966_s17  ;;  %v4509_v26 = vld [vmem:[%s4740_s0 + $0x5] sm:$0x1] }
 0xf96   :  { %v3899_v2 = vpop.eup %3898 }
 0xf97   :  { %1911 = vrot.lane.b32.xlu0 %v3899_v2, %s3966_s17 }
 0xf99   :  { %2159 = vrot.lane.b32.xlu1 %v3790_v8, %s3966_s17 }
 0xf9a   :  { %v3901_v19 = vpop.eup %3900 }
 0xf9b   :  { %v1879_v22 = vadd.f32 1.0, %v3901_v19 }
 0xf9c   :  { %v3903_v20 = vpop.eup %3902 }
 0xf9d   :  { %2095 = vrot.lane.b32.xlu1 %v3790_v8, %s3967_s20  ;;  %v1880_v23 = vadd.f32 1.0, %v3903_v20  ;;  %v1881_v25 = vmul.f32 0.5, %v1879_v22 }
 0xf9f   :  { %v1882_v40 = vmul.f32 0.5, %v1880_v23 }
 0xfa1   :  { %2217 = vrot.lane.b32.xlu1 %v3790_v8, %s3968_s21 }
0x1007   :  { %v1910_v28 = vpop.permute.xlu1 %1909 }
0x1008   :  { %v1915_v18 = vmul.f32 %v1910_v28, %v1881_v25 }
0x1009   :  { %v1912_v43 = vpop.permute.xlu0 %1911 }
0x100a   :  { %v1916_v31 = vmul.f32 %v1912_v43, %v1882_v40  ;;  %v1917_v32 = vpack.c.bf16 %v1915_v18, %v1915_v18 }
0x100b   :  { %v2160_v37 = vpop.permute.xlu1 %2159 }
0x100c   :  { %v1918_v33 = vpack.c.bf16 %v1916_v31, %v1916_v31  ;;  %v1932_v21 = vunpack.c.l.b16 %v1917_v32 }
0x100e   :  { %v1933_v34 = vunpack.c.l.b16 %v1918_v33 }
0x100f   :  { %v2096_v38 = vpop.permute.xlu1 %2095 }
0x1010   :  { %v1934_v35 = vrot.slane %v1933_v34, 7 }
0x1012   :  { %v1935_v30 = vsel %vm350_vm3, %v1934_v35, %v1932_v21 }
0x1013   :  { %v1936_v36 = vpack.c.b16 %v1935_v30, %v1935_v30  ;;  %v2218_v41 = vpop.permute.xlu1 %2217 }
0x1015   :  { %1937 = vrot.lane.b32.xlu0 %v1936_v36, %s3968_s21 }
0x1019   :  { %2157 = vrot.lane.b32.xlu0 %v3791_v29, %s3966_s17 }
0x101d   :  { %2093 = vrot.lane.b32.xlu0 %v3791_v29, %s3967_s20 }
0x1021   :  { %2215 = vrot.lane.b32.xlu0 %v3791_v29, %s3968_s21 }
0x1087   :  { %v1938_v24 = vpop.permute.xlu0 %1937 }
0x1088   :  { %3643 = vmatmul.mubr.msk.bf16.vlgmr.msra.gmra.mxu0 %vm46_vm2, %v1938_v24  ;;  %3651 = vmatmul.mubr.msk.bf16.vlgmr.msra.gmra.mxu1 %vm46_vm2, %v1938_v24 }
0x1089   :  { %3663 = vmatpush3.bf16.msra.mxu1 %v2160_v37  ;;  %3655 = vmatpush3.bf16.msra.mxu0 %v2096_v38 }
0x108a   :  { %3664 = vmatprep.subr.bf16.mxu1 %v3964_v1  ;;  %3666 = vmatprep.mubr.msk.bf16.mxu1 %vm3965_vm1, %v3964_v1 }
0x108b   :  { %v2158_v27 = vpop.permute.xlu0 %2157  ;;  %3656 = vmatprep.subr.bf16.mxu0 %v3964_v1  ;;  %3658 = vmatprep.mubr.msk.bf16.mxu0 %vm3965_vm1, %v3964_v1 }
0x108d   :  { %3665 = vmatpush3.bf16.msra.mxu1 %v2158_v27 }
0x108e   :  { %3678 = vmatprep.subr.bf16.mxu1 %v3964_v1 }
0x108f   :  { %v2094_v39 = vpop.permute.xlu0 %2093 }
0x1090   :  { %3657 = vmatpush3.bf16.msra.mxu0 %v2094_v39  ;;  %3667 = vmatmul.mubr.msk.bf16.vlgmr.msra.gmra.mxu1 %vm46_vm2, %v1938_v24 }
0x1091   :  { %3670 = vmatprep.subr.bf16.mxu0 %v3964_v1  ;;  %3682 = vmatprep.mubr.msk.bf16.mxu1 %vm3965_vm1, %v3964_v1 }
0x1093   :  { %3659 = vmatmul.mubr.msk.bf16.vlgmr.msra.gmra.mxu0 %vm46_vm2, %v1938_v24  ;;  %v2216_v42 = vpop.permute.xlu0 %2215 }
0x1094   :  { %3671 = vmatpush3.bf16.msra.mxu0 %v2218_v41  ;;  %3674 = vmatprep.mubr.msk.bf16.mxu0 %vm3965_vm1, %v3964_v1 }
0x1095   :  { %3672 = vmatprep.subr.bf16.mxu0 %v3964_v1 }
0x1098   :  { %3673 = vmatpush3.bf16.msra.mxu0 %v2216_v42 }
0x1099   :  { %3686 = vmatprep.subr.bf16.mxu0 %v3964_v1 }
0x109b   :  { %3675 = vmatmul.mubr.msk.bf16.vlgmr.msra.gmra.mxu0 %vm46_vm2, %v1938_v24 }
0x109c   :  { %3690 = vmatprep.mubr.msk.bf16.mxu0 %vm3965_vm1, %v3964_v1 }
0x1148   :  { %v1988_v62 = vpop.f32.mrf.mxu0  ;;  %v2073_v45 = vpop.f32.mrf.mxu1 }
0x1149   :  { %v1989_v47 = vadd.f32 %v4494_v44, %v1988_v62  ;;  %v2080_v16 = vrot.slane %v2073_v45, 1  ;;  %v2083_v17 = vadd.f32 %v2073_v45, %v4509_v26 }
0x114a   :  { %v3644_v48 = vpop.f32.mrf.mxu0  ;;  %v3652_v49 = vpop.f32.mrf.mxu1 }
0x114b   :  { %v2001_v50 = vrot.slane %v1989_v47, %v4125_v54  ;;  %v2084_v19 = vadd.f32 %v2080_v16, %v4515_v10  ;;  %v2085_v20 = vmul.f32 0.5, %v2083_v17 }
0x114c   :  { %v1991_v51 = vpop.f32.mrf.mxu0  ;;  %v2076_v59 = vpop.f32.mrf.mxu1 }
0x114d   :  { %v2002_v52 = vcombine.high %v2001_v50, %v2001_v50  ;;  %3288 = vst.sshfl [vmem:[%s4743_s4 + $0x4] sm:$0x1 pattern:$0x73625140] %v2001_v50  ;;  %v2086_v22 = vmul.f32 0.5, %v2084_v19 }
0x114e   :  { %v3645_v46 = vpop.f32.mrf.mxu0  ;;  %v3653_v55 = vpop.f32.mrf.mxu1 }
0x114f   :  { %3289 = vst.sshfl [vmem:[%s4743_s4 + $0xc] sm:$0x1 pattern:$0x73625140] %v2002_v52  ;;  %v3794_v52 = vld [vmem:[%s4739_s1 + $0x8] sm:$0xff]  }
0x1150   :  { %v2197_v56 = vpop.f32.mrf.mxu1  ;;  %3687 = vmatpush3.bf16.msra.mxu0 %v3794_v52  ;;  %v3796_v55 = vld [vmem:[%s4741_s2 + $0x8] sm:$0xff]  }
0x1151   :  { %v2204_v57 = vrot.slane %v2197_v56, 1  ;;  %2205 = vrot.lane.b32.xlu0 %v2197_v56, %s3966_s17  ;;  %3688 = vmatprep.subr.bf16.mxu0 %v3964_v1  ;;  %v3797_v56 = vld [vmem:[%s4741_s2] sm:$0xff]  }
0x1152   :  { %v3668_v58 = vpop.f32.mrf.mxu1  ;;  %3679 = vmatpush3.bf16.msra.mxu1 %v3796_v55  ;;  %v4606_v55 = vld [vmem:[%s4740_s0 + $0xe] sm:$0x1] }
0x1153   :  { %2207 = vrot.lane.b32.xlu1 %v2204_v57, %s3966_s17  ;;  %v2133_v60 = vpop.f32.mrf.mxu0  ;;  %3680 = vmatprep.subr.bf16.mxu1 %v3964_v1 }
0x1154   :  { %v2200_v61 = vpop.f32.mrf.mxu1  ;;  %v2140_v15 = vrot.slane %v2133_v60, 1 }
0x1155   :  { %v3660_v63 = vpop.f32.mrf.mxu0 }
0x1156   :  { %v3669_v11 = vpop.f32.mrf.mxu1  ;;  %3681 = vmatpush3.bf16.msra.mxu1 %v3797_v56 }
0x1157   :  { %v2136_v0 = vpop.f32.mrf.mxu0  ;;  %3694 = vmatprep.subr.bf16.mxu1 %v3964_v1 }
0x1159   :  { %v3661_v3 = vpop.f32.mrf.mxu0 }
0x115b   :  { %v2255_v4 = vpop.f32.mrf.mxu0 }
0x115c   :  { %v2262_v21 = vrot.slane %v2255_v4, 1 }
0x115d   :  { %v3676_v6 = vpop.f32.mrf.mxu0 }
0x115f   :  { %v2258_v7 = vpop.f32.mrf.mxu0 }
0x1161   :  { %v3677_v8 = vpop.f32.mrf.mxu0 }
0x11c3   :  { %v2206_v29 = vpop.permute.xlu0 %2205 }
0x11c4   :  { %v2211_v2 = vadd.f32 %v2206_v29, %v4509_v26 }
0x11c5   :  { %v2208_v12 = vpop.permute.xlu1 %2207 }
0x11c6   :  { %3904 = vtanh.f32 %v2211_v2  ;;  %v2212_v13 = vadd.f32 %v2208_v12, %v4515_v10 }
0x11c8   :  { %3906 = vtanh.f32 %v2212_v13 }
0x11c9   :  { %3908 = vtanh.f32 %v2085_v20 }
0x11ca   :  { %3910 = vtanh.f32 %v2086_v22 }
0x11d3   :  { %v3905_v14 = vpop.eup %3904 }
0x11d4   :  { %2283 = vrot.lane.b32.xlu0 %v3905_v14, %s3966_s17 }
0x11d5   :  { %v3907_v53 = vpop.eup %3906 }
0x11d6   :  { %2285 = vrot.lane.b32.xlu1 %v3907_v53, %s3966_s17  ;;  %v3909_v23 = vpop.eup %3908 }
0x11d7   :  { %v3911_v25 = vpop.eup %3910  ;;  %v2089_v28 = vadd.f32 1.0, %v3909_v23 }
0x11d8   :  { %2141 = vrot.lane.b32.xlu0 %v2133_v60, %s3968_s21  ;;  %v2090_v18 = vadd.f32 1.0, %v3911_v25 }
0x11d9   :  { %v2091_v40 = vmul.f32 0.5, %v2089_v28 }
0x11da   :  { %2143 = vrot.lane.b32.xlu1 %v2140_v15, %s3968_s21  ;;  %v2092_v32 = vmul.f32 0.5, %v2090_v18 }
0x1246   :  { %v2284_v43 = vpop.permute.xlu0 %2283 }
0x1247   :  { %v2289_v31 = vmul.f32 %v2284_v43, %v2091_v40 }
0x1248   :  { %v2286_v33 = vpop.permute.xlu1 %2285 }
0x1249   :  { %v2290_v34 = vmul.f32 %v2286_v33, %v2092_v32  ;;  %2293 = vrot.lane.b32.xlu0 %v2289_v31, %s3968_s21 }
0x124a   :  { %v2142_v35 = vpop.permute.xlu0 %2141 }
0x124b   :  { %2295 = vrot.lane.b32.xlu1 %v2290_v34, %s3968_s21  ;;  %v2147_v36 = vadd.f32 %v2142_v35, %v4509_v26 }
0x124c   :  { %v2144_v30 = vpop.permute.xlu1 %2143 }
0x124d   :  { %2263 = vrot.lane.b32.xlu0 %v2255_v4, %s3967_s20  ;;  %v2148_v37 = vadd.f32 %v2144_v30, %v4515_v10  ;;  %v2149_v38 = vmul.f32 0.5, %v2147_v36 }
0x124f   :  { %2265 = vrot.lane.b32.xlu1 %v2262_v21, %s3967_s20  ;;  %v2150_v24 = vmul.f32 0.5, %v2148_v37  ;;  %3912 = vtanh.f32 %v2149_v38 }
0x1251   :  { %3914 = vtanh.f32 %v2150_v24 }
0x125c   :  { %v3913_v27 = vpop.eup %3912 }
0x125d   :  { %v2153_v41 = vadd.f32 1.0, %v3913_v27 }
0x125e   :  { %v3915_v39 = vpop.eup %3914 }
0x125f   :  { %v2154_v42 = vadd.f32 1.0, %v3915_v39  ;;  %v2155_v62 = vmul.f32 0.5, %v2153_v41 }
0x1261   :  { %v2156_v45 = vmul.f32 0.5, %v2154_v42  ;;  %v2279_v47 = vmul.f32 %v2155_v62, %v4435_v5 }
0x1263   :  { %v2280_v50 = vmul.f32 %v2156_v45, %v4439_v9  ;;  %v3795_v9 = vld [vmem:[%s4739_s1] sm:$0xff]  }
0x1264   :  { %3689 = vmatpush3.bf16.msra.mxu0 %v3795_v9 }
0x1265   :  { %3702 = vmatprep.subr.bf16.mxu0 %v3964_v1 }
0x12bb   :  { %v2294_v48 = vpop.permute.xlu0 %2293 }
0x12bc   :  { %v4531_v49 = vadd.f32 %v2294_v48, %v2279_v47 }
0x12bd   :  { %v2296_v51 = vpop.permute.xlu1 %2295 }
0x12be   :  { %3916 = vtanh.f32 %v4531_v49  ;;  %v4535_v59 = vadd.f32 %v2296_v51, %v2280_v50 }
0x12bf   :  { %v2264_v57 = vpop.permute.xlu0 %2263 }
0x12c0   :  { %3918 = vtanh.f32 %v4535_v59  ;;  %v2269_v60 = vadd.f32 %v2264_v57, %v4509_v26 }
0x12c1   :  { %v2266_v58 = vpop.permute.xlu1 %2265 }
0x12c2   :  { %v2270_v61 = vadd.f32 %v2266_v58, %v4515_v10  ;;  %v2271_v63 = vmul.f32 0.5, %v2269_v60 }
0x12c4   :  { %v2272_v11 = vmul.f32 0.5, %v2270_v61  ;;  %3920 = vtanh.f32 %v2271_v63 }
0x12c6   :  { %3922 = vtanh.f32 %v2272_v11 }
0x12cb   :  { %v3917_v46 = vpop.eup %3916 }
0x12cc   :  { %2305 = vrot.lane.b32.xlu0 %v3917_v46, %s3966_s17  ;;  %v4600_v46 = vld [vmem:[%s4740_s0 + $0x6] sm:$0x1] }
0x12cd   :  { %v3919_v5 = vpop.eup %3918 }
0x12ce   :  { %2307 = vrot.lane.b32.xlu1 %v3919_v5, %s3966_s17 }
0x12d0   :  { %2555 = vrot.lane.b32.xlu0 %v3794_v52, %s3966_s17 }
0x12d1   :  { %v3921_v0 = vpop.eup %3920 }
0x12d2   :  { %v2275_v4 = vadd.f32 1.0, %v3921_v0 }
0x12d3   :  { %v3923_v3 = vpop.eup %3922 }
0x12d4   :  { %2491 = vrot.lane.b32.xlu0 %v3794_v52, %s3967_s20  ;;  %v2276_v6 = vadd.f32 1.0, %v3923_v3  ;;  %v2277_v7 = vmul.f32 0.5, %v2275_v4 }
0x12d6   :  { %v2278_v2 = vmul.f32 0.5, %v2276_v6 }
0x12d8   :  { %2613 = vrot.lane.b32.xlu0 %v3794_v52, %s3968_s21 }
0x133e   :  { %v2306_v8 = vpop.permute.xlu0 %2305 }
0x133f   :  { %v2311_v29 = vmul.f32 %v2306_v8, %v2277_v7 }
0x1340   :  { %v2308_v12 = vpop.permute.xlu1 %2307 }
0x1341   :  { %v2312_v13 = vmul.f32 %v2308_v12, %v2278_v2  ;;  %v2313_v14 = vpack.c.bf16 %v2311_v29, %v2311_v29 }
0x1342   :  { %v2556_v19 = vpop.permute.xlu0 %2555 }
0x1343   :  { %v2314_v53 = vpack.c.bf16 %v2312_v13, %v2312_v13  ;;  %v2328_v26 = vunpack.c.l.b16 %v2313_v14 }
0x1345   :  { %v2329_v15 = vunpack.c.l.b16 %v2314_v53 }
0x1346   :  { %v2492_v20 = vpop.permute.xlu0 %2491 }
0x1347   :  { %v2330_v16 = vrot.slane %v2329_v15, 7 }
0x1349   :  { %v2331_v10 = vsel %vm350_vm3, %v2330_v16, %v2328_v26 }
0x134a   :  { %v2332_v17 = vpack.c.b16 %v2331_v10, %v2331_v10  ;;  %v2614_v28 = vpop.permute.xlu0 %2613 }
0x134c   :  { %2333 = vrot.lane.b32.xlu1 %v2332_v17, %s3968_s21 }
0x1350   :  { %2553 = vrot.lane.b32.xlu1 %v3795_v9, %s3966_s17 }
0x1354   :  { %2489 = vrot.lane.b32.xlu1 %v3795_v9, %s3967_s20 }
0x1358   :  { %2611 = vrot.lane.b32.xlu1 %v3795_v9, %s3968_s21 }
0x13be   :  { %v2334_v22 = vpop.permute.xlu1 %2333 }
0x13bf   :  { %3683 = vmatmul.mubr.msk.bf16.vlgmr.msra.gmra.mxu1 %vm46_vm2, %v2334_v22  ;;  %3691 = vmatmul.mubr.msk.bf16.vlgmr.msra.gmra.mxu0 %vm46_vm2, %v2334_v22 }
0x13c0   :  { %3703 = vmatpush3.bf16.msra.mxu0 %v2556_v19  ;;  %3695 = vmatpush3.bf16.msra.mxu1 %v2492_v20 }
0x13c1   :  { %3704 = vmatprep.subr.bf16.mxu0 %v3964_v1  ;;  %3696 = vmatprep.subr.bf16.mxu1 %v3964_v1 }
0x13c2   :  { %v2554_v23 = vpop.permute.xlu1 %2553  ;;  %3706 = vmatprep.mubr.msk.bf16.mxu0 %vm3965_vm1, %v3964_v1  ;;  %3698 = vmatprep.mubr.msk.bf16.mxu1 %vm3965_vm1, %v3964_v1 }
0x13c4   :  { %3705 = vmatpush3.bf16.msra.mxu0 %v2554_v23 }
0x13c5   :  { %3718 = vmatprep.subr.bf16.mxu0 %v3964_v1 }
0x13c6   :  { %v2490_v25 = vpop.permute.xlu1 %2489 }
0x13c7   :  { %3697 = vmatpush3.bf16.msra.mxu1 %v2490_v25  ;;  %3707 = vmatmul.mubr.msk.bf16.vlgmr.msra.gmra.mxu0 %vm46_vm2, %v2334_v22 }
0x13c8   :  { %3710 = vmatprep.subr.bf16.mxu1 %v3964_v1  ;;  %3722 = vmatprep.mubr.msk.bf16.mxu0 %vm3965_vm1, %v3964_v1 }
0x13ca   :  { %3699 = vmatmul.mubr.msk.bf16.vlgmr.msra.gmra.mxu1 %vm46_vm2, %v2334_v22  ;;  %v2612_v18 = vpop.permute.xlu1 %2611 }
0x13cb   :  { %3711 = vmatpush3.bf16.msra.mxu1 %v2614_v28  ;;  %3714 = vmatprep.mubr.msk.bf16.mxu1 %vm3965_vm1, %v3964_v1 }
0x13cc   :  { %3712 = vmatprep.subr.bf16.mxu1 %v3964_v1 }
0x13cf   :  { %3713 = vmatpush3.bf16.msra.mxu1 %v2612_v18 }
0x13d0   :  { %3726 = vmatprep.subr.bf16.mxu1 %v3964_v1 }
0x13d2   :  { %3715 = vmatmul.mubr.msk.bf16.vlgmr.msra.gmra.mxu1 %vm46_vm2, %v2334_v22 }
0x13d3   :  { %3730 = vmatprep.mubr.msk.bf16.mxu1 %vm3965_vm1, %v3964_v1 }
0x147f   :  { %v2384_v40 = vpop.f32.mrf.mxu1  ;;  %v2469_v43 = vpop.f32.mrf.mxu0 }
0x1480   :  { %v2385_v31 = vadd.f32 %v4494_v44, %v2384_v40  ;;  %v2476_v63 = vrot.slane %v2469_v43, 1  ;;  %v2479_v11 = vadd.f32 %v2469_v43, %v4600_v46 }
0x1481   :  { %v3684_v32 = vpop.f32.mrf.mxu1  ;;  %v3692_v33 = vpop.f32.mrf.mxu0 }
0x1482   :  { %v2397_v34 = vrot.slane %v2385_v31, %v4125_v54  ;;  %v2480_v0 = vadd.f32 %v2476_v63, %v4606_v55  ;;  %v2481_v3 = vmul.f32 0.5, %v2479_v11 }
0x1483   :  { %v2387_v21 = vpop.f32.mrf.mxu1  ;;  %v2472_v35 = vpop.f32.mrf.mxu0 }
0x1484   :  { %v2398_v30 = vcombine.high %v2397_v34, %v2397_v34  ;;  %3300 = vst.sshfl [vmem:[%s4743_s4 + $0x5] sm:$0x1 pattern:$0x73625140] %v2397_v34  ;;  %v2482_v4 = vmul.f32 0.5, %v2480_v0 }
0x1485   :  { %v3685_v36 = vpop.f32.mrf.mxu1  ;;  %v3693_v37 = vpop.f32.mrf.mxu0 }
0x1486   :  { %3301 = vst.sshfl [vmem:[%s4743_s4 + $0xd] sm:$0x1 pattern:$0x73625140] %v2398_v30  ;;  %v3798_v30 = vld [vmem:[%s4739_s1 + $0x8] sm:$0xff]  }
0x1487   :  { %v2593_v38 = vpop.f32.mrf.mxu0  ;;  %3727 = vmatpush3.bf16.msra.mxu1 %v3798_v30  ;;  %v3800_v37 = vld [vmem:[%s4741_s2 + $0x8] sm:$0xff]  }
0x1488   :  { %v2600_v24 = vrot.slane %v2593_v38, 1  ;;  %2601 = vrot.lane.b32.xlu1 %v2593_v38, %s3966_s17  ;;  %3728 = vmatprep.subr.bf16.mxu1 %v3964_v1  ;;  %v3801_v38 = vld [vmem:[%s4741_s2] sm:$0xff]  }
0x1489   :  { %v3708_v27 = vpop.f32.mrf.mxu0  ;;  %3719 = vmatpush3.bf16.msra.mxu0 %v3800_v37  ;;  %v4694_v37 = vld [vmem:[%s4740_s0 + $0xf] sm:$0x1] }
0x148a   :  { %2603 = vrot.lane.b32.xlu0 %v2600_v24, %s3966_s17  ;;  %v2529_v39 = vpop.f32.mrf.mxu1  ;;  %3720 = vmatprep.subr.bf16.mxu0 %v3964_v1 }
0x148b   :  { %v2596_v41 = vpop.f32.mrf.mxu0  ;;  %v2536_v61 = vrot.slane %v2529_v39, 1 }
0x148c   :  { %v3700_v42 = vpop.f32.mrf.mxu1 }
0x148d   :  { %v3709_v62 = vpop.f32.mrf.mxu0  ;;  %3721 = vmatpush3.bf16.msra.mxu0 %v3801_v38 }
0x148e   :  { %v2532_v45 = vpop.f32.mrf.mxu1  ;;  %3734 = vmatprep.subr.bf16.mxu0 %v3964_v1 }
0x1490   :  { %v3701_v47 = vpop.f32.mrf.mxu1 }
0x1492   :  { %v2651_v48 = vpop.f32.mrf.mxu1 }
0x1493   :  { %v2658_v26 = vrot.slane %v2651_v48, 1 }
0x1494   :  { %v3716_v50 = vpop.f32.mrf.mxu1 }
0x1496   :  { %v2654_v51 = vpop.f32.mrf.mxu1 }
0x1498   :  { %v3717_v52 = vpop.f32.mrf.mxu1 }
0x14fa   :  { %v2602_v5 = vpop.permute.xlu1 %2601 }
0x14fb   :  { %v2607_v9 = vadd.f32 %v2602_v5, %v4600_v46 }
0x14fc   :  { %v2604_v56 = vpop.permute.xlu0 %2603 }
0x14fd   :  { %3924 = vtanh.f32 %v2607_v9  ;;  %v2608_v57 = vadd.f32 %v2604_v56, %v4606_v55 }
0x14ff   :  { %3926 = vtanh.f32 %v2608_v57 }
0x1500   :  { %3928 = vtanh.f32 %v2481_v3 }
0x1501   :  { %3930 = vtanh.f32 %v2482_v4 }
0x150a   :  { %v3925_v58 = vpop.eup %3924 }
0x150b   :  { %2679 = vrot.lane.b32.xlu1 %v3925_v58, %s3966_s17 }
0x150c   :  { %v3927_v60 = vpop.eup %3926 }
0x150d   :  { %2681 = vrot.lane.b32.xlu0 %v3927_v60, %s3966_s17  ;;  %v3929_v6 = vpop.eup %3928 }
0x150e   :  { %v3931_v7 = vpop.eup %3930  ;;  %v2485_v8 = vadd.f32 1.0, %v3929_v6 }
0x150f   :  { %2537 = vrot.lane.b32.xlu1 %v2529_v39, %s3968_s21  ;;  %v2486_v29 = vadd.f32 1.0, %v3931_v7 }
0x1510   :  { %v2487_v2 = vmul.f32 0.5, %v2485_v8 }
0x1511   :  { %2539 = vrot.lane.b32.xlu0 %v2536_v61, %s3968_s21  ;;  %v2488_v14 = vmul.f32 0.5, %v2486_v29 }
0x157d   :  { %v2680_v12 = vpop.permute.xlu1 %2679 }
0x157e   :  { %v2685_v13 = vmul.f32 %v2680_v12, %v2487_v2 }
0x157f   :  { %v2682_v53 = vpop.permute.xlu0 %2681 }
0x1580   :  { %v2686_v15 = vmul.f32 %v2682_v53, %v2488_v14  ;;  %2689 = vrot.lane.b32.xlu1 %v2685_v13, %s3968_s21 }
0x1581   :  { %v2538_v16 = vpop.permute.xlu1 %2537 }
0x1582   :  { %2691 = vrot.lane.b32.xlu0 %v2686_v15, %s3968_s21  ;;  %v2543_v17 = vadd.f32 %v2538_v16, %v4600_v46 }
0x1583   :  { %v2540_v10 = vpop.permute.xlu0 %2539 }
0x1584   :  { %2659 = vrot.lane.b32.xlu1 %v2651_v48, %s3967_s20  ;;  %v2544_v19 = vadd.f32 %v2540_v10, %v4606_v55  ;;  %v2545_v20 = vmul.f32 0.5, %v2543_v17 }
0x1586   :  { %2661 = vrot.lane.b32.xlu0 %v2658_v26, %s3967_s20  ;;  %v2546_v22 = vmul.f32 0.5, %v2544_v19  ;;  %3932 = vtanh.f32 %v2545_v20 }
0x1588   :  { %3934 = vtanh.f32 %v2546_v22 }
0x1593   :  { %v3933_v23 = vpop.eup %3932 }
0x1594   :  { %v2549_v28 = vadd.f32 1.0, %v3933_v23 }
0x1595   :  { %v3935_v25 = vpop.eup %3934 }
0x1596   :  { %v2550_v18 = vadd.f32 1.0, %v3935_v25  ;;  %v2551_v40 = vmul.f32 0.5, %v2549_v28 }
0x1598   :  { %v2552_v43 = vmul.f32 0.5, %v2550_v18  ;;  %v2675_v31 = vmul.f32 %v2551_v40, %v4531_v49 }
0x159a   :  { %v2676_v34 = vmul.f32 %v2552_v43, %v4535_v59  ;;  %v3799_v59 = vld [vmem:[%s4739_s1] sm:$0xff]  }
0x159b   :  { %3729 = vmatpush3.bf16.msra.mxu1 %v3799_v59 }
0x159c   :  { %3742 = vmatprep.subr.bf16.mxu1 %v3964_v1 }
0x15f2   :  { %v2690_v32 = vpop.permute.xlu1 %2689 }
0x15f3   :  { %v4622_v33 = vadd.f32 %v2690_v32, %v2675_v31 }
0x15f4   :  { %v2692_v21 = vpop.permute.xlu0 %2691 }
0x15f5   :  { %3936 = vtanh.f32 %v4622_v33  ;;  %v4626_v35 = vadd.f32 %v2692_v21, %v2676_v34 }
0x15f6   :  { %v2660_v24 = vpop.permute.xlu1 %2659 }
0x15f7   :  { %3938 = vtanh.f32 %v4626_v35  ;;  %v2665_v39 = vadd.f32 %v2660_v24, %v4600_v46 }
0x15f8   :  { %v2662_v27 = vpop.permute.xlu0 %2661 }
0x15f9   :  { %v2666_v41 = vadd.f32 %v2662_v27, %v4606_v55  ;;  %v2667_v42 = vmul.f32 0.5, %v2665_v39 }
0x15fb   :  { %v2668_v62 = vmul.f32 0.5, %v2666_v41  ;;  %3940 = vtanh.f32 %v2667_v42 }
0x15fd   :  { %3942 = vtanh.f32 %v2668_v62 }
0x1602   :  { %v3937_v36 = vpop.eup %3936 }
0x1603   :  { %2701 = vrot.lane.b32.xlu1 %v3937_v36, %s3966_s17  ;;  %v4688_v36 = vld [vmem:[%s4740_s0 + $0x7] sm:$0x1] }
0x1604   :  { %v3939_v49 = vpop.eup %3938 }
0x1605   :  { %2703 = vrot.lane.b32.xlu0 %v3939_v49, %s3966_s17 }
0x1607   :  { %2951 = vrot.lane.b32.xlu1 %v3798_v30, %s3966_s17 }
0x1608   :  { %v3941_v45 = vpop.eup %3940 }
0x1609   :  { %v2671_v48 = vadd.f32 1.0, %v3941_v45 }
0x160a   :  { %v3943_v47 = vpop.eup %3942 }
0x160b   :  { %2887 = vrot.lane.b32.xlu1 %v3798_v30, %s3967_s20  ;;  %v2672_v50 = vadd.f32 1.0, %v3943_v47  ;;  %v2673_v51 = vmul.f32 0.5, %v2671_v48 }
0x160d   :  { %v2674_v9 = vmul.f32 0.5, %v2672_v50 }
0x160f   :  { %3009 = vrot.lane.b32.xlu1 %v3798_v30, %s3968_s21 }
0x1675   :  { %v2702_v52 = vpop.permute.xlu1 %2701 }
0x1676   :  { %v2707_v5 = vmul.f32 %v2702_v52, %v2673_v51 }
0x1677   :  { %v2704_v56 = vpop.permute.xlu0 %2703 }
0x1678   :  { %v2708_v57 = vmul.f32 %v2704_v56, %v2674_v9  ;;  %v2709_v58 = vpack.c.bf16 %v2707_v5, %v2707_v5 }
0x1679   :  { %v2952_v0 = vpop.permute.xlu1 %2951 }
0x167a   :  { %v2710_v60 = vpack.c.bf16 %v2708_v57, %v2708_v57  ;;  %v2724_v46 = vunpack.c.l.b16 %v2709_v58 }
0x167c   :  { %v2725_v61 = vunpack.c.l.b16 %v2710_v60 }
0x167d   :  { %v2888_v3 = vpop.permute.xlu1 %2887 }
0x167e   :  { %v2726_v63 = vrot.slane %v2725_v61, 7 }
0x1680   :  { %v2727_v55 = vsel %vm350_vm3, %v2726_v63, %v2724_v46 }
0x1681   :  { %v2728_v11 = vpack.c.b16 %v2727_v55, %v2727_v55  ;;  %v3010_v8 = vpop.permute.xlu1 %3009 }
0x1683   :  { %2729 = vrot.lane.b32.xlu0 %v2728_v11, %s3968_s21 }
0x1687   :  { %2949 = vrot.lane.b32.xlu0 %v3799_v59, %s3966_s17 }
0x168b   :  { %2885 = vrot.lane.b32.xlu0 %v3799_v59, %s3967_s20 }
0x168f   :  { %3007 = vrot.lane.b32.xlu0 %v3799_v59, %s3968_s21 }
0x16f5   :  { %v2730_v4 = vpop.permute.xlu0 %2729 }
0x16f6   :  { %3723 = vmatmul.mubr.msk.bf16.vlgmr.msra.gmra.mxu0 %vm46_vm2, %v2730_v4  ;;  %3731 = vmatmul.mubr.msk.bf16.vlgmr.msra.gmra.mxu1 %vm46_vm2, %v2730_v4 }
0x16f7   :  { %3743 = vmatpush3.bf16.msra.mxu1 %v2952_v0  ;;  %3735 = vmatpush3.bf16.msra.mxu0 %v2888_v3 }
0x16f8   :  { %3744 = vmatprep.subr.bf16.mxu1 %v3964_v1  ;;  %3746 = vmatprep.mubr.msk.bf16.mxu1 %vm3965_vm1, %v3964_v1 }
0x16f9   :  { %v2950_v6 = vpop.permute.xlu0 %2949  ;;  %3736 = vmatprep.subr.bf16.mxu0 %v3964_v1  ;;  %3738 = vmatprep.mubr.msk.bf16.mxu0 %vm3965_vm1, %v3964_v1 }
0x16fb   :  { %3745 = vmatpush3.bf16.msra.mxu1 %v2950_v6 }
0x16fc   :  { %3758 = vmatprep.subr.bf16.mxu1 %v3964_v1 }
0x16fd   :  { %v2886_v7 = vpop.permute.xlu0 %2885 }
0x16fe   :  { %3737 = vmatpush3.bf16.msra.mxu0 %v2886_v7  ;;  %3747 = vmatmul.mubr.msk.bf16.vlgmr.msra.gmra.mxu1 %vm46_vm2, %v2730_v4 }
0x16ff   :  { %3750 = vmatprep.subr.bf16.mxu0 %v3964_v1  ;;  %3762 = vmatprep.mubr.msk.bf16.mxu1 %vm3965_vm1, %v3964_v1 }
0x1701   :  { %3739 = vmatmul.mubr.msk.bf16.vlgmr.msra.gmra.mxu0 %vm46_vm2, %v2730_v4  ;;  %v3008_v29 = vpop.permute.xlu0 %3007 }
0x1702   :  { %3751 = vmatpush3.bf16.msra.mxu0 %v3010_v8  ;;  %3754 = vmatprep.mubr.msk.bf16.mxu0 %vm3965_vm1, %v3964_v1 }
0x1703   :  { %3752 = vmatprep.subr.bf16.mxu0 %v3964_v1 }
0x1706   :  { %3753 = vmatpush3.bf16.msra.mxu0 %v3008_v29 }
0x1709   :  { %3755 = vmatmul.mubr.msk.bf16.vlgmr.msra.gmra.mxu0 %vm46_vm2, %v2730_v4 }
0x17b6   :  { %v2780_v2 = vpop.f32.mrf.mxu0  ;;  %v2865_v12 = vpop.f32.mrf.mxu1 }
0x17b7   :  { %v2781_v13 = vadd.f32 %v4494_v44, %v2780_v2  ;;  %v2872_v42 = vrot.slane %v2865_v12, 1  ;;  %v2875_v62 = vadd.f32 %v2865_v12, %v4688_v36 }
0x17b8   :  { %v3724_v14 = vpop.f32.mrf.mxu0  ;;  %v3732_v53 = vpop.f32.mrf.mxu1 }
0x17b9   :  { %v2793_v15 = vrot.slane %v2781_v13, %v4125_v54  ;;  %v2876_v45 = vadd.f32 %v2872_v42, %v4694_v37  ;;  %v2877_v47 = vmul.f32 0.5, %v2875_v62 }
0x17ba   :  { %v2783_v26 = vpop.f32.mrf.mxu0  ;;  %v2868_v16 = vpop.f32.mrf.mxu1 }
0x17bb   :  { %v2794_v10 = vcombine.high %v2793_v15, %v2793_v15  ;;  %3312 = vst.sshfl [vmem:[%s4743_s4 + $0x6] sm:$0x1 pattern:$0x73625140] %v2793_v15  ;;  %v2878_v48 = vmul.f32 0.5, %v2876_v45 }
0x17bc   :  { %v3725_v17 = vpop.f32.mrf.mxu0  ;;  %v3733_v19 = vpop.f32.mrf.mxu1 }
0x17bd   :  { %3313 = vst.sshfl [vmem:[%s4743_s4 + $0xe] sm:$0x1 pattern:$0x73625140] %v2794_v10 }
0x17be   :  { %v2989_v20 = vpop.f32.mrf.mxu1 }
0x17bf   :  { %v2996_v22 = vrot.slane %v2989_v20, 1  ;;  %2997 = vrot.lane.b32.xlu0 %v2989_v20, %s3966_s17 }
0x17c0   :  { %v3748_v23 = vpop.f32.mrf.mxu1 }
0x17c1   :  { %2999 = vrot.lane.b32.xlu1 %v2996_v22, %s3966_s17  ;;  %v2925_v25 = vpop.f32.mrf.mxu0 }
0x17c2   :  { %v2992_v28 = vpop.f32.mrf.mxu1  ;;  %v2932_v41 = vrot.slane %v2925_v25, 1 }
0x17c3   :  { %v3740_v18 = vpop.f32.mrf.mxu0 }
0x17c4   :  { %v3749_v40 = vpop.f32.mrf.mxu1 }
0x17c5   :  { %v2928_v43 = vpop.f32.mrf.mxu0 }
0x17c7   :  { %v3741_v31 = vpop.f32.mrf.mxu0 }
0x17c9   :  { %v3047_v32 = vpop.f32.mrf.mxu0 }
0x17ca   :  { %v3054_v46 = vrot.slane %v3047_v32, 1 }
0x17cb   :  { %v3756_v34 = vpop.f32.mrf.mxu0 }
0x17cd   :  { %v3050_v21 = vpop.f32.mrf.mxu0 }
0x17cf   :  { %v3757_v30 = vpop.f32.mrf.mxu0 }
0x1831   :  { %v2998_v49 = vpop.permute.xlu0 %2997 }
0x1832   :  { %v3003_v59 = vadd.f32 %v2998_v49, %v4688_v36 }
0x1833   :  { %v3000_v38 = vpop.permute.xlu1 %2999 }
0x1834   :  { %3944 = vtanh.f32 %v3003_v59  ;;  %v3004_v24 = vadd.f32 %v3000_v38, %v4694_v37 }
0x1836   :  { %3946 = vtanh.f32 %v3004_v24 }
0x1837   :  { %3948 = vtanh.f32 %v2877_v47 }
0x1838   :  { %3950 = vtanh.f32 %v2878_v48 }
0x1841   :  { %v3945_v27 = vpop.eup %3944 }
0x1842   :  { %3075 = vrot.lane.b32.xlu0 %v3945_v27, %s3966_s17 }
0x1843   :  { %v3947_v39 = vpop.eup %3946 }
0x1844   :  { %3077 = vrot.lane.b32.xlu1 %v3947_v39, %s3966_s17  ;;  %v3949_v50 = vpop.eup %3948 }
0x1845   :  { %v3951_v51 = vpop.eup %3950  ;;  %v2881_v52 = vadd.f32 1.0, %v3949_v50 }
0x1846   :  { %2933 = vrot.lane.b32.xlu0 %v2925_v25, %s3968_s21  ;;  %v2882_v5 = vadd.f32 1.0, %v3951_v51 }
0x1847   :  { %v2883_v9 = vmul.f32 0.5, %v2881_v52 }
0x1848   :  { %2935 = vrot.lane.b32.xlu1 %v2932_v41, %s3968_s21  ;;  %v2884_v58 = vmul.f32 0.5, %v2882_v5 }
0x18b4   :  { %v3076_v56 = vpop.permute.xlu0 %3075 }
0x18b5   :  { %v3081_v57 = vmul.f32 %v3076_v56, %v2883_v9 }
0x18b6   :  { %v3078_v60 = vpop.permute.xlu1 %3077 }
0x18b7   :  { %v3082_v61 = vmul.f32 %v3078_v60, %v2884_v58  ;;  %3085 = vrot.lane.b32.xlu0 %v3081_v57, %s3968_s21 }
0x18b8   :  { %v2934_v63 = vpop.permute.xlu0 %2933 }
0x18b9   :  { %3087 = vrot.lane.b32.xlu1 %v3082_v61, %s3968_s21  ;;  %v2939_v11 = vadd.f32 %v2934_v63, %v4688_v36 }
0x18ba   :  { %v2936_v55 = vpop.permute.xlu1 %2935 }
0x18bb   :  { %3055 = vrot.lane.b32.xlu0 %v3047_v32, %s3967_s20  ;;  %v2940_v0 = vadd.f32 %v2936_v55, %v4694_v37  ;;  %v2941_v3 = vmul.f32 0.5, %v2939_v11  ;;  %v3803_v32 = vld [vmem:[%s4741_s2] sm:$0xff]  }
0x18bd   :  { %3057 = vrot.lane.b32.xlu1 %v3054_v46, %s3967_s20  ;;  %v2942_v4 = vmul.f32 0.5, %v2940_v0  ;;  %3952 = vtanh.f32 %v2941_v3 }
0x18bf   :  { %3954 = vtanh.f32 %v2942_v4 }
0x18ca   :  { %v3953_v6 = vpop.eup %3952 }
0x18cb   :  { %v2945_v8 = vadd.f32 1.0, %v3953_v6 }
0x18cc   :  { %v3955_v7 = vpop.eup %3954 }
0x18cd   :  { %v2946_v29 = vadd.f32 1.0, %v3955_v7  ;;  %v2947_v2 = vmul.f32 0.5, %v2945_v8 }
0x18cf   :  { %v2948_v12 = vmul.f32 0.5, %v2946_v29  ;;  %v3071_v13 = vmul.f32 %v2947_v2, %v4622_v33  ;;  %v3802_v33 = vld [vmem:[%s4741_s2 + $0x8] sm:$0xff]  }
0x18d0   :  { %3759 = vmatpush3.bf16.msra.mxu1 %v3802_v33 }
0x18d1   :  { %v3072_v15 = vmul.f32 %v2948_v12, %v4626_v35  ;;  %3760 = vmatprep.subr.bf16.mxu1 %v3964_v1 }
0x18d4   :  { %3761 = vmatpush3.bf16.msra.mxu1 %v3803_v32 }
0x1929   :  { %v3086_v14 = vpop.permute.xlu0 %3085 }
0x192a   :  { %v3091_v53 = vadd.f32 %v3086_v14, %v3071_v13 }
0x192b   :  { %v3088_v26 = vpop.permute.xlu1 %3087 }
0x192c   :  { %3956 = vtanh.f32 %v3091_v53  ;;  %v3092_v16 = vadd.f32 %v3088_v26, %v3072_v15 }
0x192d   :  { %v3056_v35 = vpop.permute.xlu0 %3055 }
0x192e   :  { %3958 = vtanh.f32 %v3092_v16  ;;  %v3220_v10 = vrot.slane %v3092_v16, 7  ;;  %v3061_v23 = vadd.f32 %v3056_v35, %v4688_v36 }
0x192f   :  { %v3058_v22 = vpop.permute.xlu1 %3057 }
0x1930   :  { %v3221_v17 = vsel %vm350_vm3, %v3220_v10, %v3091_v53  ;;  %v3062_v25 = vadd.f32 %v3058_v22, %v4694_v37  ;;  %v3063_v28 = vmul.f32 0.5, %v3061_v23 }
0x1932   :  { %v3064_v18 = vmul.f32 0.5, %v3062_v25  ;;  %3960 = vtanh.f32 %v3063_v28 }
0x1934   :  { %3962 = vtanh.f32 %v3064_v18 }
0x1939   :  { %v3957_v19 = vpop.eup %3956 }
0x193a   :  { %3097 = vrot.lane.b32.xlu0 %v3957_v19, %s3966_s17 }
0x193b   :  { %v3959_v20 = vpop.eup %3958 }
0x193c   :  { %3099 = vrot.lane.b32.xlu1 %v3959_v20, %s3966_s17 }
0x193f   :  { %v3961_v40 = vpop.eup %3960 }
0x1940   :  { %v3067_v31 = vadd.f32 1.0, %v3961_v40 }
0x1941   :  { %v3963_v43 = vpop.eup %3962 }
0x1942   :  { %v3068_v34 = vadd.f32 1.0, %v3963_v43  ;;  %v3069_v1 = vmul.f32 0.5, %v3067_v31 }
0x1944   :  { %v3070_v49 = vmul.f32 0.5, %v3068_v34 }
0x19ac   :  { %v3098_v21 = vpop.permute.xlu0 %3097 }
0x19ad   :  { %v3103_v30 = vmul.f32 %v3098_v21, %v3069_v1 }
0x19ae   :  { %v3100_v36 = vpop.permute.xlu1 %3099 }
0x19af   :  { %v3104_v59 = vmul.f32 %v3100_v36, %v3070_v49  ;;  %v3105_v37 = vpack.c.bf16 %v3103_v30, %v3103_v30 }
0x19b1   :  { %v3106_v38 = vpack.c.bf16 %v3104_v59, %v3104_v59  ;;  %v3211_v24 = vrot.slane %v3104_v59, 7  ;;  %v3120_v41 = vunpack.c.l.b16 %v3105_v37 }
0x19b3   :  { %v3121_v27 = vunpack.c.l.b16 %v3106_v38  ;;  %v3212_v39 = vsel %vm350_vm3, %v3211_v24, %v3103_v30 }
0x19b4   :  { %3213 = vrot.lane.b32.xlu0 %v3212_v39, %s3968_s21 }
0x19b5   :  { %v3122_v42 = vrot.slane %v3121_v27, 7 }
0x19b7   :  { %v3123_v62 = vsel %vm350_vm3, %v3122_v42, %v3120_v41 }
0x19b8   :  { %v3124_v45 = vpack.c.b16 %v3123_v62, %v3123_v62 }
0x19ba   :  { %3125 = vrot.lane.b32.xlu1 %v3124_v45, %s3968_s21 }
0x19be   :  { %3222 = vrot.lane.b32.xlu1 %v3221_v17, %s3967_s20 }
0x1a26   :  { %v3214_v47 = vpop.permute.xlu0 %3213 }
0x1a27   :  { %3217 = vst.msk [vmem:[#allocation2] sm:$0x3] %vm22_vm0, %v3214_v47 }
0x1a2c   :  { %v3126_v48 = vpop.permute.xlu1 %3125 }
0x1a2d   :  { %3763 = vmatmul.mubr.msk.bf16.vlgmr.msra.gmra.mxu1 %vm46_vm2, %v3126_v48 }
0x1a30   :  { %v3223_v50 = vpop.permute.xlu1 %3222 }
0x1a31   :  { %3225 = vst.msk [vmem:[#allocation3] sm:$0x3] %vm22_vm0, %v3223_v50 }
0x1aed   :  { %v3176_v51 = vpop.f32.mrf.mxu1 }
0x1aee   :  { %v3177_v52 = vadd.f32 %v4494_v44, %v3176_v51 }
0x1aef   :  { %v3764_v5 = vpop.f32.mrf.mxu1 }
0x1af0   :  { %v3189_v9 = vrot.slane %v3177_v52, %v4125_v54 }
0x1af1   :  { %v3179_v56 = vpop.f32.mrf.mxu1 }
0x1af2   :  { %v3190_v57 = vcombine.high %v3189_v9, %v3189_v9  ;;  %3324 = vst.sshfl [vmem:[%s4743_s4 + $0x7] sm:$0x1 pattern:$0x73625140] %v3189_v9 }
0x1af3   :  { %v3765_v58 = vpop.f32.mrf.mxu1 }
0x1af4   :  { %3325 = vst.sshfl [vmem:[%s4743_s4 + $0xf] sm:$0x1 pattern:$0x73625140] %v3190_v57 }

// kernel: condition_encoder_lstm_forward.5
= control target key start
LH: loop header
LB: loop body
LE: loop exit
PB: predicated region body
PF: predicated region fallthrough
CT: control target
= control target key end

     0   :  { %s3987_s17 = smov 64   ;;  %v3988_v2 = vmov 0.0   ;;  %vm23_vm0 = vcmask 254976   ;;  %vm3989_vm1 = vmmov 0   ;;  %vm47_vm2 = vcmask 261120   ;;  %s3990_s20 = smov 96   ;;  %s4752_s0 = inlined_call_operand.vmem [shape: f32[2,8,128], index: 0, kind: input, shape index: {}]   ;;  %s4753_s1 = inlined_call_operand.vmem [shape: bf16[32,128], index: 1, kind: input, shape index: {}]   ;;  %s4754_s2 = inlined_call_operand.vmem [shape: bf16[32,16], index: 2, kind: input, shape index: {}]   ;;  %s4755_s3 = inlined_call_operand.vmem [shape: f32[1,16], index: 3, kind: input, shape index: {}]   ;;  %s4756_s4 = inlined_call_operand.hbm [shape: f32[2,8,16], index: 4, kind: output, shape index: {}]  }
   0x1   :  { %v3773_v0 = vld [vmem:[%s4753_s1 + $0x8] sm:$0xff]   ;;  %v3774_v1 = vld [vmem:[%s4753_s1] sm:$0xff]   ;;  %3444 = vmatprep.subr.bf16.mxu0 %v3988_v2  ;;  %3448 = vmatprep.mubr.msk.bf16.mxu0 %vm3989_vm1, %v3988_v2  ;;  %24 = vst.msk [vmem:[#allocation2] sm:$0x3] %vm23_vm0, %v3988_v2  ;;  %25 = vst.msk [vmem:[#allocation3] sm:$0x3] %vm23_vm0, %v3988_v2 }
   0x2   :  { %171 = vrot.lane.b32.xlu0 %v3773_v0, %s3987_s17  ;;  %3445 = vmatpush3.bf16.msra.mxu0 %v3773_v0 }
   0x3   :  { %3446 = vmatprep.subr.bf16.mxu0 %v3988_v2  ;;  %107 = vrot.lane.b32.xlu1 %v3773_v0, %s3990_s20 }
   0x4   :  { %3452 = vmatprep.subr.bf16.mxu1 %v3988_v2  ;;  %3456 = vmatprep.mubr.msk.bf16.mxu1 %vm3989_vm1, %v3988_v2 }
   0x6   :  { %169 = vrot.lane.b32.xlu0 %v3774_v1, %s3987_s17  ;;  %3447 = vmatpush3.bf16.msra.mxu0 %v3774_v1 }
   0x7   :  { %3460 = vmatprep.subr.bf16.mxu0 %v3988_v2  ;;  %105 = vrot.lane.b32.xlu1 %v3774_v1, %s3990_s20 }
   0x8   :  { %v26_v3 = vld [vmem:[#allocation2] sm:$0x3] }
   0x9   :  { %v28_v4 = vpack.c.bf16 %v26_v3, %v26_v3 }
   0xb   :  { %3449 = vmatmul.mubr.msk.bf16.vlgmr.msra.gmra.mxu0 %vm47_vm2, %v28_v4 }
   0xc   :  { %3464 = vmatprep.mubr.msk.bf16.mxu0 %vm3989_vm1, %v3988_v2 }
   0xd   :  { %9 = vsyncpa [#allocation5], 0  ;;  %s3991_s21 = smov 32   ;;  %v4068_v24 = vld [vmem:[%s4752_s0] sm:$0x1]  ;;  %vm351_vm3 = vcmask 1041409  }
   0xe   :  { %227 = vrot.lane.b32.xlu1 %v3774_v1, %s3991_s21  ;;  %229 = vrot.lane.b32.xlu0 %v3773_v0, %s3991_s21  ;;  %v4074_v27 = vld [vmem:[%s4752_s0 + $0x8] sm:$0x1]  ;;  %v27_v36 = vld [vmem:[#allocation3] sm:$0x3]  ;;  %vm436_vm4 = vcmask 122880  }
   0xf   :  { %v292_v38 = vrot.slane %v27_v36, 1 }
  0x74   :  { %v172_v5 = vpop.permute.xlu0 %171 }
  0x75   :  { %3461 = vmatpush3.bf16.msra.mxu0 %v172_v5  ;;  %v108_v7 = vpop.permute.xlu1 %107 }
  0x76   :  { %3462 = vmatprep.subr.bf16.mxu0 %v3988_v2  ;;  %3453 = vmatpush3.bf16.msra.mxu1 %v108_v7 }
  0x77   :  { %3454 = vmatprep.subr.bf16.mxu1 %v3988_v2 }
  0x78   :  { %v170_v6 = vpop.permute.xlu0 %169 }
  0x79   :  { %3463 = vmatpush3.bf16.msra.mxu0 %v170_v6  ;;  %v106_v8 = vpop.permute.xlu1 %105 }
  0x7a   :  { %3476 = vmatprep.subr.bf16.mxu0 %v3988_v2  ;;  %3455 = vmatpush3.bf16.msra.mxu1 %v106_v8 }
  0x7b   :  { %3468 = vmatprep.subr.bf16.mxu1 %v3988_v2 }
  0x7c   :  { %3465 = vmatmul.mubr.msk.bf16.vlgmr.msra.gmra.mxu0 %vm47_vm2, %v28_v4 }
  0x7d   :  { %3480 = vmatprep.mubr.msk.bf16.mxu0 %vm3989_vm1, %v3988_v2  ;;  %3457 = vmatmul.mubr.msk.bf16.vlgmr.msra.gmra.mxu1 %vm47_vm2, %v28_v4 }
  0x7e   :  { %3472 = vmatprep.mubr.msk.bf16.mxu1 %vm3989_vm1, %v3988_v2 }
  0x80   :  { %v230_v9 = vpop.permute.xlu0 %229  ;;  %v228_v11 = vpop.permute.xlu1 %227 }
  0x81   :  { %3469 = vmatpush3.bf16.msra.mxu1 %v230_v9 }
  0x82   :  { %3470 = vmatprep.subr.bf16.mxu1 %v3988_v2 }
  0x85   :  { %3471 = vmatpush3.bf16.msra.mxu1 %v228_v11 }
  0x86   :  { %3484 = vmatprep.subr.bf16.mxu1 %v3988_v2 }
  0x88   :  { %3473 = vmatmul.mubr.msk.bf16.vlgmr.msra.gmra.mxu1 %vm47_vm2, %v28_v4 }
  0x89   :  { %3488 = vmatprep.mubr.msk.bf16.mxu1 %vm3989_vm1, %v3988_v2 }
  0xcb   :  { %v85_v10 = vpop.f32.mrf.mxu0 }
  0xcc   :  { %v92_v39 = vrot.slane %v85_v10, 1  ;;  %v95_v40 = vadd.f32 %v85_v10, %v4068_v24 }
  0xcd   :  { %v3450_v12 = vpop.f32.mrf.mxu0 }
  0xce   :  { %v96_v41 = vadd.f32 %v92_v39, %v4074_v27  ;;  %v97_v42 = vmul.f32 0.5, %v95_v40  ;;  %v3775_v12 = vld [vmem:[%s4753_s1 + $0x8] sm:$0xff]  }
  0xcf   :  { %v88_v13 = vpop.f32.mrf.mxu0  ;;  %3485 = vmatpush3.bf16.msra.mxu1 %v3775_v12 }
  0xd0   :  { %v98_v43 = vmul.f32 0.5, %v96_v41  ;;  %3486 = vmatprep.subr.bf16.mxu1 %v3988_v2 }
  0xd1   :  { %v3451_v14 = vpop.f32.mrf.mxu0 }
  0xd2   :  { %v3776_v14 = vld [vmem:[%s4753_s1] sm:$0xff]  }
  0xd3   :  { %3487 = vmatpush3.bf16.msra.mxu1 %v3776_v14 }
  0xd4   :  { %3500 = vmatprep.subr.bf16.mxu1 %v3988_v2 }
 0x13c   :  { %v209_v15 = vpop.f32.mrf.mxu0 }
 0x13d   :  { %v216_v16 = vrot.slane %v209_v15, 1  ;;  %217 = vrot.lane.b32.xlu1 %v209_v15, %s3987_s17  ;;  %v145_v20 = vpop.f32.mrf.mxu1 }
 0x13e   :  { %v3466_v17 = vpop.f32.mrf.mxu0  ;;  %v152_v35 = vrot.slane %v145_v20, 1 }
 0x13f   :  { %219 = vrot.lane.b32.xlu0 %v216_v16, %s3987_s17  ;;  %v3458_v21 = vpop.f32.mrf.mxu1  ;;  %v3777_v16 = vld [vmem:[%s4754_s2 + $0x8] sm:$0xff]   ;;  %v3778_v17 = vld [vmem:[%s4754_s2] sm:$0xff]  }
 0x140   :  { %v212_v18 = vpop.f32.mrf.mxu0  ;;  %3477 = vmatpush3.bf16.msra.mxu0 %v3777_v16 }
 0x141   :  { %v148_v22 = vpop.f32.mrf.mxu1  ;;  %3478 = vmatprep.subr.bf16.mxu0 %v3988_v2 }
 0x142   :  { %v3467_v19 = vpop.f32.mrf.mxu0 }
 0x143   :  { %v3459_v23 = vpop.f32.mrf.mxu1 }
 0x144   :  { %3479 = vmatpush3.bf16.msra.mxu0 %v3778_v17 }
 0x145   :  { %3492 = vmatprep.subr.bf16.mxu0 %v3988_v2 }
 0x148   :  { %v267_v30 = vpop.f32.mrf.mxu1 }
 0x149   :  { %v274_v54 = vrot.slane %v267_v30, 1 }
 0x14a   :  { %v3474_v32 = vpop.f32.mrf.mxu1 }
 0x14c   :  { %v270_v34 = vpop.f32.mrf.mxu1 }
 0x14e   :  { %v3475_v37 = vpop.f32.mrf.mxu1 }
 0x1af   :  { %v218_v25 = vpop.permute.xlu1 %217 }
 0x1b0   :  { %v223_v26 = vadd.f32 %v218_v25, %v4068_v24 }
 0x1b1   :  { %v220_v28 = vpop.permute.xlu0 %219 }
 0x1b2   :  { %3805 = vtanh.f32 %v223_v26  ;;  %v224_v29 = vadd.f32 %v220_v28, %v4074_v27 }
 0x1b4   :  { %3807 = vtanh.f32 %v224_v29 }
 0x1b5   :  { %3809 = vtanh.f32 %v97_v42 }
 0x1b6   :  { %3811 = vtanh.f32 %v98_v43 }
 0x1bf   :  { %v3806_v31 = vpop.eup %3805 }
 0x1c0   :  { %303 = vrot.lane.b32.xlu1 %v3806_v31, %s3987_s17 }
 0x1c1   :  { %v3808_v33 = vpop.eup %3807 }
 0x1c2   :  { %305 = vrot.lane.b32.xlu0 %v3808_v33, %s3987_s17  ;;  %v3810_v44 = vpop.eup %3809 }
 0x1c3   :  { %v3812_v45 = vpop.eup %3811  ;;  %v101_v46 = vadd.f32 1.0, %v3810_v44 }
 0x1c4   :  { %153 = vrot.lane.b32.xlu1 %v145_v20, %s3991_s21  ;;  %v102_v47 = vadd.f32 1.0, %v3812_v45 }
 0x1c5   :  { %v103_v48 = vmul.f32 0.5, %v101_v46 }
 0x1c6   :  { %155 = vrot.lane.b32.xlu0 %v152_v35, %s3991_s21  ;;  %v104_v51 = vmul.f32 0.5, %v102_v47 }
 0x1c8   :  { %293 = vrot.lane.b32.xlu1 %v27_v36, %s3991_s21 }
 0x1ca   :  { %295 = vrot.lane.b32.xlu0 %v292_v38, %s3991_s21 }
 0x232   :  { %v304_v49 = vpop.permute.xlu1 %303 }
 0x233   :  { %v309_v50 = vmul.f32 %v304_v49, %v103_v48  ;;  %v3992_v48 = vmov 1966171168  }
 0x234   :  { %v306_v52 = vpop.permute.xlu0 %305  ;;  %v413_v49 = vunpack.c.l.s4 %v3992_v48 }
 0x235   :  { %v310_v53 = vmul.f32 %v306_v52, %v104_v51  ;;  %313 = vrot.lane.b32.xlu1 %v309_v50, %s3991_s21  ;;  %v415_v50 = vlaneseq }
 0x236   :  { %v154_v55 = vpop.permute.xlu1 %153  ;;  %v414_v51 = vunpack.c.0.s8 %v413_v49 }
 0x237   :  { %315 = vrot.lane.b32.xlu0 %v310_v53, %s3991_s21  ;;  %v159_v56 = vadd.f32 %v154_v55, %v4068_v24  ;;  %v416_v52 = vshrl.u32 %v415_v50, 7  ;;  %v4149_v53 = vld [vmem:[%s4755_s3] ss:$0 sm:$0xff] }
 0x238   :  { %v156_v57 = vpop.permute.xlu0 %155 }
 0x239   :  { %275 = vrot.lane.b32.xlu1 %v267_v30, %s3990_s20  ;;  %v161_v58 = vmul.f32 0.5, %v159_v56  ;;  %v160_v59 = vadd.f32 %v156_v57, %v4074_v27 }
 0x23a   :  { %v294_v3 = vpop.permute.xlu1 %293 }
 0x23b   :  { %277 = vrot.lane.b32.xlu0 %v274_v54, %s3990_s20  ;;  %3813 = vtanh.f32 %v161_v58  ;;  %v162_v60 = vmul.f32 0.5, %v160_v59  ;;  %v4151_v54 = vsub.s32 %v414_v51, %v416_v52 }
 0x23c   :  { %v296_v4 = vpop.permute.xlu0 %295 }
 0x23d   :  { %3815 = vtanh.f32 %v162_v60 }
 0x248   :  { %v3814_v61 = vpop.eup %3813 }
 0x249   :  { %v165_v62 = vadd.f32 1.0, %v3814_v61 }
 0x24a   :  { %v3816_v63 = vpop.eup %3815 }
 0x24b   :  { %v167_v0 = vmul.f32 0.5, %v165_v62  ;;  %v166_v1 = vadd.f32 1.0, %v3816_v63 }
 0x24d   :  { %v299_v5 = vmul.f32 %v294_v3, %v167_v0  ;;  %v168_v6 = vmul.f32 0.5, %v166_v1 }
 0x24f   :  { %v300_v8 = vmul.f32 %v296_v4, %v168_v6 }
 0x2a7   :  { %v314_v7 = vpop.permute.xlu1 %313 }
 0x2a8   :  { %v4091_v9 = vadd.f32 %v314_v7, %v299_v5 }
 0x2a9   :  { %v316_v10 = vpop.permute.xlu0 %315 }
 0x2aa   :  { %3817 = vtanh.f32 %v4091_v9  ;;  %v4094_v11 = vadd.f32 %v316_v10, %v300_v8 }
 0x2ab   :  { %v276_v18 = vpop.permute.xlu1 %275 }
 0x2ac   :  { %3819 = vtanh.f32 %v4094_v11  ;;  %v281_v20 = vadd.f32 %v276_v18, %v4068_v24 }
 0x2ad   :  { %v278_v19 = vpop.permute.xlu0 %277 }
 0x2ae   :  { %v282_v21 = vadd.f32 %v278_v19, %v4074_v27  ;;  %v283_v22 = vmul.f32 0.5, %v281_v20  ;;  %v4164_v20 = vld [vmem:[%s4752_s0 + $0x1] sm:$0x1] }
 0x2b0   :  { %v284_v23 = vmul.f32 0.5, %v282_v21  ;;  %3821 = vtanh.f32 %v283_v22 }
 0x2b2   :  { %3823 = vtanh.f32 %v284_v23  ;;  %v4170_v23 = vld [vmem:[%s4752_s0 + $0x9] sm:$0x1] }
 0x2b7   :  { %v3818_v13 = vpop.eup %3817 }
 0x2b8   :  { %325 = vrot.lane.b32.xlu1 %v3818_v13, %s3987_s17 }
 0x2b9   :  { %v3820_v15 = vpop.eup %3819 }
 0x2ba   :  { %327 = vrot.lane.b32.xlu0 %v3820_v15, %s3987_s17 }
 0x2bc   :  { %577 = vrot.lane.b32.xlu1 %v3775_v12, %s3987_s17 }
 0x2bd   :  { %v3822_v25 = vpop.eup %3821 }
 0x2be   :  { %v287_v28 = vadd.f32 1.0, %v3822_v25 }
 0x2bf   :  { %v3824_v26 = vpop.eup %3823 }
 0x2c0   :  { %513 = vrot.lane.b32.xlu1 %v3775_v12, %s3990_s20  ;;  %v288_v29 = vadd.f32 1.0, %v3824_v26  ;;  %v289_v30 = vmul.f32 0.5, %v287_v28 }
 0x2c2   :  { %v290_v31 = vmul.f32 0.5, %v288_v29 }
 0x2c4   :  { %635 = vrot.lane.b32.xlu1 %v3775_v12, %s3991_s21 }
 0x32a   :  { %v326_v32 = vpop.permute.xlu1 %325 }
 0x32b   :  { %v331_v33 = vmul.f32 %v326_v32, %v289_v30 }
 0x32c   :  { %v328_v34 = vpop.permute.xlu0 %327 }
 0x32d   :  { %v332_v35 = vmul.f32 %v328_v34, %v290_v31  ;;  %v333_v36 = vpack.c.bf16 %v331_v33, %v331_v33 }
 0x32e   :  { %v578_v41 = vpop.permute.xlu1 %577 }
 0x32f   :  { %v334_v37 = vpack.c.bf16 %v332_v35, %v332_v35  ;;  %v348_v24 = vunpack.c.l.b16 %v333_v36 }
 0x331   :  { %v349_v38 = vunpack.c.l.b16 %v334_v37 }
 0x332   :  { %v514_v42 = vpop.permute.xlu1 %513 }
 0x333   :  { %v350_v27 = vrot.slane %v349_v38, 7 }
 0x335   :  { %v352_v39 = vsel %vm351_vm3, %v350_v27, %v348_v24 }
 0x336   :  { %v353_v40 = vpack.c.b16 %v352_v39, %v352_v39  ;;  %v636_v46 = vpop.permute.xlu1 %635 }
 0x338   :  { %354 = vrot.lane.b32.xlu0 %v353_v40, %s3991_s21 }
 0x33c   :  { %575 = vrot.lane.b32.xlu0 %v3776_v14, %s3987_s17 }
 0x340   :  { %511 = vrot.lane.b32.xlu0 %v3776_v14, %s3990_s20 }
 0x344   :  { %633 = vrot.lane.b32.xlu0 %v3776_v14, %s3991_s21 }
 0x3aa   :  { %v355_v43 = vpop.permute.xlu0 %354 }
 0x3ab   :  { %3481 = vmatmul.mubr.msk.bf16.vlgmr.msra.gmra.mxu0 %vm47_vm2, %v355_v43  ;;  %3489 = vmatmul.mubr.msk.bf16.vlgmr.msra.gmra.mxu1 %vm47_vm2, %v355_v43 }
 0x3ac   :  { %3501 = vmatpush3.bf16.msra.mxu1 %v578_v41  ;;  %3493 = vmatpush3.bf16.msra.mxu0 %v514_v42 }
 0x3ad   :  { %3502 = vmatprep.subr.bf16.mxu1 %v3988_v2  ;;  %3494 = vmatprep.subr.bf16.mxu0 %v3988_v2 }
 0x3ae   :  { %v576_v44 = vpop.permute.xlu0 %575  ;;  %3504 = vmatprep.mubr.msk.bf16.mxu1 %vm3989_vm1, %v3988_v2  ;;  %3496 = vmatprep.mubr.msk.bf16.mxu0 %vm3989_vm1, %v3988_v2 }
 0x3b0   :  { %3503 = vmatpush3.bf16.msra.mxu1 %v576_v44 }
 0x3b1   :  { %3516 = vmatprep.subr.bf16.mxu1 %v3988_v2 }
 0x3b2   :  { %v512_v45 = vpop.permute.xlu0 %511 }
 0x3b3   :  { %3495 = vmatpush3.bf16.msra.mxu0 %v512_v45  ;;  %3505 = vmatmul.mubr.msk.bf16.vlgmr.msra.gmra.mxu1 %vm47_vm2, %v355_v43 }
 0x3b4   :  { %3508 = vmatprep.subr.bf16.mxu0 %v3988_v2  ;;  %3520 = vmatprep.mubr.msk.bf16.mxu1 %vm3989_vm1, %v3988_v2 }
 0x3b6   :  { %3497 = vmatmul.mubr.msk.bf16.vlgmr.msra.gmra.mxu0 %vm47_vm2, %v355_v43  ;;  %v634_v47 = vpop.permute.xlu0 %633 }
 0x3b7   :  { %3509 = vmatpush3.bf16.msra.mxu0 %v636_v46  ;;  %3512 = vmatprep.mubr.msk.bf16.mxu0 %vm3989_vm1, %v3988_v2 }
 0x3b8   :  { %3510 = vmatprep.subr.bf16.mxu0 %v3988_v2 }
 0x3bb   :  { %3511 = vmatpush3.bf16.msra.mxu0 %v634_v47 }
 0x3bc   :  { %3524 = vmatprep.subr.bf16.mxu0 %v3988_v2 }
 0x3be   :  { %3513 = vmatmul.mubr.msk.bf16.vlgmr.msra.gmra.mxu0 %vm47_vm2, %v355_v43 }
 0x3bf   :  { %3528 = vmatprep.mubr.msk.bf16.mxu0 %vm3989_vm1, %v3988_v2 }
 0x46b   :  { %v405_v55 = vpop.f32.mrf.mxu0  ;;  %v491_v56 = vpop.f32.mrf.mxu1 }
 0x46c   :  { %v406_v57 = vadd.f32 %v4149_v53, %v405_v55  ;;  %v498_v31 = vrot.slane %v491_v56, 1  ;;  %v501_v32 = vadd.f32 %v491_v56, %v4164_v20 }
 0x46d   :  { %v3482_v58 = vpop.f32.mrf.mxu0  ;;  %v3490_v59 = vpop.f32.mrf.mxu1 }
 0x46e   :  { %v418_v60 = vrot.slane %v406_v57, %v4151_v54  ;;  %v502_v33 = vadd.f32 %v498_v31, %v4170_v23  ;;  %v503_v34 = vmul.f32 0.5, %v501_v32 }
 0x46f   :  { %v408_v61 = vpop.f32.mrf.mxu0  ;;  %v494_v62 = vpop.f32.mrf.mxu1 }
 0x470   :  { %v419_v63 = vcombine.high %v418_v60, %v418_v60  ;;  %v426_v0 = vrot.slane %v418_v60, %v4151_v54  ;;  %v504_v35 = vmul.f32 0.5, %v502_v33 }
 0x471   :  { %v3483_v1 = vpop.f32.mrf.mxu0  ;;  %v3491_v3 = vpop.f32.mrf.mxu1 }
 0x472   :  { %v433_v4 = vrot.slane %v419_v63, %v4151_v54  ;;  %437 = vst.msk [vmem:[#allocation4] sm:$0x1] %vm436_vm4, %v426_v0  ;;  %v3779_v1 = vld [vmem:[%s4753_s1 + $0x8] sm:$0xff]  }
 0x473   :  { %v615_v5 = vpop.f32.mrf.mxu1  ;;  %3525 = vmatpush3.bf16.msra.mxu0 %v3779_v1 }
 0x474   :  { %438 = vst.msk [vmem:[#allocation4 + $0x8] sm:$0x1] %vm436_vm4, %v433_v4  ;;  %v622_v6 = vrot.slane %v615_v5, 1  ;;  %623 = vrot.lane.b32.xlu0 %v615_v5, %s3987_s17  ;;  %3526 = vmatprep.subr.bf16.mxu0 %v3988_v2  ;;  %v3781_v4 = vld [vmem:[%s4754_s2 + $0x8] sm:$0xff]   ;;  %v3782_v5 = vld [vmem:[%s4754_s2] sm:$0xff]  }
 0x475   :  { %v3506_v7 = vpop.f32.mrf.mxu1  ;;  %3517 = vmatpush3.bf16.msra.mxu1 %v3781_v4 }
 0x476   :  { %625 = vrot.lane.b32.xlu1 %v622_v6, %s3987_s17  ;;  %v551_v8 = vpop.f32.mrf.mxu0  ;;  %3518 = vmatprep.subr.bf16.mxu1 %v3988_v2 }
 0x477   :  { %v618_v10 = vpop.f32.mrf.mxu1  ;;  %v558_v30 = vrot.slane %v551_v8, 1 }
 0x478   :  { %v3498_v12 = vpop.f32.mrf.mxu0 }
 0x479   :  { %v3507_v13 = vpop.f32.mrf.mxu1  ;;  %3519 = vmatpush3.bf16.msra.mxu1 %v3782_v5 }
 0x47a   :  { %v554_v14 = vpop.f32.mrf.mxu0  ;;  %3532 = vmatprep.subr.bf16.mxu1 %v3988_v2 }
 0x47c   :  { %v3499_v15 = vpop.f32.mrf.mxu0 }
 0x47e   :  { %v673_v16 = vpop.f32.mrf.mxu0 }
 0x47f   :  { %v680_v44 = vrot.slane %v673_v16, 1 }
 0x480   :  { %v3514_v17 = vpop.f32.mrf.mxu0 }
 0x482   :  { %v676_v18 = vpop.f32.mrf.mxu0 }
 0x484   :  { %v3515_v19 = vpop.f32.mrf.mxu0 }
 0x4e6   :  { %v624_v21 = vpop.permute.xlu0 %623 }
 0x4e7   :  { %v629_v22 = vadd.f32 %v624_v21, %v4164_v20 }
 0x4e8   :  { %v626_v25 = vpop.permute.xlu1 %625 }
 0x4e9   :  { %3825 = vtanh.f32 %v629_v22  ;;  %v630_v26 = vadd.f32 %v626_v25, %v4170_v23 }
 0x4eb   :  { %3827 = vtanh.f32 %v630_v26 }
 0x4ec   :  { %3829 = vtanh.f32 %v503_v34 }
 0x4ed   :  { %3831 = vtanh.f32 %v504_v35 }
 0x4f6   :  { %v3826_v28 = vpop.eup %3825 }
 0x4f7   :  { %701 = vrot.lane.b32.xlu0 %v3826_v28, %s3987_s17 }
 0x4f8   :  { %v3828_v29 = vpop.eup %3827 }
 0x4f9   :  { %703 = vrot.lane.b32.xlu1 %v3828_v29, %s3987_s17  ;;  %v3830_v36 = vpop.eup %3829 }
 0x4fa   :  { %v3832_v37 = vpop.eup %3831  ;;  %v507_v38 = vadd.f32 1.0, %v3830_v36 }
 0x4fb   :  { %559 = vrot.lane.b32.xlu0 %v551_v8, %s3991_s21  ;;  %v508_v24 = vadd.f32 1.0, %v3832_v37 }
 0x4fc   :  { %v509_v27 = vmul.f32 0.5, %v507_v38 }
 0x4fd   :  { %561 = vrot.lane.b32.xlu1 %v558_v30, %s3991_s21  ;;  %v510_v41 = vmul.f32 0.5, %v508_v24 }
 0x569   :  { %v702_v39 = vpop.permute.xlu0 %701 }
 0x56a   :  { %v707_v40 = vmul.f32 %v702_v39, %v509_v27 }
 0x56b   :  { %v704_v42 = vpop.permute.xlu1 %703 }
 0x56c   :  { %v708_v43 = vmul.f32 %v704_v42, %v510_v41  ;;  %711 = vrot.lane.b32.xlu0 %v707_v40, %s3991_s21 }
 0x56d   :  { %v560_v45 = vpop.permute.xlu0 %559 }
 0x56e   :  { %713 = vrot.lane.b32.xlu1 %v708_v43, %s3991_s21  ;;  %v565_v47 = vadd.f32 %v560_v45, %v4164_v20 }
 0x56f   :  { %v562_v46 = vpop.permute.xlu1 %561 }
 0x570   :  { %681 = vrot.lane.b32.xlu0 %v673_v16, %s3990_s20  ;;  %v566_v48 = vadd.f32 %v562_v46, %v4170_v23  ;;  %v567_v49 = vmul.f32 0.5, %v565_v47 }
 0x572   :  { %683 = vrot.lane.b32.xlu1 %v680_v44, %s3990_s20  ;;  %v568_v50 = vmul.f32 0.5, %v566_v48  ;;  %3833 = vtanh.f32 %v567_v49 }
 0x574   :  { %3835 = vtanh.f32 %v568_v50 }
 0x57f   :  { %v3834_v51 = vpop.eup %3833 }
 0x580   :  { %v571_v55 = vadd.f32 1.0, %v3834_v51 }
 0x581   :  { %v3836_v52 = vpop.eup %3835 }
 0x582   :  { %v572_v56 = vadd.f32 1.0, %v3836_v52  ;;  %v573_v57 = vmul.f32 0.5, %v571_v55 }
 0x584   :  { %v574_v58 = vmul.f32 0.5, %v572_v56  ;;  %v697_v59 = vmul.f32 %v573_v57, %v4091_v9 }
 0x586   :  { %v698_v62 = vmul.f32 %v574_v58, %v4094_v11  ;;  %v3780_v11 = vld [vmem:[%s4753_s1] sm:$0xff]  }
 0x587   :  { %3527 = vmatpush3.bf16.msra.mxu0 %v3780_v11 }
 0x588   :  { %3540 = vmatprep.subr.bf16.mxu0 %v3988_v2 }
 0x5de   :  { %v712_v60 = vpop.permute.xlu0 %711 }
 0x5df   :  { %v4186_v61 = vadd.f32 %v712_v60, %v697_v59 }
 0x5e0   :  { %v714_v63 = vpop.permute.xlu1 %713 }
 0x5e1   :  { %3837 = vtanh.f32 %v4186_v61  ;;  %v4190_v0 = vadd.f32 %v714_v63, %v698_v62 }
 0x5e2   :  { %v682_v6 = vpop.permute.xlu0 %681 }
 0x5e3   :  { %3839 = vtanh.f32 %v4190_v0  ;;  %v687_v8 = vadd.f32 %v682_v6, %v4164_v20  ;;  %v4259_v6 = vld [vmem:[%s4752_s0 + $0xa] sm:$0x1] }
 0x5e4   :  { %v684_v7 = vpop.permute.xlu1 %683 }
 0x5e5   :  { %v688_v10 = vadd.f32 %v684_v7, %v4170_v23  ;;  %v689_v12 = vmul.f32 0.5, %v687_v8 }
 0x5e7   :  { %v690_v13 = vmul.f32 0.5, %v688_v10  ;;  %3841 = vtanh.f32 %v689_v12 }
 0x5e9   :  { %3843 = vtanh.f32 %v690_v13 }
 0x5ee   :  { %v3838_v9 = vpop.eup %3837 }
 0x5ef   :  { %723 = vrot.lane.b32.xlu0 %v3838_v9, %s3987_s17 }
 0x5f0   :  { %v3840_v3 = vpop.eup %3839 }
 0x5f1   :  { %725 = vrot.lane.b32.xlu1 %v3840_v3, %s3987_s17  ;;  %v4253_v3 = vld [vmem:[%s4752_s0 + $0x2] sm:$0x1] }
 0x5f3   :  { %973 = vrot.lane.b32.xlu0 %v3779_v1, %s3987_s17 }
 0x5f4   :  { %v3842_v14 = vpop.eup %3841 }
 0x5f5   :  { %v693_v16 = vadd.f32 1.0, %v3842_v14 }
 0x5f6   :  { %v3844_v15 = vpop.eup %3843 }
 0x5f7   :  { %909 = vrot.lane.b32.xlu0 %v3779_v1, %s3990_s20  ;;  %v694_v17 = vadd.f32 1.0, %v3844_v15  ;;  %v695_v18 = vmul.f32 0.5, %v693_v16 }
 0x5f9   :  { %v696_v22 = vmul.f32 0.5, %v694_v17 }
 0x5fb   :  { %1031 = vrot.lane.b32.xlu0 %v3779_v1, %s3991_s21 }
 0x661   :  { %v724_v19 = vpop.permute.xlu0 %723 }
 0x662   :  { %v729_v21 = vmul.f32 %v724_v19, %v695_v18 }
 0x663   :  { %v726_v25 = vpop.permute.xlu1 %725 }
 0x664   :  { %v730_v26 = vmul.f32 %v726_v25, %v696_v22  ;;  %v731_v28 = vpack.c.bf16 %v729_v21, %v729_v21 }
 0x665   :  { %v974_v33 = vpop.permute.xlu0 %973 }
 0x666   :  { %v732_v29 = vpack.c.bf16 %v730_v26, %v730_v26  ;;  %v746_v20 = vunpack.c.l.b16 %v731_v28 }
 0x668   :  { %v747_v30 = vunpack.c.l.b16 %v732_v29 }
 0x669   :  { %v910_v34 = vpop.permute.xlu0 %909 }
 0x66a   :  { %v748_v31 = vrot.slane %v747_v30, 7 }
 0x66c   :  { %v749_v23 = vsel %vm351_vm3, %v748_v31, %v746_v20 }
 0x66d   :  { %v750_v32 = vpack.c.b16 %v749_v23, %v749_v23  ;;  %v1032_v38 = vpop.permute.xlu0 %1031 }
 0x66f   :  { %751 = vrot.lane.b32.xlu1 %v750_v32, %s3991_s21 }
 0x673   :  { %971 = vrot.lane.b32.xlu1 %v3780_v11, %s3987_s17 }
 0x677   :  { %907 = vrot.lane.b32.xlu1 %v3780_v11, %s3990_s20 }
 0x67b   :  { %1029 = vrot.lane.b32.xlu1 %v3780_v11, %s3991_s21 }
 0x6e1   :  { %v752_v35 = vpop.permute.xlu1 %751 }
 0x6e2   :  { %3521 = vmatmul.mubr.msk.bf16.vlgmr.msra.gmra.mxu1 %vm47_vm2, %v752_v35  ;;  %3529 = vmatmul.mubr.msk.bf16.vlgmr.msra.gmra.mxu0 %vm47_vm2, %v752_v35 }
 0x6e3   :  { %3541 = vmatpush3.bf16.msra.mxu0 %v974_v33  ;;  %3533 = vmatpush3.bf16.msra.mxu1 %v910_v34 }
 0x6e4   :  { %3542 = vmatprep.subr.bf16.mxu0 %v3988_v2  ;;  %3534 = vmatprep.subr.bf16.mxu1 %v3988_v2 }
 0x6e5   :  { %v972_v36 = vpop.permute.xlu1 %971  ;;  %3544 = vmatprep.mubr.msk.bf16.mxu0 %vm3989_vm1, %v3988_v2  ;;  %3536 = vmatprep.mubr.msk.bf16.mxu1 %vm3989_vm1, %v3988_v2 }
 0x6e7   :  { %3543 = vmatpush3.bf16.msra.mxu0 %v972_v36 }
 0x6e8   :  { %3556 = vmatprep.subr.bf16.mxu0 %v3988_v2 }
 0x6e9   :  { %v908_v37 = vpop.permute.xlu1 %907 }
 0x6ea   :  { %3535 = vmatpush3.bf16.msra.mxu1 %v908_v37  ;;  %3545 = vmatmul.mubr.msk.bf16.vlgmr.msra.gmra.mxu0 %vm47_vm2, %v752_v35 }
 0x6eb   :  { %3548 = vmatprep.subr.bf16.mxu1 %v3988_v2  ;;  %3560 = vmatprep.mubr.msk.bf16.mxu0 %vm3989_vm1, %v3988_v2 }
 0x6ed   :  { %3537 = vmatmul.mubr.msk.bf16.vlgmr.msra.gmra.mxu1 %vm47_vm2, %v752_v35  ;;  %v1030_v24 = vpop.permute.xlu1 %1029 }
 0x6ee   :  { %3549 = vmatpush3.bf16.msra.mxu1 %v1032_v38  ;;  %3552 = vmatprep.mubr.msk.bf16.mxu1 %vm3989_vm1, %v3988_v2 }
 0x6ef   :  { %3550 = vmatprep.subr.bf16.mxu1 %v3988_v2 }
 0x6f2   :  { %3551 = vmatpush3.bf16.msra.mxu1 %v1030_v24 }
 0x6f3   :  { %3564 = vmatprep.subr.bf16.mxu1 %v3988_v2 }
 0x6f5   :  { %3553 = vmatmul.mubr.msk.bf16.vlgmr.msra.gmra.mxu1 %vm47_vm2, %v752_v35 }
 0x6f6   :  { %3568 = vmatprep.mubr.msk.bf16.mxu1 %vm3989_vm1, %v3988_v2 }
 0x7a2   :  { %v802_v27 = vpop.f32.mrf.mxu1  ;;  %v887_v39 = vpop.f32.mrf.mxu0 }
 0x7a3   :  { %v803_v40 = vadd.f32 %v4149_v53, %v802_v27  ;;  %v894_v14 = vrot.slane %v887_v39, 1  ;;  %v897_v15 = vadd.f32 %v887_v39, %v4253_v3 }
 0x7a4   :  { %v3522_v41 = vpop.f32.mrf.mxu1  ;;  %v3530_v42 = vpop.f32.mrf.mxu0 }
 0x7a5   :  { %v815_v43 = vrot.slane %v803_v40, %v4151_v54  ;;  %v898_v16 = vadd.f32 %v894_v14, %v4259_v6  ;;  %v899_v17 = vmul.f32 0.5, %v897_v15 }
 0x7a6   :  { %v805_v44 = vpop.f32.mrf.mxu1  ;;  %v890_v45 = vpop.f32.mrf.mxu0 }
 0x7a7   :  { %v816_v46 = vcombine.high %v815_v43, %v815_v43  ;;  %v823_v47 = vrot.slane %v815_v43, %v4151_v54  ;;  %v900_v18 = vmul.f32 0.5, %v898_v16 }
 0x7a8   :  { %v3523_v48 = vpop.f32.mrf.mxu1  ;;  %v3531_v49 = vpop.f32.mrf.mxu0 }
 0x7a9   :  { %v830_v50 = vrot.slane %v816_v46, %v4151_v54  ;;  %833 = vst.msk [vmem:[#allocation4 + $0x1] sm:$0x1] %vm436_vm4, %v823_v47  ;;  %v3783_v48 = vld [vmem:[%s4753_s1 + $0x8] sm:$0xff]  }
 0x7aa   :  { %v1011_v51 = vpop.f32.mrf.mxu0  ;;  %3565 = vmatpush3.bf16.msra.mxu1 %v3783_v48 }
 0x7ab   :  { %834 = vst.msk [vmem:[#allocation4 + $0x9] sm:$0x1] %vm436_vm4, %v830_v50  ;;  %v1018_v52 = vrot.slane %v1011_v51, 1  ;;  %1019 = vrot.lane.b32.xlu1 %v1011_v51, %s3987_s17  ;;  %3566 = vmatprep.subr.bf16.mxu1 %v3988_v2  ;;  %v3785_v50 = vld [vmem:[%s4754_s2 + $0x8] sm:$0xff]   ;;  %v3786_v51 = vld [vmem:[%s4754_s2] sm:$0xff]  }
 0x7ac   :  { %v3546_v55 = vpop.f32.mrf.mxu0  ;;  %3557 = vmatpush3.bf16.msra.mxu0 %v3785_v50 }
 0x7ad   :  { %v947_v56 = vpop.f32.mrf.mxu1  ;;  %1021 = vrot.lane.b32.xlu0 %v1018_v52, %s3987_s17  ;;  %3558 = vmatprep.subr.bf16.mxu0 %v3988_v2 }
 0x7ae   :  { %v1014_v57 = vpop.f32.mrf.mxu0  ;;  %v954_v13 = vrot.slane %v947_v56, 1 }
 0x7af   :  { %v3538_v58 = vpop.f32.mrf.mxu1 }
 0x7b0   :  { %v3547_v59 = vpop.f32.mrf.mxu0  ;;  %3559 = vmatpush3.bf16.msra.mxu0 %v3786_v51 }
 0x7b1   :  { %v950_v60 = vpop.f32.mrf.mxu1  ;;  %3572 = vmatprep.subr.bf16.mxu0 %v3988_v2 }
 0x7b3   :  { %v3539_v62 = vpop.f32.mrf.mxu1 }
 0x7b5   :  { %v1069_v63 = vpop.f32.mrf.mxu1 }
 0x7b6   :  { %v1076_v23 = vrot.slane %v1069_v63, 1 }
 0x7b7   :  { %v3554_v1 = vpop.f32.mrf.mxu1 }
 0x7b9   :  { %v1072_v9 = vpop.f32.mrf.mxu1 }
 0x7bb   :  { %v3555_v11 = vpop.f32.mrf.mxu1 }
 0x81d   :  { %v1020_v4 = vpop.permute.xlu1 %1019 }
 0x81e   :  { %v1025_v5 = vadd.f32 %v1020_v4, %v4253_v3 }
 0x81f   :  { %v1022_v7 = vpop.permute.xlu0 %1021 }
 0x820   :  { %3845 = vtanh.f32 %v1025_v5  ;;  %v1026_v8 = vadd.f32 %v1022_v7, %v4259_v6 }
 0x822   :  { %3847 = vtanh.f32 %v1026_v8 }
 0x823   :  { %3849 = vtanh.f32 %v899_v17 }
 0x824   :  { %3851 = vtanh.f32 %v900_v18 }
 0x82d   :  { %v3846_v10 = vpop.eup %3845 }
 0x82e   :  { %1097 = vrot.lane.b32.xlu1 %v3846_v10, %s3987_s17 }
 0x82f   :  { %v3848_v12 = vpop.eup %3847 }
 0x830   :  { %1099 = vrot.lane.b32.xlu0 %v3848_v12, %s3987_s17  ;;  %v3850_v19 = vpop.eup %3849 }
 0x831   :  { %v3852_v21 = vpop.eup %3851  ;;  %v903_v22 = vadd.f32 1.0, %v3850_v19 }
 0x832   :  { %955 = vrot.lane.b32.xlu1 %v947_v56, %s3991_s21  ;;  %v904_v25 = vadd.f32 1.0, %v3852_v21 }
 0x833   :  { %v905_v26 = vmul.f32 0.5, %v903_v22 }
 0x834   :  { %957 = vrot.lane.b32.xlu0 %v954_v13, %s3991_s21  ;;  %v906_v30 = vmul.f32 0.5, %v904_v25 }
 0x8a0   :  { %v1098_v28 = vpop.permute.xlu1 %1097 }
 0x8a1   :  { %v1103_v29 = vmul.f32 %v1098_v28, %v905_v26 }
 0x8a2   :  { %v1100_v20 = vpop.permute.xlu0 %1099 }
 0x8a3   :  { %v1104_v31 = vmul.f32 %v1100_v20, %v906_v30  ;;  %1107 = vrot.lane.b32.xlu1 %v1103_v29, %s3991_s21 }
 0x8a4   :  { %v956_v32 = vpop.permute.xlu1 %955 }
 0x8a5   :  { %1109 = vrot.lane.b32.xlu0 %v1104_v31, %s3991_s21  ;;  %v961_v34 = vadd.f32 %v956_v32, %v4253_v3 }
 0x8a6   :  { %v958_v33 = vpop.permute.xlu0 %957 }
 0x8a7   :  { %1077 = vrot.lane.b32.xlu1 %v1069_v63, %s3990_s20  ;;  %v962_v35 = vadd.f32 %v958_v33, %v4259_v6  ;;  %v963_v36 = vmul.f32 0.5, %v961_v34 }
 0x8a9   :  { %1079 = vrot.lane.b32.xlu0 %v1076_v23, %s3990_s20  ;;  %v964_v37 = vmul.f32 0.5, %v962_v35  ;;  %3853 = vtanh.f32 %v963_v36 }
 0x8ab   :  { %3855 = vtanh.f32 %v964_v37 }
 0x8b6   :  { %v3854_v38 = vpop.eup %3853 }
 0x8b7   :  { %v967_v27 = vadd.f32 1.0, %v3854_v38 }
 0x8b8   :  { %v3856_v24 = vpop.eup %3855 }
 0x8b9   :  { %v968_v39 = vadd.f32 1.0, %v3856_v24  ;;  %v969_v40 = vmul.f32 0.5, %v967_v27 }
 0x8bb   :  { %v970_v41 = vmul.f32 0.5, %v968_v39  ;;  %v1093_v42 = vmul.f32 %v969_v40, %v4186_v61 }
 0x8bd   :  { %v1094_v45 = vmul.f32 %v970_v41, %v4190_v0  ;;  %v3784_v0 = vld [vmem:[%s4753_s1] sm:$0xff]  }
 0x8be   :  { %3567 = vmatpush3.bf16.msra.mxu1 %v3784_v0 }
 0x8bf   :  { %3580 = vmatprep.subr.bf16.mxu1 %v3988_v2 }
 0x915   :  { %v1108_v43 = vpop.permute.xlu1 %1107 }
 0x916   :  { %v4275_v44 = vadd.f32 %v1108_v43, %v1093_v42 }
 0x917   :  { %v1110_v46 = vpop.permute.xlu0 %1109 }
 0x918   :  { %3857 = vtanh.f32 %v4275_v44  ;;  %v4279_v47 = vadd.f32 %v1110_v46, %v1094_v45 }
 0x919   :  { %v1078_v52 = vpop.permute.xlu1 %1077 }
 0x91a   :  { %3859 = vtanh.f32 %v4279_v47  ;;  %v1083_v56 = vadd.f32 %v1078_v52, %v4253_v3  ;;  %v4348_v52 = vld [vmem:[%s4752_s0 + $0xb] sm:$0x1] }
 0x91b   :  { %v1080_v55 = vpop.permute.xlu0 %1079 }
 0x91c   :  { %v1084_v57 = vadd.f32 %v1080_v55, %v4259_v6  ;;  %v1085_v58 = vmul.f32 0.5, %v1083_v56 }
 0x91e   :  { %v1086_v59 = vmul.f32 0.5, %v1084_v57  ;;  %3861 = vtanh.f32 %v1085_v58 }
 0x920   :  { %3863 = vtanh.f32 %v1086_v59 }
 0x925   :  { %v3858_v61 = vpop.eup %3857 }
 0x926   :  { %1119 = vrot.lane.b32.xlu1 %v3858_v61, %s3987_s17 }
 0x927   :  { %v3860_v49 = vpop.eup %3859 }
 0x928   :  { %1121 = vrot.lane.b32.xlu0 %v3860_v49, %s3987_s17  ;;  %v4342_v49 = vld [vmem:[%s4752_s0 + $0x3] sm:$0x1] }
 0x92a   :  { %1369 = vrot.lane.b32.xlu1 %v3783_v48, %s3987_s17 }
 0x92b   :  { %v3862_v60 = vpop.eup %3861 }
 0x92c   :  { %v1089_v63 = vadd.f32 1.0, %v3862_v60 }
 0x92d   :  { %v3864_v62 = vpop.eup %3863 }
 0x92e   :  { %1305 = vrot.lane.b32.xlu1 %v3783_v48, %s3990_s20  ;;  %v1090_v1 = vadd.f32 1.0, %v3864_v62  ;;  %v1091_v9 = vmul.f32 0.5, %v1089_v63 }
 0x930   :  { %v1092_v5 = vmul.f32 0.5, %v1090_v1 }
 0x932   :  { %1427 = vrot.lane.b32.xlu1 %v3783_v48, %s3991_s21 }
 0x998   :  { %v1120_v11 = vpop.permute.xlu1 %1119 }
 0x999   :  { %v1125_v4 = vmul.f32 %v1120_v11, %v1091_v9 }
 0x99a   :  { %v1122_v7 = vpop.permute.xlu0 %1121 }
 0x99b   :  { %v1126_v8 = vmul.f32 %v1122_v7, %v1092_v5  ;;  %v1127_v10 = vpack.c.bf16 %v1125_v4, %v1125_v4 }
 0x99c   :  { %v1370_v16 = vpop.permute.xlu1 %1369 }
 0x99d   :  { %v1128_v12 = vpack.c.bf16 %v1126_v8, %v1126_v8  ;;  %v1142_v3 = vunpack.c.l.b16 %v1127_v10 }
 0x99f   :  { %v1143_v13 = vunpack.c.l.b16 %v1128_v12 }
 0x9a0   :  { %v1306_v17 = vpop.permute.xlu1 %1305 }
 0x9a1   :  { %v1144_v14 = vrot.slane %v1143_v13, 7 }
 0x9a3   :  { %v1145_v6 = vsel %vm351_vm3, %v1144_v14, %v1142_v3 }
 0x9a4   :  { %v1146_v15 = vpack.c.b16 %v1145_v6, %v1145_v6  ;;  %v1428_v22 = vpop.permute.xlu1 %1427 }
 0x9a6   :  { %1147 = vrot.lane.b32.xlu0 %v1146_v15, %s3991_s21 }
 0x9aa   :  { %1367 = vrot.lane.b32.xlu0 %v3784_v0, %s3987_s17 }
 0x9ae   :  { %1303 = vrot.lane.b32.xlu0 %v3784_v0, %s3990_s20 }
 0x9b2   :  { %1425 = vrot.lane.b32.xlu0 %v3784_v0, %s3991_s21 }
 0xa18   :  { %v1148_v18 = vpop.permute.xlu0 %1147 }
 0xa19   :  { %3561 = vmatmul.mubr.msk.bf16.vlgmr.msra.gmra.mxu0 %vm47_vm2, %v1148_v18  ;;  %3569 = vmatmul.mubr.msk.bf16.vlgmr.msra.gmra.mxu1 %vm47_vm2, %v1148_v18 }
 0xa1a   :  { %3581 = vmatpush3.bf16.msra.mxu1 %v1370_v16  ;;  %3573 = vmatpush3.bf16.msra.mxu0 %v1306_v17 }
 0xa1b   :  { %3582 = vmatprep.subr.bf16.mxu1 %v3988_v2  ;;  %3574 = vmatprep.subr.bf16.mxu0 %v3988_v2 }
 0xa1c   :  { %v1368_v19 = vpop.permute.xlu0 %1367  ;;  %3584 = vmatprep.mubr.msk.bf16.mxu1 %vm3989_vm1, %v3988_v2  ;;  %3576 = vmatprep.mubr.msk.bf16.mxu0 %vm3989_vm1, %v3988_v2 }
 0xa1e   :  { %3583 = vmatpush3.bf16.msra.mxu1 %v1368_v19 }
 0xa1f   :  { %3596 = vmatprep.subr.bf16.mxu1 %v3988_v2 }
 0xa20   :  { %v1304_v21 = vpop.permute.xlu0 %1303 }
 0xa21   :  { %3575 = vmatpush3.bf16.msra.mxu0 %v1304_v21  ;;  %3585 = vmatmul.mubr.msk.bf16.vlgmr.msra.gmra.mxu1 %vm47_vm2, %v1148_v18 }
 0xa22   :  { %3588 = vmatprep.subr.bf16.mxu0 %v3988_v2  ;;  %3600 = vmatprep.mubr.msk.bf16.mxu1 %vm3989_vm1, %v3988_v2 }
 0xa24   :  { %3577 = vmatmul.mubr.msk.bf16.vlgmr.msra.gmra.mxu0 %vm47_vm2, %v1148_v18  ;;  %v1426_v25 = vpop.permute.xlu0 %1425 }
 0xa25   :  { %3589 = vmatpush3.bf16.msra.mxu0 %v1428_v22  ;;  %3592 = vmatprep.mubr.msk.bf16.mxu0 %vm3989_vm1, %v3988_v2 }
 0xa26   :  { %3590 = vmatprep.subr.bf16.mxu0 %v3988_v2 }
 0xa29   :  { %3591 = vmatpush3.bf16.msra.mxu0 %v1426_v25 }
 0xa2a   :  { %3604 = vmatprep.subr.bf16.mxu0 %v3988_v2 }
 0xa2c   :  { %3593 = vmatmul.mubr.msk.bf16.vlgmr.msra.gmra.mxu0 %vm47_vm2, %v1148_v18 }
 0xa2d   :  { %3608 = vmatprep.mubr.msk.bf16.mxu0 %vm3989_vm1, %v3988_v2 }
 0xad9   :  { %v1198_v26 = vpop.f32.mrf.mxu0  ;;  %v1283_v28 = vpop.f32.mrf.mxu1 }
 0xada   :  { %v1199_v29 = vadd.f32 %v4149_v53, %v1198_v26  ;;  %v1290_v60 = vrot.slane %v1283_v28, 1  ;;  %v1293_v62 = vadd.f32 %v1283_v28, %v4342_v49 }
 0xadb   :  { %v3562_v30 = vpop.f32.mrf.mxu0  ;;  %v3570_v20 = vpop.f32.mrf.mxu1 }
 0xadc   :  { %v1211_v31 = vrot.slane %v1199_v29, %v4151_v54  ;;  %v1294_v63 = vadd.f32 %v1290_v60, %v4348_v52  ;;  %v1295_v1 = vmul.f32 0.5, %v1293_v62 }
 0xadd   :  { %v1201_v23 = vpop.f32.mrf.mxu0  ;;  %v1286_v32 = vpop.f32.mrf.mxu1 }
 0xade   :  { %v1212_v33 = vcombine.high %v1211_v31, %v1211_v31  ;;  %v1219_v34 = vrot.slane %v1211_v31, %v4151_v54  ;;  %v1296_v9 = vmul.f32 0.5, %v1294_v63 }
 0xadf   :  { %v3563_v35 = vpop.f32.mrf.mxu0  ;;  %v3571_v36 = vpop.f32.mrf.mxu1 }
 0xae0   :  { %v1226_v37 = vrot.slane %v1212_v33, %v4151_v54  ;;  %1229 = vst.msk [vmem:[#allocation4 + $0x2] sm:$0x1] %vm436_vm4, %v1219_v34  ;;  %v3787_v35 = vld [vmem:[%s4753_s1 + $0x8] sm:$0xff]  }
 0xae1   :  { %v1407_v38 = vpop.f32.mrf.mxu1  ;;  %3605 = vmatpush3.bf16.msra.mxu0 %v3787_v35 }
 0xae2   :  { %1230 = vst.msk [vmem:[#allocation4 + $0xa] sm:$0x1] %vm436_vm4, %v1226_v37  ;;  %v1414_v24 = vrot.slane %v1407_v38, 1  ;;  %1415 = vrot.lane.b32.xlu0 %v1407_v38, %s3987_s17  ;;  %3606 = vmatprep.subr.bf16.mxu0 %v3988_v2  ;;  %v3789_v37 = vld [vmem:[%s4754_s2 + $0x8] sm:$0xff]   ;;  %v3790_v38 = vld [vmem:[%s4754_s2] sm:$0xff]  }
 0xae3   :  { %v3586_v27 = vpop.f32.mrf.mxu1  ;;  %3597 = vmatpush3.bf16.msra.mxu1 %v3789_v37 }
 0xae4   :  { %1417 = vrot.lane.b32.xlu1 %v1414_v24, %s3987_s17  ;;  %v1343_v39 = vpop.f32.mrf.mxu0  ;;  %3598 = vmatprep.subr.bf16.mxu1 %v3988_v2 }
 0xae5   :  { %v1410_v40 = vpop.f32.mrf.mxu1  ;;  %v1350_v59 = vrot.slane %v1343_v39, 1 }
 0xae6   :  { %v3578_v41 = vpop.f32.mrf.mxu0 }
 0xae7   :  { %v3587_v42 = vpop.f32.mrf.mxu1  ;;  %3599 = vmatpush3.bf16.msra.mxu1 %v3790_v38  ;;  %v4437_v38 = vld [vmem:[%s4752_s0 + $0xc] sm:$0x1] }
 0xae8   :  { %v1346_v43 = vpop.f32.mrf.mxu0  ;;  %3612 = vmatprep.subr.bf16.mxu1 %v3988_v2 }
 0xaea   :  { %v3579_v45 = vpop.f32.mrf.mxu0 }
 0xaec   :  { %v1465_v46 = vpop.f32.mrf.mxu0 }
 0xaed   :  { %v1472_v6 = vrot.slane %v1465_v46, 1 }
 0xaee   :  { %v3594_v48 = vpop.f32.mrf.mxu0 }
 0xaf0   :  { %v1468_v61 = vpop.f32.mrf.mxu0 }
 0xaf2   :  { %v3595_v0 = vpop.f32.mrf.mxu0 }
 0xb54   :  { %v1416_v50 = vpop.permute.xlu0 %1415 }
 0xb55   :  { %v1421_v51 = vadd.f32 %v1416_v50, %v4342_v49 }
 0xb56   :  { %v1418_v55 = vpop.permute.xlu1 %1417 }
 0xb57   :  { %3865 = vtanh.f32 %v1421_v51  ;;  %v1422_v56 = vadd.f32 %v1418_v55, %v4348_v52 }
 0xb59   :  { %3867 = vtanh.f32 %v1422_v56 }
 0xb5a   :  { %3869 = vtanh.f32 %v1295_v1 }
 0xb5b   :  { %3871 = vtanh.f32 %v1296_v9 }
 0xb64   :  { %v3866_v57 = vpop.eup %3865 }
 0xb65   :  { %1493 = vrot.lane.b32.xlu0 %v3866_v57, %s3987_s17 }
 0xb66   :  { %v3868_v58 = vpop.eup %3867 }
 0xb67   :  { %1495 = vrot.lane.b32.xlu1 %v3868_v58, %s3987_s17  ;;  %v3870_v11 = vpop.eup %3869 }
 0xb68   :  { %v3872_v4 = vpop.eup %3871  ;;  %v1299_v5 = vadd.f32 1.0, %v3870_v11 }
 0xb69   :  { %1351 = vrot.lane.b32.xlu0 %v1343_v39, %s3991_s21  ;;  %v1300_v7 = vadd.f32 1.0, %v3872_v4 }
 0xb6a   :  { %v1301_v8 = vmul.f32 0.5, %v1299_v5 }
 0xb6b   :  { %1353 = vrot.lane.b32.xlu1 %v1350_v59, %s3991_s21  ;;  %v1302_v13 = vmul.f32 0.5, %v1300_v7 }
 0xbd7   :  { %v1494_v10 = vpop.permute.xlu0 %1493 }
 0xbd8   :  { %v1499_v12 = vmul.f32 %v1494_v10, %v1301_v8 }
 0xbd9   :  { %v1496_v3 = vpop.permute.xlu1 %1495 }
 0xbda   :  { %v1500_v14 = vmul.f32 %v1496_v3, %v1302_v13  ;;  %1503 = vrot.lane.b32.xlu0 %v1499_v12, %s3991_s21 }
 0xbdb   :  { %v1352_v15 = vpop.permute.xlu0 %1351 }
 0xbdc   :  { %1505 = vrot.lane.b32.xlu1 %v1500_v14, %s3991_s21  ;;  %v1357_v17 = vadd.f32 %v1352_v15, %v4342_v49 }
 0xbdd   :  { %v1354_v16 = vpop.permute.xlu1 %1353 }
 0xbde   :  { %1473 = vrot.lane.b32.xlu0 %v1465_v46, %s3990_s20  ;;  %v1358_v18 = vadd.f32 %v1354_v16, %v4348_v52  ;;  %v1359_v19 = vmul.f32 0.5, %v1357_v17 }
 0xbe0   :  { %1475 = vrot.lane.b32.xlu1 %v1472_v6, %s3990_s20  ;;  %v1360_v21 = vmul.f32 0.5, %v1358_v18  ;;  %3873 = vtanh.f32 %v1359_v19 }
 0xbe2   :  { %3875 = vtanh.f32 %v1360_v21 }
 0xbed   :  { %v3874_v22 = vpop.eup %3873 }
 0xbee   :  { %v1363_v26 = vadd.f32 1.0, %v3874_v22 }
 0xbef   :  { %v3876_v25 = vpop.eup %3875 }
 0xbf0   :  { %v1364_v28 = vadd.f32 1.0, %v3876_v25  ;;  %v1365_v29 = vmul.f32 0.5, %v1363_v26 }
 0xbf2   :  { %v1366_v30 = vmul.f32 0.5, %v1364_v28  ;;  %v1489_v20 = vmul.f32 %v1365_v29, %v4275_v44 }
 0xbf4   :  { %v1490_v32 = vmul.f32 %v1366_v30, %v4279_v47  ;;  %v3788_v47 = vld [vmem:[%s4753_s1] sm:$0xff]  }
 0xbf5   :  { %3607 = vmatpush3.bf16.msra.mxu0 %v3788_v47 }
 0xbf6   :  { %3620 = vmatprep.subr.bf16.mxu0 %v3988_v2 }
 0xc4c   :  { %v1504_v31 = vpop.permute.xlu0 %1503 }
 0xc4d   :  { %v4364_v23 = vadd.f32 %v1504_v31, %v1489_v20 }
 0xc4e   :  { %v1506_v33 = vpop.permute.xlu1 %1505 }
 0xc4f   :  { %3877 = vtanh.f32 %v4364_v23  ;;  %v4368_v34 = vadd.f32 %v1506_v33, %v1490_v32 }
 0xc50   :  { %v1474_v24 = vpop.permute.xlu0 %1473 }
 0xc51   :  { %3879 = vtanh.f32 %v4368_v34  ;;  %v1479_v39 = vadd.f32 %v1474_v24, %v4342_v49 }
 0xc52   :  { %v1476_v27 = vpop.permute.xlu1 %1475 }
 0xc53   :  { %v1480_v40 = vadd.f32 %v1476_v27, %v4348_v52  ;;  %v1481_v41 = vmul.f32 0.5, %v1479_v39 }
 0xc55   :  { %v1482_v42 = vmul.f32 0.5, %v1480_v40  ;;  %3881 = vtanh.f32 %v1481_v41 }
 0xc57   :  { %3883 = vtanh.f32 %v1482_v42 }
 0xc5c   :  { %v3878_v44 = vpop.eup %3877 }
 0xc5d   :  { %1515 = vrot.lane.b32.xlu0 %v3878_v44, %s3987_s17 }
 0xc5e   :  { %v3880_v36 = vpop.eup %3879 }
 0xc5f   :  { %1517 = vrot.lane.b32.xlu1 %v3880_v36, %s3987_s17 }
 0xc61   :  { %1765 = vrot.lane.b32.xlu0 %v3787_v35, %s3987_s17 }
 0xc62   :  { %v3882_v43 = vpop.eup %3881 }
 0xc63   :  { %v1485_v46 = vadd.f32 1.0, %v3882_v43 }
 0xc64   :  { %v3884_v45 = vpop.eup %3883 }
 0xc65   :  { %1701 = vrot.lane.b32.xlu0 %v3787_v35, %s3990_s20  ;;  %v1486_v48 = vadd.f32 1.0, %v3884_v45  ;;  %v1487_v61 = vmul.f32 0.5, %v1485_v46 }
 0xc67   :  { %v1488_v51 = vmul.f32 0.5, %v1486_v48 }
 0xc69   :  { %1823 = vrot.lane.b32.xlu0 %v3787_v35, %s3991_s21 }
 0xccf   :  { %v1516_v0 = vpop.permute.xlu0 %1515 }
 0xcd0   :  { %v1521_v50 = vmul.f32 %v1516_v0, %v1487_v61 }
 0xcd1   :  { %v1518_v55 = vpop.permute.xlu1 %1517 }
 0xcd2   :  { %v1522_v56 = vmul.f32 %v1518_v55, %v1488_v51  ;;  %v1523_v57 = vpack.c.bf16 %v1521_v50, %v1521_v50 }
 0xcd3   :  { %v1766_v63 = vpop.permute.xlu0 %1765 }
 0xcd4   :  { %v1524_v58 = vpack.c.bf16 %v1522_v56, %v1522_v56  ;;  %v1538_v49 = vunpack.c.l.b16 %v1523_v57 }
 0xcd6   :  { %v1539_v59 = vunpack.c.l.b16 %v1524_v58 }
 0xcd7   :  { %v1702_v1 = vpop.permute.xlu0 %1701 }
 0xcd8   :  { %v1540_v60 = vrot.slane %v1539_v59, 7 }
 0xcda   :  { %v1541_v52 = vsel %vm351_vm3, %v1540_v60, %v1538_v49 }
 0xcdb   :  { %v1542_v62 = vpack.c.b16 %v1541_v52, %v1541_v52  ;;  %v1824_v5 = vpop.permute.xlu0 %1823 }
 0xcdd   :  { %1543 = vrot.lane.b32.xlu1 %v1542_v62, %s3991_s21 }
 0xce1   :  { %1763 = vrot.lane.b32.xlu1 %v3788_v47, %s3987_s17 }
 0xce5   :  { %1699 = vrot.lane.b32.xlu1 %v3788_v47, %s3990_s20 }
 0xce9   :  { %1821 = vrot.lane.b32.xlu1 %v3788_v47, %s3991_s21  ;;  %v4431_v47 = vld [vmem:[%s4752_s0 + $0x4] sm:$0x1] }
 0xd4f   :  { %v1544_v9 = vpop.permute.xlu1 %1543 }
 0xd50   :  { %3601 = vmatmul.mubr.msk.bf16.vlgmr.msra.gmra.mxu1 %vm47_vm2, %v1544_v9  ;;  %3609 = vmatmul.mubr.msk.bf16.vlgmr.msra.gmra.mxu0 %vm47_vm2, %v1544_v9 }
 0xd51   :  { %3621 = vmatpush3.bf16.msra.mxu0 %v1766_v63  ;;  %3613 = vmatpush3.bf16.msra.mxu1 %v1702_v1 }
 0xd52   :  { %3622 = vmatprep.subr.bf16.mxu0 %v3988_v2  ;;  %3614 = vmatprep.subr.bf16.mxu1 %v3988_v2 }
 0xd53   :  { %v1764_v11 = vpop.permute.xlu1 %1763  ;;  %3624 = vmatprep.mubr.msk.bf16.mxu0 %vm3989_vm1, %v3988_v2  ;;  %3616 = vmatprep.mubr.msk.bf16.mxu1 %vm3989_vm1, %v3988_v2 }
 0xd55   :  { %3623 = vmatpush3.bf16.msra.mxu0 %v1764_v11 }
 0xd56   :  { %3636 = vmatprep.subr.bf16.mxu0 %v3988_v2 }
 0xd57   :  { %v1700_v4 = vpop.permute.xlu1 %1699 }
 0xd58   :  { %3615 = vmatpush3.bf16.msra.mxu1 %v1700_v4  ;;  %3625 = vmatmul.mubr.msk.bf16.vlgmr.msra.gmra.mxu0 %vm47_vm2, %v1544_v9 }
 0xd59   :  { %3628 = vmatprep.subr.bf16.mxu1 %v3988_v2  ;;  %3640 = vmatprep.mubr.msk.bf16.mxu0 %vm3989_vm1, %v3988_v2 }
 0xd5b   :  { %3617 = vmatmul.mubr.msk.bf16.vlgmr.msra.gmra.mxu1 %vm47_vm2, %v1544_v9  ;;  %v1822_v7 = vpop.permute.xlu1 %1821 }
 0xd5c   :  { %3629 = vmatpush3.bf16.msra.mxu1 %v1824_v5  ;;  %3632 = vmatprep.mubr.msk.bf16.mxu1 %vm3989_vm1, %v3988_v2 }
 0xd5d   :  { %3630 = vmatprep.subr.bf16.mxu1 %v3988_v2 }
 0xd60   :  { %3631 = vmatpush3.bf16.msra.mxu1 %v1822_v7 }
 0xd61   :  { %3644 = vmatprep.subr.bf16.mxu1 %v3988_v2 }
 0xd63   :  { %3633 = vmatmul.mubr.msk.bf16.vlgmr.msra.gmra.mxu1 %vm47_vm2, %v1544_v9 }
 0xd64   :  { %3648 = vmatprep.mubr.msk.bf16.mxu1 %vm3989_vm1, %v3988_v2 }
 0xe10   :  { %v1594_v8 = vpop.f32.mrf.mxu1  ;;  %v1679_v10 = vpop.f32.mrf.mxu0 }
 0xe11   :  { %v1595_v12 = vadd.f32 %v4149_v53, %v1594_v8  ;;  %v1686_v42 = vrot.slane %v1679_v10, 1  ;;  %v1689_v43 = vadd.f32 %v1679_v10, %v4431_v47 }
 0xe12   :  { %v3602_v13 = vpop.f32.mrf.mxu1  ;;  %v3610_v3 = vpop.f32.mrf.mxu0 }
 0xe13   :  { %v1607_v14 = vrot.slane %v1595_v12, %v4151_v54  ;;  %v1690_v45 = vadd.f32 %v1686_v42, %v4437_v38  ;;  %v1691_v46 = vmul.f32 0.5, %v1689_v43 }
 0xe14   :  { %v1597_v6 = vpop.f32.mrf.mxu1  ;;  %v1682_v15 = vpop.f32.mrf.mxu0 }
 0xe15   :  { %v1608_v16 = vcombine.high %v1607_v14, %v1607_v14  ;;  %v1615_v17 = vrot.slane %v1607_v14, %v4151_v54  ;;  %v1692_v48 = vmul.f32 0.5, %v1690_v45 }
 0xe16   :  { %v3603_v18 = vpop.f32.mrf.mxu1  ;;  %v3611_v19 = vpop.f32.mrf.mxu0 }
 0xe17   :  { %v1622_v21 = vrot.slane %v1608_v16, %v4151_v54  ;;  %1625 = vst.msk [vmem:[#allocation4 + $0x3] sm:$0x1] %vm436_vm4, %v1615_v17  ;;  %v3791_v17 = vld [vmem:[%s4753_s1 + $0x8] sm:$0xff]  }
 0xe18   :  { %v1803_v22 = vpop.f32.mrf.mxu0  ;;  %3645 = vmatpush3.bf16.msra.mxu1 %v3791_v17  ;;  %v3793_v19 = vld [vmem:[%s4754_s2 + $0x8] sm:$0xff]  }
 0xe19   :  { %1626 = vst.msk [vmem:[#allocation4 + $0xb] sm:$0x1] %vm436_vm4, %v1622_v21  ;;  %v1810_v25 = vrot.slane %v1803_v22, 1  ;;  %1811 = vrot.lane.b32.xlu1 %v1803_v22, %s3987_s17  ;;  %3646 = vmatprep.subr.bf16.mxu1 %v3988_v2  ;;  %v3794_v21 = vld [vmem:[%s4754_s2] sm:$0xff]  }
 0xe1a   :  { %v3626_v53 = vpop.f32.mrf.mxu0  ;;  %3637 = vmatpush3.bf16.msra.mxu0 %v3793_v19 }
 0xe1b   :  { %v1739_v26 = vpop.f32.mrf.mxu1  ;;  %1813 = vrot.lane.b32.xlu0 %v1810_v25, %s3987_s17  ;;  %3638 = vmatprep.subr.bf16.mxu0 %v3988_v2 }
 0xe1c   :  { %v1806_v28 = vpop.f32.mrf.mxu0  ;;  %v1746_v41 = vrot.slane %v1739_v26, 1 }
 0xe1d   :  { %v3618_v29 = vpop.f32.mrf.mxu1 }
 0xe1e   :  { %v3627_v30 = vpop.f32.mrf.mxu0  ;;  %3639 = vmatpush3.bf16.msra.mxu0 %v3794_v21 }
 0xe1f   :  { %v1742_v20 = vpop.f32.mrf.mxu1  ;;  %3652 = vmatprep.subr.bf16.mxu0 %v3988_v2 }
 0xe21   :  { %v3619_v31 = vpop.f32.mrf.mxu1 }
 0xe23   :  { %v1861_v32 = vpop.f32.mrf.mxu1 }
 0xe24   :  { %v1868_v60 = vrot.slane %v1861_v32, 1 }
 0xe25   :  { %v3634_v33 = vpop.f32.mrf.mxu1 }
 0xe27   :  { %v1864_v35 = vpop.f32.mrf.mxu1 }
 0xe29   :  { %v3635_v44 = vpop.f32.mrf.mxu1 }
 0xe8b   :  { %v1812_v36 = vpop.permute.xlu1 %1811 }
 0xe8c   :  { %v1817_v37 = vadd.f32 %v1812_v36, %v4431_v47 }
 0xe8d   :  { %v1814_v24 = vpop.permute.xlu0 %1813 }
 0xe8e   :  { %3885 = vtanh.f32 %v1817_v37  ;;  %v1818_v27 = vadd.f32 %v1814_v24, %v4437_v38 }
 0xe90   :  { %3887 = vtanh.f32 %v1818_v27 }
 0xe91   :  { %3889 = vtanh.f32 %v1691_v46 }
 0xe92   :  { %3891 = vtanh.f32 %v1692_v48 }
 0xe9b   :  { %v3886_v39 = vpop.eup %3885 }
 0xe9c   :  { %1889 = vrot.lane.b32.xlu1 %v3886_v39, %s3987_s17 }
 0xe9d   :  { %v3888_v40 = vpop.eup %3887 }
 0xe9e   :  { %1891 = vrot.lane.b32.xlu0 %v3888_v40, %s3987_s17  ;;  %v3890_v61 = vpop.eup %3889 }
 0xe9f   :  { %v3892_v0 = vpop.eup %3891  ;;  %v1695_v50 = vadd.f32 1.0, %v3890_v61 }
 0xea0   :  { %1747 = vrot.lane.b32.xlu1 %v1739_v26, %s3991_s21  ;;  %v1696_v51 = vadd.f32 1.0, %v3892_v0 }
 0xea1   :  { %v1697_v55 = vmul.f32 0.5, %v1695_v50 }
 0xea2   :  { %1749 = vrot.lane.b32.xlu0 %v1746_v41, %s3991_s21  ;;  %v1698_v58 = vmul.f32 0.5, %v1696_v51  ;;  %v4512_v51 = vld [vmem:[%s4755_s3] ss:$0 sm:$0xff] }
 0xf0e   :  { %v1890_v56 = vpop.permute.xlu1 %1889 }
 0xf0f   :  { %v1895_v57 = vmul.f32 %v1890_v56, %v1697_v55 }
 0xf10   :  { %v1892_v59 = vpop.permute.xlu0 %1891 }
 0xf11   :  { %v1896_v49 = vmul.f32 %v1892_v59, %v1698_v58  ;;  %1899 = vrot.lane.b32.xlu1 %v1895_v57, %s3991_s21 }
 0xf12   :  { %v1748_v52 = vpop.permute.xlu1 %1747 }
 0xf13   :  { %1901 = vrot.lane.b32.xlu0 %v1896_v49, %s3991_s21  ;;  %v1753_v63 = vadd.f32 %v1748_v52, %v4431_v47 }
 0xf14   :  { %v1750_v62 = vpop.permute.xlu0 %1749 }
 0xf15   :  { %1869 = vrot.lane.b32.xlu1 %v1861_v32, %s3990_s20  ;;  %v1754_v1 = vadd.f32 %v1750_v62, %v4437_v38  ;;  %v1755_v9 = vmul.f32 0.5, %v1753_v63 }
 0xf17   :  { %1871 = vrot.lane.b32.xlu0 %v1868_v60, %s3990_s20  ;;  %v1756_v11 = vmul.f32 0.5, %v1754_v1  ;;  %3893 = vtanh.f32 %v1755_v9 }
 0xf19   :  { %3895 = vtanh.f32 %v1756_v11 }
 0xf24   :  { %v3894_v4 = vpop.eup %3893 }
 0xf25   :  { %v1759_v7 = vadd.f32 1.0, %v3894_v4 }
 0xf26   :  { %v3896_v5 = vpop.eup %3895 }
 0xf27   :  { %v1760_v8 = vadd.f32 1.0, %v3896_v5  ;;  %v1761_v10 = vmul.f32 0.5, %v1759_v7 }
 0xf29   :  { %v1762_v12 = vmul.f32 0.5, %v1760_v8  ;;  %v1885_v13 = vmul.f32 %v1761_v10, %v4364_v23 }
 0xf2b   :  { %v1886_v6 = vmul.f32 %v1762_v12, %v4368_v34  ;;  %v3792_v34 = vld [vmem:[%s4753_s1] sm:$0xff]  }
 0xf2c   :  { %3647 = vmatpush3.bf16.msra.mxu1 %v3792_v34 }
 0xf2d   :  { %3660 = vmatprep.subr.bf16.mxu1 %v3988_v2 }
 0xf83   :  { %v1900_v3 = vpop.permute.xlu1 %1899 }
 0xf84   :  { %v4453_v14 = vadd.f32 %v1900_v3, %v1885_v13 }
 0xf85   :  { %v1902_v15 = vpop.permute.xlu0 %1901 }
 0xf86   :  { %3897 = vtanh.f32 %v4453_v14  ;;  %v4457_v16 = vadd.f32 %v1902_v15, %v1886_v6 }
 0xf87   :  { %v1870_v22 = vpop.permute.xlu1 %1869 }
 0xf88   :  { %3899 = vtanh.f32 %v4457_v16  ;;  %v1875_v53 = vadd.f32 %v1870_v22, %v4431_v47  ;;  %v4531_v22 = vld [vmem:[%s4752_s0 + $0xd] sm:$0x1] }
 0xf89   :  { %v1872_v25 = vpop.permute.xlu0 %1871 }
 0xf8a   :  { %v1876_v26 = vadd.f32 %v1872_v25, %v4437_v38  ;;  %v1877_v28 = vmul.f32 0.5, %v1875_v53 }
 0xf8c   :  { %v1878_v29 = vmul.f32 0.5, %v1876_v26  ;;  %3901 = vtanh.f32 %v1877_v28 }
 0xf8e   :  { %3903 = vtanh.f32 %v1878_v29 }
 0xf93   :  { %v3898_v23 = vpop.eup %3897 }
 0xf94   :  { %1911 = vrot.lane.b32.xlu1 %v3898_v23, %s3987_s17 }
 0xf95   :  { %v3900_v18 = vpop.eup %3899 }
 0xf96   :  { %1913 = vrot.lane.b32.xlu0 %v3900_v18, %s3987_s17  ;;  %v4525_v18 = vld [vmem:[%s4752_s0 + $0x5] sm:$0x1] }
 0xf98   :  { %2161 = vrot.lane.b32.xlu1 %v3791_v17, %s3987_s17 }
 0xf99   :  { %v3902_v30 = vpop.eup %3901 }
 0xf9a   :  { %v1881_v31 = vadd.f32 1.0, %v3902_v30 }
 0xf9b   :  { %v3904_v20 = vpop.eup %3903 }
 0xf9c   :  { %2097 = vrot.lane.b32.xlu1 %v3791_v17, %s3990_s20  ;;  %v1882_v32 = vadd.f32 1.0, %v3904_v20  ;;  %v1883_v33 = vmul.f32 0.5, %v1881_v31 }
 0xf9e   :  { %v1884_v36 = vmul.f32 0.5, %v1882_v32 }
 0xfa0   :  { %2219 = vrot.lane.b32.xlu1 %v3791_v17, %s3991_s21 }
0x1006   :  { %v1912_v35 = vpop.permute.xlu1 %1911 }
0x1007   :  { %v1917_v44 = vmul.f32 %v1912_v35, %v1883_v33 }
0x1008   :  { %v1914_v37 = vpop.permute.xlu0 %1913 }
0x1009   :  { %v1918_v24 = vmul.f32 %v1914_v37, %v1884_v36  ;;  %v1919_v27 = vpack.c.bf16 %v1917_v44, %v1917_v44 }
0x100a   :  { %v2162_v43 = vpop.permute.xlu1 %2161 }
0x100b   :  { %v1920_v39 = vpack.c.bf16 %v1918_v24, %v1918_v24  ;;  %v1934_v47 = vunpack.c.l.b16 %v1919_v27 }
0x100d   :  { %v1935_v40 = vunpack.c.l.b16 %v1920_v39 }
0x100e   :  { %v2098_v45 = vpop.permute.xlu1 %2097 }
0x100f   :  { %v1936_v41 = vrot.slane %v1935_v40, 7 }
0x1011   :  { %v1937_v38 = vsel %vm351_vm3, %v1936_v41, %v1934_v47 }
0x1012   :  { %v1938_v42 = vpack.c.b16 %v1937_v38, %v1937_v38  ;;  %v2220_v0 = vpop.permute.xlu1 %2219 }
0x1014   :  { %1939 = vrot.lane.b32.xlu0 %v1938_v42, %s3991_s21 }
0x1018   :  { %2159 = vrot.lane.b32.xlu0 %v3792_v34, %s3987_s17 }
0x101c   :  { %2095 = vrot.lane.b32.xlu0 %v3792_v34, %s3990_s20 }
0x1020   :  { %2217 = vrot.lane.b32.xlu0 %v3792_v34, %s3991_s21 }
0x1086   :  { %v1940_v46 = vpop.permute.xlu0 %1939 }
0x1087   :  { %3641 = vmatmul.mubr.msk.bf16.vlgmr.msra.gmra.mxu0 %vm47_vm2, %v1940_v46  ;;  %3649 = vmatmul.mubr.msk.bf16.vlgmr.msra.gmra.mxu1 %vm47_vm2, %v1940_v46 }
0x1088   :  { %3661 = vmatpush3.bf16.msra.mxu1 %v2162_v43  ;;  %3653 = vmatpush3.bf16.msra.mxu0 %v2098_v45 }
0x1089   :  { %3662 = vmatprep.subr.bf16.mxu1 %v3988_v2  ;;  %3654 = vmatprep.subr.bf16.mxu0 %v3988_v2 }
0x108a   :  { %v2160_v48 = vpop.permute.xlu0 %2159  ;;  %3664 = vmatprep.mubr.msk.bf16.mxu1 %vm3989_vm1, %v3988_v2  ;;  %3656 = vmatprep.mubr.msk.bf16.mxu0 %vm3989_vm1, %v3988_v2 }
0x108c   :  { %3663 = vmatpush3.bf16.msra.mxu1 %v2160_v48 }
0x108d   :  { %3676 = vmatprep.subr.bf16.mxu1 %v3988_v2 }
0x108e   :  { %v2096_v61 = vpop.permute.xlu0 %2095 }
0x108f   :  { %3655 = vmatpush3.bf16.msra.mxu0 %v2096_v61  ;;  %3665 = vmatmul.mubr.msk.bf16.vlgmr.msra.gmra.mxu1 %vm47_vm2, %v1940_v46 }
0x1090   :  { %3668 = vmatprep.subr.bf16.mxu0 %v3988_v2  ;;  %3680 = vmatprep.mubr.msk.bf16.mxu1 %vm3989_vm1, %v3988_v2 }
0x1092   :  { %3657 = vmatmul.mubr.msk.bf16.vlgmr.msra.gmra.mxu0 %vm47_vm2, %v1940_v46  ;;  %v2218_v50 = vpop.permute.xlu0 %2217 }
0x1093   :  { %3669 = vmatpush3.bf16.msra.mxu0 %v2220_v0  ;;  %3672 = vmatprep.mubr.msk.bf16.mxu0 %vm3989_vm1, %v3988_v2 }
0x1094   :  { %3670 = vmatprep.subr.bf16.mxu0 %v3988_v2 }
0x1097   :  { %3671 = vmatpush3.bf16.msra.mxu0 %v2218_v50 }
0x1098   :  { %3684 = vmatprep.subr.bf16.mxu0 %v3988_v2 }
0x109a   :  { %3673 = vmatmul.mubr.msk.bf16.vlgmr.msra.gmra.mxu0 %vm47_vm2, %v1940_v46 }
0x109b   :  { %3688 = vmatprep.mubr.msk.bf16.mxu0 %vm3989_vm1, %v3988_v2 }
0x1147   :  { %v1990_v55 = vpop.f32.mrf.mxu0  ;;  %v2075_v56 = vpop.f32.mrf.mxu1 }
0x1148   :  { %v1991_v57 = vadd.f32 %v4512_v51, %v1990_v55  ;;  %v2082_v30 = vrot.slane %v2075_v56, 1  ;;  %v2085_v20 = vadd.f32 %v2075_v56, %v4525_v18 }
0x1149   :  { %v3642_v58 = vpop.f32.mrf.mxu0  ;;  %v3650_v59 = vpop.f32.mrf.mxu1 }
0x114a   :  { %v2003_v49 = vrot.slane %v1991_v57, %v4151_v54  ;;  %v2086_v31 = vadd.f32 %v2082_v30, %v4531_v22  ;;  %v2087_v32 = vmul.f32 0.5, %v2085_v20 }
0x114b   :  { %v1993_v60 = vpop.f32.mrf.mxu0  ;;  %v2078_v52 = vpop.f32.mrf.mxu1 }
0x114c   :  { %v2004_v62 = vcombine.high %v2003_v49, %v2003_v49  ;;  %v2011_v63 = vrot.slane %v2003_v49, %v4151_v54  ;;  %v2088_v33 = vmul.f32 0.5, %v2086_v31 }
0x114d   :  { %v3643_v1 = vpop.f32.mrf.mxu0  ;;  %v3651_v9 = vpop.f32.mrf.mxu1 }
0x114e   :  { %v2018_v11 = vrot.slane %v2004_v62, %v4151_v54  ;;  %2021 = vst.msk [vmem:[#allocation4 + $0x4] sm:$0x1] %vm436_vm4, %v2011_v63  ;;  %v3795_v1 = vld [vmem:[%s4753_s1 + $0x8] sm:$0xff]  }
0x114f   :  { %v2199_v4 = vpop.f32.mrf.mxu1  ;;  %3685 = vmatpush3.bf16.msra.mxu0 %v3795_v1 }
0x1150   :  { %2022 = vst.msk [vmem:[#allocation4 + $0xc] sm:$0x1] %vm436_vm4, %v2018_v11  ;;  %v2206_v5 = vrot.slane %v2199_v4, 1  ;;  %2207 = vrot.lane.b32.xlu0 %v2199_v4, %s3987_s17  ;;  %3686 = vmatprep.subr.bf16.mxu0 %v3988_v2  ;;  %v3797_v11 = vld [vmem:[%s4754_s2 + $0x8] sm:$0xff]   ;;  %v3798_v4 = vld [vmem:[%s4754_s2] sm:$0xff]  }
0x1151   :  { %v3666_v7 = vpop.f32.mrf.mxu1  ;;  %3677 = vmatpush3.bf16.msra.mxu1 %v3797_v11 }
0x1152   :  { %2209 = vrot.lane.b32.xlu1 %v2206_v5, %s3987_s17  ;;  %v2135_v8 = vpop.f32.mrf.mxu0  ;;  %3678 = vmatprep.subr.bf16.mxu1 %v3988_v2 }
0x1153   :  { %v2202_v10 = vpop.f32.mrf.mxu1  ;;  %v2142_v29 = vrot.slane %v2135_v8, 1 }
0x1154   :  { %v3658_v12 = vpop.f32.mrf.mxu0 }
0x1155   :  { %v3667_v13 = vpop.f32.mrf.mxu1  ;;  %3679 = vmatpush3.bf16.msra.mxu1 %v3798_v4 }
0x1156   :  { %v2138_v3 = vpop.f32.mrf.mxu0  ;;  %3692 = vmatprep.subr.bf16.mxu1 %v3988_v2 }
0x1158   :  { %v3659_v6 = vpop.f32.mrf.mxu0 }
0x115a   :  { %v2257_v15 = vpop.f32.mrf.mxu0 }
0x115b   :  { %v2264_v38 = vrot.slane %v2257_v15, 1 }
0x115c   :  { %v3674_v17 = vpop.f32.mrf.mxu0 }
0x115e   :  { %v2260_v23 = vpop.f32.mrf.mxu0 }
0x1160   :  { %v3675_v34 = vpop.f32.mrf.mxu0 }
0x11c2   :  { %v2208_v19 = vpop.permute.xlu0 %2207 }
0x11c3   :  { %v2213_v21 = vadd.f32 %v2208_v19, %v4525_v18 }
0x11c4   :  { %v2210_v25 = vpop.permute.xlu1 %2209 }
0x11c5   :  { %3905 = vtanh.f32 %v2213_v21  ;;  %v2214_v53 = vadd.f32 %v2210_v25, %v4531_v22 }
0x11c7   :  { %3907 = vtanh.f32 %v2214_v53 }
0x11c8   :  { %3909 = vtanh.f32 %v2087_v32 }
0x11c9   :  { %3911 = vtanh.f32 %v2088_v33 }
0x11d2   :  { %v3906_v26 = vpop.eup %3905 }
0x11d3   :  { %2285 = vrot.lane.b32.xlu0 %v3906_v26, %s3987_s17 }
0x11d4   :  { %v3908_v28 = vpop.eup %3907 }
0x11d5   :  { %2287 = vrot.lane.b32.xlu1 %v3908_v28, %s3987_s17  ;;  %v3910_v35 = vpop.eup %3909 }
0x11d6   :  { %v3912_v44 = vpop.eup %3911  ;;  %v2091_v36 = vadd.f32 1.0, %v3910_v35 }
0x11d7   :  { %2143 = vrot.lane.b32.xlu0 %v2135_v8, %s3991_s21  ;;  %v2092_v37 = vadd.f32 1.0, %v3912_v44 }
0x11d8   :  { %v2093_v24 = vmul.f32 0.5, %v2091_v36 }
0x11d9   :  { %2145 = vrot.lane.b32.xlu1 %v2142_v29, %s3991_s21  ;;  %v2094_v40 = vmul.f32 0.5, %v2092_v37 }
0x1245   :  { %v2286_v27 = vpop.permute.xlu0 %2285 }
0x1246   :  { %v2291_v39 = vmul.f32 %v2286_v27, %v2093_v24 }
0x1247   :  { %v2288_v47 = vpop.permute.xlu1 %2287 }
0x1248   :  { %v2292_v41 = vmul.f32 %v2288_v47, %v2094_v40  ;;  %2295 = vrot.lane.b32.xlu0 %v2291_v39, %s3991_s21 }
0x1249   :  { %v2144_v42 = vpop.permute.xlu0 %2143 }
0x124a   :  { %2297 = vrot.lane.b32.xlu1 %v2292_v41, %s3991_s21  ;;  %v2149_v45 = vadd.f32 %v2144_v42, %v4525_v18 }
0x124b   :  { %v2146_v43 = vpop.permute.xlu1 %2145 }
0x124c   :  { %2265 = vrot.lane.b32.xlu0 %v2257_v15, %s3990_s20  ;;  %v2150_v46 = vadd.f32 %v2146_v43, %v4531_v22  ;;  %v2151_v48 = vmul.f32 0.5, %v2149_v45 }
0x124e   :  { %2267 = vrot.lane.b32.xlu1 %v2264_v38, %s3990_s20  ;;  %v2152_v61 = vmul.f32 0.5, %v2150_v46  ;;  %3913 = vtanh.f32 %v2151_v48 }
0x1250   :  { %3915 = vtanh.f32 %v2152_v61 }
0x125b   :  { %v3914_v0 = vpop.eup %3913 }
0x125c   :  { %v2155_v55 = vadd.f32 1.0, %v3914_v0 }
0x125d   :  { %v3916_v50 = vpop.eup %3915 }
0x125e   :  { %v2156_v56 = vadd.f32 1.0, %v3916_v50  ;;  %v2157_v57 = vmul.f32 0.5, %v2155_v55 }
0x1260   :  { %v2158_v58 = vmul.f32 0.5, %v2156_v56  ;;  %v2281_v59 = vmul.f32 %v2157_v57, %v4453_v14 }
0x1262   :  { %v2282_v52 = vmul.f32 %v2158_v58, %v4457_v16  ;;  %v3796_v16 = vld [vmem:[%s4753_s1] sm:$0xff]  }
0x1263   :  { %3687 = vmatpush3.bf16.msra.mxu0 %v3796_v16 }
0x1264   :  { %3700 = vmatprep.subr.bf16.mxu0 %v3988_v2 }
0x12ba   :  { %v2296_v49 = vpop.permute.xlu0 %2295 }
0x12bb   :  { %v4547_v60 = vadd.f32 %v2296_v49, %v2281_v59 }
0x12bc   :  { %v2298_v62 = vpop.permute.xlu1 %2297 }
0x12bd   :  { %3917 = vtanh.f32 %v4547_v60  ;;  %v4551_v63 = vadd.f32 %v2298_v62, %v2282_v52 }
0x12be   :  { %v2266_v5 = vpop.permute.xlu0 %2265 }
0x12bf   :  { %3919 = vtanh.f32 %v4551_v63  ;;  %v2271_v8 = vadd.f32 %v2266_v5, %v4525_v18  ;;  %v4620_v5 = vld [vmem:[%s4752_s0 + $0xe] sm:$0x1] }
0x12c0   :  { %v2268_v7 = vpop.permute.xlu1 %2267 }
0x12c1   :  { %v2272_v10 = vadd.f32 %v2268_v7, %v4531_v22  ;;  %v2273_v12 = vmul.f32 0.5, %v2271_v8 }
0x12c3   :  { %v2274_v13 = vmul.f32 0.5, %v2272_v10  ;;  %3921 = vtanh.f32 %v2273_v12 }
0x12c5   :  { %3923 = vtanh.f32 %v2274_v13 }
0x12ca   :  { %v3918_v9 = vpop.eup %3917 }
0x12cb   :  { %2307 = vrot.lane.b32.xlu0 %v3918_v9, %s3987_s17 }
0x12cc   :  { %v3920_v14 = vpop.eup %3919 }
0x12cd   :  { %2309 = vrot.lane.b32.xlu1 %v3920_v14, %s3987_s17 }
0x12cf   :  { %2557 = vrot.lane.b32.xlu0 %v3795_v1, %s3987_s17 }
0x12d0   :  { %v3922_v3 = vpop.eup %3921 }
0x12d1   :  { %v2277_v15 = vadd.f32 1.0, %v3922_v3 }
0x12d2   :  { %v3924_v6 = vpop.eup %3923 }
0x12d3   :  { %2493 = vrot.lane.b32.xlu0 %v3795_v1, %s3990_s20  ;;  %v2278_v17 = vadd.f32 1.0, %v3924_v6  ;;  %v2279_v23 = vmul.f32 0.5, %v2277_v15 }
0x12d5   :  { %v2280_v21 = vmul.f32 0.5, %v2278_v17 }
0x12d7   :  { %2615 = vrot.lane.b32.xlu0 %v3795_v1, %s3991_s21 }
0x133d   :  { %v2308_v34 = vpop.permute.xlu0 %2307 }
0x133e   :  { %v2313_v19 = vmul.f32 %v2308_v34, %v2279_v23 }
0x133f   :  { %v2310_v25 = vpop.permute.xlu1 %2309 }
0x1340   :  { %v2314_v53 = vmul.f32 %v2310_v25, %v2280_v21  ;;  %v2315_v26 = vpack.c.bf16 %v2313_v19, %v2313_v19 }
0x1341   :  { %v2558_v31 = vpop.permute.xlu0 %2557 }
0x1342   :  { %v2316_v28 = vpack.c.bf16 %v2314_v53, %v2314_v53  ;;  %v2330_v18 = vunpack.c.l.b16 %v2315_v26 }
0x1344   :  { %v2331_v29 = vunpack.c.l.b16 %v2316_v28 }
0x1345   :  { %v2494_v32 = vpop.permute.xlu0 %2493 }
0x1346   :  { %v2332_v30 = vrot.slane %v2331_v29, 7 }
0x1348   :  { %v2333_v22 = vsel %vm351_vm3, %v2332_v30, %v2330_v18 }
0x1349   :  { %v2334_v20 = vpack.c.b16 %v2333_v22, %v2333_v22  ;;  %v2616_v36 = vpop.permute.xlu0 %2615 }
0x134b   :  { %2335 = vrot.lane.b32.xlu1 %v2334_v20, %s3991_s21 }
0x134f   :  { %2555 = vrot.lane.b32.xlu1 %v3796_v16, %s3987_s17 }
0x1353   :  { %2491 = vrot.lane.b32.xlu1 %v3796_v16, %s3990_s20 }
0x1357   :  { %2613 = vrot.lane.b32.xlu1 %v3796_v16, %s3991_s21  ;;  %v4614_v16 = vld [vmem:[%s4752_s0 + $0x6] sm:$0x1] }
0x13bd   :  { %v2336_v33 = vpop.permute.xlu1 %2335 }
0x13be   :  { %3681 = vmatmul.mubr.msk.bf16.vlgmr.msra.gmra.mxu1 %vm47_vm2, %v2336_v33  ;;  %3689 = vmatmul.mubr.msk.bf16.vlgmr.msra.gmra.mxu0 %vm47_vm2, %v2336_v33 }
0x13bf   :  { %3701 = vmatpush3.bf16.msra.mxu0 %v2558_v31  ;;  %3693 = vmatpush3.bf16.msra.mxu1 %v2494_v32 }
0x13c0   :  { %3702 = vmatprep.subr.bf16.mxu0 %v3988_v2  ;;  %3694 = vmatprep.subr.bf16.mxu1 %v3988_v2 }
0x13c1   :  { %v2556_v35 = vpop.permute.xlu1 %2555  ;;  %3704 = vmatprep.mubr.msk.bf16.mxu0 %vm3989_vm1, %v3988_v2  ;;  %3696 = vmatprep.mubr.msk.bf16.mxu1 %vm3989_vm1, %v3988_v2 }
0x13c3   :  { %3703 = vmatpush3.bf16.msra.mxu0 %v2556_v35 }
0x13c4   :  { %3716 = vmatprep.subr.bf16.mxu0 %v3988_v2 }
0x13c5   :  { %v2492_v44 = vpop.permute.xlu1 %2491 }
0x13c6   :  { %3695 = vmatpush3.bf16.msra.mxu1 %v2492_v44  ;;  %3705 = vmatmul.mubr.msk.bf16.vlgmr.msra.gmra.mxu0 %vm47_vm2, %v2336_v33 }
0x13c7   :  { %3708 = vmatprep.subr.bf16.mxu1 %v3988_v2  ;;  %3720 = vmatprep.mubr.msk.bf16.mxu0 %vm3989_vm1, %v3988_v2 }
0x13c9   :  { %3697 = vmatmul.mubr.msk.bf16.vlgmr.msra.gmra.mxu1 %vm47_vm2, %v2336_v33  ;;  %v2614_v37 = vpop.permute.xlu1 %2613 }
0x13ca   :  { %3709 = vmatpush3.bf16.msra.mxu1 %v2616_v36  ;;  %3712 = vmatprep.mubr.msk.bf16.mxu1 %vm3989_vm1, %v3988_v2 }
0x13cb   :  { %3710 = vmatprep.subr.bf16.mxu1 %v3988_v2 }
0x13ce   :  { %3711 = vmatpush3.bf16.msra.mxu1 %v2614_v37 }
0x13cf   :  { %3724 = vmatprep.subr.bf16.mxu1 %v3988_v2 }
0x13d1   :  { %3713 = vmatmul.mubr.msk.bf16.vlgmr.msra.gmra.mxu1 %vm47_vm2, %v2336_v33 }
0x13d2   :  { %3728 = vmatprep.mubr.msk.bf16.mxu1 %vm3989_vm1, %v3988_v2 }
0x147e   :  { %v2386_v24 = vpop.f32.mrf.mxu1  ;;  %v2471_v27 = vpop.f32.mrf.mxu0 }
0x147f   :  { %v2387_v39 = vadd.f32 %v4512_v51, %v2386_v24  ;;  %v2478_v3 = vrot.slane %v2471_v27, 1  ;;  %v2481_v6 = vadd.f32 %v2471_v27, %v4614_v16 }
0x1480   :  { %v3682_v40 = vpop.f32.mrf.mxu1  ;;  %v3690_v47 = vpop.f32.mrf.mxu0 }
0x1481   :  { %v2399_v41 = vrot.slane %v2387_v39, %v4151_v54  ;;  %v2482_v15 = vadd.f32 %v2478_v3, %v4620_v5  ;;  %v2483_v17 = vmul.f32 0.5, %v2481_v6 }
0x1482   :  { %v2389_v38 = vpop.f32.mrf.mxu1  ;;  %v2474_v42 = vpop.f32.mrf.mxu0 }
0x1483   :  { %v2400_v43 = vcombine.high %v2399_v41, %v2399_v41  ;;  %v2407_v45 = vrot.slane %v2399_v41, %v4151_v54  ;;  %v2484_v23 = vmul.f32 0.5, %v2482_v15 }
0x1484   :  { %v3683_v46 = vpop.f32.mrf.mxu1  ;;  %v3691_v48 = vpop.f32.mrf.mxu0 }
0x1485   :  { %v2414_v61 = vrot.slane %v2400_v43, %v4151_v54  ;;  %2417 = vst.msk [vmem:[#allocation4 + $0x5] sm:$0x1] %vm436_vm4, %v2407_v45  ;;  %v3799_v46 = vld [vmem:[%s4753_s1 + $0x8] sm:$0xff]  }
0x1486   :  { %v2595_v0 = vpop.f32.mrf.mxu0  ;;  %3725 = vmatpush3.bf16.msra.mxu1 %v3799_v46 }
0x1487   :  { %2418 = vst.msk [vmem:[#allocation4 + $0xd] sm:$0x1] %vm436_vm4, %v2414_v61  ;;  %v2602_v50 = vrot.slane %v2595_v0, 1  ;;  %2603 = vrot.lane.b32.xlu1 %v2595_v0, %s3987_s17  ;;  %3726 = vmatprep.subr.bf16.mxu1 %v3988_v2  ;;  %v3801_v61 = vld [vmem:[%s4754_s2 + $0x8] sm:$0xff]   ;;  %v3802_v0 = vld [vmem:[%s4754_s2] sm:$0xff]  }
0x1488   :  { %v3706_v55 = vpop.f32.mrf.mxu0  ;;  %3717 = vmatpush3.bf16.msra.mxu0 %v3801_v61 }
0x1489   :  { %v2531_v56 = vpop.f32.mrf.mxu1  ;;  %2605 = vrot.lane.b32.xlu0 %v2602_v50, %s3987_s17  ;;  %3718 = vmatprep.subr.bf16.mxu0 %v3988_v2 }
0x148a   :  { %v2598_v57 = vpop.f32.mrf.mxu0  ;;  %v2538_v13 = vrot.slane %v2531_v56, 1 }
0x148b   :  { %v3698_v58 = vpop.f32.mrf.mxu1 }
0x148c   :  { %v3707_v59 = vpop.f32.mrf.mxu0  ;;  %3719 = vmatpush3.bf16.msra.mxu0 %v3802_v0 }
0x148d   :  { %v2534_v49 = vpop.f32.mrf.mxu1  ;;  %3732 = vmatprep.subr.bf16.mxu0 %v3988_v2 }
0x148f   :  { %v3699_v52 = vpop.f32.mrf.mxu1 }
0x1491   :  { %v2653_v62 = vpop.f32.mrf.mxu1 }
0x1492   :  { %v2660_v22 = vrot.slane %v2653_v62, 1 }
0x1493   :  { %v3714_v1 = vpop.f32.mrf.mxu1 }
0x1495   :  { %v2656_v9 = vpop.f32.mrf.mxu1 }
0x1497   :  { %v3715_v14 = vpop.f32.mrf.mxu1 }
0x14f9   :  { %v2604_v11 = vpop.permute.xlu1 %2603 }
0x14fa   :  { %v2609_v4 = vadd.f32 %v2604_v11, %v4614_v16 }
0x14fb   :  { %v2606_v7 = vpop.permute.xlu0 %2605 }
0x14fc   :  { %3925 = vtanh.f32 %v2609_v4  ;;  %v2610_v8 = vadd.f32 %v2606_v7, %v4620_v5 }
0x14fe   :  { %3927 = vtanh.f32 %v2610_v8 }
0x14ff   :  { %3929 = vtanh.f32 %v2483_v17 }
0x1500   :  { %3931 = vtanh.f32 %v2484_v23 }
0x1509   :  { %v3926_v10 = vpop.eup %3925 }
0x150a   :  { %2681 = vrot.lane.b32.xlu1 %v3926_v10, %s3987_s17 }
0x150b   :  { %v3928_v12 = vpop.eup %3927 }
0x150c   :  { %2683 = vrot.lane.b32.xlu0 %v3928_v12, %s3987_s17  ;;  %v3930_v34 = vpop.eup %3929 }
0x150d   :  { %v3932_v19 = vpop.eup %3931  ;;  %v2487_v21 = vadd.f32 1.0, %v3930_v34 }
0x150e   :  { %2539 = vrot.lane.b32.xlu1 %v2531_v56, %s3991_s21  ;;  %v2488_v25 = vadd.f32 1.0, %v3932_v19 }
0x150f   :  { %v2489_v53 = vmul.f32 0.5, %v2487_v21 }
0x1510   :  { %2541 = vrot.lane.b32.xlu0 %v2538_v13, %s3991_s21  ;;  %v2490_v29 = vmul.f32 0.5, %v2488_v25 }
0x157c   :  { %v2682_v26 = vpop.permute.xlu1 %2681 }
0x157d   :  { %v2687_v28 = vmul.f32 %v2682_v26, %v2489_v53 }
0x157e   :  { %v2684_v18 = vpop.permute.xlu0 %2683 }
0x157f   :  { %v2688_v30 = vmul.f32 %v2684_v18, %v2490_v29  ;;  %2691 = vrot.lane.b32.xlu1 %v2687_v28, %s3991_s21 }
0x1580   :  { %v2540_v20 = vpop.permute.xlu1 %2539 }
0x1581   :  { %2693 = vrot.lane.b32.xlu0 %v2688_v30, %s3991_s21  ;;  %v2545_v32 = vadd.f32 %v2540_v20, %v4614_v16 }
0x1582   :  { %v2542_v31 = vpop.permute.xlu0 %2541 }
0x1583   :  { %2661 = vrot.lane.b32.xlu1 %v2653_v62, %s3990_s20  ;;  %v2546_v33 = vadd.f32 %v2542_v31, %v4620_v5  ;;  %v2547_v35 = vmul.f32 0.5, %v2545_v32 }
0x1585   :  { %2663 = vrot.lane.b32.xlu0 %v2660_v22, %s3990_s20  ;;  %v2548_v44 = vmul.f32 0.5, %v2546_v33  ;;  %3933 = vtanh.f32 %v2547_v35 }
0x1587   :  { %3935 = vtanh.f32 %v2548_v44 }
0x1592   :  { %v3934_v36 = vpop.eup %3933 }
0x1593   :  { %v2551_v24 = vadd.f32 1.0, %v3934_v36 }
0x1594   :  { %v3936_v37 = vpop.eup %3935 }
0x1595   :  { %v2552_v27 = vadd.f32 1.0, %v3936_v37  ;;  %v2553_v39 = vmul.f32 0.5, %v2551_v24 }
0x1597   :  { %v2554_v40 = vmul.f32 0.5, %v2552_v27  ;;  %v2677_v47 = vmul.f32 %v2553_v39, %v4547_v60 }
0x1599   :  { %v2678_v42 = vmul.f32 %v2554_v40, %v4551_v63  ;;  %v3800_v63 = vld [vmem:[%s4753_s1] sm:$0xff]  }
0x159a   :  { %3727 = vmatpush3.bf16.msra.mxu1 %v3800_v63 }
0x159b   :  { %3740 = vmatprep.subr.bf16.mxu1 %v3988_v2 }
0x15f1   :  { %v2692_v41 = vpop.permute.xlu1 %2691 }
0x15f2   :  { %v4636_v38 = vadd.f32 %v2692_v41, %v2677_v47 }
0x15f3   :  { %v2694_v43 = vpop.permute.xlu0 %2693 }
0x15f4   :  { %3937 = vtanh.f32 %v4636_v38  ;;  %v4640_v45 = vadd.f32 %v2694_v43, %v2678_v42 }
0x15f5   :  { %v2662_v50 = vpop.permute.xlu1 %2661 }
0x15f6   :  { %3939 = vtanh.f32 %v4640_v45  ;;  %v2667_v56 = vadd.f32 %v2662_v50, %v4614_v16  ;;  %v4706_v50 = vld [vmem:[%s4752_s0 + $0xf] sm:$0x1] }
0x15f7   :  { %v2664_v55 = vpop.permute.xlu0 %2663 }
0x15f8   :  { %v2668_v57 = vadd.f32 %v2664_v55, %v4620_v5  ;;  %v2669_v58 = vmul.f32 0.5, %v2667_v56 }
0x15fa   :  { %v2670_v59 = vmul.f32 0.5, %v2668_v57  ;;  %3941 = vtanh.f32 %v2669_v58 }
0x15fc   :  { %3943 = vtanh.f32 %v2670_v59 }
0x1601   :  { %v3938_v48 = vpop.eup %3937 }
0x1602   :  { %2703 = vrot.lane.b32.xlu1 %v3938_v48, %s3987_s17 }
0x1603   :  { %v3940_v60 = vpop.eup %3939 }
0x1604   :  { %2705 = vrot.lane.b32.xlu0 %v3940_v60, %s3987_s17 }
0x1606   :  { %2953 = vrot.lane.b32.xlu1 %v3799_v46, %s3987_s17 }
0x1607   :  { %v3942_v49 = vpop.eup %3941 }
0x1608   :  { %v2673_v62 = vadd.f32 1.0, %v3942_v49 }
0x1609   :  { %v3944_v52 = vpop.eup %3943 }
0x160a   :  { %2889 = vrot.lane.b32.xlu1 %v3799_v46, %s3990_s20  ;;  %v2674_v1 = vadd.f32 1.0, %v3944_v52  ;;  %v2675_v9 = vmul.f32 0.5, %v2673_v62 }
0x160c   :  { %v2676_v4 = vmul.f32 0.5, %v2674_v1 }
0x160e   :  { %3011 = vrot.lane.b32.xlu1 %v3799_v46, %s3991_s21 }
0x1674   :  { %v2704_v14 = vpop.permute.xlu1 %2703 }
0x1675   :  { %v2709_v11 = vmul.f32 %v2704_v14, %v2675_v9 }
0x1676   :  { %v2706_v7 = vpop.permute.xlu0 %2705 }
0x1677   :  { %v2710_v8 = vmul.f32 %v2706_v7, %v2676_v4  ;;  %v2711_v10 = vpack.c.bf16 %v2709_v11, %v2709_v11 }
0x1678   :  { %v2954_v15 = vpop.permute.xlu1 %2953 }
0x1679   :  { %v2712_v12 = vpack.c.bf16 %v2710_v8, %v2710_v8  ;;  %v2726_v16 = vunpack.c.l.b16 %v2711_v10 }
0x167b   :  { %v2727_v13 = vunpack.c.l.b16 %v2712_v12 }
0x167c   :  { %v2890_v17 = vpop.permute.xlu1 %2889 }
0x167d   :  { %v2728_v3 = vrot.slane %v2727_v13, 7 }
0x167f   :  { %v2729_v5 = vsel %vm351_vm3, %v2728_v3, %v2726_v16 }
0x1680   :  { %v2730_v6 = vpack.c.b16 %v2729_v5, %v2729_v5  ;;  %v3012_v21 = vpop.permute.xlu1 %3011 }
0x1682   :  { %2731 = vrot.lane.b32.xlu0 %v2730_v6, %s3991_s21 }
0x1686   :  { %2951 = vrot.lane.b32.xlu0 %v3800_v63, %s3987_s17 }
0x168a   :  { %2887 = vrot.lane.b32.xlu0 %v3800_v63, %s3990_s20 }
0x168e   :  { %3009 = vrot.lane.b32.xlu0 %v3800_v63, %s3991_s21  ;;  %v4700_v63 = vld [vmem:[%s4752_s0 + $0x7] sm:$0x1] }
0x16f4   :  { %v2732_v23 = vpop.permute.xlu0 %2731 }
0x16f5   :  { %3721 = vmatmul.mubr.msk.bf16.vlgmr.msra.gmra.mxu0 %vm47_vm2, %v2732_v23  ;;  %3729 = vmatmul.mubr.msk.bf16.vlgmr.msra.gmra.mxu1 %vm47_vm2, %v2732_v23 }
0x16f6   :  { %3741 = vmatpush3.bf16.msra.mxu1 %v2954_v15  ;;  %3733 = vmatpush3.bf16.msra.mxu0 %v2890_v17 }
0x16f7   :  { %3742 = vmatprep.subr.bf16.mxu1 %v3988_v2  ;;  %3734 = vmatprep.subr.bf16.mxu0 %v3988_v2 }
0x16f8   :  { %v2952_v34 = vpop.permute.xlu0 %2951  ;;  %3744 = vmatprep.mubr.msk.bf16.mxu1 %vm3989_vm1, %v3988_v2  ;;  %3736 = vmatprep.mubr.msk.bf16.mxu0 %vm3989_vm1, %v3988_v2 }
0x16fa   :  { %3743 = vmatpush3.bf16.msra.mxu1 %v2952_v34 }
0x16fb   :  { %3756 = vmatprep.subr.bf16.mxu1 %v3988_v2 }
0x16fc   :  { %v2888_v19 = vpop.permute.xlu0 %2887 }
0x16fd   :  { %3735 = vmatpush3.bf16.msra.mxu0 %v2888_v19  ;;  %3745 = vmatmul.mubr.msk.bf16.vlgmr.msra.gmra.mxu1 %vm47_vm2, %v2732_v23 }
0x16fe   :  { %3748 = vmatprep.subr.bf16.mxu0 %v3988_v2  ;;  %3760 = vmatprep.mubr.msk.bf16.mxu1 %vm3989_vm1, %v3988_v2 }
0x1700   :  { %3737 = vmatmul.mubr.msk.bf16.vlgmr.msra.gmra.mxu0 %vm47_vm2, %v2732_v23  ;;  %v3010_v25 = vpop.permute.xlu0 %3009 }
0x1701   :  { %3749 = vmatpush3.bf16.msra.mxu0 %v3012_v21  ;;  %3752 = vmatprep.mubr.msk.bf16.mxu0 %vm3989_vm1, %v3988_v2 }
0x1702   :  { %3750 = vmatprep.subr.bf16.mxu0 %v3988_v2 }
0x1705   :  { %3751 = vmatpush3.bf16.msra.mxu0 %v3010_v25 }
0x1708   :  { %3753 = vmatmul.mubr.msk.bf16.vlgmr.msra.gmra.mxu0 %vm47_vm2, %v2732_v23 }
0x17b5   :  { %v2782_v53 = vpop.f32.mrf.mxu0  ;;  %v2867_v26 = vpop.f32.mrf.mxu1 }
0x17b6   :  { %v2783_v28 = vadd.f32 %v4512_v51, %v2782_v53  ;;  %v2874_v49 = vrot.slane %v2867_v26, 1  ;;  %v2877_v52 = vadd.f32 %v2867_v26, %v4700_v63 }
0x17b7   :  { %v3722_v29 = vpop.f32.mrf.mxu0  ;;  %v3730_v18 = vpop.f32.mrf.mxu1 }
0x17b8   :  { %v2795_v30 = vrot.slane %v2783_v28, %v4151_v54  ;;  %v2878_v62 = vadd.f32 %v2874_v49, %v4706_v50  ;;  %v2879_v1 = vmul.f32 0.5, %v2877_v52 }
0x17b9   :  { %v2785_v22 = vpop.f32.mrf.mxu0  ;;  %v2870_v20 = vpop.f32.mrf.mxu1 }
0x17ba   :  { %v2796_v31 = vcombine.high %v2795_v30, %v2795_v30  ;;  %v2803_v32 = vrot.slane %v2795_v30, %v4151_v54  ;;  %v2880_v9 = vmul.f32 0.5, %v2878_v62 }
0x17bb   :  { %v3723_v33 = vpop.f32.mrf.mxu0  ;;  %v3731_v35 = vpop.f32.mrf.mxu1 }
0x17bc   :  { %v2810_v44 = vrot.slane %v2796_v31, %v4151_v54  ;;  %2813 = vst.msk [vmem:[#allocation4 + $0x6] sm:$0x1] %vm436_vm4, %v2803_v32 }
0x17bd   :  { %v2991_v36 = vpop.f32.mrf.mxu1 }
0x17be   :  { %2814 = vst.msk [vmem:[#allocation4 + $0xe] sm:$0x1] %vm436_vm4, %v2810_v44  ;;  %v2998_v37 = vrot.slane %v2991_v36, 1  ;;  %2999 = vrot.lane.b32.xlu0 %v2991_v36, %s3987_s17 }
0x17bf   :  { %v3746_v24 = vpop.f32.mrf.mxu1 }
0x17c0   :  { %3001 = vrot.lane.b32.xlu1 %v2998_v37, %s3987_s17  ;;  %v2927_v27 = vpop.f32.mrf.mxu0 }
0x17c1   :  { %v2994_v39 = vpop.f32.mrf.mxu1  ;;  %v2934_v59 = vrot.slane %v2927_v27, 1 }
0x17c2   :  { %v3738_v40 = vpop.f32.mrf.mxu0 }
0x17c3   :  { %v3747_v47 = vpop.f32.mrf.mxu1 }
0x17c4   :  { %v2930_v41 = vpop.f32.mrf.mxu0 }
0x17c6   :  { %v3739_v42 = vpop.f32.mrf.mxu0 }
0x17c8   :  { %v3049_v43 = vpop.f32.mrf.mxu0 }
0x17c9   :  { %v3056_v5 = vrot.slane %v3049_v43, 1 }
0x17ca   :  { %v3754_v46 = vpop.f32.mrf.mxu0 }
0x17cc   :  { %v3052_v48 = vpop.f32.mrf.mxu0 }
0x17ce   :  { %v3755_v60 = vpop.f32.mrf.mxu0 }
0x1830   :  { %v3000_v61 = vpop.permute.xlu0 %2999 }
0x1831   :  { %v3005_v0 = vadd.f32 %v3000_v61, %v4700_v63 }
0x1832   :  { %v3002_v55 = vpop.permute.xlu1 %3001 }
0x1833   :  { %3945 = vtanh.f32 %v3005_v0  ;;  %v3006_v56 = vadd.f32 %v3002_v55, %v4706_v50 }
0x1835   :  { %3947 = vtanh.f32 %v3006_v56 }
0x1836   :  { %3949 = vtanh.f32 %v2879_v1 }
0x1837   :  { %3951 = vtanh.f32 %v2880_v9 }
0x1840   :  { %v3946_v57 = vpop.eup %3945 }
0x1841   :  { %3077 = vrot.lane.b32.xlu0 %v3946_v57, %s3987_s17 }
0x1842   :  { %v3948_v58 = vpop.eup %3947 }
0x1843   :  { %3079 = vrot.lane.b32.xlu1 %v3948_v58, %s3987_s17  ;;  %v3950_v14 = vpop.eup %3949 }
0x1844   :  { %v3952_v11 = vpop.eup %3951  ;;  %v2883_v4 = vadd.f32 1.0, %v3950_v14 }
0x1845   :  { %2935 = vrot.lane.b32.xlu0 %v2927_v27, %s3991_s21  ;;  %v2884_v7 = vadd.f32 1.0, %v3952_v11 }
0x1846   :  { %v2885_v8 = vmul.f32 0.5, %v2883_v4 }
0x1847   :  { %2937 = vrot.lane.b32.xlu1 %v2934_v59, %s3991_s21  ;;  %v2886_v13 = vmul.f32 0.5, %v2884_v7 }
0x18b3   :  { %v3078_v10 = vpop.permute.xlu0 %3077 }
0x18b4   :  { %v3083_v12 = vmul.f32 %v3078_v10, %v2885_v8 }
0x18b5   :  { %v3080_v16 = vpop.permute.xlu1 %3079 }
0x18b6   :  { %v3084_v3 = vmul.f32 %v3080_v16, %v2886_v13  ;;  %3087 = vrot.lane.b32.xlu0 %v3083_v12, %s3991_s21 }
0x18b7   :  { %v2936_v6 = vpop.permute.xlu0 %2935 }
0x18b8   :  { %3089 = vrot.lane.b32.xlu1 %v3084_v3, %s3991_s21  ;;  %v2941_v17 = vadd.f32 %v2936_v6, %v4700_v63 }
0x18b9   :  { %v2938_v15 = vpop.permute.xlu1 %2937 }
0x18ba   :  { %3057 = vrot.lane.b32.xlu0 %v3049_v43, %s3990_s20  ;;  %v2942_v23 = vadd.f32 %v2938_v15, %v4706_v50  ;;  %v2943_v34 = vmul.f32 0.5, %v2941_v17  ;;  %v3804_v43 = vld [vmem:[%s4754_s2] sm:$0xff]  }
0x18bc   :  { %3059 = vrot.lane.b32.xlu1 %v3056_v5, %s3990_s20  ;;  %v2944_v19 = vmul.f32 0.5, %v2942_v23  ;;  %3953 = vtanh.f32 %v2943_v34 }
0x18be   :  { %3955 = vtanh.f32 %v2944_v19 }
0x18c9   :  { %v3954_v21 = vpop.eup %3953 }
0x18ca   :  { %v2947_v53 = vadd.f32 1.0, %v3954_v21 }
0x18cb   :  { %v3956_v25 = vpop.eup %3955 }
0x18cc   :  { %v2948_v26 = vadd.f32 1.0, %v3956_v25  ;;  %v2949_v28 = vmul.f32 0.5, %v2947_v53 }
0x18ce   :  { %v2950_v29 = vmul.f32 0.5, %v2948_v26  ;;  %v3073_v18 = vmul.f32 %v2949_v28, %v4636_v38  ;;  %v3803_v38 = vld [vmem:[%s4754_s2 + $0x8] sm:$0xff]   ;;  %s3993_s2 = smov [#allocation4]  }
0x18cf   :  { %3757 = vmatpush3.bf16.msra.mxu1 %v3803_v38  ;;  %s3233_s19 = sshll.u32 %s3993_s2, 4  ;;  %s3234_s19 = int_to_ptr.vmem [resolvable:$true] %s3233_s19 }
0x18d0   :  { %v3074_v20 = vmul.f32 %v2950_v29, %v4640_v45  ;;  %3758 = vmatprep.subr.bf16.mxu1 %v3988_v2  ;;  %p3970_p1 = scmp.lt.s32.totalorder %s3234_s19, %s3234_s19 }
0x18d3   :  { %3759 = vmatpush3.bf16.msra.mxu1 %v3804_v43 }
0x1928   :  { %v3088_v30 = vpop.permute.xlu0 %3087 }
0x1929   :  { %v3093_v22 = vadd.f32 %v3088_v30, %v3073_v18 }
0x192a   :  { %v3090_v31 = vpop.permute.xlu1 %3089 }
0x192b   :  { %3957 = vtanh.f32 %v3093_v22  ;;  %v3094_v32 = vadd.f32 %v3090_v31, %v3074_v20 }
0x192c   :  { %v3058_v45 = vpop.permute.xlu0 %3057 }
0x192d   :  { %3959 = vtanh.f32 %v3094_v32  ;;  %v3222_v33 = vrot.slane %v3094_v32, 7  ;;  %v3063_v24 = vadd.f32 %v3058_v45, %v4700_v63 }
0x192e   :  { %v3060_v37 = vpop.permute.xlu1 %3059 }
0x192f   :  { %v3223_v35 = vsel %vm351_vm3, %v3222_v33, %v3093_v22  ;;  %v3064_v27 = vadd.f32 %v3060_v37, %v4706_v50  ;;  %v3065_v39 = vmul.f32 0.5, %v3063_v24 }
0x1931   :  { %v3066_v40 = vmul.f32 0.5, %v3064_v27  ;;  %3961 = vtanh.f32 %v3065_v39 }
0x1933   :  { %3963 = vtanh.f32 %v3066_v40 }
0x1938   :  { %v3958_v44 = vpop.eup %3957 }
0x1939   :  { %3099 = vrot.lane.b32.xlu0 %v3958_v44, %s3987_s17 }
0x193a   :  { %v3960_v36 = vpop.eup %3959 }
0x193b   :  { %3101 = vrot.lane.b32.xlu1 %v3960_v36, %s3987_s17 }
0x193e   :  { %v3962_v47 = vpop.eup %3961 }
0x193f   :  { %v3069_v42 = vadd.f32 1.0, %v3962_v47 }
0x1940   :  { %v3964_v41 = vpop.eup %3963 }
0x1941   :  { %v3070_v46 = vadd.f32 1.0, %v3964_v41  ;;  %v3071_v2 = vmul.f32 0.5, %v3069_v42 }
0x1943   :  { %v3072_v61 = vmul.f32 0.5, %v3070_v46 }
0x19ab   :  { %v3100_v48 = vpop.permute.xlu0 %3099 }
0x19ac   :  { %v3105_v60 = vmul.f32 %v3100_v48, %v3071_v2 }
0x19ad   :  { %v3102_v63 = vpop.permute.xlu1 %3101 }
0x19ae   :  { %v3106_v0 = vmul.f32 %v3102_v63, %v3072_v61  ;;  %v3107_v50 = vpack.c.bf16 %v3105_v60, %v3105_v60 }
0x19b0   :  { %v3108_v55 = vpack.c.bf16 %v3106_v0, %v3106_v0  ;;  %v3213_v56 = vrot.slane %v3106_v0, 7  ;;  %v3122_v59 = vunpack.c.l.b16 %v3107_v50 }
0x19b2   :  { %v3123_v57 = vunpack.c.l.b16 %v3108_v55  ;;  %v3214_v58 = vsel %vm351_vm3, %v3213_v56, %v3105_v60 }
0x19b3   :  { %3215 = vrot.lane.b32.xlu0 %v3214_v58, %s3991_s21 }
0x19b4   :  { %v3124_v49 = vrot.slane %v3123_v57, 7 }
0x19b6   :  { %v3125_v52 = vsel %vm351_vm3, %v3124_v49, %v3122_v59 }
0x19b7   :  { %v3126_v62 = vpack.c.b16 %v3125_v52, %v3125_v52 }
0x19b9   :  { %3127 = vrot.lane.b32.xlu1 %v3126_v62, %s3991_s21 }
0x19bd   :  { %3224 = vrot.lane.b32.xlu1 %v3223_v35, %s3990_s20  ;;  %s3965_s20 = scalar_lea.vmem %s3234_s19, 256 }
0x19be   :  { %p3966_p0 = scmp.ne.s32.totalorder %s3234_s19, %s3965_s20  ;;  %p3971_p2 = scmp.lt.s32.totalorder %s3965_s20, %s3965_s20 }
0x19c0   :  { %p3972_p3 = por %p3971_p2, %p3970_p1 }
0x19c2   :  { %p3973_p4 = pnand %p3972_p3, %p3966_p0 }
0x1a25   :  { %v3216_v1 = vpop.permute.xlu0 %3215 }
0x1a26   :  { %3219 = vst.msk [vmem:[#allocation2] sm:$0x3] %vm23_vm0, %v3216_v1 }
0x1a2b   :  { %v3128_v9 = vpop.permute.xlu1 %3127 }
0x1a2c   :  { %3761 = vmatmul.mubr.msk.bf16.vlgmr.msra.gmra.mxu1 %vm47_vm2, %v3128_v9 }
0x1a2f   :  { %v3225_v14 = vpop.permute.xlu1 %3224 }
0x1a30   :  { %3227 = vst.msk [vmem:[#allocation3] sm:$0x3] %vm23_vm0, %v3225_v14 }
0x1aec   :  { %v3178_v11 = vpop.f32.mrf.mxu1 }
0x1aed   :  { %v3179_v4 = vadd.f32 %v4512_v51, %v3178_v11 }
0x1aee   :  { %v3762_v7 = vpop.f32.mrf.mxu1 }
0x1aef   :  { %v3191_v8 = vrot.slane %v3179_v4, %v4151_v54 }
0x1af0   :  { %v3181_v10 = vpop.f32.mrf.mxu1 }
0x1af1   :  { %v3192_v12 = vcombine.high %v3191_v8, %v3191_v8  ;;  %v3199_v13 = vrot.slane %v3191_v8, %v4151_v54 }
0x1af2   :  { %v3763_v16 = vpop.f32.mrf.mxu1 }
0x1af3   :  { %v3206_v3 = vrot.slane %v3192_v12, %v4151_v54  ;;  %3209 = vst.msk [vmem:[#allocation4 + $0x7] sm:$0x1] %vm436_vm4, %v3199_v13 }
0x1af5   :  { %3210 = vst.msk [vmem:[#allocation4 + $0xf] sm:$0x1] %vm436_vm4, %v3206_v3 }
0x1af6   :  { %3976 = shalt.err (!%p3973_p4)
}
0x1af7   :  { %s3994_s21 = smov 128   ;;  %s3995_s22 = smov 8  }
0x1af8   :  { %3239 = dma.vmem_to_hbm [thread:$0]  %s3234_s19, 256, %s4756_s4, [#allocation5], %s3994_s21, %s3994_s21, %s3995_s22  }
0x1af9   :  { %3985 = dma.done.wait [#allocation5], 256  }
0x1afa   :  { %3986 = vsyncadd [#allocation5], 4294967040 }
0x1afb   :  { %3243 = vsyncpa [#allocation5], 1 }

// kernel: condition_encoder_lstm_forward.3
= control target key start
LH: loop header
LB: loop body
LE: loop exit
PB: predicated region body
PF: predicated region fallthrough
CT: control target
= control target key end

     0   :  { %14 = vsyncpa [#allocation3], 0  ;;  %s9222_s0 = inlined_call_operand.hbm [shape: f32[16,2666], index: 0, kind: input, shape index: {}]   ;;  %s9223_s1 = inlined_call_operand.vmem [shape: f32[16,26], index: 1, kind: input, shape index: {}]   ;;  %s9224_s2 = inlined_call_operand.hbm [shape: bf16[2666,512], index: 2, kind: input, shape index: {}]   ;;  %s9225_s3 = inlined_call_operand.hbm [shape: f32[1,512], index: 3, kind: input, shape index: {}]   ;;  %s9226_s4 = inlined_call_operand.hbm [shape: bf16[512,512], index: 4, kind: input, shape index: {}]   ;;  %s9227_s5 = inlined_call_operand.hbm [shape: f32[1,512], index: 5, kind: input, shape index: {}]   ;;  %s9228_s6 = inlined_call_operand.hbm [shape: bf16[512,128], index: 6, kind: input, shape index: {}]   ;;  %s9229_s7 = inlined_call_operand.hbm [shape: bf16[26,128], index: 7, kind: input, shape index: {}]   ;;  %s9230_s8 = inlined_call_operand.hbm [shape: f32[1,128], index: 8, kind: input, shape index: {}]   ;;  %s9231_s9 = inlined_call_operand.vmem [shape: f32[16,128], index: 9, kind: output, shape index: {}]  }
   0x1   :  { %15 = vsyncpa [#allocation5], 0 }
   0x2   :  { %16 = vsyncpa [#allocation8], 0 }
   0x3   :  { %17 = vsyncpa [#allocation11], 0 }
   0x4   :  { %18 = vsyncpa [#allocation14], 0  ;;  %s8897_s30 = smov [#allocation4]  }
   0x5   :  { %s38_s10 = sshll.u32 %s8897_s30, 4  ;;  %s39_s10 = int_to_ptr.vmem [resolvable:$true] %s38_s10 }
   0x6   :  { %s8735_s11 = scalar_lea.vmem %s39_s10, 85504  ;;  %p8740_p1 = scmp.lt.s32.totalorder %s39_s10, %s39_s10 }
   0x7   :  { %p8736_p0 = scmp.ne.s32.totalorder %s39_s10, %s8735_s11  ;;  %p8741_p2 = scmp.lt.s32.totalorder %s8735_s11, %s8735_s11 }
   0x9   :  { %p8742_p3 = por %p8741_p2, %p8740_p1 }
   0xb   :  { %p8743_p4 = pnand %p8742_p3, %p8736_p0 }
   0xd   :  { %8746 = shalt.err (!%p8743_p4)
}
   0xe   :  { %s8898_s12 = smov 256   ;;  %s8899_s13 = smov 16  }
   0xf   :  { %44 = dma.hbm_to_vmem [thread:$0]  %s9224_s2, 85504, %s39_s10, [#allocation5], %s8898_s12, %s8898_s12, %s8899_s13  }
  0x10   :  { %s8900_s16 = smov [#allocation7]   ;;  %s8901_s18 = smov [#allocation10]  }
  0x11   :  { %s60_s17 = sshll.u32 %s8900_s16, 4  ;;  %s82_s19 = sshll.u32 %s8901_s18, 4  ;;  %s61_s17 = int_to_ptr.vmem [resolvable:$true] %s60_s17  ;;  %s83_s19 = int_to_ptr.vmem [resolvable:$true] %s82_s19 }
  0x12   :  { %s8755_s20 = scalar_lea.vmem %s61_s17, 16384  ;;  %p8760_p6 = scmp.lt.s32.totalorder %s61_s17, %s61_s17 }
  0x13   :  { %p8756_p5 = scmp.ne.s32.totalorder %s61_s17, %s8755_s20  ;;  %p8761_p7 = scmp.lt.s32.totalorder %s8755_s20, %s8755_s20 }
  0x15   :  { %p8762_p8 = por %p8761_p7, %p8760_p6 }
  0x17   :  { %p8763_p9 = pnand %p8762_p8, %p8756_p5 }
  0x19   :  { %8766 = shalt.err (!%p8763_p9)
}
  0x1a   :  { %66 = dma.hbm_to_vmem [thread:$0]  %s9226_s4, 16384, %s61_s17, [#allocation8], %s8898_s12, %s8898_s12, %s8899_s13  }
  0x1b   :  { %s8775_s23 = scalar_lea.vmem %s83_s19, 4096  ;;  %p8780_p11 = scmp.lt.s32.totalorder %s83_s19, %s83_s19 }
  0x1c   :  { %p8776_p10 = scmp.ne.s32.totalorder %s83_s19, %s8775_s23  ;;  %p8781_p12 = scmp.lt.s32.totalorder %s8775_s23, %s8775_s23 }
  0x1e   :  { %p8782_p13 = por %p8781_p12, %p8780_p11 }
  0x20   :  { %p8783_p0 = pnand %p8782_p13, %p8776_p10 }
  0x22   :  { %8786 = shalt.err (!%p8783_p0)
}
  0x23   :  { %s8902_s2 = smov 64   ;;  %s8903_s24 = smov 4  }
  0x24   :  { %88 = dma.hbm_to_vmem [thread:$0]  %s9228_s6, 4096, %s83_s19, [#allocation11], %s8902_s2, %s8902_s2, %s8903_s24  }
  0x25   :  { %s8904_s27 = smov [#allocation2]  }
  0x26   :  { %s24_s28 = sshll.u32 %s8904_s27, 4  ;;  %s25_s28 = int_to_ptr.vmem [resolvable:$true] %s24_s28 }
  0x27   :  { %s8795_s4 = scalar_lea.vmem %s25_s28, 5376  ;;  %p8800_p2 = scmp.lt.s32.totalorder %s25_s28, %s25_s28 }
  0x28   :  { %p8796_p1 = scmp.ne.s32.totalorder %s25_s28, %s8795_s4  ;;  %p8801_p3 = scmp.lt.s32.totalorder %s8795_s4, %s8795_s4 }
  0x2a   :  { %p8802_p4 = por %p8801_p3, %p8800_p2 }
  0x2c   :  { %p8803_p5 = pnand %p8802_p4, %p8796_p1 }
  0x2e   :  { %8806 = shalt.err (!%p8803_p5)
}
  0x2f   :  { %s8905_s29 = smov 2688   ;;  %s8906_s30 = smov 168  }
  0x30   :  { %30 = dma.hbm_to_vmem [thread:$0]  %s9222_s0, 5376, %s25_s28, [#allocation3], %s8905_s29, %s8905_s29, %s8906_s30  }
  0x31   :  { %s8907_s12 = smov [#allocation6]   ;;  %s8908_s14 = smov [#allocation9]  }
  0x32   :  { %s51_s13 = sshll.u32 %s8907_s12, 4  ;;  %s73_s6 = sshll.u32 %s8908_s14, 4  ;;  %s52_s13 = int_to_ptr.vmem [resolvable:$true] %s51_s13  ;;  %s74_s6 = int_to_ptr.vmem [resolvable:$true] %s73_s6 }
  0x33   :  { %s8815_s15 = scalar_lea.vmem %s52_s13, 64  ;;  %p8820_p7 = scmp.lt.s32.totalorder %s52_s13, %s52_s13 }
  0x34   :  { %p8816_p6 = scmp.ne.s32.totalorder %s52_s13, %s8815_s15  ;;  %p8821_p8 = scmp.lt.s32.totalorder %s8815_s15, %s8815_s15 }
  0x36   :  { %p8822_p9 = por %p8821_p8, %p8820_p7 }
  0x38   :  { %p8823_p10 = pnand %p8822_p9, %p8816_p6 }
  0x3a   :  { %8826 = shalt.err (!%p8823_p10)
}
  0x3b   :  { %54 = dma.hbm_to_vmem [thread:$0]  %s9225_s3, 64, %s52_s13, [#allocation5]  }
  0x3c   :  { %s8835_s18 = scalar_lea.vmem %s74_s6, 64  ;;  %p8840_p12 = scmp.lt.s32.totalorder %s74_s6, %s74_s6 }
  0x3d   :  { %p8836_p11 = scmp.ne.s32.totalorder %s74_s6, %s8835_s18  ;;  %p8841_p13 = scmp.lt.s32.totalorder %s8835_s18, %s8835_s18 }
  0x3f   :  { %p8842_p0 = por %p8841_p13, %p8840_p12 }
  0x41   :  { %p8843_p1 = pnand %p8842_p0, %p8836_p11 }
  0x43   :  { %8846 = shalt.err (!%p8843_p1)
}
  0x44   :  { %76 = dma.hbm_to_vmem [thread:$0]  %s9227_s5, 64, %s74_s6, [#allocation8]  }
  0x45   :  { %s8909_s20 = smov [#allocation12]   ;;  %s8910_s22 = smov [#allocation13]  }
  0x46   :  { %s94_s21 = sshll.u32 %s8909_s20, 4  ;;  %s107_s23 = sshll.u32 %s8910_s22, 4  ;;  %s95_s21 = int_to_ptr.vmem [resolvable:$true] %s94_s21  ;;  %s108_s23 = int_to_ptr.vmem [resolvable:$true] %s107_s23 }
  0x47   :  { %s8855_s25 = scalar_lea.vmem %s95_s21, 256  ;;  %p8860_p3 = scmp.lt.s32.totalorder %s95_s21, %s95_s21 }
  0x48   :  { %p8856_p2 = scmp.ne.s32.totalorder %s95_s21, %s8855_s25  ;;  %p8861_p4 = scmp.lt.s32.totalorder %s8855_s25, %s8855_s25 }
  0x4a   :  { %p8862_p5 = por %p8861_p4, %p8860_p3 }
  0x4c   :  { %p8863_p6 = pnand %p8862_p5, %p8856_p2 }
  0x4e   :  { %8866 = shalt.err (!%p8863_p6)
}
  0x4f   :  { %100 = dma.hbm_to_vmem [thread:$0]  %s9229_s7, 256, %s95_s21, [#allocation11], %s8902_s2, %s8902_s2, %s8903_s24  }
  0x50   :  { %s8875_s5 = scalar_lea.vmem %s108_s23, 16  ;;  %s8879_s27 = scalar_lea.vmem %s108_s23, 32 }
  0x51   :  { %p8876_p7 = scmp.ne.s32.totalorder %s108_s23, %s8875_s5  ;;  %p8880_p8 = scmp.lt.s32.totalorder %s108_s23, %s108_s23 }
  0x52   :  { %p8881_p9 = scmp.lt.s32.totalorder %s8879_s27, %s8875_s5 }
  0x54   :  { %p8882_p10 = por %p8881_p9, %p8880_p8 }
  0x56   :  { %p8883_p11 = pnand %p8882_p10, %p8876_p7 }
  0x58   :  { %8886 = shalt.err (!%p8883_p11)
}
  0x59   :  { %110 = dma.hbm_to_vmem [thread:$0]  %s9230_s8, 16, %s108_s23, [#allocation14]  }
  0x5a   :  { %8887 = dma.done.wait [#allocation3], 5376  }
  0x5b   :  { %8888 = vsyncadd [#allocation3], 4294961920 }
  0x5c   :  { %8889 = dma.done.wait [#allocation5], 85568  }
  0x5d   :  { %8890 = vsyncadd [#allocation5], 4294881728 }
  0x5e   :  { %8891 = dma.done.wait [#allocation8], 16448  }
  0x5f   :  { %8892 = vsyncadd [#allocation8], 4294950848 }
  0x60   :  { %8893 = dma.done.wait [#allocation11], 4352  }
  0x61   :  { %8894 = vsyncadd [#allocation11], 4294962944 }
  0x62   :  { %8895 = dma.done.wait [#allocation14], 16  }
  0x63   :  { %8896 = vsyncadd [#allocation14], 4294967280  ;;  %v7498_v0 = vld [vmem:[#allocation4 + $0xe4] ss:$16 sps:$4 sm:$0xff]   ;;  %v7502_v2 = vld [vmem:[#allocation4 + $0xe0] ss:$16 sps:$4 sm:$0xff]  }
  0x64   :  { %v7500_v1 = vld [vmem:[#allocation4 + $0x2e4] ss:$16 sps:$4 sm:$0xff]   ;;  %4242 = vmatprep.subr.bf16.mxu0 %v7498_v0  ;;  %v7503_v3 = vld [vmem:[#allocation4 + $0x2e0] ss:$16 sps:$4 sm:$0xff]   ;;  %v137_v46 = vld [vmem:[#allocation2 + $0x8] sm:$0xff]  ;;  %vm4229_vm0 = vcmask 1044480  }
  0x65   :  { %4285 = vmatprep.subr.bf16.mxu1 %v7500_v1  ;;  %v7504_v4 = vld [vmem:[#allocation4 + $0xc4] ss:$16 sps:$4 sm:$0xff]   ;;  %4243 = vmatpush1.bf16.msra.mxu0 %v7502_v2  ;;  %v7508_v6 = vld [vmem:[#allocation4 + $0xc0] ss:$16 sps:$4 sm:$0xff]   ;;  %v139_v48 = vld [vmem:[#allocation2 + $0x18] sm:$0xff]  ;;  %vm4225_vm1 = vcmask 867328  }
  0x66   :  { %4286 = vmatpush1.bf16.msra.mxu1 %v7503_v3  ;;  %v7506_v5 = vld [vmem:[#allocation4 + $0x2c4] ss:$16 sps:$4 sm:$0xff]   ;;  %4244 = vmatprep.subr.bf16.mxu0 %v7504_v4  ;;  %v7509_v7 = vld [vmem:[#allocation4 + $0x2c0] ss:$16 sps:$4 sm:$0xff]   ;;  %vm8913_vm2 = vmmov 0   ;;  %vm6248_vm3 = vcmask 211968  }
  0x67   :  { %4287 = vmatprep.subr.bf16.mxu1 %v7506_v5  ;;  %v7510_v8 = vld [vmem:[#allocation4 + $0xa4] ss:$16 sps:$4 sm:$0xff]   ;;  %v7514_v10 = vld [vmem:[#allocation4 + $0xa0] ss:$16 sps:$4 sm:$0xff]  }
  0x68   :  { %v7512_v9 = vld [vmem:[#allocation4 + $0x2a4] ss:$16 sps:$4 sm:$0xff]   ;;  %v7515_v11 = vld [vmem:[#allocation4 + $0x2a0] ss:$16 sps:$4 sm:$0xff]  }
  0x69   :  { %4245 = vmatpush1.bf16.msra.mxu0 %v7508_v6  ;;  %v7516_v12 = vld [vmem:[#allocation4 + $0x84] ss:$16 sps:$4 sm:$0xff]   ;;  %v7520_v14 = vld [vmem:[#allocation4 + $0x80] ss:$16 sps:$4 sm:$0xff]  }
  0x6a   :  { %4288 = vmatpush1.bf16.msra.mxu1 %v7509_v7  ;;  %4246 = vmatprep.subr.bf16.mxu0 %v7510_v8  ;;  %v7518_v13 = vld [vmem:[#allocation4 + $0x284] ss:$16 sps:$4 sm:$0xff]   ;;  %v7521_v15 = vld [vmem:[#allocation4 + $0x280] ss:$16 sps:$4 sm:$0xff]   ;;  %v157_v7 = vld [vmem:[#allocation2 + $0xa8] sm:$0xff] }
  0x6b   :  { %4289 = vmatprep.subr.bf16.mxu1 %v7512_v9  ;;  %v7522_v16 = vld [vmem:[#allocation4 + $0x64] ss:$16 sps:$4 sm:$0xff]   ;;  %v7526_v18 = vld [vmem:[#allocation4 + $0x60] ss:$16 sps:$4 sm:$0xff]   ;;  %v159_v9 = vld [vmem:[#allocation2 + $0xb8] sm:$0xff] }
  0x6c   :  { %v7524_v17 = vld [vmem:[#allocation4 + $0x264] ss:$16 sps:$4 sm:$0xff]   ;;  %v7527_v19 = vld [vmem:[#allocation4 + $0x260] ss:$16 sps:$4 sm:$0xff]  }
  0x6d   :  { %4247 = vmatpush1.bf16.msra.mxu0 %v7514_v10  ;;  %v7528_v20 = vld [vmem:[#allocation4 + $0x44] ss:$16 sps:$4 sm:$0xff]   ;;  %v7532_v22 = vld [vmem:[#allocation4 + $0x40] ss:$16 sps:$4 sm:$0xff]  }
  0x6e   :  { %4290 = vmatpush1.bf16.msra.mxu1 %v7515_v11  ;;  %4248 = vmatprep.subr.bf16.mxu0 %v7516_v12  ;;  %v7530_v21 = vld [vmem:[#allocation4 + $0x244] ss:$16 sps:$4 sm:$0xff]   ;;  %v7533_v23 = vld [vmem:[#allocation4 + $0x240] ss:$16 sps:$4 sm:$0xff]  }
  0x6f   :  { %4291 = vmatprep.subr.bf16.mxu1 %v7518_v13  ;;  %v7534_v24 = vld [vmem:[#allocation4 + $0x24] ss:$16 sps:$4 sm:$0xff]   ;;  %v7538_v26 = vld [vmem:[#allocation4 + $0x20] ss:$16 sps:$4 sm:$0xff]  }
  0x70   :  { %v7536_v25 = vld [vmem:[#allocation4 + $0x224] ss:$16 sps:$4 sm:$0xff]   ;;  %v7539_v27 = vld [vmem:[#allocation4 + $0x220] ss:$16 sps:$4 sm:$0xff]  }
  0x71   :  { %4249 = vmatpush1.bf16.msra.mxu0 %v7520_v14  ;;  %v7540_v28 = vld [vmem:[#allocation4 + $0x4] ss:$16 sps:$4 sm:$0xff]   ;;  %v7544_v30 = vld [vmem:[#allocation4] ss:$16 sps:$4 sm:$0xff]  }
  0x72   :  { %4292 = vmatpush1.bf16.msra.mxu1 %v7521_v15  ;;  %4250 = vmatprep.subr.bf16.mxu0 %v7522_v16  ;;  %v7542_v29 = vld [vmem:[#allocation4 + $0x204] ss:$16 sps:$4 sm:$0xff]   ;;  %v7545_v31 = vld [vmem:[#allocation4 + $0x200] ss:$16 sps:$4 sm:$0xff]  }
  0x73   :  { %4293 = vmatprep.subr.bf16.mxu1 %v7524_v17  ;;  %v7546_v32 = vld [vmem:[#allocation4 + $0x1e4] ss:$16 sps:$4 sm:$0xff]   ;;  %v7550_v34 = vld [vmem:[#allocation4 + $0x1e0] ss:$16 sps:$4 sm:$0xff]  }
  0x74   :  { %v7548_v33 = vld [vmem:[#allocation4 + $0x3e4] ss:$16 sps:$4 sm:$0xff]   ;;  %v7551_v35 = vld [vmem:[#allocation4 + $0x3e0] ss:$16 sps:$4 sm:$0xff]  }
  0x75   :  { %4251 = vmatpush1.bf16.msra.mxu0 %v7526_v18  ;;  %v7552_v36 = vld [vmem:[#allocation4 + $0x1c4] ss:$16 sps:$4 sm:$0xff]   ;;  %v7556_v38 = vld [vmem:[#allocation4 + $0x1c0] ss:$16 sps:$4 sm:$0xff]  }
  0x76   :  { %4294 = vmatpush1.bf16.msra.mxu1 %v7527_v19  ;;  %4252 = vmatprep.subr.bf16.mxu0 %v7528_v20  ;;  %v7554_v37 = vld [vmem:[#allocation4 + $0x3c4] ss:$16 sps:$4 sm:$0xff]   ;;  %v7557_v39 = vld [vmem:[#allocation4 + $0x3c0] ss:$16 sps:$4 sm:$0xff]  }
  0x77   :  { %4295 = vmatprep.subr.bf16.mxu1 %v7530_v21  ;;  %v7558_v40 = vld [vmem:[#allocation4 + $0x1a4] ss:$16 sps:$4 sm:$0xff]   ;;  %v7562_v42 = vld [vmem:[#allocation4 + $0x1a0] ss:$16 sps:$4 sm:$0xff]  }
  0x78   :  { %v7560_v41 = vld [vmem:[#allocation4 + $0x3a4] ss:$16 sps:$4 sm:$0xff]   ;;  %v7563_v43 = vld [vmem:[#allocation4 + $0x3a0] ss:$16 sps:$4 sm:$0xff]  }
  0x79   :  { %4253 = vmatpush1.bf16.msra.mxu0 %v7532_v22  ;;  %v7564_v44 = vld [vmem:[#allocation4 + $0x184] ss:$16 sps:$4 sm:$0xff]   ;;  %v7568_v50 = vld [vmem:[#allocation4 + $0x180] ss:$16 sps:$4 sm:$0xff]  }
  0x7a   :  { %4296 = vmatpush1.bf16.msra.mxu1 %v7533_v23  ;;  %4254 = vmatprep.subr.bf16.mxu0 %v7534_v24  ;;  %v7566_v45 = vld [vmem:[#allocation4 + $0x384] ss:$16 sps:$4 sm:$0xff]   ;;  %v7569_v51 = vld [vmem:[#allocation4 + $0x380] ss:$16 sps:$4 sm:$0xff]  }
  0x7b   :  { %4297 = vmatprep.subr.bf16.mxu1 %v7536_v25  ;;  %v158_v47 = vld [vmem:[#allocation2 + $0xb0] sm:$0xff]  ;;  %v160_v49 = vld [vmem:[#allocation2 + $0xc0] sm:$0xff] }
  0x7c   :  { %v7570_v52 = vld [vmem:[#allocation4 + $0x164] ss:$16 sps:$4 sm:$0xff]   ;;  %v8994_v53 = vpack.c.bf16 %v158_v47, %v137_v46  ;;  %v8996_v54 = vpack.c.bf16 %v160_v49, %v139_v48  ;;  %v7574_v56 = vld [vmem:[#allocation4 + $0x160] ss:$16 sps:$4 sm:$0xff]  }
  0x7d   :  { %4255 = vmatpush1.bf16.msra.mxu0 %v7538_v26  ;;  %v7572_v55 = vld [vmem:[#allocation4 + $0x364] ss:$16 sps:$4 sm:$0xff]   ;;  %v7575_v57 = vld [vmem:[#allocation4 + $0x360] ss:$16 sps:$4 sm:$0xff]  }
  0x7e   :  { %4298 = vmatpush1.bf16.msra.mxu1 %v7539_v27  ;;  %4256 = vmatprep.subr.bf16.mxu0 %v7540_v28  ;;  %v7576_v58 = vld [vmem:[#allocation4 + $0x144] ss:$16 sps:$4 sm:$0xff]   ;;  %v7580_v60 = vld [vmem:[#allocation4 + $0x140] ss:$16 sps:$4 sm:$0xff]  }
  0x7f   :  { %4299 = vmatprep.subr.bf16.mxu1 %v7542_v29  ;;  %4274 = vmatprep.mubr.bf16.mxu0 %v8994_v53  ;;  %v7578_v59 = vld [vmem:[#allocation4 + $0x344] ss:$16 sps:$4 sm:$0xff]   ;;  %v7581_v61 = vld [vmem:[#allocation4 + $0x340] ss:$16 sps:$4 sm:$0xff]  }
  0x80   :  { %4317 = vmatprep.mubr.bf16.mxu1 %v8996_v54  ;;  %v7582_v62 = vld [vmem:[#allocation4 + $0x124] ss:$16 sps:$4 sm:$0xff]   ;;  %v7586_v0 = vld [vmem:[#allocation4 + $0x120] ss:$16 sps:$4 sm:$0xff]  }
  0x81   :  { %4257 = vmatpush1.bf16.msra.mxu0 %v7544_v30  ;;  %v7584_v63 = vld [vmem:[#allocation4 + $0x324] ss:$16 sps:$4 sm:$0xff]   ;;  %v7587_v1 = vld [vmem:[#allocation4 + $0x320] ss:$16 sps:$4 sm:$0xff]  }
  0x82   :  { %4300 = vmatpush1.bf16.msra.mxu1 %v7545_v31  ;;  %4258 = vmatprep.subr.bf16.mxu0 %v7546_v32  ;;  %v7588_v2 = vld [vmem:[#allocation4 + $0x104] ss:$16 sps:$4 sm:$0xff]   ;;  %v7592_v4 = vld [vmem:[#allocation4 + $0x100] ss:$16 sps:$4 sm:$0xff]  }
  0x83   :  { %4301 = vmatprep.subr.bf16.mxu1 %v7548_v33  ;;  %v7590_v3 = vld [vmem:[#allocation4 + $0x304] ss:$16 sps:$4 sm:$0xff]   ;;  %v7593_v5 = vld [vmem:[#allocation4 + $0x300] ss:$16 sps:$4 sm:$0xff]  }
  0x84   :  { %v136_v6 = vld [vmem:[#allocation2] sm:$0xff]  ;;  %v138_v8 = vld [vmem:[#allocation2 + $0x10] sm:$0xff] }
  0x85   :  { %4259 = vmatpush2.bf16.msra.mxu0 %v7550_v34  ;;  %v7596_v10 = vld [vmem:[#allocation4 + $0x4e4] ss:$16 sps:$4 sm:$0xff]   ;;  %v9000_v12 = vpack.c.bf16 %v157_v7, %v136_v6  ;;  %v9002_v13 = vpack.c.bf16 %v159_v9, %v138_v8  ;;  %v7594_v14 = vld [vmem:[#allocation4 + $0x4e0] ss:$16 sps:$4 sm:$0xff]  }
  0x86   :  { %4302 = vmatpush2.bf16.msra.mxu1 %v7551_v35  ;;  %4260 = vmatprep.subr.bf16.mxu0 %v7552_v36  ;;  %v7599_v11 = vld [vmem:[#allocation4 + $0x6e4] ss:$16 sps:$4 sm:$0xff]   ;;  %v7597_v15 = vld [vmem:[#allocation4 + $0x6e0] ss:$16 sps:$4 sm:$0xff]  }
  0x87   :  { %4303 = vmatprep.subr.bf16.mxu1 %v7554_v37  ;;  %v7602_v16 = vld [vmem:[#allocation4 + $0x4c4] ss:$16 sps:$4 sm:$0xff]   ;;  %v7600_v18 = vld [vmem:[#allocation4 + $0x4c0] ss:$16 sps:$4 sm:$0xff]  }
  0x88   :  { %v7605_v17 = vld [vmem:[#allocation4 + $0x6c4] ss:$16 sps:$4 sm:$0xff]   ;;  %v7603_v19 = vld [vmem:[#allocation4 + $0x6c0] ss:$16 sps:$4 sm:$0xff]  }
  0x89   :  { %4261 = vmatpush2.bf16.msra.mxu0 %v7556_v38  ;;  %v7608_v20 = vld [vmem:[#allocation4 + $0x4a4] ss:$16 sps:$4 sm:$0xff]   ;;  %v7606_v22 = vld [vmem:[#allocation4 + $0x4a0] ss:$16 sps:$4 sm:$0xff]  }
  0x8a   :  { %4304 = vmatpush2.bf16.msra.mxu1 %v7557_v39  ;;  %4262 = vmatprep.subr.bf16.mxu0 %v7558_v40  ;;  %v7611_v21 = vld [vmem:[#allocation4 + $0x6a4] ss:$16 sps:$4 sm:$0xff]   ;;  %v7609_v23 = vld [vmem:[#allocation4 + $0x6a0] ss:$16 sps:$4 sm:$0xff]   ;;  %v141_v40 = vld [vmem:[#allocation2 + $0x28] sm:$0xff] }
  0x8b   :  { %4305 = vmatprep.subr.bf16.mxu1 %v7560_v41  ;;  %v7614_v24 = vld [vmem:[#allocation4 + $0x484] ss:$16 sps:$4 sm:$0xff]   ;;  %v7612_v26 = vld [vmem:[#allocation4 + $0x480] ss:$16 sps:$4 sm:$0xff]  }
  0x8c   :  { %v7617_v25 = vld [vmem:[#allocation4 + $0x684] ss:$16 sps:$4 sm:$0xff]   ;;  %v7615_v27 = vld [vmem:[#allocation4 + $0x680] ss:$16 sps:$4 sm:$0xff]  }
  0x8d   :  { %4263 = vmatpush2.bf16.msra.mxu0 %v7562_v42  ;;  %v7620_v28 = vld [vmem:[#allocation4 + $0x464] ss:$16 sps:$4 sm:$0xff]   ;;  %v7618_v30 = vld [vmem:[#allocation4 + $0x460] ss:$16 sps:$4 sm:$0xff]   ;;  %v143_v42 = vld [vmem:[#allocation2 + $0x38] sm:$0xff] }
  0x8e   :  { %4306 = vmatpush2.bf16.msra.mxu1 %v7563_v43  ;;  %4264 = vmatprep.subr.bf16.mxu0 %v7564_v44  ;;  %v7623_v29 = vld [vmem:[#allocation4 + $0x664] ss:$16 sps:$4 sm:$0xff]   ;;  %v7621_v31 = vld [vmem:[#allocation4 + $0x660] ss:$16 sps:$4 sm:$0xff]  }
  0x8f   :  { %4307 = vmatprep.subr.bf16.mxu1 %v7566_v45  ;;  %v7626_v32 = vld [vmem:[#allocation4 + $0x444] ss:$16 sps:$4 sm:$0xff]   ;;  %v7624_v34 = vld [vmem:[#allocation4 + $0x440] ss:$16 sps:$4 sm:$0xff]  }
  0x90   :  { %v7629_v33 = vld [vmem:[#allocation4 + $0x644] ss:$16 sps:$4 sm:$0xff]   ;;  %v7627_v35 = vld [vmem:[#allocation4 + $0x640] ss:$16 sps:$4 sm:$0xff]  }
  0x91   :  { %4265 = vmatpush2.bf16.msra.mxu0 %v7568_v50  ;;  %v7632_v36 = vld [vmem:[#allocation4 + $0x424] ss:$16 sps:$4 sm:$0xff]   ;;  %v7630_v38 = vld [vmem:[#allocation4 + $0x420] ss:$16 sps:$4 sm:$0xff]  }
  0x92   :  { %4308 = vmatpush2.bf16.msra.mxu1 %v7569_v51  ;;  %4266 = vmatprep.subr.bf16.mxu0 %v7570_v52  ;;  %v7635_v37 = vld [vmem:[#allocation4 + $0x624] ss:$16 sps:$4 sm:$0xff]   ;;  %v7633_v39 = vld [vmem:[#allocation4 + $0x620] ss:$16 sps:$4 sm:$0xff]  }
  0x93   :  { %4309 = vmatprep.subr.bf16.mxu1 %v7572_v55  ;;  %v162_v41 = vld [vmem:[#allocation2 + $0xd0] sm:$0xff]  ;;  %v164_v46 = vld [vmem:[#allocation2 + $0xe0] sm:$0xff] }
  0x94   :  { %v7638_v43 = vld [vmem:[#allocation4 + $0x404] ss:$16 sps:$4 sm:$0xff]   ;;  %v9006_v45 = vpack.c.bf16 %v162_v41, %v141_v40  ;;  %v9008_v47 = vpack.c.bf16 %v164_v46, %v143_v42  ;;  %v7636_v48 = vld [vmem:[#allocation4 + $0x400] ss:$16 sps:$4 sm:$0xff]   ;;  %v147_v41 = vld [vmem:[#allocation2 + $0x58] sm:$0xff] }
  0x95   :  { %4267 = vmatpush2.bf16.msra.mxu0 %v7574_v56  ;;  %v7641_v44 = vld [vmem:[#allocation4 + $0x604] ss:$16 sps:$4 sm:$0xff]   ;;  %v7639_v49 = vld [vmem:[#allocation4 + $0x600] ss:$16 sps:$4 sm:$0xff]  }
  0x96   :  { %4310 = vmatpush2.bf16.msra.mxu1 %v7575_v57  ;;  %4268 = vmatprep.subr.bf16.mxu0 %v7576_v58  ;;  %v7644_v50 = vld [vmem:[#allocation4 + $0x5e4] ss:$16 sps:$4 sm:$0xff]   ;;  %v7642_v52 = vld [vmem:[#allocation4 + $0x5e0] ss:$16 sps:$4 sm:$0xff]  }
  0x97   :  { %4311 = vmatprep.subr.bf16.mxu1 %v7578_v59  ;;  %v7647_v51 = vld [vmem:[#allocation4 + $0x7e4] ss:$16 sps:$4 sm:$0xff]   ;;  %v7645_v55 = vld [vmem:[#allocation4 + $0x7e0] ss:$16 sps:$4 sm:$0xff]  }
  0x98   :  { %v7650_v56 = vld [vmem:[#allocation4 + $0x5c4] ss:$16 sps:$4 sm:$0xff]   ;;  %v7648_v58 = vld [vmem:[#allocation4 + $0x5c0] ss:$16 sps:$4 sm:$0xff]  }
  0x99   :  { %4269 = vmatpush2.bf16.msra.mxu0 %v7580_v60  ;;  %v7653_v57 = vld [vmem:[#allocation4 + $0x7c4] ss:$16 sps:$4 sm:$0xff]   ;;  %v7651_v59 = vld [vmem:[#allocation4 + $0x7c0] ss:$16 sps:$4 sm:$0xff]  }
  0x9a   :  { %4312 = vmatpush2.bf16.msra.mxu1 %v7581_v61  ;;  %4270 = vmatprep.subr.bf16.mxu0 %v7582_v62  ;;  %v7656_v60 = vld [vmem:[#allocation4 + $0x5a4] ss:$16 sps:$4 sm:$0xff]   ;;  %v7654_v62 = vld [vmem:[#allocation4 + $0x5a0] ss:$16 sps:$4 sm:$0xff]  }
  0x9b   :  { %4313 = vmatprep.subr.bf16.mxu1 %v7584_v63  ;;  %v7659_v61 = vld [vmem:[#allocation4 + $0x7a4] ss:$16 sps:$4 sm:$0xff]   ;;  %v7657_v63 = vld [vmem:[#allocation4 + $0x7a0] ss:$16 sps:$4 sm:$0xff]  }
  0x9c   :  { %v7666_v6 = vld [vmem:[#allocation4 + $0x560] ss:$16 sps:$4 sm:$0xff]   ;;  %v7674_v8 = vld [vmem:[#allocation4 + $0x544] ss:$16 sps:$4 sm:$0xff]  }
  0x9d   :  { %4271 = vmatpush2.bf16.msra.mxu0 %v7586_v0  ;;  %v7662_v0 = vld [vmem:[#allocation4 + $0x584] ss:$16 sps:$4 sm:$0xff]   ;;  %v7669_v7 = vld [vmem:[#allocation4 + $0x760] ss:$16 sps:$4 sm:$0xff]  }
  0x9e   :  { %4314 = vmatpush2.bf16.msra.mxu1 %v7587_v1  ;;  %4272 = vmatprep.subr.bf16.mxu0 %v7588_v2  ;;  %v7665_v1 = vld [vmem:[#allocation4 + $0x784] ss:$16 sps:$4 sm:$0xff]   ;;  %v7660_v2 = vld [vmem:[#allocation4 + $0x580] ss:$16 sps:$4 sm:$0xff]  }
  0x9f   :  { %4315 = vmatprep.subr.bf16.mxu1 %v7590_v3  ;;  %v7663_v3 = vld [vmem:[#allocation4 + $0x780] ss:$16 sps:$4 sm:$0xff]   ;;  %v7677_v9 = vld [vmem:[#allocation4 + $0x744] ss:$16 sps:$4 sm:$0xff]  }
  0xa0   :  { %v168_v42 = vld [vmem:[#allocation2 + $0x100] sm:$0xff] }
  0xa1   :  { %4273 = vmatpush2.bf16.msra.mxu0 %v7592_v4  ;;  %v7668_v4 = vld [vmem:[#allocation4 + $0x564] ss:$16 sps:$4 sm:$0xff]   ;;  %v9020_v46 = vpack.c.bf16 %v168_v42, %v147_v41  ;;  %v7780_v41 = vld [vmem:[#allocation4 + $0x900] ss:$16 sps:$4 sm:$0xff]  }
  0xa2   :  { %4316 = vmatpush2.bf16.msra.mxu1 %v7593_v5  ;;  %4328 = vmatprep.subr.bf16.mxu0 %v7596_v10  ;;  %v7671_v5 = vld [vmem:[#allocation4 + $0x764] ss:$16 sps:$4 sm:$0xff]   ;;  %v7672_v10 = vld [vmem:[#allocation4 + $0x540] ss:$16 sps:$4 sm:$0xff]  }
  0xa3   :  { %4371 = vmatprep.subr.bf16.mxu1 %v7599_v11  ;;  %v7675_v11 = vld [vmem:[#allocation4 + $0x740] ss:$16 sps:$4 sm:$0xff]  }
  0xa4   :  { %4275 = vmatmul.mubr.bf16.vlgmr.msra.gmra.mxu0 %v9000_v12  ;;  %v7783_v42 = vld [vmem:[#allocation4 + $0xb00] ss:$16 sps:$4 sm:$0xff]  }
  0xa5   :  { %4318 = vmatmul.mubr.bf16.vlgmr.msra.gmra.mxu1 %v9002_v13  ;;  %4329 = vmatpush1.bf16.msra.mxu0 %v7594_v14  ;;  %v7680_v14 = vld [vmem:[#allocation4 + $0x524] ss:$16 sps:$4 sm:$0xff]  }
  0xa6   :  { %4372 = vmatpush1.bf16.msra.mxu1 %v7597_v15  ;;  %4330 = vmatprep.subr.bf16.mxu0 %v7602_v16  ;;  %v7683_v15 = vld [vmem:[#allocation4 + $0x724] ss:$16 sps:$4 sm:$0xff]   ;;  %v7678_v16 = vld [vmem:[#allocation4 + $0x520] ss:$16 sps:$4 sm:$0xff]  }
  0xa7   :  { %4373 = vmatprep.subr.bf16.mxu1 %v7605_v17  ;;  %4360 = vmatprep.mubr.bf16.mxu0 %v9006_v45  ;;  %v7681_v17 = vld [vmem:[#allocation4 + $0x720] ss:$16 sps:$4 sm:$0xff]  }
  0xa8   :  { %4403 = vmatprep.mubr.bf16.mxu1 %v9008_v47 }
  0xa9   :  { %4331 = vmatpush1.bf16.msra.mxu0 %v7600_v18  ;;  %v7686_v18 = vld [vmem:[#allocation4 + $0x504] ss:$16 sps:$4 sm:$0xff]  }
  0xaa   :  { %4374 = vmatpush1.bf16.msra.mxu1 %v7603_v19  ;;  %4332 = vmatprep.subr.bf16.mxu0 %v7608_v20  ;;  %v7689_v19 = vld [vmem:[#allocation4 + $0x704] ss:$16 sps:$4 sm:$0xff]   ;;  %v7684_v20 = vld [vmem:[#allocation4 + $0x500] ss:$16 sps:$4 sm:$0xff]  }
  0xab   :  { %4375 = vmatprep.subr.bf16.mxu1 %v7611_v21  ;;  %v7687_v21 = vld [vmem:[#allocation4 + $0x700] ss:$16 sps:$4 sm:$0xff]  }
  0xad   :  { %4333 = vmatpush1.bf16.msra.mxu0 %v7606_v22  ;;  %v140_v22 = vld [vmem:[#allocation2 + $0x20] sm:$0xff] }
  0xae   :  { %4376 = vmatpush1.bf16.msra.mxu1 %v7609_v23  ;;  %4334 = vmatprep.subr.bf16.mxu0 %v7614_v24  ;;  %v161_v23 = vld [vmem:[#allocation2 + $0xc8] sm:$0xff]  ;;  %v142_v24 = vld [vmem:[#allocation2 + $0x30] sm:$0xff] }
  0xaf   :  { %4377 = vmatprep.subr.bf16.mxu1 %v7617_v25  ;;  %v163_v25 = vld [vmem:[#allocation2 + $0xd8] sm:$0xff] }
  0xb1   :  { %4335 = vmatpush1.bf16.msra.mxu0 %v7612_v26  ;;  %v7692_v26 = vld [vmem:[#allocation4 + $0x8e4] ss:$16 sps:$4 sm:$0xff]  }
  0xb2   :  { %4378 = vmatpush1.bf16.msra.mxu1 %v7615_v27  ;;  %4336 = vmatprep.subr.bf16.mxu0 %v7620_v28  ;;  %v7695_v27 = vld [vmem:[#allocation4 + $0xae4] ss:$16 sps:$4 sm:$0xff]   ;;  %v9012_v28 = vpack.c.bf16 %v161_v23, %v140_v22  ;;  %v7756_v22 = vld [vmem:[#allocation4 + $0x980] ss:$16 sps:$4 sm:$0xff]  }
  0xb3   :  { %4379 = vmatprep.subr.bf16.mxu1 %v7623_v29  ;;  %v9014_v29 = vpack.c.bf16 %v163_v25, %v142_v24  ;;  %v7759_v23 = vld [vmem:[#allocation4 + $0xb80] ss:$16 sps:$4 sm:$0xff]   ;;  %v7764_v24 = vld [vmem:[#allocation4 + $0x964] ss:$16 sps:$4 sm:$0xff]  }
  0xb4   :  { %v7767_v25 = vld [vmem:[#allocation4 + $0xb64] ss:$16 sps:$4 sm:$0xff]  }
  0xb5   :  { %4337 = vmatpush1.bf16.msra.mxu0 %v7618_v30  ;;  %v7690_v30 = vld [vmem:[#allocation4 + $0x8e0] ss:$16 sps:$4 sm:$0xff]  }
  0xb6   :  { %4380 = vmatpush1.bf16.msra.mxu1 %v7621_v31  ;;  %4338 = vmatprep.subr.bf16.mxu0 %v7626_v32  ;;  %v7693_v31 = vld [vmem:[#allocation4 + $0xae0] ss:$16 sps:$4 sm:$0xff]   ;;  %v7698_v32 = vld [vmem:[#allocation4 + $0x8c4] ss:$16 sps:$4 sm:$0xff]  }
  0xb7   :  { %4381 = vmatprep.subr.bf16.mxu1 %v7629_v33  ;;  %v7701_v33 = vld [vmem:[#allocation4 + $0xac4] ss:$16 sps:$4 sm:$0xff]  }
  0xb9   :  { %4339 = vmatpush1.bf16.msra.mxu0 %v7624_v34  ;;  %v7696_v34 = vld [vmem:[#allocation4 + $0x8c0] ss:$16 sps:$4 sm:$0xff]  }
  0xba   :  { %4382 = vmatpush1.bf16.msra.mxu1 %v7627_v35  ;;  %4340 = vmatprep.subr.bf16.mxu0 %v7632_v36  ;;  %v7699_v35 = vld [vmem:[#allocation4 + $0xac0] ss:$16 sps:$4 sm:$0xff]   ;;  %v7704_v36 = vld [vmem:[#allocation4 + $0x8a4] ss:$16 sps:$4 sm:$0xff]  }
  0xbb   :  { %4383 = vmatprep.subr.bf16.mxu1 %v7635_v37  ;;  %v7707_v37 = vld [vmem:[#allocation4 + $0xaa4] ss:$16 sps:$4 sm:$0xff]  }
  0xbd   :  { %4341 = vmatpush1.bf16.msra.mxu0 %v7630_v38  ;;  %v145_v38 = vld [vmem:[#allocation2 + $0x48] sm:$0xff] }
  0xbe   :  { %4384 = vmatpush1.bf16.msra.mxu1 %v7633_v39  ;;  %4342 = vmatprep.subr.bf16.mxu0 %v7638_v43  ;;  %v166_v39 = vld [vmem:[#allocation2 + $0xf0] sm:$0xff] }
  0xbf   :  { %4385 = vmatprep.subr.bf16.mxu1 %v7641_v44  ;;  %v9018_v40 = vpack.c.bf16 %v166_v39, %v145_v38  ;;  %v7702_v43 = vld [vmem:[#allocation4 + $0x8a0] ss:$16 sps:$4 sm:$0xff]   ;;  %v7782_v38 = vld [vmem:[#allocation4 + $0x904] ss:$16 sps:$4 sm:$0xff]  }
  0xc0   :  { %v7705_v44 = vld [vmem:[#allocation4 + $0xaa0] ss:$16 sps:$4 sm:$0xff]   ;;  %v7785_v39 = vld [vmem:[#allocation4 + $0xb04] ss:$16 sps:$4 sm:$0xff]  }
  0xc1   :  { %4343 = vmatpush1.bf16.msra.mxu0 %v7636_v48  ;;  %v7710_v48 = vld [vmem:[#allocation4 + $0x884] ss:$16 sps:$4 sm:$0xff]  }
  0xc2   :  { %4386 = vmatpush1.bf16.msra.mxu1 %v7639_v49  ;;  %4344 = vmatprep.subr.bf16.mxu0 %v7644_v50  ;;  %v7713_v49 = vld [vmem:[#allocation4 + $0xa84] ss:$16 sps:$4 sm:$0xff]   ;;  %v7708_v50 = vld [vmem:[#allocation4 + $0x880] ss:$16 sps:$4 sm:$0xff]  }
  0xc3   :  { %4387 = vmatprep.subr.bf16.mxu1 %v7647_v51  ;;  %v7711_v51 = vld [vmem:[#allocation4 + $0xa80] ss:$16 sps:$4 sm:$0xff]  }
  0xc5   :  { %4345 = vmatpush2.bf16.msra.mxu0 %v7642_v52  ;;  %v7716_v52 = vld [vmem:[#allocation4 + $0x864] ss:$16 sps:$4 sm:$0xff]  }
  0xc6   :  { %4388 = vmatpush2.bf16.msra.mxu1 %v7645_v55  ;;  %4346 = vmatprep.subr.bf16.mxu0 %v7650_v56  ;;  %v7719_v55 = vld [vmem:[#allocation4 + $0xa64] ss:$16 sps:$4 sm:$0xff]   ;;  %v7714_v56 = vld [vmem:[#allocation4 + $0x860] ss:$16 sps:$4 sm:$0xff]  }
  0xc7   :  { %4389 = vmatprep.subr.bf16.mxu1 %v7653_v57  ;;  %v7717_v57 = vld [vmem:[#allocation4 + $0xa60] ss:$16 sps:$4 sm:$0xff]  }
  0xc9   :  { %4347 = vmatpush2.bf16.msra.mxu0 %v7648_v58  ;;  %v7722_v58 = vld [vmem:[#allocation4 + $0x844] ss:$16 sps:$4 sm:$0xff]  }
  0xca   :  { %4390 = vmatpush2.bf16.msra.mxu1 %v7651_v59  ;;  %4348 = vmatprep.subr.bf16.mxu0 %v7656_v60  ;;  %v7725_v59 = vld [vmem:[#allocation4 + $0xa44] ss:$16 sps:$4 sm:$0xff]   ;;  %v7720_v60 = vld [vmem:[#allocation4 + $0x840] ss:$16 sps:$4 sm:$0xff]  }
  0xcb   :  { %4391 = vmatprep.subr.bf16.mxu1 %v7659_v61  ;;  %v7723_v61 = vld [vmem:[#allocation4 + $0xa40] ss:$16 sps:$4 sm:$0xff]  }
  0xcd   :  { %4349 = vmatpush2.bf16.msra.mxu0 %v7654_v62  ;;  %v7728_v62 = vld [vmem:[#allocation4 + $0x824] ss:$16 sps:$4 sm:$0xff]  }
  0xce   :  { %4392 = vmatpush2.bf16.msra.mxu1 %v7657_v63  ;;  %4350 = vmatprep.subr.bf16.mxu0 %v7662_v0  ;;  %v7731_v63 = vld [vmem:[#allocation4 + $0xa24] ss:$16 sps:$4 sm:$0xff]   ;;  %v7726_v0 = vld [vmem:[#allocation4 + $0x820] ss:$16 sps:$4 sm:$0xff]  }
  0xcf   :  { %4393 = vmatprep.subr.bf16.mxu1 %v7665_v1  ;;  %v7729_v1 = vld [vmem:[#allocation4 + $0xa20] ss:$16 sps:$4 sm:$0xff]  }
  0xd1   :  { %4351 = vmatpush2.bf16.msra.mxu0 %v7660_v2  ;;  %v7734_v2 = vld [vmem:[#allocation4 + $0x804] ss:$16 sps:$4 sm:$0xff]  }
  0xd2   :  { %4394 = vmatpush2.bf16.msra.mxu1 %v7663_v3  ;;  %4352 = vmatprep.subr.bf16.mxu0 %v7668_v4  ;;  %v7737_v3 = vld [vmem:[#allocation4 + $0xa04] ss:$16 sps:$4 sm:$0xff]   ;;  %v7732_v4 = vld [vmem:[#allocation4 + $0x800] ss:$16 sps:$4 sm:$0xff]  }
  0xd3   :  { %4395 = vmatprep.subr.bf16.mxu1 %v7671_v5  ;;  %v7735_v5 = vld [vmem:[#allocation4 + $0xa00] ss:$16 sps:$4 sm:$0xff]  }
  0xd5   :  { %4353 = vmatpush2.bf16.msra.mxu0 %v7666_v6  ;;  %v7740_v6 = vld [vmem:[#allocation4 + $0x9e4] ss:$16 sps:$4 sm:$0xff]  }
  0xd6   :  { %4396 = vmatpush2.bf16.msra.mxu1 %v7669_v7  ;;  %4354 = vmatprep.subr.bf16.mxu0 %v7674_v8  ;;  %v7743_v7 = vld [vmem:[#allocation4 + $0xbe4] ss:$16 sps:$4 sm:$0xff]   ;;  %v7738_v8 = vld [vmem:[#allocation4 + $0x9e0] ss:$16 sps:$4 sm:$0xff]  }
  0xd7   :  { %4397 = vmatprep.subr.bf16.mxu1 %v7677_v9  ;;  %v7741_v9 = vld [vmem:[#allocation4 + $0xbe0] ss:$16 sps:$4 sm:$0xff]  }
  0xd9   :  { %4355 = vmatpush2.bf16.msra.mxu0 %v7672_v10  ;;  %v7746_v10 = vld [vmem:[#allocation4 + $0x9c4] ss:$16 sps:$4 sm:$0xff]  }
  0xda   :  { %4398 = vmatpush2.bf16.msra.mxu1 %v7675_v11  ;;  %4356 = vmatprep.subr.bf16.mxu0 %v7680_v14  ;;  %v7749_v11 = vld [vmem:[#allocation4 + $0xbc4] ss:$16 sps:$4 sm:$0xff]   ;;  %v7744_v14 = vld [vmem:[#allocation4 + $0x9c0] ss:$16 sps:$4 sm:$0xff]  }
  0xdb   :  { %4399 = vmatprep.subr.bf16.mxu1 %v7683_v15  ;;  %v7747_v15 = vld [vmem:[#allocation4 + $0xbc0] ss:$16 sps:$4 sm:$0xff]  }
  0xdd   :  { %4357 = vmatpush2.bf16.msra.mxu0 %v7678_v16  ;;  %v7752_v16 = vld [vmem:[#allocation4 + $0x9a4] ss:$16 sps:$4 sm:$0xff]  }
  0xde   :  { %4400 = vmatpush2.bf16.msra.mxu1 %v7681_v17  ;;  %4358 = vmatprep.subr.bf16.mxu0 %v7686_v18  ;;  %v7755_v17 = vld [vmem:[#allocation4 + $0xba4] ss:$16 sps:$4 sm:$0xff]   ;;  %v7750_v18 = vld [vmem:[#allocation4 + $0x9a0] ss:$16 sps:$4 sm:$0xff]  }
  0xdf   :  { %4401 = vmatprep.subr.bf16.mxu1 %v7689_v19  ;;  %v7753_v19 = vld [vmem:[#allocation4 + $0xba0] ss:$16 sps:$4 sm:$0xff]  }
  0xe1   :  { %4359 = vmatpush2.bf16.msra.mxu0 %v7684_v20  ;;  %v7758_v20 = vld [vmem:[#allocation4 + $0x984] ss:$16 sps:$4 sm:$0xff]  }
  0xe2   :  { %4402 = vmatpush2.bf16.msra.mxu1 %v7687_v21  ;;  %4414 = vmatprep.subr.bf16.mxu0 %v7692_v26  ;;  %v7761_v21 = vld [vmem:[#allocation4 + $0xb84] ss:$16 sps:$4 sm:$0xff]   ;;  %v7762_v26 = vld [vmem:[#allocation4 + $0x960] ss:$16 sps:$4 sm:$0xff]  }
  0xe3   :  { %4457 = vmatprep.subr.bf16.mxu1 %v7695_v27  ;;  %v7765_v27 = vld [vmem:[#allocation4 + $0xb60] ss:$16 sps:$4 sm:$0xff]  }
  0xe4   :  { %4361 = vmatmul.mubr.bf16.vlgmr.msra.gmra.mxu0 %v9012_v28 }
  0xe5   :  { %4404 = vmatmul.mubr.bf16.vlgmr.msra.gmra.mxu1 %v9014_v29  ;;  %4415 = vmatpush1.bf16.msra.mxu0 %v7690_v30  ;;  %v7770_v30 = vld [vmem:[#allocation4 + $0x944] ss:$16 sps:$4 sm:$0xff]  }
  0xe6   :  { %4458 = vmatpush1.bf16.msra.mxu1 %v7693_v31  ;;  %4416 = vmatprep.subr.bf16.mxu0 %v7698_v32  ;;  %v7773_v31 = vld [vmem:[#allocation4 + $0xb44] ss:$16 sps:$4 sm:$0xff]   ;;  %v7768_v32 = vld [vmem:[#allocation4 + $0x940] ss:$16 sps:$4 sm:$0xff]  }
  0xe7   :  { %4459 = vmatprep.subr.bf16.mxu1 %v7701_v33  ;;  %4446 = vmatprep.mubr.bf16.mxu0 %v9018_v40  ;;  %v7771_v33 = vld [vmem:[#allocation4 + $0xb40] ss:$16 sps:$4 sm:$0xff]  }
  0xe8   :  { %4489 = vmatprep.mubr.bf16.mxu1 %v9020_v46 }
  0xe9   :  { %4417 = vmatpush1.bf16.msra.mxu0 %v7696_v34  ;;  %v7776_v34 = vld [vmem:[#allocation4 + $0x924] ss:$16 sps:$4 sm:$0xff]  }
  0xea   :  { %4460 = vmatpush1.bf16.msra.mxu1 %v7699_v35  ;;  %4418 = vmatprep.subr.bf16.mxu0 %v7704_v36  ;;  %v7779_v35 = vld [vmem:[#allocation4 + $0xb24] ss:$16 sps:$4 sm:$0xff]   ;;  %v7774_v36 = vld [vmem:[#allocation4 + $0x920] ss:$16 sps:$4 sm:$0xff]  }
  0xeb   :  { %4461 = vmatprep.subr.bf16.mxu1 %v7707_v37  ;;  %v7777_v37 = vld [vmem:[#allocation4 + $0xb20] ss:$16 sps:$4 sm:$0xff]  }
  0xed   :  { %4419 = vmatpush1.bf16.msra.mxu0 %v7702_v43  ;;  %v144_v43 = vld [vmem:[#allocation2 + $0x40] sm:$0xff] }
  0xee   :  { %4462 = vmatpush1.bf16.msra.mxu1 %v7705_v44  ;;  %4420 = vmatprep.subr.bf16.mxu0 %v7710_v48  ;;  %v165_v44 = vld [vmem:[#allocation2 + $0xe8] sm:$0xff]  ;;  %v146_v48 = vld [vmem:[#allocation2 + $0x50] sm:$0xff] }
  0xef   :  { %4463 = vmatprep.subr.bf16.mxu1 %v7713_v49  ;;  %v167_v49 = vld [vmem:[#allocation2 + $0xf8] sm:$0xff] }
  0xf1   :  { %4421 = vmatpush1.bf16.msra.mxu0 %v7708_v50  ;;  %v7788_v50 = vld [vmem:[#allocation4 + $0xce4] ss:$16 sps:$4 sm:$0xff]  }
  0xf2   :  { %4464 = vmatpush1.bf16.msra.mxu1 %v7711_v51  ;;  %4422 = vmatprep.subr.bf16.mxu0 %v7716_v52  ;;  %v7791_v51 = vld [vmem:[#allocation4 + $0xee4] ss:$16 sps:$4 sm:$0xff]   ;;  %v149_v52 = vld [vmem:[#allocation2 + $0x68] sm:$0xff] }
  0xf3   :  { %4465 = vmatprep.subr.bf16.mxu1 %v7719_v55  ;;  %v7786_v55 = vld [vmem:[#allocation4 + $0xce0] ss:$16 sps:$4 sm:$0xff]  }
  0xf5   :  { %4423 = vmatpush1.bf16.msra.mxu0 %v7714_v56  ;;  %v170_v56 = vld [vmem:[#allocation2 + $0x110] sm:$0xff] }
  0xf6   :  { %4466 = vmatpush1.bf16.msra.mxu1 %v7717_v57  ;;  %4424 = vmatprep.subr.bf16.mxu0 %v7722_v58  ;;  %v151_v57 = vld [vmem:[#allocation2 + $0x78] sm:$0xff]  ;;  %v9024_v58 = vpack.c.bf16 %v165_v44, %v144_v43  ;;  %v7846_v43 = vld [vmem:[#allocation4 + $0xda0] ss:$16 sps:$4 sm:$0xff]  }
  0xf7   :  { %4467 = vmatprep.subr.bf16.mxu1 %v7725_v59  ;;  %v9026_v59 = vpack.c.bf16 %v167_v49, %v146_v48  ;;  %v7849_v44 = vld [vmem:[#allocation4 + $0xfa0] ss:$16 sps:$4 sm:$0xff]   ;;  %v7854_v48 = vld [vmem:[#allocation4 + $0xd84] ss:$16 sps:$4 sm:$0xff]  }
  0xf8   :  { %v7857_v49 = vld [vmem:[#allocation4 + $0xf84] ss:$16 sps:$4 sm:$0xff]  }
  0xf9   :  { %4425 = vmatpush1.bf16.msra.mxu0 %v7720_v60  ;;  %v172_v60 = vld [vmem:[#allocation2 + $0x120] sm:$0xff] }
  0xfa   :  { %4468 = vmatpush1.bf16.msra.mxu1 %v7723_v61  ;;  %4426 = vmatprep.subr.bf16.mxu0 %v7728_v62  ;;  %v7789_v61 = vld [vmem:[#allocation4 + $0xee0] ss:$16 sps:$4 sm:$0xff]   ;;  %v7794_v62 = vld [vmem:[#allocation4 + $0xcc4] ss:$16 sps:$4 sm:$0xff]  }
  0xfb   :  { %4469 = vmatprep.subr.bf16.mxu1 %v7731_v63  ;;  %v7797_v63 = vld [vmem:[#allocation4 + $0xec4] ss:$16 sps:$4 sm:$0xff]  }
  0xfd   :  { %4427 = vmatpush1.bf16.msra.mxu0 %v7726_v0  ;;  %v9028_v0 = vpack.c.bf16 %v170_v56, %v149_v52  ;;  %v7860_v52 = vld [vmem:[#allocation4 + $0xd64] ss:$16 sps:$4 sm:$0xff]   ;;  %v7858_v56 = vld [vmem:[#allocation4 + $0xd60] ss:$16 sps:$4 sm:$0xff]  }
  0xfe   :  { %4470 = vmatpush1.bf16.msra.mxu1 %v7729_v1  ;;  %4428 = vmatprep.subr.bf16.mxu0 %v7734_v2  ;;  %v9030_v1 = vpack.c.bf16 %v172_v60, %v151_v57  ;;  %v7792_v2 = vld [vmem:[#allocation4 + $0xcc0] ss:$16 sps:$4 sm:$0xff]   ;;  %v7866_v60 = vld [vmem:[#allocation4 + $0xd44] ss:$16 sps:$4 sm:$0xff]  }
  0xff   :  { %4471 = vmatprep.subr.bf16.mxu1 %v7737_v3  ;;  %v7795_v3 = vld [vmem:[#allocation4 + $0xec0] ss:$16 sps:$4 sm:$0xff]  }
 0x100   :  { %v7861_v57 = vld [vmem:[#allocation4 + $0xf60] ss:$16 sps:$4 sm:$0xff]  }
 0x101   :  { %4429 = vmatpush1.bf16.msra.mxu0 %v7732_v4  ;;  %v7800_v4 = vld [vmem:[#allocation4 + $0xca4] ss:$16 sps:$4 sm:$0xff]  }
 0x102   :  { %4472 = vmatpush1.bf16.msra.mxu1 %v7735_v5  ;;  %4430 = vmatprep.subr.bf16.mxu0 %v7740_v6  ;;  %v7803_v5 = vld [vmem:[#allocation4 + $0xea4] ss:$16 sps:$4 sm:$0xff]   ;;  %v7798_v6 = vld [vmem:[#allocation4 + $0xca0] ss:$16 sps:$4 sm:$0xff]  }
 0x103   :  { %4473 = vmatprep.subr.bf16.mxu1 %v7743_v7  ;;  %v7801_v7 = vld [vmem:[#allocation4 + $0xea0] ss:$16 sps:$4 sm:$0xff]  }
 0x105   :  { %4431 = vmatpush2.bf16.msra.mxu0 %v7738_v8  ;;  %v7806_v8 = vld [vmem:[#allocation4 + $0xc84] ss:$16 sps:$4 sm:$0xff]  }
 0x106   :  { %4474 = vmatpush2.bf16.msra.mxu1 %v7741_v9  ;;  %4432 = vmatprep.subr.bf16.mxu0 %v7746_v10  ;;  %v7809_v9 = vld [vmem:[#allocation4 + $0xe84] ss:$16 sps:$4 sm:$0xff]   ;;  %v7804_v10 = vld [vmem:[#allocation4 + $0xc80] ss:$16 sps:$4 sm:$0xff]  }
 0x107   :  { %4475 = vmatprep.subr.bf16.mxu1 %v7749_v11  ;;  %v7807_v11 = vld [vmem:[#allocation4 + $0xe80] ss:$16 sps:$4 sm:$0xff]  }
 0x109   :  { %4433 = vmatpush2.bf16.msra.mxu0 %v7744_v14  ;;  %v7812_v14 = vld [vmem:[#allocation4 + $0xc64] ss:$16 sps:$4 sm:$0xff]  }
 0x10a   :  { %4476 = vmatpush2.bf16.msra.mxu1 %v7747_v15  ;;  %4434 = vmatprep.subr.bf16.mxu0 %v7752_v16  ;;  %v7815_v15 = vld [vmem:[#allocation4 + $0xe64] ss:$16 sps:$4 sm:$0xff]   ;;  %v7810_v16 = vld [vmem:[#allocation4 + $0xc60] ss:$16 sps:$4 sm:$0xff]  }
 0x10b   :  { %4477 = vmatprep.subr.bf16.mxu1 %v7755_v17  ;;  %v7813_v17 = vld [vmem:[#allocation4 + $0xe60] ss:$16 sps:$4 sm:$0xff]  }
 0x10d   :  { %4435 = vmatpush2.bf16.msra.mxu0 %v7750_v18  ;;  %v7818_v18 = vld [vmem:[#allocation4 + $0xc44] ss:$16 sps:$4 sm:$0xff]  }
 0x10e   :  { %4478 = vmatpush2.bf16.msra.mxu1 %v7753_v19  ;;  %4436 = vmatprep.subr.bf16.mxu0 %v7758_v20  ;;  %v7821_v19 = vld [vmem:[#allocation4 + $0xe44] ss:$16 sps:$4 sm:$0xff]   ;;  %v7816_v20 = vld [vmem:[#allocation4 + $0xc40] ss:$16 sps:$4 sm:$0xff]  }
 0x10f   :  { %4479 = vmatprep.subr.bf16.mxu1 %v7761_v21  ;;  %v7819_v21 = vld [vmem:[#allocation4 + $0xe40] ss:$16 sps:$4 sm:$0xff]  }
 0x111   :  { %4437 = vmatpush2.bf16.msra.mxu0 %v7756_v22  ;;  %v7824_v22 = vld [vmem:[#allocation4 + $0xc24] ss:$16 sps:$4 sm:$0xff]  }
 0x112   :  { %4480 = vmatpush2.bf16.msra.mxu1 %v7759_v23  ;;  %4438 = vmatprep.subr.bf16.mxu0 %v7764_v24  ;;  %v7827_v23 = vld [vmem:[#allocation4 + $0xe24] ss:$16 sps:$4 sm:$0xff]   ;;  %v7822_v24 = vld [vmem:[#allocation4 + $0xc20] ss:$16 sps:$4 sm:$0xff]  }
 0x113   :  { %4481 = vmatprep.subr.bf16.mxu1 %v7767_v25  ;;  %v7825_v25 = vld [vmem:[#allocation4 + $0xe20] ss:$16 sps:$4 sm:$0xff]  }
 0x115   :  { %4439 = vmatpush2.bf16.msra.mxu0 %v7762_v26  ;;  %v7830_v26 = vld [vmem:[#allocation4 + $0xc04] ss:$16 sps:$4 sm:$0xff]  }
 0x116   :  { %4482 = vmatpush2.bf16.msra.mxu1 %v7765_v27  ;;  %4440 = vmatprep.subr.bf16.mxu0 %v7770_v30  ;;  %v7833_v27 = vld [vmem:[#allocation4 + $0xe04] ss:$16 sps:$4 sm:$0xff]   ;;  %v7828_v30 = vld [vmem:[#allocation4 + $0xc00] ss:$16 sps:$4 sm:$0xff]  }
 0x117   :  { %4483 = vmatprep.subr.bf16.mxu1 %v7773_v31  ;;  %v7831_v31 = vld [vmem:[#allocation4 + $0xe00] ss:$16 sps:$4 sm:$0xff]  }
 0x119   :  { %4441 = vmatpush2.bf16.msra.mxu0 %v7768_v32  ;;  %v7836_v32 = vld [vmem:[#allocation4 + $0xde4] ss:$16 sps:$4 sm:$0xff]  }
 0x11a   :  { %4484 = vmatpush2.bf16.msra.mxu1 %v7771_v33  ;;  %4442 = vmatprep.subr.bf16.mxu0 %v7776_v34  ;;  %v7839_v33 = vld [vmem:[#allocation4 + $0xfe4] ss:$16 sps:$4 sm:$0xff]   ;;  %v7834_v34 = vld [vmem:[#allocation4 + $0xde0] ss:$16 sps:$4 sm:$0xff]  }
 0x11b   :  { %4485 = vmatprep.subr.bf16.mxu1 %v7779_v35  ;;  %v7837_v35 = vld [vmem:[#allocation4 + $0xfe0] ss:$16 sps:$4 sm:$0xff]  }
 0x11d   :  { %4443 = vmatpush2.bf16.msra.mxu0 %v7774_v36  ;;  %v7842_v36 = vld [vmem:[#allocation4 + $0xdc4] ss:$16 sps:$4 sm:$0xff]  }
 0x11e   :  { %4486 = vmatpush2.bf16.msra.mxu1 %v7777_v37  ;;  %4444 = vmatprep.subr.bf16.mxu0 %v7782_v38  ;;  %v7845_v37 = vld [vmem:[#allocation4 + $0xfc4] ss:$16 sps:$4 sm:$0xff]   ;;  %v7840_v38 = vld [vmem:[#allocation4 + $0xdc0] ss:$16 sps:$4 sm:$0xff]  }
 0x11f   :  { %4487 = vmatprep.subr.bf16.mxu1 %v7785_v39  ;;  %v7843_v39 = vld [vmem:[#allocation4 + $0xfc0] ss:$16 sps:$4 sm:$0xff]  }
 0x121   :  { %4445 = vmatpush2.bf16.msra.mxu0 %v7780_v41  ;;  %v7848_v41 = vld [vmem:[#allocation4 + $0xda4] ss:$16 sps:$4 sm:$0xff]  }
 0x122   :  { %4488 = vmatpush2.bf16.msra.mxu1 %v7783_v42  ;;  %4500 = vmatprep.subr.bf16.mxu0 %v7788_v50  ;;  %v7851_v42 = vld [vmem:[#allocation4 + $0xfa4] ss:$16 sps:$4 sm:$0xff]   ;;  %v7852_v50 = vld [vmem:[#allocation4 + $0xd80] ss:$16 sps:$4 sm:$0xff]  }
 0x123   :  { %4543 = vmatprep.subr.bf16.mxu1 %v7791_v51  ;;  %v7855_v51 = vld [vmem:[#allocation4 + $0xf80] ss:$16 sps:$4 sm:$0xff]  }
 0x124   :  { %4447 = vmatmul.mubr.bf16.vlgmr.msra.gmra.mxu0 %v9024_v58 }
 0x125   :  { %4490 = vmatmul.mubr.bf16.vlgmr.msra.gmra.mxu1 %v9026_v59  ;;  %4501 = vmatpush1.bf16.msra.mxu0 %v7786_v55  ;;  %v7863_v55 = vld [vmem:[#allocation4 + $0xf64] ss:$16 sps:$4 sm:$0xff]  }
 0x126   :  { %4544 = vmatpush1.bf16.msra.mxu1 %v7789_v61  ;;  %4502 = vmatprep.subr.bf16.mxu0 %v7794_v62  ;;  %v7869_v61 = vld [vmem:[#allocation4 + $0xf44] ss:$16 sps:$4 sm:$0xff]   ;;  %v7864_v62 = vld [vmem:[#allocation4 + $0xd40] ss:$16 sps:$4 sm:$0xff]  }
 0x127   :  { %4545 = vmatprep.subr.bf16.mxu1 %v7797_v63  ;;  %4532 = vmatprep.mubr.bf16.mxu0 %v9028_v0  ;;  %v7867_v63 = vld [vmem:[#allocation4 + $0xf40] ss:$16 sps:$4 sm:$0xff]  }
 0x128   :  { %4575 = vmatprep.mubr.bf16.mxu1 %v9030_v1 }
 0x129   :  { %4503 = vmatpush1.bf16.msra.mxu0 %v7792_v2  ;;  %v869_v2 = vlaneseq }
 0x12a   :  { %4546 = vmatpush1.bf16.msra.mxu1 %v7795_v3  ;;  %4504 = vmatprep.subr.bf16.mxu0 %v7800_v4  ;;  %v7872_v3 = vld [vmem:[#allocation4 + $0xd24] ss:$16 sps:$4 sm:$0xff]  }
 0x12b   :  { %4547 = vmatprep.subr.bf16.mxu1 %v7803_v5  ;;  %v7875_v4 = vld [vmem:[#allocation4 + $0xf24] ss:$16 sps:$4 sm:$0xff]   ;;  %v7870_v5 = vld [vmem:[#allocation4 + $0xd20] ss:$16 sps:$4 sm:$0xff]  }
 0x12d   :  { %4505 = vmatpush1.bf16.msra.mxu0 %v7798_v6  ;;  %v7873_v6 = vld [vmem:[#allocation4 + $0xf20] ss:$16 sps:$4 sm:$0xff]  }
 0x12e   :  { %4548 = vmatpush1.bf16.msra.mxu1 %v7801_v7  ;;  %4506 = vmatprep.subr.bf16.mxu0 %v7806_v8  ;;  %v7878_v7 = vld [vmem:[#allocation4 + $0xd04] ss:$16 sps:$4 sm:$0xff]   ;;  %v9036_v8 = vshrl.u32 %v869_v2, 7  ;;  %v7903_v2 = vld [vmem:[#allocation4 + $0x1280] ss:$16 sps:$4 sm:$0xff]  }
 0x12f   :  { %4549 = vmatprep.subr.bf16.mxu1 %v7809_v9  ;;  %v7881_v9 = vld [vmem:[#allocation4 + $0xf04] ss:$16 sps:$4 sm:$0xff]  }
 0x131   :  { %4507 = vmatpush1.bf16.msra.mxu0 %v7804_v10  ;;  %v7876_v10 = vld [vmem:[#allocation4 + $0xd00] ss:$16 sps:$4 sm:$0xff]  }
 0x132   :  { %4550 = vmatpush1.bf16.msra.mxu1 %v7807_v11  ;;  %4508 = vmatprep.subr.bf16.mxu0 %v7812_v14  ;;  %v7879_v11 = vld [vmem:[#allocation4 + $0xf00] ss:$16 sps:$4 sm:$0xff]  }
 0x133   :  { %4551 = vmatprep.subr.bf16.mxu1 %v7815_v15  ;;  %v148_v14 = vld [vmem:[#allocation2 + $0x60] sm:$0xff]  ;;  %v169_v15 = vld [vmem:[#allocation2 + $0x108] sm:$0xff] }
 0x135   :  { %4509 = vmatpush1.bf16.msra.mxu0 %v7810_v16  ;;  %v867_v16 = vld [vmem:[#allocation6] sm:$0xf] }
 0x136   :  { %4552 = vmatpush1.bf16.msra.mxu1 %v7813_v17  ;;  %4510 = vmatprep.subr.bf16.mxu0 %v7818_v18  ;;  %v150_v17 = vld [vmem:[#allocation2 + $0x70] sm:$0xff]  ;;  %v171_v18 = vld [vmem:[#allocation2 + $0x118] sm:$0xff] }
 0x137   :  { %4553 = vmatprep.subr.bf16.mxu1 %v7821_v19  ;;  %v871_v19 = vsub.s32 0, %v9036_v8 }
 0x139   :  { %4511 = vmatpush1.bf16.msra.mxu0 %v7816_v20  ;;  %v7884_v20 = vld [vmem:[#allocation4 + $0x10e4] ss:$16 sps:$4 sm:$0xff]  }
 0x13a   :  { %4554 = vmatpush1.bf16.msra.mxu1 %v7819_v21  ;;  %4512 = vmatprep.subr.bf16.mxu0 %v7824_v22  ;;  %v7887_v21 = vld [vmem:[#allocation4 + $0x12e4] ss:$16 sps:$4 sm:$0xff]   ;;  %v153_v22 = vld [vmem:[#allocation2 + $0x88] sm:$0xff] }
 0x13b   :  { %4555 = vmatprep.subr.bf16.mxu1 %v7827_v23  ;;  %v7882_v23 = vld [vmem:[#allocation4 + $0x10e0] ss:$16 sps:$4 sm:$0xff]  }
 0x13d   :  { %4513 = vmatpush1.bf16.msra.mxu0 %v7822_v24  ;;  %v174_v24 = vld [vmem:[#allocation2 + $0x130] sm:$0xff] }
 0x13e   :  { %4556 = vmatpush1.bf16.msra.mxu1 %v7825_v25  ;;  %4514 = vmatprep.subr.bf16.mxu0 %v7830_v26  ;;  %v9039_v25 = vpack.c.bf16 %v169_v15, %v148_v14  ;;  %v9041_v26 = vpack.c.bf16 %v171_v18, %v150_v17  ;;  %v7920_v14 = vld [vmem:[#allocation4 + $0x1024] ss:$16 sps:$4 sm:$0xff]   ;;  %v7921_v17 = vld [vmem:[#allocation4 + $0x1220] ss:$16 sps:$4 sm:$0xff]  }
 0x13f   :  { %4557 = vmatprep.subr.bf16.mxu1 %v7833_v27  ;;  %v155_v27 = vld [vmem:[#allocation2 + $0x98] sm:$0xff]  ;;  %v7923_v15 = vld [vmem:[#allocation4 + $0x1224] ss:$16 sps:$4 sm:$0xff]  }
 0x140   :  { %v7926_v18 = vld [vmem:[#allocation4 + $0x1004] ss:$16 sps:$4 sm:$0xff]  }
 0x141   :  { %4515 = vmatpush1.bf16.msra.mxu0 %v7828_v30  ;;  %v176_v30 = vld [vmem:[#allocation2 + $0x140] sm:$0xff] }
 0x142   :  { %4558 = vmatpush1.bf16.msra.mxu1 %v7831_v31  ;;  %4516 = vmatprep.subr.bf16.mxu0 %v7836_v32  ;;  %v872_v31 = vrot.slane %v867_v16, %v871_v19  ;;  %v7885_v32 = vld [vmem:[#allocation4 + $0x12e0] ss:$16 sps:$4 sm:$0xff]  }
 0x143   :  { %4559 = vmatprep.subr.bf16.mxu1 %v7839_v33  ;;  %v7890_v33 = vld [vmem:[#allocation4 + $0x10c4] ss:$16 sps:$4 sm:$0xff]   ;;  %v7918_v16 = vld [vmem:[#allocation4 + $0x1020] ss:$16 sps:$4 sm:$0xff]  }
 0x145   :  { %4517 = vmatpush2.bf16.msra.mxu0 %v7834_v34  ;;  %v7893_v34 = vld [vmem:[#allocation4 + $0x12c4] ss:$16 sps:$4 sm:$0xff]  }
 0x146   :  { %4560 = vmatpush2.bf16.msra.mxu1 %v7837_v35  ;;  %4518 = vmatprep.subr.bf16.mxu0 %v7842_v36  ;;  %v9045_v35 = vpack.c.bf16 %v174_v24, %v153_v22  ;;  %v9047_v36 = vpack.c.bf16 %v176_v30, %v155_v27  ;;  %v7927_v22 = vld [vmem:[#allocation4 + $0x1200] ss:$16 sps:$4 sm:$0xff]   ;;  %v7935_v24 = vld [vmem:[#allocation4 + $0x13e4] ss:$16 sps:$4 sm:$0xff]  }
 0x147   :  { %4561 = vmatprep.subr.bf16.mxu1 %v7845_v37  ;;  %v7930_v27 = vld [vmem:[#allocation4 + $0x11e0] ss:$16 sps:$4 sm:$0xff]  }
 0x148   :  { %v7933_v30 = vld [vmem:[#allocation4 + $0x13e0] ss:$16 sps:$4 sm:$0xff]  }
 0x149   :  { %4519 = vmatpush2.bf16.msra.mxu0 %v7840_v38 }
 0x14a   :  { %4562 = vmatpush2.bf16.msra.mxu1 %v7843_v39  ;;  %4520 = vmatprep.subr.bf16.mxu0 %v7848_v41  ;;  %v7888_v39 = vld [vmem:[#allocation4 + $0x10c0] ss:$16 sps:$4 sm:$0xff]  }
 0x14b   :  { %4563 = vmatprep.subr.bf16.mxu1 %v7851_v42  ;;  %v7891_v42 = vld [vmem:[#allocation4 + $0x12c0] ss:$16 sps:$4 sm:$0xff]  }
 0x14d   :  { %4521 = vmatpush2.bf16.msra.mxu0 %v7846_v43  ;;  %v7896_v43 = vld [vmem:[#allocation4 + $0x10a4] ss:$16 sps:$4 sm:$0xff]  }
 0x14e   :  { %4564 = vmatpush2.bf16.msra.mxu1 %v7849_v44  ;;  %4522 = vmatprep.subr.bf16.mxu0 %v7854_v48 }
 0x14f   :  { %4565 = vmatprep.subr.bf16.mxu1 %v7857_v49  ;;  %v7899_v49 = vld [vmem:[#allocation4 + $0x12a4] ss:$16 sps:$4 sm:$0xff]  }
 0x151   :  { %4523 = vmatpush2.bf16.msra.mxu0 %v7852_v50 }
 0x152   :  { %4566 = vmatpush2.bf16.msra.mxu1 %v7855_v51  ;;  %4524 = vmatprep.subr.bf16.mxu0 %v7860_v52  ;;  %v7894_v52 = vld [vmem:[#allocation4 + $0x10a0] ss:$16 sps:$4 sm:$0xff]  }
 0x153   :  { %4567 = vmatprep.subr.bf16.mxu1 %v7863_v55 }
 0x155   :  { %4525 = vmatpush2.bf16.msra.mxu0 %v7858_v56  ;;  %v7897_v56 = vld [vmem:[#allocation4 + $0x12a0] ss:$16 sps:$4 sm:$0xff]  }
 0x156   :  { %4568 = vmatpush2.bf16.msra.mxu1 %v7861_v57  ;;  %4526 = vmatprep.subr.bf16.mxu0 %v7866_v60  ;;  %v7902_v57 = vld [vmem:[#allocation4 + $0x1084] ss:$16 sps:$4 sm:$0xff]  }
 0x157   :  { %4569 = vmatprep.subr.bf16.mxu1 %v7869_v61  ;;  %v7905_v61 = vld [vmem:[#allocation4 + $0x1284] ss:$16 sps:$4 sm:$0xff]  }
 0x159   :  { %4527 = vmatpush2.bf16.msra.mxu0 %v7864_v62 }
 0x15a   :  { %4570 = vmatpush2.bf16.msra.mxu1 %v7867_v63  ;;  %4528 = vmatprep.subr.bf16.mxu0 %v7872_v3  ;;  %v7900_v63 = vld [vmem:[#allocation4 + $0x1080] ss:$16 sps:$4 sm:$0xff]   ;;  %v7908_v3 = vld [vmem:[#allocation4 + $0x1064] ss:$16 sps:$4 sm:$0xff]  }
 0x15b   :  { %4571 = vmatprep.subr.bf16.mxu1 %v7875_v4  ;;  %v7911_v4 = vld [vmem:[#allocation4 + $0x1264] ss:$16 sps:$4 sm:$0xff]  }
 0x15d   :  { %4529 = vmatpush2.bf16.msra.mxu0 %v7870_v5  ;;  %v7906_v5 = vld [vmem:[#allocation4 + $0x1060] ss:$16 sps:$4 sm:$0xff]  }
 0x15e   :  { %4572 = vmatpush2.bf16.msra.mxu1 %v7873_v6  ;;  %4530 = vmatprep.subr.bf16.mxu0 %v7878_v7  ;;  %v7909_v6 = vld [vmem:[#allocation4 + $0x1260] ss:$16 sps:$4 sm:$0xff]   ;;  %v7914_v7 = vld [vmem:[#allocation4 + $0x1044] ss:$16 sps:$4 sm:$0xff]  }
 0x15f   :  { %4573 = vmatprep.subr.bf16.mxu1 %v7881_v9  ;;  %v7917_v9 = vld [vmem:[#allocation4 + $0x1244] ss:$16 sps:$4 sm:$0xff]  }
 0x161   :  { %4531 = vmatpush2.bf16.msra.mxu0 %v7876_v10  ;;  %v7912_v10 = vld [vmem:[#allocation4 + $0x1040] ss:$16 sps:$4 sm:$0xff]  }
 0x162   :  { %4574 = vmatpush2.bf16.msra.mxu1 %v7879_v11  ;;  %4586 = vmatprep.subr.bf16.mxu0 %v7884_v20  ;;  %v7915_v11 = vld [vmem:[#allocation4 + $0x1240] ss:$16 sps:$4 sm:$0xff]   ;;  %v7929_v20 = vld [vmem:[#allocation4 + $0x1204] ss:$16 sps:$4 sm:$0xff]  }
 0x163   :  { %4629 = vmatprep.subr.bf16.mxu1 %v7887_v21  ;;  %v7924_v21 = vld [vmem:[#allocation4 + $0x1000] ss:$16 sps:$4 sm:$0xff]  }
 0x164   :  { %v4276_v37 = vpop.f32.mrf.mxu0  ;;  %4533 = vmatmul.mubr.bf16.vlgmr.msra.gmra.mxu0 %v9039_v25 }
 0x165   :  { %v4319_v38 = vpop.f32.mrf.mxu1  ;;  %4576 = vmatmul.mubr.bf16.vlgmr.msra.gmra.mxu1 %v9041_v26  ;;  %v4277_v41 = vadd.f32 %v4276_v37, %v872_v31  ;;  %4587 = vmatpush1.bf16.msra.mxu0 %v7882_v23  ;;  %v7932_v23 = vld [vmem:[#allocation4 + $0x11e4] ss:$16 sps:$4 sm:$0xff]  }
 0x166   :  { %4630 = vmatpush1.bf16.msra.mxu1 %v7885_v32  ;;  %v9051_v44 = vpop.f32.mrf.mxu0  ;;  %4588 = vmatprep.subr.bf16.mxu0 %v7890_v33  ;;  %v7941_v32 = vld [vmem:[#allocation4 + $0x13c4] ss:$16 sps:$4 sm:$0xff]   ;;  %v7936_v33 = vld [vmem:[#allocation4 + $0x11c0] ss:$16 sps:$4 sm:$0xff]  }
 0x167   :  { %v9053_v48 = vpop.f32.mrf.mxu1  ;;  %4631 = vmatprep.subr.bf16.mxu1 %v7893_v34  ;;  %v9055_v50 = vadd.f32 %v4319_v38, %v4277_v41  ;;  %4618 = vmatprep.mubr.bf16.mxu0 %v9045_v35  ;;  %v7939_v34 = vld [vmem:[#allocation4 + $0x13c0] ss:$16 sps:$4 sm:$0xff]   ;;  %v7944_v37 = vld [vmem:[#allocation4 + $0x11a4] ss:$16 sps:$4 sm:$0xff]  }
 0x168   :  { %4661 = vmatprep.mubr.bf16.mxu1 %v9047_v36  ;;  %v4280_v51 = vpop.f32.mrf.mxu0  ;;  %v7947_v38 = vld [vmem:[#allocation4 + $0x13a4] ss:$16 sps:$4 sm:$0xff]   ;;  %v7945_v41 = vld [vmem:[#allocation4 + $0x13a0] ss:$16 sps:$4 sm:$0xff]  }
 0x169   :  { %v4281_v55 = vadd.f32 %v4280_v51, %v872_v31  ;;  %4589 = vmatpush1.bf16.msra.mxu0 %v7888_v39  ;;  %v4323_v60 = vpop.f32.mrf.mxu1  ;;  %v7938_v31 = vld [vmem:[#allocation4 + $0x11c4] ss:$16 sps:$4 sm:$0xff]   ;;  %v7942_v39 = vld [vmem:[#allocation4 + $0x11a0] ss:$16 sps:$4 sm:$0xff]  }
 0x16a   :  { %4632 = vmatpush1.bf16.msra.mxu1 %v7891_v42  ;;  %4590 = vmatprep.subr.bf16.mxu0 %v7896_v43  ;;  %v7950_v42 = vld [vmem:[#allocation4 + $0x1184] ss:$16 sps:$4 sm:$0xff]   ;;  %v7951_v51 = vld [vmem:[#allocation4 + $0x1380] ss:$16 sps:$4 sm:$0xff]  }
 0x16b   :  { %4633 = vmatprep.subr.bf16.mxu1 %v7899_v49  ;;  %v9059_v62 = vadd.f32 %v4323_v60, %v4281_v55  ;;  %v7953_v43 = vld [vmem:[#allocation4 + $0x1384] ss:$16 sps:$4 sm:$0xff]   ;;  %v7948_v49 = vld [vmem:[#allocation4 + $0x1180] ss:$16 sps:$4 sm:$0xff]  }
 0x16c   :  { %v7959_v55 = vld [vmem:[#allocation4 + $0x1364] ss:$16 sps:$4 sm:$0xff]  }
 0x16d   :  { %4591 = vmatpush1.bf16.msra.mxu0 %v7894_v52  ;;  %v7956_v52 = vld [vmem:[#allocation4 + $0x1164] ss:$16 sps:$4 sm:$0xff]  }
 0x16e   :  { %4634 = vmatpush1.bf16.msra.mxu1 %v7897_v56  ;;  %4592 = vmatprep.subr.bf16.mxu0 %v7902_v57  ;;  %v7954_v56 = vld [vmem:[#allocation4 + $0x1160] ss:$16 sps:$4 sm:$0xff]   ;;  %v7962_v60 = vld [vmem:[#allocation4 + $0x1144] ss:$16 sps:$4 sm:$0xff]  }
 0x16f   :  { %4635 = vmatprep.subr.bf16.mxu1 %v7905_v61  ;;  %v7957_v57 = vld [vmem:[#allocation4 + $0x1360] ss:$16 sps:$4 sm:$0xff]   ;;  %v7965_v61 = vld [vmem:[#allocation4 + $0x1344] ss:$16 sps:$4 sm:$0xff]  }
 0x171   :  { %4593 = vmatpush1.bf16.msra.mxu0 %v7900_v63  ;;  %v7960_v63 = vld [vmem:[#allocation4 + $0x1140] ss:$16 sps:$4 sm:$0xff]  }
 0x172   :  { %4636 = vmatpush1.bf16.msra.mxu1 %v7903_v2  ;;  %4594 = vmatprep.subr.bf16.mxu0 %v7908_v3  ;;  %v7963_v2 = vld [vmem:[#allocation4 + $0x1340] ss:$16 sps:$4 sm:$0xff]   ;;  %v7968_v3 = vld [vmem:[#allocation4 + $0x1124] ss:$16 sps:$4 sm:$0xff]  }
 0x173   :  { %4637 = vmatprep.subr.bf16.mxu1 %v7911_v4  ;;  %v7971_v4 = vld [vmem:[#allocation4 + $0x1324] ss:$16 sps:$4 sm:$0xff]  }
 0x175   :  { %4595 = vmatpush1.bf16.msra.mxu0 %v7906_v5  ;;  %v7966_v5 = vld [vmem:[#allocation4 + $0x1120] ss:$16 sps:$4 sm:$0xff]  }
 0x176   :  { %4638 = vmatpush1.bf16.msra.mxu1 %v7909_v6  ;;  %4596 = vmatprep.subr.bf16.mxu0 %v7914_v7  ;;  %v7969_v6 = vld [vmem:[#allocation4 + $0x1320] ss:$16 sps:$4 sm:$0xff]   ;;  %v7974_v7 = vld [vmem:[#allocation4 + $0x1104] ss:$16 sps:$4 sm:$0xff]  }
 0x177   :  { %4639 = vmatprep.subr.bf16.mxu1 %v7917_v9  ;;  %v7977_v9 = vld [vmem:[#allocation4 + $0x1304] ss:$16 sps:$4 sm:$0xff]  }
 0x179   :  { %4597 = vmatpush1.bf16.msra.mxu0 %v7912_v10  ;;  %v7972_v10 = vld [vmem:[#allocation4 + $0x1100] ss:$16 sps:$4 sm:$0xff]  }
 0x17a   :  { %4640 = vmatpush1.bf16.msra.mxu1 %v7915_v11  ;;  %4598 = vmatprep.subr.bf16.mxu0 %v7920_v14  ;;  %v7975_v11 = vld [vmem:[#allocation4 + $0x1300] ss:$16 sps:$4 sm:$0xff]  }
 0x17b   :  { %4641 = vmatprep.subr.bf16.mxu1 %v7923_v15  ;;  %v152_v14 = vld [vmem:[#allocation2 + $0x80] sm:$0xff]  ;;  %v173_v15 = vld [vmem:[#allocation2 + $0x128] sm:$0xff] }
 0x17d   :  { %4599 = vmatpush1.bf16.msra.mxu0 %v7918_v16  ;;  %v154_v16 = vld [vmem:[#allocation2 + $0x90] sm:$0xff] }
 0x17e   :  { %4642 = vmatpush1.bf16.msra.mxu1 %v7921_v17  ;;  %4600 = vmatprep.subr.bf16.mxu0 %v7926_v18  ;;  %v175_v17 = vld [vmem:[#allocation2 + $0x138] sm:$0xff]  ;;  %v7978_v18 = vld [vmem:[#allocation4 + $0x14c4] ss:$16 sps:$4 sm:$0x1f]  }
 0x17f   :  { %4643 = vmatprep.subr.bf16.mxu1 %v7929_v20  ;;  %v7982_v20 = vld [vmem:[#allocation4 + $0xec] ss:$16 sps:$4 sm:$0xff]  }
 0x181   :  { %4601 = vmatpush1.bf16.msra.mxu0 %v7924_v21  ;;  %v7983_v21 = vld [vmem:[#allocation4 + $0x14c0] ss:$16 sps:$4 sm:$0x1f]  }
 0x182   :  { %4644 = vmatpush1.bf16.msra.mxu1 %v7927_v22  ;;  %4602 = vmatprep.subr.bf16.mxu0 %v7932_v23  ;;  %v7980_v22 = vld [vmem:[#allocation4 + $0xe8] ss:$16 sps:$4 sm:$0xff]   ;;  %v9061_v23 = vpack.c.bf16 %v173_v15, %v152_v14  ;;  %v8016_v15 = vld [vmem:[#allocation4 + $0x1404] ss:$16 sps:$4 sm:$0xff]  }
 0x183   :  { %4645 = vmatprep.subr.bf16.mxu1 %v7935_v24  ;;  %v9063_v24 = vpack.c.bf16 %v175_v17, %v154_v16  ;;  %v8011_v14 = vld [vmem:[#allocation4 + $0x48] ss:$16 sps:$4 sm:$0xff]   ;;  %v8019_v16 = vld [vmem:[#allocation4 + $0x2c] ss:$16 sps:$4 sm:$0xff]   ;;  %v8014_v17 = vld [vmem:[#allocation4 + $0x1400] ss:$16 sps:$4 sm:$0xff]  }
 0x185   :  { %4603 = vmatpush2.bf16.msra.mxu0 %v7930_v27  ;;  %v9065_v27 = vpop.f32.mrf.mxu0 }
 0x186   :  { %4646 = vmatpush2.bf16.msra.mxu1 %v7933_v30  ;;  %4604 = vmatprep.subr.bf16.mxu0 %v7938_v31  ;;  %v9067_v30 = vpop.f32.mrf.mxu1  ;;  %v4231_v31 = vsel %vm4229_vm0, %v7983_v21, 0  ;;  %v177_v21 = vld [vmem:[#allocation2 + $0x148] sm:$0xff] }
 0x187   :  { %4647 = vmatprep.subr.bf16.mxu1 %v7941_v32  ;;  %v7986_v32 = vld [vmem:[#allocation4 + $0x14a4] ss:$16 sps:$4 sm:$0xff]  }
 0x189   :  { %4605 = vmatpush2.bf16.msra.mxu0 %v7936_v33  ;;  %v7989_v33 = vld [vmem:[#allocation4 + $0xcc] ss:$16 sps:$4 sm:$0xff]  }
 0x18a   :  { %4648 = vmatpush2.bf16.msra.mxu1 %v7939_v34  ;;  %4606 = vmatprep.subr.bf16.mxu0 %v7944_v37  ;;  %v7984_v34 = vld [vmem:[#allocation4 + $0x14a0] ss:$16 sps:$4 sm:$0xff]   ;;  %v7987_v37 = vld [vmem:[#allocation4 + $0xc8] ss:$16 sps:$4 sm:$0xff]  }
 0x18b   :  { %4649 = vmatprep.subr.bf16.mxu1 %v7947_v38 }
 0x18d   :  { %4607 = vmatpush2.bf16.msra.mxu0 %v7942_v39 }
 0x18e   :  { %4650 = vmatpush2.bf16.msra.mxu1 %v7945_v41  ;;  %4608 = vmatprep.subr.bf16.mxu0 %v7950_v42 }
 0x18f   :  { %4651 = vmatprep.subr.bf16.mxu1 %v7953_v43 }
 0x191   :  { %4609 = vmatpush2.bf16.msra.mxu0 %v7948_v49  ;;  %v7992_v49 = vld [vmem:[#allocation4 + $0x1484] ss:$16 sps:$4 sm:$0xff]  }
 0x192   :  { %4652 = vmatpush2.bf16.msra.mxu1 %v7951_v51  ;;  %4610 = vmatprep.subr.bf16.mxu0 %v7956_v52  ;;  %v7995_v51 = vld [vmem:[#allocation4 + $0xac] ss:$16 sps:$4 sm:$0xff]  }
 0x193   :  { %4653 = vmatprep.subr.bf16.mxu1 %v7959_v55  ;;  %v7990_v55 = vld [vmem:[#allocation4 + $0x1480] ss:$16 sps:$4 sm:$0xff]  }
 0x195   :  { %4611 = vmatpush2.bf16.msra.mxu0 %v7954_v56  ;;  %v7993_v56 = vld [vmem:[#allocation4 + $0xa8] ss:$16 sps:$4 sm:$0xff]  }
 0x196   :  { %4654 = vmatpush2.bf16.msra.mxu1 %v7957_v57  ;;  %4612 = vmatprep.subr.bf16.mxu0 %v7962_v60  ;;  %v8911_v57 = vmov 0  }
 0x197   :  { %4655 = vmatprep.subr.bf16.mxu1 %v7965_v61 }
 0x199   :  { %4613 = vmatpush2.bf16.msra.mxu0 %v7960_v63  ;;  %v7998_v63 = vld [vmem:[#allocation4 + $0x1464] ss:$16 sps:$4 sm:$0xff]  }
 0x19a   :  { %4656 = vmatpush2.bf16.msra.mxu1 %v7963_v2  ;;  %4614 = vmatprep.subr.bf16.mxu0 %v7968_v3  ;;  %v8001_v2 = vld [vmem:[#allocation4 + $0x8c] ss:$16 sps:$4 sm:$0xff]  }
 0x19b   :  { %4657 = vmatprep.subr.bf16.mxu1 %v7971_v4  ;;  %v7996_v4 = vld [vmem:[#allocation4 + $0x1460] ss:$16 sps:$4 sm:$0xff]  }
 0x19d   :  { %4615 = vmatpush2.bf16.msra.mxu0 %v7966_v5  ;;  %v7999_v5 = vld [vmem:[#allocation4 + $0x88] ss:$16 sps:$4 sm:$0xff]  }
 0x19e   :  { %4658 = vmatpush2.bf16.msra.mxu1 %v7969_v6  ;;  %4616 = vmatprep.subr.bf16.mxu0 %v7974_v7  ;;  %v8004_v6 = vld [vmem:[#allocation4 + $0x1444] ss:$16 sps:$4 sm:$0xff]   ;;  %v8005_v7 = vld [vmem:[#allocation4 + $0x68] ss:$16 sps:$4 sm:$0xff]  }
 0x19f   :  { %4659 = vmatprep.subr.bf16.mxu1 %v7977_v9  ;;  %v8010_v9 = vld [vmem:[#allocation4 + $0x1424] ss:$16 sps:$4 sm:$0xff]  }
 0x1a1   :  { %4617 = vmatpush2.bf16.msra.mxu0 %v7972_v10  ;;  %v8013_v10 = vld [vmem:[#allocation4 + $0x4c] ss:$16 sps:$4 sm:$0xff]  }
 0x1a2   :  { %4660 = vmatpush2.bf16.msra.mxu1 %v7975_v11  ;;  %7258 = vmatprep.subr.msk.bf16.mxu0 %vm4229_vm0, %v7978_v18  ;;  %v8008_v11 = vld [vmem:[#allocation4 + $0x1420] ss:$16 sps:$4 sm:$0xff]   ;;  %v8017_v18 = vld [vmem:[#allocation4 + $0x28] ss:$16 sps:$4 sm:$0xff]  }
 0x1a3   :  { %4715 = vmatprep.subr.bf16.mxu1 %v7982_v20  ;;  %v156_v20 = vld [vmem:[#allocation2 + $0xa0] sm:$0xff] }
 0x1a4   :  { %v4362_v38 = vpop.f32.mrf.mxu0  ;;  %4619 = vmatmul.mubr.bf16.vlgmr.msra.gmra.mxu0 %v9061_v23 }
 0x1a5   :  { %v4405_v39 = vpop.f32.mrf.mxu1  ;;  %4662 = vmatmul.mubr.bf16.vlgmr.msra.gmra.mxu1 %v9063_v24  ;;  %v4363_v41 = vadd.f32 %v4362_v38, %v9055_v50  ;;  %4675 = vmatpush1.bf16.msra.mxu0 %v4231_v31  ;;  %v8025_v31 = vld [vmem:[#allocation4 + $0x2ec] ss:$16 sps:$4 sm:$0xff]  }
 0x1a6   :  { %4716 = vmatpush1.bf16.msra.mxu1 %v7980_v22  ;;  %v9074_v42 = vpop.f32.mrf.mxu0  ;;  %4676 = vmatprep.subr.bf16.mxu0 %v7986_v32  ;;  %v8022_v22 = vld [vmem:[#allocation4 + $0xc] ss:$16 sps:$4 sm:$0xff]   ;;  %v8020_v32 = vld [vmem:[#allocation4 + $0x8] ss:$16 sps:$4 sm:$0xff]  }
 0x1a7   :  { %v9076_v43 = vpop.f32.mrf.mxu1  ;;  %4717 = vmatprep.subr.bf16.mxu1 %v7989_v33  ;;  %v9078_v52 = vadd.f32 %v4405_v39, %v4363_v41  ;;  %4704 = vmatprep.mubr.bf16.mxu0 %v8911_v57  ;;  %v8023_v33 = vld [vmem:[#allocation4 + $0x2e8] ss:$16 sps:$4 sm:$0xff]   ;;  %v8031_v38 = vld [vmem:[#allocation4 + $0x2cc] ss:$16 sps:$4 sm:$0xff]  }
 0x1a8   :  { %4747 = vmatprep.mubr.bf16.mxu1 %v8994_v53  ;;  %v4366_v50 = vpop.f32.mrf.mxu0  ;;  %v8007_v53 = vld [vmem:[#allocation4 + $0x6c] ss:$16 sps:$4 sm:$0xff]   ;;  %v8026_v39 = vld [vmem:[#allocation4 + $0x1e8] ss:$16 sps:$4 sm:$0xff]  }
 0x1a9   :  { %v4367_v60 = vadd.f32 %v4366_v50, %v9059_v62  ;;  %4677 = vmatpush1.bf16.msra.mxu0 %v7984_v34  ;;  %v4409_v61 = vpop.f32.mrf.mxu1  ;;  %v8002_v62 = vld [vmem:[#allocation4 + $0x1440] ss:$16 sps:$4 sm:$0xff]   ;;  %v9085_v34 = vpack.c.bf16 %v177_v21, %v156_v20  ;;  %v8029_v41 = vld [vmem:[#allocation4 + $0x2c8] ss:$16 sps:$4 sm:$0xff]   ;;  %v8040_v50 = vld [vmem:[#allocation4 + $0x1ac] ss:$16 sps:$4 sm:$0xff]  }
 0x1aa   :  { %4718 = vmatpush1.bf16.msra.mxu1 %v7987_v37  ;;  %4678 = vmatprep.subr.bf16.mxu0 %v7992_v49  ;;  %v8028_v37 = vld [vmem:[#allocation4 + $0x1ec] ss:$16 sps:$4 sm:$0xff]  }
 0x1ab   :  { %4719 = vmatprep.subr.bf16.mxu1 %v7995_v51  ;;  %v9083_v3 = vadd.f32 %v4409_v61, %v4367_v60  ;;  %v8034_v49 = vld [vmem:[#allocation4 + $0x1cc] ss:$16 sps:$4 sm:$0xff]   ;;  %v8038_v61 = vld [vmem:[#allocation4 + $0x1a8] ss:$16 sps:$4 sm:$0xff]  }
 0x1ac   :  { %v8037_v51 = vld [vmem:[#allocation4 + $0x2ac] ss:$16 sps:$4 sm:$0xff]  }
 0x1ad   :  { %4679 = vmatpush1.bf16.msra.mxu0 %v7990_v55  ;;  %v8032_v55 = vld [vmem:[#allocation4 + $0x1c8] ss:$16 sps:$4 sm:$0xff]   ;;  %v8043_v60 = vld [vmem:[#allocation4 + $0x28c] ss:$16 sps:$4 sm:$0xff]  }
 0x1ae   :  { %4720 = vmatpush1.bf16.msra.mxu1 %v7993_v56  ;;  %4680 = vmatprep.subr.bf16.mxu0 %v7998_v63  ;;  %v8035_v56 = vld [vmem:[#allocation4 + $0x2a8] ss:$16 sps:$4 sm:$0xff]   ;;  %v8070_v20 = vld [vmem:[#allocation4 + $0x10c] ss:$16 sps:$4 sm:$0xff]  }
 0x1af   :  { %4721 = vmatprep.subr.bf16.mxu1 %v8001_v2  ;;  %v8041_v63 = vld [vmem:[#allocation4 + $0x288] ss:$16 sps:$4 sm:$0xff]   ;;  %v8046_v2 = vld [vmem:[#allocation4 + $0x18c] ss:$16 sps:$4 sm:$0xff]  }
 0x1b0   :  { %v8073_v21 = vld [vmem:[#allocation4 + $0x3ec] ss:$16 sps:$4 sm:$0xff]  }
 0x1b1   :  { %4681 = vmatpush1.bf16.msra.mxu0 %v7996_v4  ;;  %v8049_v4 = vld [vmem:[#allocation4 + $0x26c] ss:$16 sps:$4 sm:$0xff]  }
 0x1b2   :  { %4722 = vmatpush1.bf16.msra.mxu1 %v7999_v5  ;;  %4682 = vmatprep.subr.bf16.mxu0 %v8004_v6  ;;  %v8044_v5 = vld [vmem:[#allocation4 + $0x188] ss:$16 sps:$4 sm:$0xff]   ;;  %v8052_v6 = vld [vmem:[#allocation4 + $0x16c] ss:$16 sps:$4 sm:$0xff]  }
 0x1b3   :  { %4723 = vmatprep.subr.bf16.mxu1 %v8007_v53  ;;  %v8055_v53 = vld [vmem:[#allocation4 + $0x24c] ss:$16 sps:$4 sm:$0xff]  }
 0x1b5   :  { %4683 = vmatpush1.bf16.msra.mxu0 %v8002_v62  ;;  %v8050_v62 = vld [vmem:[#allocation4 + $0x168] ss:$16 sps:$4 sm:$0xff]  }
 0x1b6   :  { %4724 = vmatpush1.bf16.msra.mxu1 %v8005_v7  ;;  %4684 = vmatprep.subr.bf16.mxu0 %v8010_v9  ;;  %v8053_v7 = vld [vmem:[#allocation4 + $0x248] ss:$16 sps:$4 sm:$0xff]   ;;  %v8058_v9 = vld [vmem:[#allocation4 + $0x14c] ss:$16 sps:$4 sm:$0xff]  }
 0x1b7   :  { %4725 = vmatprep.subr.bf16.mxu1 %v8013_v10  ;;  %v8061_v10 = vld [vmem:[#allocation4 + $0x22c] ss:$16 sps:$4 sm:$0xff]  }
 0x1b9   :  { %4685 = vmatpush1.bf16.msra.mxu0 %v8008_v11  ;;  %v8056_v11 = vld [vmem:[#allocation4 + $0x148] ss:$16 sps:$4 sm:$0xff]  }
 0x1ba   :  { %4726 = vmatpush1.bf16.msra.mxu1 %v8011_v14  ;;  %4686 = vmatprep.subr.bf16.mxu0 %v8016_v15  ;;  %v8059_v14 = vld [vmem:[#allocation4 + $0x228] ss:$16 sps:$4 sm:$0xff]   ;;  %v8064_v15 = vld [vmem:[#allocation4 + $0x12c] ss:$16 sps:$4 sm:$0xff]  }
 0x1bb   :  { %4727 = vmatprep.subr.bf16.mxu1 %v8019_v16  ;;  %v8067_v16 = vld [vmem:[#allocation4 + $0x20c] ss:$16 sps:$4 sm:$0xff]  }
 0x1bd   :  { %4687 = vmatpush1.bf16.msra.mxu0 %v8014_v17  ;;  %v8062_v17 = vld [vmem:[#allocation4 + $0x128] ss:$16 sps:$4 sm:$0xff]  }
 0x1be   :  { %4728 = vmatpush1.bf16.msra.mxu1 %v8017_v18  ;;  %4758 = vmatprep.subr.bf16.mxu0 %v8025_v31  ;;  %v8065_v18 = vld [vmem:[#allocation4 + $0x208] ss:$16 sps:$4 sm:$0xff]  }
 0x1bf   :  { %4729 = vmatprep.subr.bf16.mxu1 %v8022_v22  ;;  %v8068_v22 = vld [vmem:[#allocation4 + $0x108] ss:$16 sps:$4 sm:$0xff]  }
 0x1c0   :  { %7259 = vmatmul.mubr.msk.bf16.vlgmr.msra.gmra.mxu0 %vm4225_vm1, %v9085_v34  ;;  %v8071_v31 = vld [vmem:[#allocation4 + $0x3e8] ss:$16 sps:$4 sm:$0xff]  }
 0x1c1   :  { %4759 = vmatpush1.bf16.msra.mxu0 %v8023_v33  ;;  %4790 = vmatprep.mubr.bf16.mxu0 %v8996_v54  ;;  %v8047_v54 = vld [vmem:[#allocation4 + $0x268] ss:$16 sps:$4 sm:$0xff]   ;;  %v8079_v33 = vld [vmem:[#allocation4 + $0x4ec] ss:$16 sps:$4 sm:$0xff]  }
 0x1c2   :  { %4730 = vmatpush1.bf16.msra.mxu1 %v8020_v32  ;;  %4760 = vmatprep.subr.bf16.mxu0 %v8031_v38  ;;  %v8076_v32 = vld [vmem:[#allocation4 + $0x3cc] ss:$16 sps:$4 sm:$0xff]   ;;  %v8077_v38 = vld [vmem:[#allocation4 + $0x4e8] ss:$16 sps:$4 sm:$0xff]  }
 0x1c3   :  { %4731 = vmatprep.subr.bf16.mxu1 %v8028_v37  ;;  %v8074_v37 = vld [vmem:[#allocation4 + $0x3c8] ss:$16 sps:$4 sm:$0xff]  }
 0x1c5   :  { %4761 = vmatpush1.bf16.msra.mxu0 %v8029_v41  ;;  %v9092_v41 = vpop.f32.mrf.mxu1 }
 0x1c6   :  { %4732 = vmatpush2.bf16.msra.mxu1 %v8026_v39  ;;  %4762 = vmatprep.subr.bf16.mxu0 %v8037_v51  ;;  %v9090_v39 = vpop.f32.mrf.mxu0  ;;  %v8085_v51 = vld [vmem:[#allocation4 + $0x4cc] ss:$16 sps:$4 sm:$0xff]  }
 0x1c7   :  { %4733 = vmatprep.subr.bf16.mxu1 %v8034_v49  ;;  %v8082_v49 = vld [vmem:[#allocation4 + $0x3ac] ss:$16 sps:$4 sm:$0xff]  }
 0x1c9   :  { %4763 = vmatpush1.bf16.msra.mxu0 %v8035_v56  ;;  %v8083_v56 = vld [vmem:[#allocation4 + $0x4c8] ss:$16 sps:$4 sm:$0xff]  }
 0x1ca   :  { %4734 = vmatpush2.bf16.msra.mxu1 %v8032_v55  ;;  %4764 = vmatprep.subr.bf16.mxu0 %v8043_v60  ;;  %v8080_v55 = vld [vmem:[#allocation4 + $0x3a8] ss:$16 sps:$4 sm:$0xff]  }
 0x1cb   :  { %4735 = vmatprep.subr.bf16.mxu1 %v8040_v50 }
 0x1cd   :  { %4765 = vmatpush1.bf16.msra.mxu0 %v8041_v63 }
 0x1ce   :  { %4736 = vmatpush2.bf16.msra.mxu1 %v8038_v61  ;;  %4766 = vmatprep.subr.bf16.mxu0 %v8049_v4  ;;  %v8088_v4 = vld [vmem:[#allocation4 + $0x38c] ss:$16 sps:$4 sm:$0xff]  }
 0x1cf   :  { %4737 = vmatprep.subr.bf16.mxu1 %v8046_v2 }
 0x1d1   :  { %4767 = vmatpush1.bf16.msra.mxu0 %v8047_v54 }
 0x1d2   :  { %4738 = vmatpush2.bf16.msra.mxu1 %v8044_v5  ;;  %4768 = vmatprep.subr.bf16.mxu0 %v8055_v53  ;;  %v8091_v5 = vld [vmem:[#allocation4 + $0x4ac] ss:$16 sps:$4 sm:$0xff]   ;;  %v8089_v53 = vld [vmem:[#allocation4 + $0x4a8] ss:$16 sps:$4 sm:$0xff]  }
 0x1d3   :  { %4739 = vmatprep.subr.bf16.mxu1 %v8052_v6  ;;  %v8086_v6 = vld [vmem:[#allocation4 + $0x388] ss:$16 sps:$4 sm:$0xff]  }
 0x1d5   :  { %4769 = vmatpush1.bf16.msra.mxu0 %v8053_v7  ;;  %v8094_v7 = vld [vmem:[#allocation4 + $0x36c] ss:$16 sps:$4 sm:$0xff]  }
 0x1d6   :  { %4740 = vmatpush2.bf16.msra.mxu1 %v8050_v62  ;;  %4770 = vmatprep.subr.bf16.mxu0 %v8061_v10 }
 0x1d7   :  { %4741 = vmatprep.subr.bf16.mxu1 %v8058_v9  ;;  %v8097_v9 = vld [vmem:[#allocation4 + $0x48c] ss:$16 sps:$4 sm:$0xff]  }
 0x1d9   :  { %4771 = vmatpush1.bf16.msra.mxu0 %v8059_v14  ;;  %v8095_v14 = vld [vmem:[#allocation4 + $0x488] ss:$16 sps:$4 sm:$0xff]  }
 0x1da   :  { %4742 = vmatpush2.bf16.msra.mxu1 %v8056_v11  ;;  %4772 = vmatprep.subr.bf16.mxu0 %v8067_v16  ;;  %v8092_v11 = vld [vmem:[#allocation4 + $0x368] ss:$16 sps:$4 sm:$0xff]  }
 0x1db   :  { %4743 = vmatprep.subr.bf16.mxu1 %v8064_v15  ;;  %v8100_v15 = vld [vmem:[#allocation4 + $0x34c] ss:$16 sps:$4 sm:$0xff]   ;;  %v8101_v16 = vld [vmem:[#allocation4 + $0x468] ss:$16 sps:$4 sm:$0xff]  }
 0x1dd   :  { %4773 = vmatpush1.bf16.msra.mxu0 %v8065_v18  ;;  %v8109_v18 = vld [vmem:[#allocation4 + $0x44c] ss:$16 sps:$4 sm:$0xff]  }
 0x1de   :  { %4744 = vmatpush2.bf16.msra.mxu1 %v8062_v17  ;;  %4774 = vmatprep.subr.bf16.mxu0 %v8073_v21  ;;  %v8106_v17 = vld [vmem:[#allocation4 + $0x32c] ss:$16 sps:$4 sm:$0xff]   ;;  %v8107_v21 = vld [vmem:[#allocation4 + $0x448] ss:$16 sps:$4 sm:$0xff]  }
 0x1df   :  { %4745 = vmatprep.subr.bf16.mxu1 %v8070_v20  ;;  %v8104_v20 = vld [vmem:[#allocation4 + $0x328] ss:$16 sps:$4 sm:$0xff]  }
 0x1e1   :  { %4775 = vmatpush2.bf16.msra.mxu0 %v8071_v31  ;;  %v8115_v31 = vld [vmem:[#allocation4 + $0x42c] ss:$16 sps:$4 sm:$0xff]  }
 0x1e2   :  { %4746 = vmatpush2.bf16.msra.mxu1 %v8068_v22  ;;  %4776 = vmatprep.subr.bf16.mxu0 %v8076_v32  ;;  %v8112_v22 = vld [vmem:[#allocation4 + $0x30c] ss:$16 sps:$4 sm:$0xff]   ;;  %v8110_v32 = vld [vmem:[#allocation4 + $0x308] ss:$16 sps:$4 sm:$0xff]  }
 0x1e3   :  { %4801 = vmatprep.subr.bf16.mxu1 %v8079_v33  ;;  %v8113_v33 = vld [vmem:[#allocation4 + $0x428] ss:$16 sps:$4 sm:$0xff]  }
 0x1e4   :  { %v4448_v50 = vpop.f32.mrf.mxu0 }
 0x1e5   :  { %v4491_v60 = vpop.f32.mrf.mxu1  ;;  %4748 = vmatmul.mubr.bf16.vlgmr.msra.gmra.mxu1 %v9000_v12  ;;  %v4449_v61 = vadd.f32 %v4448_v50, %v9078_v52  ;;  %4777 = vmatpush2.bf16.msra.mxu0 %v8074_v37  ;;  %v8118_v37 = vld [vmem:[#allocation4 + $0x40c] ss:$16 sps:$4 sm:$0xff]   ;;  %v8122_v50 = vld [vmem:[#allocation4 + $0x5e8] ss:$16 sps:$4 sm:$0xff]  }
 0x1e6   :  { %4802 = vmatpush1.bf16.msra.mxu1 %v8077_v38  ;;  %v9096_v63 = vpop.f32.mrf.mxu0  ;;  %4778 = vmatprep.subr.bf16.mxu0 %v8082_v49  ;;  %v8121_v38 = vld [vmem:[#allocation4 + $0x6ec] ss:$16 sps:$4 sm:$0xff]   ;;  %v8116_v49 = vld [vmem:[#allocation4 + $0x408] ss:$16 sps:$4 sm:$0xff]  }
 0x1e7   :  { %v9098_v2 = vpop.f32.mrf.mxu1  ;;  %4803 = vmatprep.subr.bf16.mxu1 %v8085_v51  ;;  %v9100_v54 = vadd.f32 %v4491_v60, %v4449_v61  ;;  %4833 = vmatprep.mubr.bf16.mxu1 %v9006_v45  ;;  %v8103_v45 = vld [vmem:[#allocation4 + $0x46c] ss:$16 sps:$4 sm:$0xff]   ;;  %v8119_v51 = vld [vmem:[#allocation4 + $0x6e8] ss:$16 sps:$4 sm:$0xff]  }
 0x1e8   :  { %v4452_v62 = vpop.f32.mrf.mxu0  ;;  %v8125_v60 = vld [vmem:[#allocation4 + $0x6c8] ss:$16 sps:$4 sm:$0xff]   ;;  %v8130_v61 = vld [vmem:[#allocation4 + $0x5cc] ss:$16 sps:$4 sm:$0xff]  }
 0x1e9   :  { %v4453_v12 = vadd.f32 %v4452_v62, %v9083_v3  ;;  %4779 = vmatpush2.bf16.msra.mxu0 %v8080_v55  ;;  %v4495_v52 = vpop.f32.mrf.mxu1  ;;  %v8098_v3 = vld [vmem:[#allocation4 + $0x348] ss:$16 sps:$4 sm:$0xff]   ;;  %v8124_v55 = vld [vmem:[#allocation4 + $0x5ec] ss:$16 sps:$4 sm:$0xff]  }
 0x1ea   :  { %4804 = vmatpush1.bf16.msra.mxu1 %v8083_v56  ;;  %4780 = vmatprep.subr.bf16.mxu0 %v8088_v4  ;;  %v8127_v56 = vld [vmem:[#allocation4 + $0x6cc] ss:$16 sps:$4 sm:$0xff]  }
 0x1eb   :  { %4805 = vmatprep.subr.bf16.mxu1 %v8091_v5  ;;  %v9104_v10 = vadd.f32 %v4495_v52, %v4453_v12  ;;  %v8133_v4 = vld [vmem:[#allocation4 + $0x6ac] ss:$16 sps:$4 sm:$0xff]   ;;  %v8128_v5 = vld [vmem:[#allocation4 + $0x5c8] ss:$16 sps:$4 sm:$0xff]  }
 0x1ec   :  { %v8139_v62 = vld [vmem:[#allocation4 + $0x68c] ss:$16 sps:$4 sm:$0xff]   ;;  %v8134_v12 = vld [vmem:[#allocation4 + $0x5a8] ss:$16 sps:$4 sm:$0xff]  }
 0x1ed   :  { %4781 = vmatpush2.bf16.msra.mxu0 %v8086_v6  ;;  %v8131_v6 = vld [vmem:[#allocation4 + $0x6a8] ss:$16 sps:$4 sm:$0xff]  }
 0x1ee   :  { %4806 = vmatpush1.bf16.msra.mxu1 %v8089_v53  ;;  %4782 = vmatprep.subr.bf16.mxu0 %v8094_v7  ;;  %v8136_v53 = vld [vmem:[#allocation4 + $0x5ac] ss:$16 sps:$4 sm:$0xff]   ;;  %v8137_v52 = vld [vmem:[#allocation4 + $0x688] ss:$16 sps:$4 sm:$0xff]  }
 0x1ef   :  { %4807 = vmatprep.subr.bf16.mxu1 %v8097_v9  ;;  %v8145_v7 = vld [vmem:[#allocation4 + $0x66c] ss:$16 sps:$4 sm:$0xff]   ;;  %v8140_v9 = vld [vmem:[#allocation4 + $0x588] ss:$16 sps:$4 sm:$0xff]  }
 0x1f1   :  { %4783 = vmatpush2.bf16.msra.mxu0 %v8092_v11  ;;  %v8143_v11 = vld [vmem:[#allocation4 + $0x668] ss:$16 sps:$4 sm:$0xff]  }
 0x1f2   :  { %4808 = vmatpush1.bf16.msra.mxu1 %v8095_v14  ;;  %4784 = vmatprep.subr.bf16.mxu0 %v8100_v15  ;;  %v8151_v14 = vld [vmem:[#allocation4 + $0x64c] ss:$16 sps:$4 sm:$0xff]   ;;  %v8146_v15 = vld [vmem:[#allocation4 + $0x568] ss:$16 sps:$4 sm:$0xff]  }
 0x1f3   :  { %4809 = vmatprep.subr.bf16.mxu1 %v8103_v45  ;;  %v8149_v45 = vld [vmem:[#allocation4 + $0x648] ss:$16 sps:$4 sm:$0xff]  }
 0x1f5   :  { %4785 = vmatpush2.bf16.msra.mxu0 %v8098_v3  ;;  %v8154_v3 = vld [vmem:[#allocation4 + $0x54c] ss:$16 sps:$4 sm:$0xff]  }
 0x1f6   :  { %4810 = vmatpush1.bf16.msra.mxu1 %v8101_v16  ;;  %4786 = vmatprep.subr.bf16.mxu0 %v8106_v17  ;;  %v8157_v16 = vld [vmem:[#allocation4 + $0x62c] ss:$16 sps:$4 sm:$0xff]   ;;  %v8152_v17 = vld [vmem:[#allocation4 + $0x548] ss:$16 sps:$4 sm:$0xff]  }
 0x1f7   :  { %4811 = vmatprep.subr.bf16.mxu1 %v8109_v18  ;;  %v8155_v18 = vld [vmem:[#allocation4 + $0x628] ss:$16 sps:$4 sm:$0xff]  }
 0x1f9   :  { %4787 = vmatpush2.bf16.msra.mxu0 %v8104_v20  ;;  %v8160_v20 = vld [vmem:[#allocation4 + $0x52c] ss:$16 sps:$4 sm:$0xff]  }
 0x1fa   :  { %4812 = vmatpush1.bf16.msra.mxu1 %v8107_v21  ;;  %4788 = vmatprep.subr.bf16.mxu0 %v8112_v22  ;;  %v8163_v21 = vld [vmem:[#allocation4 + $0x60c] ss:$16 sps:$4 sm:$0xff]   ;;  %v8158_v22 = vld [vmem:[#allocation4 + $0x528] ss:$16 sps:$4 sm:$0xff]  }
 0x1fb   :  { %4813 = vmatprep.subr.bf16.mxu1 %v8115_v31  ;;  %v8161_v31 = vld [vmem:[#allocation4 + $0x608] ss:$16 sps:$4 sm:$0xff]  }
 0x1fd   :  { %4789 = vmatpush2.bf16.msra.mxu0 %v8110_v32  ;;  %v8166_v32 = vld [vmem:[#allocation4 + $0x50c] ss:$16 sps:$4 sm:$0xff]  }
 0x1fe   :  { %4814 = vmatpush1.bf16.msra.mxu1 %v8113_v33  ;;  %4844 = vmatprep.subr.bf16.mxu0 %v8121_v38  ;;  %v8169_v33 = vld [vmem:[#allocation4 + $0x7ec] ss:$16 sps:$4 sm:$0xff]   ;;  %v8167_v38 = vld [vmem:[#allocation4 + $0x7e8] ss:$16 sps:$4 sm:$0xff]  }
 0x1ff   :  { %4815 = vmatprep.subr.bf16.mxu1 %v8118_v37  ;;  %v8164_v37 = vld [vmem:[#allocation4 + $0x508] ss:$16 sps:$4 sm:$0xff]  }
 0x200   :  { %4791 = vmatmul.mubr.bf16.vlgmr.msra.gmra.mxu0 %v9002_v13  ;;  %v8142_v13 = vld [vmem:[#allocation4 + $0x58c] ss:$16 sps:$4 sm:$0xff]  }
 0x201   :  { %4845 = vmatpush1.bf16.msra.mxu0 %v8119_v51  ;;  %4876 = vmatprep.mubr.bf16.mxu0 %v9008_v47  ;;  %v8148_v47 = vld [vmem:[#allocation4 + $0x56c] ss:$16 sps:$4 sm:$0xff]  }
 0x202   :  { %4816 = vmatpush1.bf16.msra.mxu1 %v8116_v49  ;;  %4846 = vmatprep.subr.bf16.mxu0 %v8127_v56  ;;  %v8172_v49 = vld [vmem:[#allocation4 + $0x7cc] ss:$16 sps:$4 sm:$0xff]   ;;  %v8173_v56 = vld [vmem:[#allocation4 + $0x8e8] ss:$16 sps:$4 sm:$0xff]  }
 0x203   :  { %4817 = vmatprep.subr.bf16.mxu1 %v8124_v55  ;;  %v8175_v51 = vld [vmem:[#allocation4 + $0x8ec] ss:$16 sps:$4 sm:$0xff]   ;;  %v8170_v55 = vld [vmem:[#allocation4 + $0x7c8] ss:$16 sps:$4 sm:$0xff]  }
 0x205   :  { %4847 = vmatpush1.bf16.msra.mxu0 %v8125_v60  ;;  %v9110_v60 = vpop.f32.mrf.mxu1 }
 0x206   :  { %4818 = vmatpush2.bf16.msra.mxu1 %v8122_v50  ;;  %4848 = vmatprep.subr.bf16.mxu0 %v8133_v4  ;;  %v9108_v50 = vpop.f32.mrf.mxu0  ;;  %v8181_v4 = vld [vmem:[#allocation4 + $0x8cc] ss:$16 sps:$4 sm:$0xff]  }
 0x207   :  { %4819 = vmatprep.subr.bf16.mxu1 %v8130_v61  ;;  %v8178_v61 = vld [vmem:[#allocation4 + $0x7ac] ss:$16 sps:$4 sm:$0xff]  }
 0x209   :  { %4849 = vmatpush1.bf16.msra.mxu0 %v8131_v6  ;;  %v8179_v6 = vld [vmem:[#allocation4 + $0x8c8] ss:$16 sps:$4 sm:$0xff]  }
 0x20a   :  { %4820 = vmatpush2.bf16.msra.mxu1 %v8128_v5  ;;  %4850 = vmatprep.subr.bf16.mxu0 %v8139_v62  ;;  %v8176_v5 = vld [vmem:[#allocation4 + $0x7a8] ss:$16 sps:$4 sm:$0xff]  }
 0x20b   :  { %4821 = vmatprep.subr.bf16.mxu1 %v8136_v53 }
 0x20d   :  { %4851 = vmatpush1.bf16.msra.mxu0 %v8137_v52 }
 0x20e   :  { %4822 = vmatpush2.bf16.msra.mxu1 %v8134_v12  ;;  %4852 = vmatprep.subr.bf16.mxu0 %v8145_v7  ;;  %v8184_v7 = vld [vmem:[#allocation4 + $0x78c] ss:$16 sps:$4 sm:$0xff]  }
 0x20f   :  { %4823 = vmatprep.subr.bf16.mxu1 %v8142_v13 }
 0x211   :  { %4853 = vmatpush1.bf16.msra.mxu0 %v8143_v11 }
 0x212   :  { %4824 = vmatpush2.bf16.msra.mxu1 %v8140_v9  ;;  %4854 = vmatprep.subr.bf16.mxu0 %v8151_v14  ;;  %v8187_v9 = vld [vmem:[#allocation4 + $0x8ac] ss:$16 sps:$4 sm:$0xff]   ;;  %v8185_v14 = vld [vmem:[#allocation4 + $0x8a8] ss:$16 sps:$4 sm:$0xff]  }
 0x213   :  { %4825 = vmatprep.subr.bf16.mxu1 %v8148_v47  ;;  %v8182_v47 = vld [vmem:[#allocation4 + $0x788] ss:$16 sps:$4 sm:$0xff]  }
 0x215   :  { %4855 = vmatpush1.bf16.msra.mxu0 %v8149_v45  ;;  %v8190_v45 = vld [vmem:[#allocation4 + $0x76c] ss:$16 sps:$4 sm:$0xff]  }
 0x216   :  { %4826 = vmatpush2.bf16.msra.mxu1 %v8146_v15  ;;  %4856 = vmatprep.subr.bf16.mxu0 %v8157_v16 }
 0x217   :  { %4827 = vmatprep.subr.bf16.mxu1 %v8154_v3  ;;  %v8193_v3 = vld [vmem:[#allocation4 + $0x88c] ss:$16 sps:$4 sm:$0xff]  }
 0x219   :  { %4857 = vmatpush1.bf16.msra.mxu0 %v8155_v18  ;;  %v8191_v18 = vld [vmem:[#allocation4 + $0x888] ss:$16 sps:$4 sm:$0xff]  }
 0x21a   :  { %4828 = vmatpush2.bf16.msra.mxu1 %v8152_v17  ;;  %4858 = vmatprep.subr.bf16.mxu0 %v8163_v21  ;;  %v8188_v17 = vld [vmem:[#allocation4 + $0x768] ss:$16 sps:$4 sm:$0xff]  }
 0x21b   :  { %4829 = vmatprep.subr.bf16.mxu1 %v8160_v20  ;;  %v8196_v20 = vld [vmem:[#allocation4 + $0x74c] ss:$16 sps:$4 sm:$0xff]   ;;  %v8197_v21 = vld [vmem:[#allocation4 + $0x868] ss:$16 sps:$4 sm:$0xff]  }
 0x21d   :  { %4859 = vmatpush1.bf16.msra.mxu0 %v8161_v31  ;;  %v8205_v31 = vld [vmem:[#allocation4 + $0x84c] ss:$16 sps:$4 sm:$0xff]  }
 0x21e   :  { %4830 = vmatpush2.bf16.msra.mxu1 %v8158_v22  ;;  %4860 = vmatprep.subr.bf16.mxu0 %v8169_v33  ;;  %v8202_v22 = vld [vmem:[#allocation4 + $0x72c] ss:$16 sps:$4 sm:$0xff]   ;;  %v8203_v33 = vld [vmem:[#allocation4 + $0x848] ss:$16 sps:$4 sm:$0xff]  }
 0x21f   :  { %4831 = vmatprep.subr.bf16.mxu1 %v8166_v32  ;;  %v8200_v32 = vld [vmem:[#allocation4 + $0x728] ss:$16 sps:$4 sm:$0xff]  }
 0x221   :  { %4861 = vmatpush2.bf16.msra.mxu0 %v8167_v38  ;;  %v8211_v38 = vld [vmem:[#allocation4 + $0x82c] ss:$16 sps:$4 sm:$0xff]  }
 0x222   :  { %4832 = vmatpush2.bf16.msra.mxu1 %v8164_v37  ;;  %4862 = vmatprep.subr.bf16.mxu0 %v8172_v49  ;;  %v8208_v37 = vld [vmem:[#allocation4 + $0x70c] ss:$16 sps:$4 sm:$0xff]   ;;  %v8206_v49 = vld [vmem:[#allocation4 + $0x708] ss:$16 sps:$4 sm:$0xff]  }
 0x223   :  { %4887 = vmatprep.subr.bf16.mxu1 %v8175_v51  ;;  %v8209_v51 = vld [vmem:[#allocation4 + $0x828] ss:$16 sps:$4 sm:$0xff]  }
 0x224   :  { %v4534_v53 = vpop.f32.mrf.mxu0 }
 0x225   :  { %v4577_v62 = vpop.f32.mrf.mxu1  ;;  %4834 = vmatmul.mubr.bf16.vlgmr.msra.gmra.mxu1 %v9012_v28  ;;  %v4535_v12 = vadd.f32 %v4534_v53, %v9100_v54  ;;  %4863 = vmatpush2.bf16.msra.mxu0 %v8170_v55  ;;  %v8214_v55 = vld [vmem:[#allocation4 + $0x80c] ss:$16 sps:$4 sm:$0xff]   ;;  %v8218_v53 = vld [vmem:[#allocation4 + $0x9e8] ss:$16 sps:$4 sm:$0xff]  }
 0x226   :  { %4888 = vmatpush1.bf16.msra.mxu1 %v8173_v56  ;;  %v9114_v52 = vpop.f32.mrf.mxu0  ;;  %4864 = vmatprep.subr.bf16.mxu0 %v8178_v61  ;;  %v8217_v56 = vld [vmem:[#allocation4 + $0xaec] ss:$16 sps:$4 sm:$0xff]   ;;  %v8212_v61 = vld [vmem:[#allocation4 + $0x808] ss:$16 sps:$4 sm:$0xff]  }
 0x227   :  { %v9116_v13 = vpop.f32.mrf.mxu1  ;;  %4889 = vmatprep.subr.bf16.mxu1 %v8181_v4  ;;  %v9118_v11 = vadd.f32 %v4577_v62, %v4535_v12  ;;  %4919 = vmatprep.mubr.bf16.mxu1 %v9018_v40  ;;  %v8199_v40 = vld [vmem:[#allocation4 + $0x86c] ss:$16 sps:$4 sm:$0xff]   ;;  %v8215_v4 = vld [vmem:[#allocation4 + $0xae8] ss:$16 sps:$4 sm:$0xff]  }
 0x228   :  { %v4538_v15 = vpop.f32.mrf.mxu0  ;;  %v8221_v62 = vld [vmem:[#allocation4 + $0xac8] ss:$16 sps:$4 sm:$0xff]   ;;  %v8226_v12 = vld [vmem:[#allocation4 + $0x9cc] ss:$16 sps:$4 sm:$0xff]  }
 0x229   :  { %v4539_v28 = vadd.f32 %v4538_v15, %v9104_v10  ;;  %4865 = vmatpush2.bf16.msra.mxu0 %v8176_v5  ;;  %v4581_v54 = vpop.f32.mrf.mxu1  ;;  %v8194_v10 = vld [vmem:[#allocation4 + $0x748] ss:$16 sps:$4 sm:$0xff]   ;;  %v8220_v5 = vld [vmem:[#allocation4 + $0x9ec] ss:$16 sps:$4 sm:$0xff]  }
 0x22a   :  { %4890 = vmatpush1.bf16.msra.mxu1 %v8179_v6  ;;  %4866 = vmatprep.subr.bf16.mxu0 %v8184_v7  ;;  %v8223_v6 = vld [vmem:[#allocation4 + $0xacc] ss:$16 sps:$4 sm:$0xff]  }
 0x22b   :  { %4891 = vmatprep.subr.bf16.mxu1 %v8187_v9  ;;  %v9122_v16 = vadd.f32 %v4581_v54, %v4539_v28  ;;  %v8229_v7 = vld [vmem:[#allocation4 + $0xaac] ss:$16 sps:$4 sm:$0xff]   ;;  %v8224_v9 = vld [vmem:[#allocation4 + $0x9c8] ss:$16 sps:$4 sm:$0xff]  }
 0x22c   :  { %v8235_v15 = vld [vmem:[#allocation4 + $0xa8c] ss:$16 sps:$4 sm:$0xff]   ;;  %v8230_v28 = vld [vmem:[#allocation4 + $0x9a8] ss:$16 sps:$4 sm:$0xff]  }
 0x22d   :  { %4867 = vmatpush2.bf16.msra.mxu0 %v8182_v47  ;;  %v8227_v47 = vld [vmem:[#allocation4 + $0xaa8] ss:$16 sps:$4 sm:$0xff]   ;;  %v8238_v54 = vld [vmem:[#allocation4 + $0x98c] ss:$16 sps:$4 sm:$0xff]  }
 0x22e   :  { %4892 = vmatpush1.bf16.msra.mxu1 %v8185_v14  ;;  %4868 = vmatprep.subr.bf16.mxu0 %v8190_v45  ;;  %v8232_v14 = vld [vmem:[#allocation4 + $0x9ac] ss:$16 sps:$4 sm:$0xff]  }
 0x22f   :  { %4893 = vmatprep.subr.bf16.mxu1 %v8193_v3  ;;  %v8241_v45 = vld [vmem:[#allocation4 + $0xa6c] ss:$16 sps:$4 sm:$0xff]   ;;  %v8236_v3 = vld [vmem:[#allocation4 + $0x988] ss:$16 sps:$4 sm:$0xff]  }
 0x231   :  { %4869 = vmatpush2.bf16.msra.mxu0 %v8188_v17  ;;  %v8239_v17 = vld [vmem:[#allocation4 + $0xa68] ss:$16 sps:$4 sm:$0xff]  }
 0x232   :  { %4894 = vmatpush1.bf16.msra.mxu1 %v8191_v18  ;;  %4870 = vmatprep.subr.bf16.mxu0 %v8196_v20  ;;  %v8247_v18 = vld [vmem:[#allocation4 + $0xa4c] ss:$16 sps:$4 sm:$0xff]   ;;  %v8242_v20 = vld [vmem:[#allocation4 + $0x968] ss:$16 sps:$4 sm:$0xff]  }
 0x233   :  { %4895 = vmatprep.subr.bf16.mxu1 %v8199_v40  ;;  %v8245_v40 = vld [vmem:[#allocation4 + $0xa48] ss:$16 sps:$4 sm:$0xff]  }
 0x235   :  { %4871 = vmatpush2.bf16.msra.mxu0 %v8194_v10  ;;  %v8250_v10 = vld [vmem:[#allocation4 + $0x94c] ss:$16 sps:$4 sm:$0xff]  }
 0x236   :  { %4896 = vmatpush1.bf16.msra.mxu1 %v8197_v21  ;;  %4872 = vmatprep.subr.bf16.mxu0 %v8202_v22  ;;  %v8253_v21 = vld [vmem:[#allocation4 + $0xa2c] ss:$16 sps:$4 sm:$0xff]   ;;  %v8248_v22 = vld [vmem:[#allocation4 + $0x948] ss:$16 sps:$4 sm:$0xff]  }
 0x237   :  { %4897 = vmatprep.subr.bf16.mxu1 %v8205_v31  ;;  %v8251_v31 = vld [vmem:[#allocation4 + $0xa28] ss:$16 sps:$4 sm:$0xff]  }
 0x239   :  { %4873 = vmatpush2.bf16.msra.mxu0 %v8200_v32  ;;  %v8256_v32 = vld [vmem:[#allocation4 + $0x92c] ss:$16 sps:$4 sm:$0xff]  }
 0x23a   :  { %4898 = vmatpush1.bf16.msra.mxu1 %v8203_v33  ;;  %4874 = vmatprep.subr.bf16.mxu0 %v8208_v37  ;;  %v8259_v33 = vld [vmem:[#allocation4 + $0xa0c] ss:$16 sps:$4 sm:$0xff]   ;;  %v8254_v37 = vld [vmem:[#allocation4 + $0x928] ss:$16 sps:$4 sm:$0xff]  }
 0x23b   :  { %4899 = vmatprep.subr.bf16.mxu1 %v8211_v38  ;;  %v8257_v38 = vld [vmem:[#allocation4 + $0xa08] ss:$16 sps:$4 sm:$0xff]  }
 0x23d   :  { %4875 = vmatpush2.bf16.msra.mxu0 %v8206_v49  ;;  %v8262_v49 = vld [vmem:[#allocation4 + $0x90c] ss:$16 sps:$4 sm:$0xff]  }
 0x23e   :  { %4900 = vmatpush1.bf16.msra.mxu1 %v8209_v51  ;;  %4930 = vmatprep.subr.bf16.mxu0 %v8217_v56  ;;  %v8265_v51 = vld [vmem:[#allocation4 + $0xbec] ss:$16 sps:$4 sm:$0xff]   ;;  %v8263_v56 = vld [vmem:[#allocation4 + $0xbe8] ss:$16 sps:$4 sm:$0xff]  }
 0x23f   :  { %4901 = vmatprep.subr.bf16.mxu1 %v8214_v55  ;;  %v8260_v55 = vld [vmem:[#allocation4 + $0x908] ss:$16 sps:$4 sm:$0xff]  }
 0x240   :  { %4877 = vmatmul.mubr.bf16.vlgmr.msra.gmra.mxu0 %v9014_v29  ;;  %v8233_v29 = vld [vmem:[#allocation4 + $0xa88] ss:$16 sps:$4 sm:$0xff]  }
 0x241   :  { %4931 = vmatpush1.bf16.msra.mxu0 %v8215_v4  ;;  %4962 = vmatprep.mubr.bf16.mxu0 %v9020_v46  ;;  %v8244_v46 = vld [vmem:[#allocation4 + $0x96c] ss:$16 sps:$4 sm:$0xff]  }
 0x242   :  { %4902 = vmatpush1.bf16.msra.mxu1 %v8212_v61  ;;  %4932 = vmatprep.subr.bf16.mxu0 %v8223_v6  ;;  %v8268_v61 = vld [vmem:[#allocation4 + $0xbcc] ss:$16 sps:$4 sm:$0xff]   ;;  %v8269_v6 = vld [vmem:[#allocation4 + $0xce8] ss:$16 sps:$4 sm:$0xff]  }
 0x243   :  { %4903 = vmatprep.subr.bf16.mxu1 %v8220_v5  ;;  %v8271_v4 = vld [vmem:[#allocation4 + $0xcec] ss:$16 sps:$4 sm:$0xff]   ;;  %v8266_v5 = vld [vmem:[#allocation4 + $0xbc8] ss:$16 sps:$4 sm:$0xff]  }
 0x245   :  { %4933 = vmatpush1.bf16.msra.mxu0 %v8221_v62  ;;  %v9128_v62 = vpop.f32.mrf.mxu1 }
 0x246   :  { %4904 = vmatpush2.bf16.msra.mxu1 %v8218_v53  ;;  %4934 = vmatprep.subr.bf16.mxu0 %v8229_v7  ;;  %v9126_v53 = vpop.f32.mrf.mxu0  ;;  %v8277_v7 = vld [vmem:[#allocation4 + $0xccc] ss:$16 sps:$4 sm:$0xff]  }
 0x247   :  { %4905 = vmatprep.subr.bf16.mxu1 %v8226_v12  ;;  %v8274_v12 = vld [vmem:[#allocation4 + $0xbac] ss:$16 sps:$4 sm:$0xff]  }
 0x249   :  { %4935 = vmatpush1.bf16.msra.mxu0 %v8227_v47 }
 0x24a   :  { %4906 = vmatpush2.bf16.msra.mxu1 %v8224_v9  ;;  %4936 = vmatprep.subr.bf16.mxu0 %v8235_v15  ;;  %v8272_v9 = vld [vmem:[#allocation4 + $0xba8] ss:$16 sps:$4 sm:$0xff]  }
 0x24b   :  { %4907 = vmatprep.subr.bf16.mxu1 %v8232_v14 }
 0x24d   :  { %4937 = vmatpush1.bf16.msra.mxu0 %v8233_v29 }
 0x24e   :  { %4908 = vmatpush2.bf16.msra.mxu1 %v8230_v28  ;;  %4938 = vmatprep.subr.bf16.mxu0 %v8241_v45  ;;  %v8275_v28 = vld [vmem:[#allocation4 + $0xcc8] ss:$16 sps:$4 sm:$0xff]   ;;  %v8280_v45 = vld [vmem:[#allocation4 + $0xb8c] ss:$16 sps:$4 sm:$0xff]  }
 0x24f   :  { %4909 = vmatprep.subr.bf16.mxu1 %v8238_v54 }
 0x251   :  { %4939 = vmatpush1.bf16.msra.mxu0 %v8239_v17 }
 0x252   :  { %4910 = vmatpush2.bf16.msra.mxu1 %v8236_v3  ;;  %4940 = vmatprep.subr.bf16.mxu0 %v8247_v18  ;;  %v8283_v3 = vld [vmem:[#allocation4 + $0xcac] ss:$16 sps:$4 sm:$0xff]  }
 0x253   :  { %4911 = vmatprep.subr.bf16.mxu1 %v8244_v46 }
 0x255   :  { %4941 = vmatpush1.bf16.msra.mxu0 %v8245_v40  ;;  %v8286_v40 = vld [vmem:[#allocation4 + $0xb6c] ss:$16 sps:$4 sm:$0xff]  }
 0x256   :  { %4912 = vmatpush2.bf16.msra.mxu1 %v8242_v20  ;;  %4942 = vmatprep.subr.bf16.mxu0 %v8253_v21 }
 0x257   :  { %4913 = vmatprep.subr.bf16.mxu1 %v8250_v10  ;;  %v8289_v10 = vld [vmem:[#allocation4 + $0xc8c] ss:$16 sps:$4 sm:$0xff]  }
 0x259   :  { %4943 = vmatpush1.bf16.msra.mxu0 %v8251_v31  ;;  %v8287_v31 = vld [vmem:[#allocation4 + $0xc88] ss:$16 sps:$4 sm:$0xff]  }
 0x25a   :  { %4914 = vmatpush2.bf16.msra.mxu1 %v8248_v22  ;;  %4944 = vmatprep.subr.bf16.mxu0 %v8259_v33  ;;  %v8284_v22 = vld [vmem:[#allocation4 + $0xb68] ss:$16 sps:$4 sm:$0xff]  }
 0x25b   :  { %4915 = vmatprep.subr.bf16.mxu1 %v8256_v32  ;;  %v8295_v32 = vld [vmem:[#allocation4 + $0xc6c] ss:$16 sps:$4 sm:$0xff]   ;;  %v8293_v33 = vld [vmem:[#allocation4 + $0xc68] ss:$16 sps:$4 sm:$0xff]  }
 0x25d   :  { %4945 = vmatpush1.bf16.msra.mxu0 %v8257_v38  ;;  %v8301_v38 = vld [vmem:[#allocation4 + $0xc4c] ss:$16 sps:$4 sm:$0xff]  }
 0x25e   :  { %4916 = vmatpush2.bf16.msra.mxu1 %v8254_v37  ;;  %4946 = vmatprep.subr.bf16.mxu0 %v8265_v51  ;;  %v8298_v37 = vld [vmem:[#allocation4 + $0xb2c] ss:$16 sps:$4 sm:$0xff]   ;;  %v8299_v51 = vld [vmem:[#allocation4 + $0xc48] ss:$16 sps:$4 sm:$0xff]  }
 0x25f   :  { %4917 = vmatprep.subr.bf16.mxu1 %v8262_v49  ;;  %v8296_v49 = vld [vmem:[#allocation4 + $0xb28] ss:$16 sps:$4 sm:$0xff]  }
 0x261   :  { %4947 = vmatpush2.bf16.msra.mxu0 %v8263_v56  ;;  %v8307_v56 = vld [vmem:[#allocation4 + $0xc2c] ss:$16 sps:$4 sm:$0xff]  }
 0x262   :  { %4918 = vmatpush2.bf16.msra.mxu1 %v8260_v55  ;;  %4948 = vmatprep.subr.bf16.mxu0 %v8268_v61  ;;  %v8304_v55 = vld [vmem:[#allocation4 + $0xb0c] ss:$16 sps:$4 sm:$0xff]   ;;  %v8302_v61 = vld [vmem:[#allocation4 + $0xb08] ss:$16 sps:$4 sm:$0xff]  }
 0x263   :  { %4973 = vmatprep.subr.bf16.mxu1 %v8271_v4  ;;  %v8305_v4 = vld [vmem:[#allocation4 + $0xc28] ss:$16 sps:$4 sm:$0xff]  }
 0x264   :  { %v4620_v47 = vpop.f32.mrf.mxu0 }
 0x265   :  { %v4663_v14 = vpop.f32.mrf.mxu1  ;;  %4920 = vmatmul.mubr.bf16.vlgmr.msra.gmra.mxu1 %v9024_v58  ;;  %v4621_v15 = vadd.f32 %v4620_v47, %v9118_v11  ;;  %4949 = vmatpush2.bf16.msra.mxu0 %v8266_v5  ;;  %v8278_v58 = vld [vmem:[#allocation4 + $0xb88] ss:$16 sps:$4 sm:$0xff]   ;;  %v8310_v5 = vld [vmem:[#allocation4 + $0xc0c] ss:$16 sps:$4 sm:$0xff]  }
 0x266   :  { %4974 = vmatpush1.bf16.msra.mxu1 %v8269_v6  ;;  %v9132_v29 = vpop.f32.mrf.mxu0  ;;  %4950 = vmatprep.subr.bf16.mxu0 %v8274_v12  ;;  %v8281_v11 = vld [vmem:[#allocation4 + $0xca8] ss:$16 sps:$4 sm:$0xff]   ;;  %v8313_v6 = vld [vmem:[#allocation4 + $0xeec] ss:$16 sps:$4 sm:$0xff]  }
 0x267   :  { %v9134_v54 = vpop.f32.mrf.mxu1  ;;  %4975 = vmatprep.subr.bf16.mxu1 %v8277_v7  ;;  %v4664_v17 = vadd.f32 %v4663_v14, %v4621_v15  ;;  %5005 = vmatprep.mubr.bf16.mxu1 %v9028_v0  ;;  %v8292_v0 = vld [vmem:[#allocation4 + $0xb4c] ss:$16 sps:$4 sm:$0xff]   ;;  %v8308_v12 = vld [vmem:[#allocation4 + $0xc08] ss:$16 sps:$4 sm:$0xff]  }
 0x268   :  { %v4624_v46 = vpop.f32.mrf.mxu0  ;;  %v8311_v7 = vld [vmem:[#allocation4 + $0xee8] ss:$16 sps:$4 sm:$0xff]   ;;  %v8316_v47 = vld [vmem:[#allocation4 + $0xdec] ss:$16 sps:$4 sm:$0xff]  }
 0x269   :  { %v4625_v18 = vadd.f32 %v4624_v46, %v9122_v16  ;;  %4951 = vmatpush2.bf16.msra.mxu0 %v8272_v9  ;;  %v4667_v20 = vpop.f32.mrf.mxu1  ;;  %v8290_v16 = vld [vmem:[#allocation4 + $0xb48] ss:$16 sps:$4 sm:$0xff]   ;;  %v8319_v14 = vld [vmem:[#allocation4 + $0xecc] ss:$16 sps:$4 sm:$0xff]  }
 0x26a   :  { %4976 = vmatpush1.bf16.msra.mxu1 %v8275_v28  ;;  %4952 = vmatprep.subr.bf16.mxu0 %v8280_v45  ;;  %v9138_v9 = vpop.f32.mrf.mxu0  ;;  %v8314_v45 = vld [vmem:[#allocation4 + $0xde8] ss:$16 sps:$4 sm:$0xff]  }
 0x26b   :  { %4977 = vmatprep.subr.bf16.mxu1 %v8283_v3  ;;  %v4668_v21 = vadd.f32 %v4667_v20, %v4625_v18  ;;  %v8317_v3 = vld [vmem:[#allocation4 + $0xec8] ss:$16 sps:$4 sm:$0xff]   ;;  %v8322_v18 = vld [vmem:[#allocation4 + $0xdcc] ss:$16 sps:$4 sm:$0xff]  }
 0x26d   :  { %4953 = vmatpush2.bf16.msra.mxu0 %v8278_v58  ;;  %v8325_v58 = vld [vmem:[#allocation4 + $0xeac] ss:$16 sps:$4 sm:$0xff]  }
 0x26e   :  { %4978 = vmatpush1.bf16.msra.mxu1 %v8281_v11  ;;  %4954 = vmatprep.subr.bf16.mxu0 %v8286_v40  ;;  %v8320_v40 = vld [vmem:[#allocation4 + $0xdc8] ss:$16 sps:$4 sm:$0xff]  }
 0x26f   :  { %4979 = vmatprep.subr.bf16.mxu1 %v8289_v10  ;;  %v8323_v10 = vld [vmem:[#allocation4 + $0xea8] ss:$16 sps:$4 sm:$0xff]  }
 0x271   :  { %4955 = vmatpush2.bf16.msra.mxu0 %v8284_v22 }
 0x272   :  { %4980 = vmatpush1.bf16.msra.mxu1 %v8287_v31  ;;  %4956 = vmatprep.subr.bf16.mxu0 %v8292_v0 }
 0x273   :  { %4981 = vmatprep.subr.bf16.mxu1 %v8295_v32  ;;  %v8326_v32 = vld [vmem:[#allocation4 + $0xda8] ss:$16 sps:$4 sm:$0xff]  }
 0x275   :  { %4957 = vmatpush2.bf16.msra.mxu0 %v8290_v16  ;;  %v8329_v16 = vld [vmem:[#allocation4 + $0xe88] ss:$16 sps:$4 sm:$0xff]  }
 0x276   :  { %4982 = vmatpush1.bf16.msra.mxu1 %v8293_v33  ;;  %4958 = vmatprep.subr.bf16.mxu0 %v8298_v37  ;;  %v8332_v33 = vld [vmem:[#allocation4 + $0xd88] ss:$16 sps:$4 sm:$0xff]  }
 0x277   :  { %4983 = vmatprep.subr.bf16.mxu1 %v8301_v38  ;;  %v8335_v37 = vld [vmem:[#allocation4 + $0xe68] ss:$16 sps:$4 sm:$0xff]   ;;  %v8340_v38 = vld [vmem:[#allocation4 + $0xd6c] ss:$16 sps:$4 sm:$0xff]  }
 0x279   :  { %4959 = vmatpush2.bf16.msra.mxu0 %v8296_v49  ;;  %v8343_v49 = vld [vmem:[#allocation4 + $0xe4c] ss:$16 sps:$4 sm:$0xff]  }
 0x27a   :  { %4984 = vmatpush1.bf16.msra.mxu1 %v8299_v51  ;;  %4960 = vmatprep.subr.bf16.mxu0 %v8304_v55  ;;  %v8338_v51 = vld [vmem:[#allocation4 + $0xd68] ss:$16 sps:$4 sm:$0xff]  }
 0x27b   :  { %4985 = vmatprep.subr.bf16.mxu1 %v8307_v56  ;;  %v8341_v55 = vld [vmem:[#allocation4 + $0xe48] ss:$16 sps:$4 sm:$0xff]   ;;  %v8346_v56 = vld [vmem:[#allocation4 + $0xd4c] ss:$16 sps:$4 sm:$0xff]  }
 0x27d   :  { %4961 = vmatpush2.bf16.msra.mxu0 %v8302_v61  ;;  %v8349_v61 = vld [vmem:[#allocation4 + $0xe2c] ss:$16 sps:$4 sm:$0xff]  }
 0x27e   :  { %4986 = vmatpush1.bf16.msra.mxu1 %v8305_v4  ;;  %5016 = vmatprep.subr.bf16.mxu0 %v8313_v6  ;;  %v8344_v4 = vld [vmem:[#allocation4 + $0xd48] ss:$16 sps:$4 sm:$0xff]   ;;  %v8352_v6 = vld [vmem:[#allocation4 + $0xd2c] ss:$16 sps:$4 sm:$0xff]  }
 0x27f   :  { %4987 = vmatprep.subr.bf16.mxu1 %v8310_v5  ;;  %v8347_v5 = vld [vmem:[#allocation4 + $0xe28] ss:$16 sps:$4 sm:$0xff]  }
 0x280   :  { %v4706_v15 = vpop.f32.mrf.mxu0  ;;  %4963 = vmatmul.mubr.bf16.vlgmr.msra.gmra.mxu0 %v9026_v59  ;;  %v8328_v59 = vld [vmem:[#allocation4 + $0xdac] ss:$16 sps:$4 sm:$0xff]  }
 0x281   :  { %v4707_v28 = vadd.f32 %v4706_v15, %v4664_v17  ;;  %5017 = vmatpush1.bf16.msra.mxu0 %v8311_v7  ;;  %5048 = vmatprep.mubr.bf16.mxu0 %v9030_v1  ;;  %v8331_v17 = vld [vmem:[#allocation4 + $0xe8c] ss:$16 sps:$4 sm:$0xff]   ;;  %v8350_v7 = vld [vmem:[#allocation4 + $0xd28] ss:$16 sps:$4 sm:$0xff]  }
 0x282   :  { %4988 = vmatpush1.bf16.msra.mxu1 %v8308_v12  ;;  %v9141_v46 = vpop.f32.mrf.mxu0  ;;  %5018 = vmatprep.subr.bf16.mxu0 %v8319_v14  ;;  %v8334_v1 = vld [vmem:[#allocation4 + $0xd8c] ss:$16 sps:$4 sm:$0xff]  }
 0x283   :  { %4989 = vmatprep.subr.bf16.mxu1 %v8316_v47  ;;  %v5188_v22 = vmax.f32 %v4707_v28, 0.0  ;;  %v8355_v12 = vld [vmem:[#allocation4 + $0xe0c] ss:$16 sps:$4 sm:$0xff]   ;;  %v8353_v47 = vld [vmem:[#allocation4 + $0xe08] ss:$16 sps:$4 sm:$0xff]  }
 0x284   :  { %v4710_v11 = vpop.f32.mrf.mxu0  ;;  %v8358_v14 = vld [vmem:[#allocation4 + $0xd0c] ss:$16 sps:$4 sm:$0xff]   ;;  %v8356_v28 = vld [vmem:[#allocation4 + $0xd08] ss:$16 sps:$4 sm:$0xff]  }
 0x285   :  { %v4711_v20 = vadd.f32 %v4710_v11, %v4668_v21  ;;  %5019 = vmatpush1.bf16.msra.mxu0 %v8317_v3  ;;  %v8337_v21 = vld [vmem:[#allocation4 + $0xe6c] ss:$16 sps:$4 sm:$0xff]   ;;  %v8365_v11 = vld [vmem:[#allocation4 + $0x10e8] ss:$16 sps:$4 sm:$0xff]  }
 0x286   :  { %4990 = vmatpush2.bf16.msra.mxu1 %v8314_v45  ;;  %5020 = vmatprep.subr.bf16.mxu0 %v8325_v58  ;;  %v8361_v15 = vld [vmem:[#allocation4 + $0xfec] ss:$16 sps:$4 sm:$0xff]   ;;  %v8359_v45 = vld [vmem:[#allocation4 + $0xfe8] ss:$16 sps:$4 sm:$0xff]  }
 0x287   :  { %4991 = vmatprep.subr.bf16.mxu1 %v8322_v18  ;;  %v5192_v31 = vmax.f32 %v4711_v20, 0.0  ;;  %v8364_v3 = vld [vmem:[#allocation4 + $0xfcc] ss:$16 sps:$4 sm:$0xff]   ;;  %v8362_v58 = vld [vmem:[#allocation4 + $0xfc8] ss:$16 sps:$4 sm:$0xff]  }
 0x288   :  { %v8367_v18 = vld [vmem:[#allocation4 + $0x10ec] ss:$16 sps:$4 sm:$0xff]  }
 0x289   :  { %v9144_v0 = vpack.c.bf16 %v5192_v31, %v5188_v22  ;;  %5021 = vmatpush1.bf16.msra.mxu0 %v8323_v10  ;;  %v8370_v20 = vld [vmem:[#allocation4 + $0xfac] ss:$16 sps:$4 sm:$0xff]   ;;  %v8368_v10 = vld [vmem:[#allocation4 + $0xfa8] ss:$16 sps:$4 sm:$0xff]  }
 0x28a   :  { %4992 = vmatpush2.bf16.msra.mxu1 %v8320_v40  ;;  %5022 = vmatprep.subr.bf16.mxu0 %v8331_v17  ;;  %v8373_v40 = vld [vmem:[#allocation4 + $0x10cc] ss:$16 sps:$4 sm:$0xff]   ;;  %v8374_v31 = vld [vmem:[#allocation4 + $0xf88] ss:$16 sps:$4 sm:$0xff]  }
 0x28b   :  { %4993 = vmatprep.subr.bf16.mxu1 %v8328_v59  ;;  %v8371_v59 = vld [vmem:[#allocation4 + $0x10c8] ss:$16 sps:$4 sm:$0xff]   ;;  %v8376_v17 = vld [vmem:[#allocation4 + $0xf8c] ss:$16 sps:$4 sm:$0xff]  }
 0x28c   :  { %v8379_v22 = vld [vmem:[#allocation4 + $0x10ac] ss:$16 sps:$4 sm:$0xff]  }
 0x28d   :  { %5023 = vmatpush1.bf16.msra.mxu0 %v8329_v16  ;;  %v8382_v16 = vld [vmem:[#allocation4 + $0xf6c] ss:$16 sps:$4 sm:$0xff]  }
 0x28e   :  { %4994 = vmatpush2.bf16.msra.mxu1 %v8326_v32  ;;  %5024 = vmatprep.subr.bf16.mxu0 %v8337_v21  ;;  %v8377_v32 = vld [vmem:[#allocation4 + $0x10a8] ss:$16 sps:$4 sm:$0xff]  }
 0x28f   :  { %4995 = vmatprep.subr.bf16.mxu1 %v8334_v1  ;;  %v8385_v1 = vld [vmem:[#allocation4 + $0x108c] ss:$16 sps:$4 sm:$0xff]   ;;  %v8383_v21 = vld [vmem:[#allocation4 + $0x1088] ss:$16 sps:$4 sm:$0xff]  }
 0x291   :  { %5025 = vmatpush1.bf16.msra.mxu0 %v8335_v37  ;;  %v8391_v37 = vld [vmem:[#allocation4 + $0x106c] ss:$16 sps:$4 sm:$0xff]  }
 0x292   :  { %4996 = vmatpush2.bf16.msra.mxu1 %v8332_v33  ;;  %5026 = vmatprep.subr.bf16.mxu0 %v8343_v49  ;;  %v8388_v33 = vld [vmem:[#allocation4 + $0xf4c] ss:$16 sps:$4 sm:$0xff]  }
 0x293   :  { %4997 = vmatprep.subr.bf16.mxu1 %v8340_v38  ;;  %v8386_v38 = vld [vmem:[#allocation4 + $0xf48] ss:$16 sps:$4 sm:$0xff]   ;;  %v8394_v49 = vld [vmem:[#allocation4 + $0xf2c] ss:$16 sps:$4 sm:$0xff]  }
 0x295   :  { %5027 = vmatpush1.bf16.msra.mxu0 %v8341_v55  ;;  %v8392_v55 = vld [vmem:[#allocation4 + $0xf28] ss:$16 sps:$4 sm:$0xff]  }
 0x296   :  { %4998 = vmatpush2.bf16.msra.mxu1 %v8338_v51  ;;  %5028 = vmatprep.subr.bf16.mxu0 %v8349_v61  ;;  %v8397_v51 = vld [vmem:[#allocation4 + $0x104c] ss:$16 sps:$4 sm:$0xff]  }
 0x297   :  { %4999 = vmatprep.subr.bf16.mxu1 %v8346_v56  ;;  %v8395_v56 = vld [vmem:[#allocation4 + $0x1048] ss:$16 sps:$4 sm:$0xff]   ;;  %v8400_v61 = vld [vmem:[#allocation4 + $0xf0c] ss:$16 sps:$4 sm:$0xff]  }
 0x299   :  { %5029 = vmatpush1.bf16.msra.mxu0 %v8347_v5  ;;  %v8398_v5 = vld [vmem:[#allocation4 + $0xf08] ss:$16 sps:$4 sm:$0xff]  }
 0x29a   :  { %5000 = vmatpush2.bf16.msra.mxu1 %v8344_v4  ;;  %5030 = vmatprep.subr.bf16.mxu0 %v8355_v12  ;;  %v8403_v4 = vld [vmem:[#allocation4 + $0x102c] ss:$16 sps:$4 sm:$0xff]  }
 0x29b   :  { %5001 = vmatprep.subr.bf16.mxu1 %v8352_v6  ;;  %v8401_v6 = vld [vmem:[#allocation4 + $0x1028] ss:$16 sps:$4 sm:$0xff]   ;;  %v8406_v12 = vld [vmem:[#allocation4 + $0x100c] ss:$16 sps:$4 sm:$0xff]  }
 0x29d   :  { %5031 = vmatpush1.bf16.msra.mxu0 %v8353_v47  ;;  %v8404_v47 = vld [vmem:[#allocation4 + $0x1008] ss:$16 sps:$4 sm:$0xff]  }
 0x29e   :  { %5002 = vmatpush2.bf16.msra.mxu1 %v8350_v7  ;;  %5032 = vmatprep.subr.bf16.mxu0 %v8361_v15  ;;  %v8409_v7 = vld [vmem:[#allocation4 + $0x12ec] ss:$16 sps:$4 sm:$0xff]  }
 0x29f   :  { %5003 = vmatprep.subr.bf16.mxu1 %v8358_v14  ;;  %v8407_v14 = vld [vmem:[#allocation4 + $0x12e8] ss:$16 sps:$4 sm:$0xff]   ;;  %v8412_v15 = vld [vmem:[#allocation4 + $0x11ec] ss:$16 sps:$4 sm:$0xff]  }
 0x2a1   :  { %5033 = vmatpush2.bf16.msra.mxu0 %v8359_v45  ;;  %v8410_v45 = vld [vmem:[#allocation4 + $0x11e8] ss:$16 sps:$4 sm:$0xff]  }
 0x2a2   :  { %5004 = vmatpush2.bf16.msra.mxu1 %v8356_v28  ;;  %5034 = vmatprep.subr.bf16.mxu0 %v8364_v3  ;;  %v8415_v28 = vld [vmem:[#allocation4 + $0x12cc] ss:$16 sps:$4 sm:$0xff]   ;;  %v8413_v3 = vld [vmem:[#allocation4 + $0x12c8] ss:$16 sps:$4 sm:$0xff]  }
 0x2a3   :  { %5059 = vmatprep.subr.bf16.mxu1 %v8367_v18  ;;  %v8418_v18 = vld [vmem:[#allocation4 + $0x11cc] ss:$16 sps:$4 sm:$0xff]  }
 0x2a5   :  { %5006 = vmatmul.mubr.bf16.vlgmr.msra.gmra.mxu1 %v9039_v25  ;;  %5035 = vmatpush2.bf16.msra.mxu0 %v8362_v58  ;;  %v8380_v25 = vld [vmem:[#allocation4 + $0xf68] ss:$16 sps:$4 sm:$0xff]   ;;  %v8421_v58 = vld [vmem:[#allocation4 + $0x12ac] ss:$16 sps:$4 sm:$0xff]  }
 0x2a6   :  { %5060 = vmatpush1.bf16.msra.mxu1 %v8365_v11  ;;  %5036 = vmatprep.subr.bf16.mxu0 %v8370_v20  ;;  %v8416_v11 = vld [vmem:[#allocation4 + $0x11c8] ss:$16 sps:$4 sm:$0xff]  }
 0x2a7   :  { %5061 = vmatprep.subr.bf16.mxu1 %v8373_v40  ;;  %5091 = vmatprep.mubr.bf16.mxu1 %v9045_v35  ;;  %v8389_v35 = vld [vmem:[#allocation4 + $0x1068] ss:$16 sps:$4 sm:$0xff]   ;;  %v8424_v40 = vld [vmem:[#allocation4 + $0x11ac] ss:$16 sps:$4 sm:$0xff]  }
 0x2a8   :  { %v8419_v20 = vld [vmem:[#allocation4 + $0x12a8] ss:$16 sps:$4 sm:$0xff]  }
 0x2a9   :  { %5037 = vmatpush2.bf16.msra.mxu0 %v8368_v10  ;;  %v8427_v10 = vld [vmem:[#allocation4 + $0x128c] ss:$16 sps:$4 sm:$0xff]  }
 0x2aa   :  { %5062 = vmatpush1.bf16.msra.mxu1 %v8371_v59  ;;  %5038 = vmatprep.subr.bf16.mxu0 %v8376_v17  ;;  %v8425_v59 = vld [vmem:[#allocation4 + $0x1288] ss:$16 sps:$4 sm:$0xff]   ;;  %v8430_v17 = vld [vmem:[#allocation4 + $0x118c] ss:$16 sps:$4 sm:$0xff]  }
 0x2ab   :  { %5063 = vmatprep.subr.bf16.mxu1 %v8379_v22  ;;  %v8433_v22 = vld [vmem:[#allocation4 + $0x126c] ss:$16 sps:$4 sm:$0xff]  }
 0x2ad   :  { %5039 = vmatpush2.bf16.msra.mxu0 %v8374_v31  ;;  %v8428_v31 = vld [vmem:[#allocation4 + $0x1188] ss:$16 sps:$4 sm:$0xff]  }
 0x2ae   :  { %5064 = vmatpush1.bf16.msra.mxu1 %v8377_v32  ;;  %5040 = vmatprep.subr.bf16.mxu0 %v8382_v16  ;;  %v8436_v32 = vld [vmem:[#allocation4 + $0x116c] ss:$16 sps:$4 sm:$0xff]  }
 0x2af   :  { %5065 = vmatprep.subr.bf16.mxu1 %v8385_v1  ;;  %v8439_v16 = vld [vmem:[#allocation4 + $0x124c] ss:$16 sps:$4 sm:$0xff]   ;;  %v8434_v1 = vld [vmem:[#allocation4 + $0x1168] ss:$16 sps:$4 sm:$0xff]  }
 0x2b1   :  { %5041 = vmatpush2.bf16.msra.mxu0 %v8380_v25  ;;  %v8437_v25 = vld [vmem:[#allocation4 + $0x1248] ss:$16 sps:$4 sm:$0xff]  }
 0x2b2   :  { %5066 = vmatpush1.bf16.msra.mxu1 %v8383_v21  ;;  %5042 = vmatprep.subr.bf16.mxu0 %v8388_v33  ;;  %v8442_v21 = vld [vmem:[#allocation4 + $0x114c] ss:$16 sps:$4 sm:$0xff]  }
 0x2b3   :  { %5067 = vmatprep.subr.bf16.mxu1 %v8391_v37  ;;  %v8445_v33 = vld [vmem:[#allocation4 + $0x122c] ss:$16 sps:$4 sm:$0xff]   ;;  %v875_v37 = vsub.s32 1, %v9036_v8 }
 0x2b5   :  { %5043 = vmatpush2.bf16.msra.mxu0 %v8386_v38  ;;  %v8440_v38 = vld [vmem:[#allocation4 + $0x1148] ss:$16 sps:$4 sm:$0xff]  }
 0x2b6   :  { %5068 = vmatpush1.bf16.msra.mxu1 %v8389_v35  ;;  %5044 = vmatprep.subr.bf16.mxu0 %v8394_v49  ;;  %v8443_v35 = vld [vmem:[#allocation4 + $0x1228] ss:$16 sps:$4 sm:$0xff]   ;;  %v8448_v49 = vld [vmem:[#allocation4 + $0x112c] ss:$16 sps:$4 sm:$0xff]  }
 0x2b7   :  { %5069 = vmatprep.subr.bf16.mxu1 %v8397_v51  ;;  %v8451_v51 = vld [vmem:[#allocation4 + $0x120c] ss:$16 sps:$4 sm:$0xff]  }
 0x2b9   :  { %5045 = vmatpush2.bf16.msra.mxu0 %v8392_v55  ;;  %v9151_v55 = vld [vmem:[#allocation6] sm:$0xf] }
 0x2ba   :  { %5070 = vmatpush1.bf16.msra.mxu1 %v8395_v56  ;;  %5046 = vmatprep.subr.bf16.mxu0 %v8400_v61  ;;  %v876_v56 = vrot.slane %v9151_v55, %v875_v37 }
 0x2bb   :  { %5071 = vmatprep.subr.bf16.mxu1 %v8403_v4  ;;  %v8446_v4 = vld [vmem:[#allocation4 + $0x1128] ss:$16 sps:$4 sm:$0xff]  }
 0x2bc   :  { %v4283_v61 = vadd.f32 %v9065_v27, %v876_v56  ;;  %v8461_v27 = vld [vmem:[#allocation4 + $0x14cc] ss:$16 sps:$4 sm:$0x1f]  }
 0x2bd   :  { %5047 = vmatpush2.bf16.msra.mxu0 %v8398_v5  ;;  %v8449_v5 = vld [vmem:[#allocation4 + $0x1208] ss:$16 sps:$4 sm:$0xff]  }
 0x2be   :  { %5072 = vmatpush1.bf16.msra.mxu1 %v8401_v6  ;;  %5102 = vmatprep.subr.bf16.mxu0 %v8409_v7  ;;  %v8454_v6 = vld [vmem:[#allocation4 + $0x110c] ss:$16 sps:$4 sm:$0xff]   ;;  %v4279_v7 = vadd.f32 %v9051_v44, %v876_v56  ;;  %v8458_v44 = vld [vmem:[#allocation4 + $0x13c8] ss:$16 sps:$4 sm:$0xff]  }
 0x2bf   :  { %5073 = vmatprep.subr.bf16.mxu1 %v8406_v12  ;;  %v8457_v12 = vld [vmem:[#allocation4 + $0x13ec] ss:$16 sps:$4 sm:$0xff]   ;;  %v8491_v56 = vld [vmem:[#allocation4 + $0x1428] ss:$16 sps:$4 sm:$0xff]  }
 0x2c0   :  { %5049 = vmatmul.mubr.bf16.vlgmr.msra.gmra.mxu0 %v9041_v26  ;;  %v8422_v26 = vld [vmem:[#allocation4 + $0x11a8] ss:$16 sps:$4 sm:$0xff]  }
 0x2c1   :  { %5103 = vmatpush1.bf16.msra.mxu0 %v8407_v14  ;;  %5134 = vmatprep.mubr.bf16.mxu0 %v9047_v36  ;;  %v8431_v36 = vld [vmem:[#allocation4 + $0x1268] ss:$16 sps:$4 sm:$0xff]  }
 0x2c2   :  { %5074 = vmatpush1.bf16.msra.mxu1 %v8404_v47  ;;  %5104 = vmatprep.subr.bf16.mxu0 %v8415_v28  ;;  %v4326_v47 = vadd.f32 %v9067_v30, %v4283_v61  ;;  %v8452_v14 = vld [vmem:[#allocation4 + $0x1108] ss:$16 sps:$4 sm:$0xff]   ;;  %v8460_v28 = vld [vmem:[#allocation4 + $0x13cc] ss:$16 sps:$4 sm:$0xff]  }
 0x2c3   :  { %5075 = vmatprep.subr.bf16.mxu1 %v8412_v15  ;;  %v8455_v15 = vld [vmem:[#allocation4 + $0x13e8] ss:$16 sps:$4 sm:$0xff]  }
 0x2c5   :  { %5105 = vmatpush1.bf16.msra.mxu0 %v8413_v3  ;;  %v4322_v3 = vadd.f32 %v9053_v48, %v4279_v7 }
 0x2c6   :  { %5076 = vmatpush2.bf16.msra.mxu1 %v8410_v45  ;;  %5106 = vmatprep.subr.bf16.mxu0 %v8421_v58  ;;  %v8463_v45 = vld [vmem:[#allocation4 + $0x14c8] ss:$16 sps:$4 sm:$0x1f]  }
 0x2c7   :  { %5077 = vmatprep.subr.bf16.mxu1 %v8418_v18  ;;  %v4369_v18 = vadd.f32 %v9090_v39, %v4326_v47  ;;  %v4365_v58 = vadd.f32 %v9074_v42, %v4322_v3  ;;  %v4237_v30 = vsel %vm4229_vm0, %v8463_v45, 0  ;;  %v8464_v42 = vld [vmem:[#allocation4 + $0x13a8] ss:$16 sps:$4 sm:$0xff]   ;;  %v8596_v3 = vld [vmem:[#allocation7 + $0x2e0] ss:$16 sps:$4 sm:$0xff]  }
 0x2c8   :  { %v8511_v45 = vld [vmem:[#allocation7 + $0x84] ss:$16 sps:$4 sm:$0xff]  }
 0x2c9   :  { %5107 = vmatpush1.bf16.msra.mxu0 %v8419_v20  ;;  %v8469_v20 = vld [vmem:[#allocation4 + $0x14ac] ss:$16 sps:$4 sm:$0xff]   ;;  %v4408_v48 = vadd.f32 %v9076_v43, %v4365_v58  ;;  %v8473_v43 = vld [vmem:[#allocation4 + $0x1488] ss:$16 sps:$4 sm:$0xff]  }
 0x2ca   :  { %5078 = vmatpush2.bf16.msra.mxu1 %v8416_v11  ;;  %5108 = vmatprep.subr.bf16.mxu0 %v8427_v10  ;;  %v8466_v11 = vld [vmem:[#allocation4 + $0x13ac] ss:$16 sps:$4 sm:$0xff]   ;;  %v8467_v10 = vld [vmem:[#allocation4 + $0x14a8] ss:$16 sps:$4 sm:$0xff]  }
 0x2cb   :  { %5079 = vmatprep.subr.bf16.mxu1 %v8424_v40  ;;  %v4412_v40 = vadd.f32 %v9092_v41, %v4369_v18  ;;  %v8598_v18 = vld [vmem:[#allocation7 + $0x2e4] ss:$16 sps:$4 sm:$0xff]  }
 0x2cc   :  { %v8601_v58 = vld [vmem:[#allocation7 + $0x2c4] ss:$16 sps:$4 sm:$0xff]  }
 0x2cd   :  { %5109 = vmatpush1.bf16.msra.mxu0 %v8425_v59  ;;  %v4455_v39 = vadd.f32 %v9108_v50, %v4412_v40  ;;  %v8475_v59 = vld [vmem:[#allocation4 + $0x148c] ss:$16 sps:$4 sm:$0xff]   ;;  %v8602_v40 = vld [vmem:[#allocation7 + $0x2a0] ss:$16 sps:$4 sm:$0xff]  }
 0x2ce   :  { %5080 = vmatpush2.bf16.msra.mxu1 %v8422_v26  ;;  %5110 = vmatprep.subr.bf16.mxu0 %v8433_v22  ;;  %v8472_v26 = vld [vmem:[#allocation4 + $0x138c] ss:$16 sps:$4 sm:$0xff]  }
 0x2cf   :  { %5081 = vmatprep.subr.bf16.mxu1 %v8430_v17  ;;  %v4451_v17 = vadd.f32 %v9096_v63, %v4408_v48  ;;  %v4498_v41 = vadd.f32 %v9110_v60, %v4455_v39  ;;  %v8478_v50 = vld [vmem:[#allocation4 + $0x136c] ss:$16 sps:$4 sm:$0xff]   ;;  %v8476_v63 = vld [vmem:[#allocation4 + $0x1368] ss:$16 sps:$4 sm:$0xff]   ;;  %v8515_v39 = vld [vmem:[#allocation7 + $0x40] ss:$16 sps:$4 sm:$0xff]  }
 0x2d0   :  { %v8481_v22 = vld [vmem:[#allocation4 + $0x146c] ss:$16 sps:$4 sm:$0xff]   ;;  %v8607_v48 = vld [vmem:[#allocation7 + $0x284] ss:$16 sps:$4 sm:$0xff]  }
 0x2d1   :  { %5111 = vmatpush1.bf16.msra.mxu0 %v8431_v36  ;;  %v4541_v36 = vadd.f32 %v9126_v53, %v4498_v41  ;;  %v8484_v60 = vld [vmem:[#allocation4 + $0x134c] ss:$16 sps:$4 sm:$0xff]   ;;  %v8485_v53 = vld [vmem:[#allocation4 + $0x1448] ss:$16 sps:$4 sm:$0xff]   ;;  %v8608_v41 = vld [vmem:[#allocation7 + $0x260] ss:$16 sps:$4 sm:$0xff]  }
 0x2d2   :  { %5082 = vmatpush2.bf16.msra.mxu1 %v8428_v31  ;;  %5112 = vmatprep.subr.bf16.mxu0 %v8439_v16  ;;  %v4494_v31 = vadd.f32 %v9098_v2, %v4451_v17  ;;  %v8487_v16 = vld [vmem:[#allocation4 + $0x144c] ss:$16 sps:$4 sm:$0xff]   ;;  %v8482_v2 = vld [vmem:[#allocation4 + $0x1348] ss:$16 sps:$4 sm:$0xff]  }
 0x2d3   :  { %5083 = vmatprep.subr.bf16.mxu1 %v8436_v32  ;;  %v8523_v17 = vld [vmem:[#allocation7 + $0x4] ss:$16 sps:$4 sm:$0xff]  }
 0x2d4   :  { %v4537_v32 = vadd.f32 %v9114_v52, %v4494_v31  ;;  %v8490_v52 = vld [vmem:[#allocation4 + $0x132c] ss:$16 sps:$4 sm:$0xff]   ;;  %v8524_v31 = vld [vmem:[#allocation7 + $0x1e0] ss:$16 sps:$4 sm:$0xff]  }
 0x2d5   :  { %5113 = vmatpush1.bf16.msra.mxu0 %v8437_v25 }
 0x2d6   :  { %5084 = vmatpush2.bf16.msra.mxu1 %v8434_v1  ;;  %5114 = vmatprep.subr.bf16.mxu0 %v8445_v33  ;;  %v4584_v1 = vadd.f32 %v9128_v62, %v4541_v36  ;;  %v4580_v25 = vadd.f32 %v9116_v13, %v4537_v32  ;;  %v8493_v33 = vld [vmem:[#allocation4 + $0x142c] ss:$16 sps:$4 sm:$0xff]   ;;  %v8488_v62 = vld [vmem:[#allocation4 + $0x1328] ss:$16 sps:$4 sm:$0xff]   ;;  %v8527_v32 = vld [vmem:[#allocation7 + $0x1c0] ss:$16 sps:$4 sm:$0xff]  }
 0x2d7   :  { %5085 = vmatprep.subr.bf16.mxu1 %v8442_v21  ;;  %v8496_v13 = vld [vmem:[#allocation4 + $0x130c] ss:$16 sps:$4 sm:$0xff]   ;;  %v8529_v36 = vld [vmem:[#allocation7 + $0x1c4] ss:$16 sps:$4 sm:$0xff]  }
 0x2d8   :  { %v4627_v21 = vadd.f32 %v9138_v9, %v4584_v1  ;;  %v8499_v9 = vld [vmem:[#allocation4 + $0x140c] ss:$16 sps:$4 sm:$0xff]   ;;  %v8614_v1 = vld [vmem:[#allocation7 + $0x220] ss:$16 sps:$4 sm:$0xff]  }
 0x2d9   :  { %5115 = vmatpush1.bf16.msra.mxu0 %v8443_v35  ;;  %v4669_v35 = vpop.f32.mrf.mxu1 }
 0x2da   :  { %5086 = vmatpush2.bf16.msra.mxu1 %v8440_v38  ;;  %5116 = vmatprep.subr.bf16.mxu0 %v8451_v51  ;;  %v4623_v38 = vadd.f32 %v9132_v29, %v4580_v25  ;;  %v4670_v51 = vadd.f32 %v4669_v35, %v4627_v21  ;;  %v8497_v29 = vld [vmem:[#allocation4 + $0x1408] ss:$16 sps:$4 sm:$0xff]   ;;  %v8533_v25 = vld [vmem:[#allocation7 + $0x180] ss:$16 sps:$4 sm:$0xff]  }
 0x2db   :  { %5087 = vmatprep.subr.bf16.mxu1 %v8448_v49  ;;  %v4712_v49 = vpop.f32.mrf.mxu0  ;;  %v8619_v21 = vld [vmem:[#allocation7 + $0x204] ss:$16 sps:$4 sm:$0xff]  }
 0x2dc   :  { %v4666_v61 = vadd.f32 %v9134_v54, %v4623_v38  ;;  %v8503_v54 = vld [vmem:[#allocation7 + $0xc0] ss:$16 sps:$4 sm:$0xff]   ;;  %v8625_v35 = vld [vmem:[#allocation7 + $0x3c4] ss:$16 sps:$4 sm:$0xff]  }
 0x2dd   :  { %5117 = vmatpush1.bf16.msra.mxu0 %v8449_v5  ;;  %v8536_v38 = vld [vmem:[#allocation7 + $0x160] ss:$16 sps:$4 sm:$0xff]  }
 0x2de   :  { %5088 = vmatpush2.bf16.msra.mxu1 %v8446_v4  ;;  %5118 = vmatprep.subr.bf16.mxu0 %v8457_v12  ;;  %v4713_v4 = vadd.f32 %v4712_v49, %v4670_v51  ;;  %v4709_v5 = vadd.f32 %v9141_v46, %v4666_v61  ;;  %v8502_v12 = vld [vmem:[#allocation7 + $0xe4] ss:$16 sps:$4 sm:$0xff]   ;;  %v8623_v51 = vld [vmem:[#allocation7 + $0x3c0] ss:$16 sps:$4 sm:$0xff]  }
 0x2df   :  { %5089 = vmatprep.subr.bf16.mxu1 %v8454_v6  ;;  %v8494_v6 = vld [vmem:[#allocation4 + $0x1308] ss:$16 sps:$4 sm:$0xff]   ;;  %v8542_v61 = vld [vmem:[#allocation7 + $0x120] ss:$16 sps:$4 sm:$0xff]  }
 0x2e0   :  { %v5193_v7 = vmax.f32 %v4713_v4, 0.0  ;;  %v5189_v47 = vmax.f32 %v4709_v5, 0.0  ;;  %v8508_v46 = vld [vmem:[#allocation7 + $0xa4] ss:$16 sps:$4 sm:$0xff]  }
 0x2e1   :  { %5119 = vmatpush2.bf16.msra.mxu0 %v8455_v15  ;;  %v8505_v15 = vld [vmem:[#allocation7 + $0xc4] ss:$16 sps:$4 sm:$0xff]  }
 0x2e2   :  { %5090 = vmatpush2.bf16.msra.mxu1 %v8452_v14  ;;  %5120 = vmatprep.subr.bf16.mxu0 %v8460_v28  ;;  %v8500_v14 = vld [vmem:[#allocation7 + $0xe0] ss:$16 sps:$4 sm:$0xff]   ;;  %v9180_v28 = vpack.c.bf16 %v5193_v7, %v5189_v47  ;;  %v8541_v49 = vld [vmem:[#allocation7 + $0x144] ss:$16 sps:$4 sm:$0xff]   ;;  %v8550_v7 = vld [vmem:[#allocation7 + $0xec] ss:$16 sps:$4 sm:$0xff]  }
 0x2e3   :  { %7260 = vmatprep.subr.msk.bf16.mxu1 %vm4229_vm0, %v8461_v27  ;;  %v8506_v27 = vld [vmem:[#allocation7 + $0xa0] ss:$16 sps:$4 sm:$0xff]   ;;  %v8631_v4 = vld [vmem:[#allocation7 + $0x384] ss:$16 sps:$4 sm:$0xff]  }
 0x2e4   :  { %v8547_v5 = vld [vmem:[#allocation7 + $0x104] ss:$16 sps:$4 sm:$0xff]   ;;  %v8632_v47 = vld [vmem:[#allocation7 + $0x360] ss:$16 sps:$4 sm:$0xff]  }
 0x2e5   :  { %5092 = vmatmul.mubr.bf16.vlgmr.msra.gmra.mxu1 %v9061_v23  ;;  %5121 = vmatpush2.bf16.msra.mxu0 %v8458_v44  ;;  %v8470_v23 = vld [vmem:[#allocation4 + $0x1388] ss:$16 sps:$4 sm:$0xff]   ;;  %v8509_v44 = vld [vmem:[#allocation7 + $0x80] ss:$16 sps:$4 sm:$0xff]  }
 0x2e6   :  { %5148 = vmatpush1.bf16.msra.mxu1 %v4237_v30  ;;  %5122 = vmatprep.subr.bf16.mxu0 %v8466_v11  ;;  %v8604_v30 = vld [vmem:[#allocation7 + $0x2a4] ss:$16 sps:$4 sm:$0xff]   ;;  %v8512_v11 = vld [vmem:[#allocation7 + $0x60] ss:$16 sps:$4 sm:$0xff]  }
 0x2e7   :  { %5149 = vmatprep.subr.bf16.mxu1 %v8469_v20  ;;  %5177 = vmatprep.mubr.bf16.mxu1 %v8911_v57  ;;  %v8479_v57 = vld [vmem:[#allocation4 + $0x1468] ss:$16 sps:$4 sm:$0xff]  }
 0x2e8   :  { %v8517_v20 = vld [vmem:[#allocation7 + $0x44] ss:$16 sps:$4 sm:$0xff]  }
 0x2e9   :  { %5123 = vmatpush2.bf16.msra.mxu0 %v8464_v42  ;;  %v8520_v42 = vld [vmem:[#allocation7 + $0x24] ss:$16 sps:$4 sm:$0xff]  }
 0x2ea   :  { %5150 = vmatpush1.bf16.msra.mxu1 %v8467_v10  ;;  %5124 = vmatprep.subr.bf16.mxu0 %v8472_v26  ;;  %v8605_v10 = vld [vmem:[#allocation7 + $0x280] ss:$16 sps:$4 sm:$0xff]   ;;  %v8610_v26 = vld [vmem:[#allocation7 + $0x264] ss:$16 sps:$4 sm:$0xff]  }
 0x2eb   :  { %5151 = vmatprep.subr.bf16.mxu1 %v8475_v59  ;;  %v8518_v59 = vld [vmem:[#allocation7 + $0x20] ss:$16 sps:$4 sm:$0xff]  }
 0x2ed   :  { %5125 = vmatpush2.bf16.msra.mxu0 %v8470_v23  ;;  %v8613_v23 = vld [vmem:[#allocation7 + $0x244] ss:$16 sps:$4 sm:$0xff]  }
 0x2ee   :  { %5152 = vmatpush1.bf16.msra.mxu1 %v8473_v43  ;;  %5126 = vmatprep.subr.bf16.mxu0 %v8478_v50  ;;  %v8521_v43 = vld [vmem:[#allocation7] ss:$16 sps:$4 sm:$0xff]   ;;  %v8526_v50 = vld [vmem:[#allocation7 + $0x1e4] ss:$16 sps:$4 sm:$0xff]  }
 0x2ef   :  { %5153 = vmatprep.subr.bf16.mxu1 %v8481_v22  ;;  %v8611_v22 = vld [vmem:[#allocation7 + $0x240] ss:$16 sps:$4 sm:$0xff]  }
 0x2f1   :  { %5127 = vmatpush2.bf16.msra.mxu0 %v8476_v63  ;;  %v8532_v63 = vld [vmem:[#allocation7 + $0x1a4] ss:$16 sps:$4 sm:$0xff]  }
 0x2f2   :  { %5154 = vmatpush1.bf16.msra.mxu1 %v8479_v57  ;;  %5128 = vmatprep.subr.bf16.mxu0 %v8484_v60  ;;  %v8530_v57 = vld [vmem:[#allocation7 + $0x1a0] ss:$16 sps:$4 sm:$0xff]   ;;  %v8616_v60 = vld [vmem:[#allocation7 + $0x224] ss:$16 sps:$4 sm:$0xff]  }
 0x2f3   :  { %5155 = vmatprep.subr.bf16.mxu1 %v8487_v16  ;;  %v8535_v16 = vld [vmem:[#allocation7 + $0x184] ss:$16 sps:$4 sm:$0xff]  }
 0x2f5   :  { %5129 = vmatpush2.bf16.msra.mxu0 %v8482_v2  ;;  %v8538_v2 = vld [vmem:[#allocation7 + $0x164] ss:$16 sps:$4 sm:$0xff]  }
 0x2f6   :  { %5156 = vmatpush1.bf16.msra.mxu1 %v8485_v53  ;;  %5130 = vmatprep.subr.bf16.mxu0 %v8490_v52  ;;  %v8617_v53 = vld [vmem:[#allocation7 + $0x200] ss:$16 sps:$4 sm:$0xff]   ;;  %v8622_v52 = vld [vmem:[#allocation7 + $0x3e4] ss:$16 sps:$4 sm:$0xff]  }
 0x2f7   :  { %5157 = vmatprep.subr.bf16.mxu1 %v8493_v33  ;;  %v8620_v33 = vld [vmem:[#allocation7 + $0x3e0] ss:$16 sps:$4 sm:$0xff]  }
 0x2f9   :  { %5131 = vmatpush2.bf16.msra.mxu0 %v8488_v62  ;;  %v8539_v62 = vld [vmem:[#allocation7 + $0x140] ss:$16 sps:$4 sm:$0xff]  }
 0x2fa   :  { %5158 = vmatpush1.bf16.msra.mxu1 %v8491_v56  ;;  %5132 = vmatprep.subr.bf16.mxu0 %v8496_v13  ;;  %v8628_v56 = vld [vmem:[#allocation7 + $0x3a4] ss:$16 sps:$4 sm:$0xff]  }
 0x2fb   :  { %5159 = vmatprep.subr.bf16.mxu1 %v8499_v9  ;;  %v8544_v13 = vld [vmem:[#allocation7 + $0x124] ss:$16 sps:$4 sm:$0xff]   ;;  %v8626_v9 = vld [vmem:[#allocation7 + $0x3a0] ss:$16 sps:$4 sm:$0xff]  }
 0x2fd   :  { %5133 = vmatpush2.bf16.msra.mxu0 %v8494_v6  ;;  %v8629_v6 = vld [vmem:[#allocation7 + $0x380] ss:$16 sps:$4 sm:$0xff]  }
 0x2fe   :  { %5160 = vmatpush1.bf16.msra.mxu1 %v8497_v29  ;;  %5990 = vmatprep.subr.bf16.mxu0 %v8502_v12  ;;  %v8545_v29 = vld [vmem:[#allocation7 + $0x100] ss:$16 sps:$4 sm:$0xff]   ;;  %v8634_v12 = vld [vmem:[#allocation7 + $0x364] ss:$16 sps:$4 sm:$0xff]  }
 0x2ff   :  { %6033 = vmatprep.subr.bf16.mxu1 %v8598_v18  ;;  %v8640_v18 = vld [vmem:[#allocation7 + $0x324] ss:$16 sps:$4 sm:$0xff]  }
 0x300   :  { %5135 = vmatmul.mubr.bf16.vlgmr.msra.gmra.mxu0 %v9063_v24  ;;  %v8514_v24 = vld [vmem:[#allocation7 + $0x64] ss:$16 sps:$4 sm:$0xff]  }
 0x301   :  { %7261 = vmatmul.mubr.msk.bf16.vlgmr.msra.gmra.mxu1 %vm4225_vm1, %v9085_v34  ;;  %5991 = vmatpush1.bf16.msra.mxu0 %v8500_v14  ;;  %v8599_v34 = vld [vmem:[#allocation7 + $0x2c0] ss:$16 sps:$4 sm:$0xff]   ;;  %v8548_v14 = vld [vmem:[#allocation7 + $0xe8] ss:$16 sps:$4 sm:$0xff]  }
 0x302   :  { %6022 = vmatprep.mubr.bf16.mxu0 %v9180_v28  ;;  %5992 = vmatprep.subr.bf16.mxu0 %v8505_v15  ;;  %v8553_v15 = vld [vmem:[#allocation7 + $0xcc] ss:$16 sps:$4 sm:$0xff]  }
 0x303   :  { %6034 = vmatpush1.bf16.msra.mxu1 %v8596_v3  ;;  %v8554_v3 = vld [vmem:[#allocation7 + $0xa8] ss:$16 sps:$4 sm:$0xff]  }
 0x304   :  { %6035 = vmatprep.subr.bf16.mxu1 %v8601_v58  ;;  %v8559_v58 = vld [vmem:[#allocation7 + $0x8c] ss:$16 sps:$4 sm:$0xff]  }
 0x305   :  { %5993 = vmatpush1.bf16.msra.mxu0 %v8503_v54  ;;  %v8551_v54 = vld [vmem:[#allocation7 + $0xc8] ss:$16 sps:$4 sm:$0xff]  }
 0x306   :  { %5994 = vmatprep.subr.bf16.mxu0 %v8508_v46  ;;  %v8637_v46 = vld [vmem:[#allocation7 + $0x344] ss:$16 sps:$4 sm:$0xff]  }
 0x307   :  { %6036 = vmatpush1.bf16.msra.mxu1 %v8599_v34  ;;  %v8643_v34 = vld [vmem:[#allocation7 + $0x304] ss:$16 sps:$4 sm:$0xff]  }
 0x308   :  { %6037 = vmatprep.subr.bf16.mxu1 %v8604_v30  ;;  %v8641_v30 = vld [vmem:[#allocation7 + $0x300] ss:$16 sps:$4 sm:$0xff]  }
 0x309   :  { %5995 = vmatpush1.bf16.msra.mxu0 %v8506_v27  ;;  %v8556_v27 = vld [vmem:[#allocation7 + $0xac] ss:$16 sps:$4 sm:$0xff]  }
 0x30a   :  { %5996 = vmatprep.subr.bf16.mxu0 %v8511_v45  ;;  %v8635_v45 = vld [vmem:[#allocation7 + $0x340] ss:$16 sps:$4 sm:$0xff]  }
 0x30b   :  { %6038 = vmatpush1.bf16.msra.mxu1 %v8602_v40  ;;  %v8565_v40 = vld [vmem:[#allocation7 + $0x4c] ss:$16 sps:$4 sm:$0xff]  }
 0x30c   :  { %6039 = vmatprep.subr.bf16.mxu1 %v8607_v48  ;;  %v8563_v48 = vld [vmem:[#allocation7 + $0x48] ss:$16 sps:$4 sm:$0xff]  }
 0x30d   :  { %5997 = vmatpush1.bf16.msra.mxu0 %v8509_v44  ;;  %v8638_v44 = vld [vmem:[#allocation7 + $0x320] ss:$16 sps:$4 sm:$0xff]  }
 0x30e   :  { %5998 = vmatprep.subr.bf16.mxu0 %v8514_v24  ;;  %v8557_v24 = vld [vmem:[#allocation7 + $0x88] ss:$16 sps:$4 sm:$0xff]  }
 0x30f   :  { %6040 = vmatpush1.bf16.msra.mxu1 %v8605_v10  ;;  %v8571_v10 = vld [vmem:[#allocation7 + $0xc] ss:$16 sps:$4 sm:$0xff]  }
 0x310   :  { %6041 = vmatprep.subr.bf16.mxu1 %v8610_v26  ;;  %v8569_v26 = vld [vmem:[#allocation7 + $0x8] ss:$16 sps:$4 sm:$0xff]  }
 0x311   :  { %5999 = vmatpush1.bf16.msra.mxu0 %v8512_v11  ;;  %v8560_v11 = vld [vmem:[#allocation7 + $0x68] ss:$16 sps:$4 sm:$0xff]  }
 0x312   :  { %6000 = vmatprep.subr.bf16.mxu0 %v8517_v20  ;;  %v8646_v20 = vld [vmem:[#allocation7 + $0x2ec] ss:$16 sps:$4 sm:$0xff]  }
 0x313   :  { %6042 = vmatpush1.bf16.msra.mxu1 %v8608_v41  ;;  %v8577_v41 = vld [vmem:[#allocation7 + $0x1cc] ss:$16 sps:$4 sm:$0xff]  }
 0x314   :  { %6043 = vmatprep.subr.bf16.mxu1 %v8613_v23  ;;  %v8575_v23 = vld [vmem:[#allocation7 + $0x1c8] ss:$16 sps:$4 sm:$0xff]  }
 0x315   :  { %6001 = vmatpush1.bf16.msra.mxu0 %v8515_v39  ;;  %v8568_v39 = vld [vmem:[#allocation7 + $0x2c] ss:$16 sps:$4 sm:$0xff]  }
 0x316   :  { %6002 = vmatprep.subr.bf16.mxu0 %v8520_v42  ;;  %v8566_v42 = vld [vmem:[#allocation7 + $0x28] ss:$16 sps:$4 sm:$0xff]  }
 0x317   :  { %6044 = vmatpush1.bf16.msra.mxu1 %v8611_v22  ;;  %v8583_v22 = vld [vmem:[#allocation7 + $0x18c] ss:$16 sps:$4 sm:$0xff]  }
 0x318   :  { %6045 = vmatprep.subr.bf16.mxu1 %v8616_v60  ;;  %v8592_v60 = vld [vmem:[#allocation7 + $0x12c] ss:$16 sps:$4 sm:$0xff]  }
 0x319   :  { %6003 = vmatpush1.bf16.msra.mxu0 %v8518_v59  ;;  %v8574_v59 = vld [vmem:[#allocation7 + $0x1ec] ss:$16 sps:$4 sm:$0xff]  }
 0x31a   :  { %6004 = vmatprep.subr.bf16.mxu0 %v8523_v17  ;;  %v8572_v17 = vld [vmem:[#allocation7 + $0x1e8] ss:$16 sps:$4 sm:$0xff]  }
 0x31b   :  { %6046 = vmatpush1.bf16.msra.mxu1 %v8614_v1  ;;  %v8595_v1 = vld [vmem:[#allocation7 + $0x10c] ss:$16 sps:$4 sm:$0xff]  }
 0x31c   :  { %6047 = vmatprep.subr.bf16.mxu1 %v8619_v21  ;;  %v4749_v21 = vpop.f32.mrf.mxu1 }
 0x31d   :  { %6005 = vmatpush1.bf16.msra.mxu0 %v8521_v43  ;;  %v8580_v43 = vld [vmem:[#allocation7 + $0x1ac] ss:$16 sps:$4 sm:$0xff]  }
 0x31e   :  { %6006 = vmatprep.subr.bf16.mxu0 %v8526_v50  ;;  %v8578_v50 = vld [vmem:[#allocation7 + $0x1a8] ss:$16 sps:$4 sm:$0xff]  }
 0x31f   :  { %6048 = vmatpush1.bf16.msra.mxu1 %v8617_v53 }
 0x320   :  { %6049 = vmatprep.subr.bf16.mxu1 %v8622_v52 }
 0x321   :  { %6007 = vmatpush2.bf16.msra.mxu0 %v8524_v31  ;;  %v8581_v31 = vld [vmem:[#allocation7 + $0x188] ss:$16 sps:$4 sm:$0xff]  }
 0x322   :  { %6008 = vmatprep.subr.bf16.mxu0 %v8529_v36  ;;  %v8586_v36 = vld [vmem:[#allocation7 + $0x16c] ss:$16 sps:$4 sm:$0xff]  }
 0x323   :  { %6050 = vmatpush2.bf16.msra.mxu1 %v8620_v33  ;;  %v4792_v33 = vpop.f32.mrf.mxu0 }
 0x324   :  { %6051 = vmatprep.subr.bf16.mxu1 %v8625_v35 }
 0x325   :  { %6009 = vmatpush2.bf16.msra.mxu0 %v8527_v32  ;;  %v8584_v32 = vld [vmem:[#allocation7 + $0x168] ss:$16 sps:$4 sm:$0xff]   ;;  %v4794_v35 = vpop.f32.mrf.mxu0 }
 0x326   :  { %6010 = vmatprep.subr.bf16.mxu0 %v8532_v63  ;;  %v8589_v63 = vld [vmem:[#allocation7 + $0x14c] ss:$16 sps:$4 sm:$0xff]  }
 0x327   :  { %6052 = vmatpush2.bf16.msra.mxu1 %v8623_v51  ;;  %v4796_v51 = vpop.f32.mrf.mxu0 }
 0x328   :  { %6053 = vmatprep.subr.bf16.mxu1 %v8628_v56 }
 0x329   :  { %6011 = vmatpush2.bf16.msra.mxu0 %v8530_v57  ;;  %v8587_v57 = vld [vmem:[#allocation7 + $0x148] ss:$16 sps:$4 sm:$0xff]   ;;  %v4798_v56 = vpop.f32.mrf.mxu0 }
 0x32a   :  { %6012 = vmatprep.subr.bf16.mxu0 %v8535_v16  ;;  %v8590_v16 = vld [vmem:[#allocation7 + $0x128] ss:$16 sps:$4 sm:$0xff]  }
 0x32b   :  { %6054 = vmatpush2.bf16.msra.mxu1 %v8626_v9  ;;  %v4878_v9 = vpop.f32.mrf.mxu0 }
 0x32c   :  { %6055 = vmatprep.subr.bf16.mxu1 %v8631_v4 }
 0x32d   :  { %6013 = vmatpush2.bf16.msra.mxu0 %v8533_v25  ;;  %v8593_v25 = vld [vmem:[#allocation7 + $0x108] ss:$16 sps:$4 sm:$0xff]   ;;  %v4880_v4 = vpop.f32.mrf.mxu0 }
 0x32e   :  { %6014 = vmatprep.subr.bf16.mxu0 %v8538_v2  ;;  %v4751_v2 = vpop.f32.mrf.mxu1 }
 0x32f   :  { %6056 = vmatpush2.bf16.msra.mxu1 %v8629_v6  ;;  %v4882_v6 = vpop.f32.mrf.mxu0 }
 0x330   :  { %6057 = vmatprep.subr.bf16.mxu1 %v8634_v12  ;;  %v4753_v53 = vpop.f32.mrf.mxu1 }
 0x331   :  { %6015 = vmatpush2.bf16.msra.mxu0 %v8536_v38  ;;  %v4884_v12 = vpop.f32.mrf.mxu0 }
 0x332   :  { %6016 = vmatprep.subr.bf16.mxu0 %v8541_v49  ;;  %v4755_v52 = vpop.f32.mrf.mxu1 }
 0x333   :  { %6058 = vmatpush2.bf16.msra.mxu1 %v8632_v47 }
 0x334   :  { %6059 = vmatprep.subr.bf16.mxu1 %v8637_v46  ;;  %v4835_v38 = vpop.f32.mrf.mxu1  ;;  %v879_v46 = vsub.s32 2, %v9036_v8 }
 0x335   :  { %6017 = vmatpush2.bf16.msra.mxu0 %v8539_v62 }
 0x336   :  { %6018 = vmatprep.subr.bf16.mxu0 %v8544_v13  ;;  %v4837_v49 = vpop.f32.mrf.mxu1 }
 0x337   :  { %6060 = vmatpush2.bf16.msra.mxu1 %v8635_v45 }
 0x338   :  { %6061 = vmatprep.subr.bf16.mxu1 %v8640_v18  ;;  %v4839_v62 = vpop.f32.mrf.mxu1  ;;  %v880_v18 = vrot.slane %v9151_v55, %v879_v46 }
 0x339   :  { %6019 = vmatpush2.bf16.msra.mxu0 %v8542_v61 }
 0x33a   :  { %6020 = vmatprep.subr.bf16.mxu0 %v8547_v5  ;;  %v4841_v13 = vpop.f32.mrf.mxu1 }
 0x33b   :  { %6062 = vmatpush2.bf16.msra.mxu1 %v8638_v44 }
 0x33c   :  { %6063 = vmatprep.subr.bf16.mxu1 %v8643_v34  ;;  %v4921_v61 = vpop.f32.mrf.mxu1  ;;  %v4750_v34 = vadd.f32 %v4749_v21, %v880_v18 }
 0x33d   :  { %6021 = vmatpush2.bf16.msra.mxu0 %v8545_v29 }
 0x33e   :  { %6076 = vmatprep.subr.bf16.mxu0 %v8550_v7  ;;  %v4923_v5 = vpop.f32.mrf.mxu1 }
 0x33f   :  { %6064 = vmatpush2.bf16.msra.mxu1 %v8641_v30 }
 0x340   :  { %6023 = vmatmul.mubr.bf16.vlgmr.msra.gmra.mxu0 %v9144_v0  ;;  %6119 = vmatprep.subr.bf16.mxu1 %v8646_v20  ;;  %v4925_v29 = vpop.f32.mrf.mxu1  ;;  %v4964_v47 = vpop.f32.mrf.mxu0 }
 0x341   :  { %6077 = vmatpush1.bf16.msra.mxu0 %v8548_v14  ;;  %6108 = vmatprep.mubr.bf16.mxu0 %v9180_v28  ;;  %v8562_v28 = vld [vmem:[#allocation7 + $0x6c] ss:$16 sps:$4 sm:$0xff]  }
 0x342   :  { %6078 = vmatprep.subr.bf16.mxu0 %v8553_v15  ;;  %v4927_v7 = vpop.f32.mrf.mxu1  ;;  %v4966_v14 = vpop.f32.mrf.mxu0 }
 0x345   :  { %6079 = vmatpush1.bf16.msra.mxu0 %v8551_v54  ;;  %v883_v54 = vsub.s32 3, %v9036_v8 }
 0x346   :  { %6080 = vmatprep.subr.bf16.mxu0 %v8556_v27  ;;  %v4968_v27 = vpop.f32.mrf.mxu0 }
 0x349   :  { %6081 = vmatpush1.bf16.msra.mxu0 %v8554_v3  ;;  %v884_v3 = vrot.slane %v9151_v55, %v883_v54 }
 0x34a   :  { %6082 = vmatprep.subr.bf16.mxu0 %v8559_v58  ;;  %v4970_v58 = vpop.f32.mrf.mxu0 }
 0x34d   :  { %6083 = vmatpush1.bf16.msra.mxu0 %v8557_v24  ;;  %v4752_v24 = vadd.f32 %v4751_v2, %v884_v3 }
 0x34e   :  { %6084 = vmatprep.subr.bf16.mxu0 %v8562_v28 }
 0x34f   :  { %v4795_v20 = vadd.f32 %v4794_v35, %v4752_v24 }
 0x351   :  { %6085 = vmatpush1.bf16.msra.mxu0 %v8560_v11  ;;  %v4754_v11 = vadd.f32 %v4753_v53, %v880_v18 }
 0x352   :  { %6086 = vmatprep.subr.bf16.mxu0 %v8565_v40  ;;  %v4793_v40 = vadd.f32 %v4792_v33, %v4750_v34 }
 0x355   :  { %6087 = vmatpush1.bf16.msra.mxu0 %v8563_v48  ;;  %v4756_v48 = vadd.f32 %v4755_v52, %v884_v3 }
 0x356   :  { %6088 = vmatprep.subr.bf16.mxu0 %v8568_v39  ;;  %v4797_v39 = vadd.f32 %v4796_v51, %v4754_v11 }
 0x359   :  { %6089 = vmatpush1.bf16.msra.mxu0 %v8566_v42  ;;  %v4838_v42 = vadd.f32 %v4837_v49, %v4795_v20 }
 0x35a   :  { %6090 = vmatprep.subr.bf16.mxu0 %v8571_v10  ;;  %v4836_v10 = vadd.f32 %v4835_v38, %v4793_v40  ;;  %v8644_v40 = vld [vmem:[#allocation7 + $0x2e8] ss:$16 sps:$4 sm:$0xff]  }
 0x35d   :  { %6091 = vmatpush1.bf16.msra.mxu0 %v8569_v26 }
 0x35e   :  { %6092 = vmatprep.subr.bf16.mxu0 %v8574_v59 }
 0x361   :  { %6093 = vmatpush2.bf16.msra.mxu0 %v8572_v17  ;;  %v4799_v17 = vadd.f32 %v4798_v56, %v4756_v48 }
 0x362   :  { %6094 = vmatprep.subr.bf16.mxu0 %v8577_v41  ;;  %v4840_v41 = vadd.f32 %v4839_v62, %v4797_v39  ;;  %v8649_v39 = vld [vmem:[#allocation7 + $0x2cc] ss:$16 sps:$4 sm:$0xff]  }
 0x363   :  { %v4842_v55 = vadd.f32 %v4841_v13, %v4799_v17  ;;  %v8653_v17 = vld [vmem:[#allocation7 + $0x288] ss:$16 sps:$4 sm:$0xff]  }
 0x365   :  { %6095 = vmatpush2.bf16.msra.mxu0 %v8575_v23  ;;  %v4881_v23 = vadd.f32 %v4880_v4, %v4838_v42  ;;  %v8647_v42 = vld [vmem:[#allocation7 + $0x2c8] ss:$16 sps:$4 sm:$0xff]  }
 0x366   :  { %6096 = vmatprep.subr.bf16.mxu0 %v8580_v43  ;;  %v4879_v43 = vadd.f32 %v4878_v9, %v4836_v10  ;;  %v8652_v10 = vld [vmem:[#allocation7 + $0x2ac] ss:$16 sps:$4 sm:$0xff]  }
 0x369   :  { %6097 = vmatpush2.bf16.msra.mxu0 %v8578_v50  ;;  %v4883_v50 = vadd.f32 %v4882_v6, %v4840_v41  ;;  %v8658_v41 = vld [vmem:[#allocation7 + $0x26c] ss:$16 sps:$4 sm:$0xff]  }
 0x36a   :  { %6098 = vmatprep.subr.bf16.mxu0 %v8583_v22  ;;  %v4924_v22 = vadd.f32 %v4923_v5, %v4881_v23  ;;  %v8656_v23 = vld [vmem:[#allocation7 + $0x268] ss:$16 sps:$4 sm:$0xff]  }
 0x36d   :  { %6099 = vmatpush2.bf16.msra.mxu0 %v8581_v31  ;;  %v4922_v31 = vadd.f32 %v4921_v61, %v4879_v43  ;;  %v8661_v43 = vld [vmem:[#allocation7 + $0x24c] ss:$16 sps:$4 sm:$0xff]  }
 0x36e   :  { %6100 = vmatprep.subr.bf16.mxu0 %v8586_v36 }
 0x371   :  { %6101 = vmatpush2.bf16.msra.mxu0 %v8584_v32 }
 0x372   :  { %6102 = vmatprep.subr.bf16.mxu0 %v8589_v63  ;;  %v4885_v63 = vadd.f32 %v4884_v12, %v4842_v55  ;;  %v8659_v55 = vld [vmem:[#allocation7 + $0x248] ss:$16 sps:$4 sm:$0xff]  }
 0x375   :  { %6103 = vmatpush2.bf16.msra.mxu0 %v8587_v57  ;;  %v4926_v57 = vadd.f32 %v4925_v29, %v4883_v50  ;;  %v8664_v50 = vld [vmem:[#allocation7 + $0x22c] ss:$16 sps:$4 sm:$0xff]  }
 0x376   :  { %6104 = vmatprep.subr.bf16.mxu0 %v8592_v60  ;;  %v4967_v60 = vadd.f32 %v4966_v14, %v4924_v22  ;;  %v8662_v22 = vld [vmem:[#allocation7 + $0x228] ss:$16 sps:$4 sm:$0xff]  }
 0x379   :  { %6105 = vmatpush2.bf16.msra.mxu0 %v8590_v16  ;;  %v4965_v16 = vadd.f32 %v4964_v47, %v4922_v31  ;;  %v8667_v31 = vld [vmem:[#allocation7 + $0x20c] ss:$16 sps:$4 sm:$0xff]  }
 0x37a   :  { %6106 = vmatprep.subr.bf16.mxu0 %v8595_v1  ;;  %v4928_v1 = vadd.f32 %v4927_v7, %v4885_v63  ;;  %v8668_v63 = vld [vmem:[#allocation7 + $0x3e8] ss:$16 sps:$4 sm:$0xff]  }
 0x37c   :  { %v4971_v33 = vadd.f32 %v4970_v58, %v4928_v1  ;;  %v8674_v1 = vld [vmem:[#allocation7 + $0x3a8] ss:$16 sps:$4 sm:$0xff]  }
 0x37d   :  { %6107 = vmatpush2.bf16.msra.mxu0 %v8593_v25  ;;  %v4969_v25 = vadd.f32 %v4968_v27, %v4926_v57  ;;  %v8673_v57 = vld [vmem:[#allocation7 + $0x3cc] ss:$16 sps:$4 sm:$0xff]  }
 0x380   :  { %6109 = vmatmul.mubr.bf16.vlgmr.msra.gmra.mxu0 %v9144_v0  ;;  %v5007_v0 = vpop.f32.mrf.mxu1  ;;  %v5050_v28 = vpop.f32.mrf.mxu0 }
 0x381   :  { %v5008_v2 = vadd.f32 %v5007_v0, %v4965_v16  ;;  %v8676_v16 = vld [vmem:[#allocation7 + $0x3ac] ss:$16 sps:$4 sm:$0xff]  }
 0x382   :  { %v5009_v15 = vpop.f32.mrf.mxu1  ;;  %v5052_v26 = vpop.f32.mrf.mxu0 }
 0x383   :  { %v5010_v21 = vadd.f32 %v5009_v15, %v4967_v60  ;;  %v5051_v49 = vadd.f32 %v5050_v28, %v5008_v2  ;;  %v8671_v60 = vld [vmem:[#allocation7 + $0x3c8] ss:$16 sps:$4 sm:$0xff]   ;;  %v8682_v2 = vld [vmem:[#allocation7 + $0x36c] ss:$16 sps:$4 sm:$0xff]  }
 0x384   :  { %v5011_v45 = vpop.f32.mrf.mxu1  ;;  %v5054_v36 = vpop.f32.mrf.mxu0 }
 0x385   :  { %v5012_v38 = vadd.f32 %v5011_v45, %v4969_v25  ;;  %v5053_v35 = vadd.f32 %v5052_v26, %v5010_v21  ;;  %v8650_v26 = vld [vmem:[#allocation7 + $0x2a8] ss:$16 sps:$4 sm:$0xff]   ;;  %v8679_v25 = vld [vmem:[#allocation7 + $0x38c] ss:$16 sps:$4 sm:$0xff]  }
 0x386   :  { %v5013_v44 = vpop.f32.mrf.mxu1  ;;  %v5056_v53 = vpop.f32.mrf.mxu0  ;;  %v8677_v21 = vld [vmem:[#allocation7 + $0x388] ss:$16 sps:$4 sm:$0xff]  }
 0x387   :  { %v5014_v56 = vadd.f32 %v5013_v44, %v4971_v33  ;;  %v5055_v13 = vadd.f32 %v5054_v36, %v5012_v38  ;;  %v8665_v36 = vld [vmem:[#allocation7 + $0x208] ss:$16 sps:$4 sm:$0xff]   ;;  %v8688_v38 = vld [vmem:[#allocation7 + $0x32c] ss:$16 sps:$4 sm:$0xff]  }
 0x388   :  { %v8683_v33 = vld [vmem:[#allocation7 + $0x348] ss:$16 sps:$4 sm:$0xff]  }
 0x389   :  { %v5057_v6 = vadd.f32 %v5056_v53, %v5014_v56  ;;  %v8680_v53 = vld [vmem:[#allocation7 + $0x368] ss:$16 sps:$4 sm:$0xff]   ;;  %v8693_v56 = vld [vmem:[#allocation10 + $0x38] sm:$0xff]  }
 0x3a5   :  { %v5093_v30 = vpop.f32.mrf.mxu1 }
 0x3a6   :  { %v5094_v61 = vadd.f32 %v5093_v30, %v5051_v49  ;;  %v8691_v49 = vld [vmem:[#allocation7 + $0x30c] ss:$16 sps:$4 sm:$0xff]  }
 0x3a7   :  { %v5095_v59 = vpop.f32.mrf.mxu1 }
 0x3a8   :  { %v5096_v9 = vadd.f32 %v5095_v59, %v5053_v35  ;;  %v8655_v59 = vld [vmem:[#allocation7 + $0x28c] ss:$16 sps:$4 sm:$0xff]   ;;  %v8686_v35 = vld [vmem:[#allocation7 + $0x328] ss:$16 sps:$4 sm:$0xff]  }
 0x3a9   :  { %v5097_v32 = vpop.f32.mrf.mxu1 }
 0x3aa   :  { %v5098_v29 = vadd.f32 %v5097_v32, %v5055_v13  ;;  %v8670_v32 = vld [vmem:[#allocation7 + $0x3ec] ss:$16 sps:$4 sm:$0xff]   ;;  %v8694_v13 = vld [vmem:[#allocation10 + $0x70] sm:$0xff]  }
 0x3ab   :  { %v5099_v52 = vpop.f32.mrf.mxu1 }
 0x3ac   :  { %v5100_v14 = vadd.f32 %v5099_v52, %v5057_v6  ;;  %v8685_v52 = vld [vmem:[#allocation7 + $0x34c] ss:$16 sps:$4 sm:$0xff]  }
 0x3ad   :  { %v8707_v6 = vld [vmem:[#allocation12 + $0x8] sm:$0x1f]  }
 0x3c0   :  { %v5136_v51 = vpop.f32.mrf.mxu0 }
 0x3c1   :  { %v5179_v62 = vpop.f32.mrf.mxu1  ;;  %v5137_v7 = vadd.f32 %v5136_v51, %v5094_v61  ;;  %v8689_v51 = vld [vmem:[#allocation7 + $0x308] ss:$16 sps:$4 sm:$0xff]   ;;  %v8696_v61 = vld [vmem:[#allocation10 + $0x68] sm:$0xff]  }
 0x3c2   :  { %v5138_v4 = vpop.f32.mrf.mxu0 }
 0x3c3   :  { %v5181_v5 = vpop.f32.mrf.mxu1  ;;  %v5139_v12 = vadd.f32 %v5138_v4, %v5096_v9  ;;  %v5180_v58 = vadd.f32 %v5179_v62, %v5137_v7  ;;  %v8692_v62 = vld [vmem:[#allocation10 + $0x78] sm:$0xff]   ;;  %v8695_v9 = vld [vmem:[#allocation10 + $0x30] sm:$0xff]   ;;  %v8697_v4 = vld [vmem:[#allocation10 + $0x28] sm:$0xff]   ;;  %v6253_v7 = vsel %vm4229_vm0, %v8707_v6, 0 }
 0x3c4   :  { %v5140_v47 = vpop.f32.mrf.mxu0 }
 0x3c5   :  { %v5183_v0 = vpop.f32.mrf.mxu1  ;;  %v5141_v15 = vadd.f32 %v5140_v47, %v5098_v29  ;;  %v5182_v45 = vadd.f32 %v5181_v5, %v5139_v12  ;;  %v5190_v11 = vmax.f32 %v5180_v58, 0.0  ;;  %v8698_v5 = vld [vmem:[#allocation10 + $0x60] sm:$0xff]   ;;  %v8912_v12 = vmov 0.0   ;;  %v8700_v47 = vld [vmem:[#allocation10 + $0x58] sm:$0xff]  }
 0x3c6   :  { %v5142_v27 = vpop.f32.mrf.mxu0  ;;  %v8699_v29 = vld [vmem:[#allocation10 + $0x20] sm:$0xff]   ;;  %7473 = vmatprep.subr.bf16.mxu0 %v8912_v12  ;;  %7477 = vmatprep.mubr.msk.bf16.mxu0 %vm8913_vm2, %v8912_v12  ;;  %v8711_v58 = vld [vmem:[#allocation10 + $0xb8] sm:$0xff]  }
 0x3c7   :  { %v5184_v3 = vadd.f32 %v5183_v0, %v5141_v15  ;;  %v5143_v18 = vadd.f32 %v5142_v27, %v5100_v14  ;;  %v5185_v24 = vpop.f32.mrf.mxu1  ;;  %v5191_v28 = vmax.f32 %v5182_v45, 0.0  ;;  %7474 = vmatpush3.bf16.msra.mxu0 %v6253_v7  ;;  %v8709_v0 = vld [vmem:[#allocation12] sm:$0xff]   ;;  %v6230_v14 = vld [vmem:[%s9223_s1] sm:$0xff]  ;;  %v6231_v15 = vld [vmem:[%s9223_s1 + $0x8] sm:$0xff] }
 0x3c8   :  { %7475 = vmatprep.subr.bf16.mxu0 %v8912_v12  ;;  %v8701_v27 = vld [vmem:[#allocation10 + $0x18] sm:$0xff]   ;;  %v6232_v45 = vpack.c.bf16 %v6231_v15, %v6230_v14 }
 0x3c9   :  { %v5186_v44 = vadd.f32 %v5185_v24, %v5143_v18  ;;  %v5194_v34 = vmax.f32 %v5184_v3, 0.0  ;;  %v8710_v3 = vld [vmem:[#allocation10 + $0xf8] sm:$0xff]   ;;  %v8702_v18 = vld [vmem:[#allocation10 + $0x50] sm:$0xff]  }
 0x3ca   :  { %v8712_v24 = vld [vmem:[#allocation10 + $0xf0] sm:$0xff]  }
 0x3cb   :  { %v5195_v30 = vmax.f32 %v5186_v44, 0.0  ;;  %v9197_v48 = vpack.c.bf16 %v5194_v34, %v5190_v11  ;;  %7476 = vmatpush3.bf16.msra.mxu0 %v8709_v0  ;;  %v8703_v44 = vld [vmem:[#allocation10 + $0x10] sm:$0xff]   ;;  %v8704_v34 = vld [vmem:[#allocation10 + $0x48] sm:$0xff]  }
 0x3cc   :  { %7451 = vmatprep.subr.bf16.mxu0 %v8710_v3  ;;  %v8705_v11 = vld [vmem:[#allocation10 + $0x8] sm:$0xff]  }
 0x3cd   :  { %v5199_v20 = vpack.c.bf16 %v5195_v30, %v5191_v28  ;;  %v8713_v28 = vld [vmem:[#allocation10 + $0xb0] sm:$0xff]   ;;  %v8714_v30 = vld [vmem:[#allocation10 + $0xe8] sm:$0xff]  }
 0x3ce   :  { %7478 = vmatmul.mubr.msk.bf16.vlgmr.msra.gmra.mxu0 %vm6248_vm3, %v6232_v45 }
 0x3cf   :  { %6065 = vmatprep.mubr.bf16.mxu1 %v5199_v20  ;;  %7452 = vmatpush3.bf16.msra.mxu0 %v8711_v58 }
 0x3d0   :  { %6066 = vmatmul.mubr.bf16.vlgmr.msra.gmra.mxu1 %v9197_v48  ;;  %7453 = vmatprep.subr.bf16.mxu0 %v8712_v24 }
 0x3d1   :  { %6120 = vmatpush1.bf16.msra.mxu1 %v8644_v40  ;;  %6151 = vmatprep.mubr.bf16.mxu1 %v5199_v20  ;;  %v8706_v20 = vld [vmem:[#allocation10 + $0x40] sm:$0xff]   ;;  %v8715_v40 = vld [vmem:[#allocation10 + $0xa8] sm:$0xff]  }
 0x3d2   :  { %6121 = vmatprep.subr.bf16.mxu1 %v8649_v39  ;;  %v8708_v39 = vld [vmem:[#allocation10] sm:$0xff]  }
 0x3d3   :  { %7454 = vmatpush3.bf16.msra.mxu0 %v8713_v28 }
 0x3d4   :  { %7455 = vmatprep.subr.bf16.mxu0 %v8714_v30 }
 0x3d5   :  { %6122 = vmatpush1.bf16.msra.mxu1 %v8647_v42  ;;  %v8717_v42 = vld [vmem:[#allocation10 + $0xa0] sm:$0xff]  }
 0x3d6   :  { %6123 = vmatprep.subr.bf16.mxu1 %v8652_v10  ;;  %v8718_v10 = vld [vmem:[#allocation10 + $0xd8] sm:$0xff]  }
 0x3d7   :  { %7456 = vmatpush3.bf16.msra.mxu0 %v8715_v40 }
 0x3d9   :  { %6124 = vmatpush1.bf16.msra.mxu1 %v8650_v26  ;;  %v8719_v26 = vld [vmem:[#allocation10 + $0x98] sm:$0xff]  }
 0x3da   :  { %6125 = vmatprep.subr.bf16.mxu1 %v8655_v59  ;;  %v8720_v59 = vld [vmem:[#allocation10 + $0xd0] sm:$0xff]  }
 0x3dd   :  { %6126 = vmatpush1.bf16.msra.mxu1 %v8653_v17  ;;  %v8721_v17 = vld [vmem:[#allocation10 + $0x90] sm:$0xff]  }
 0x3de   :  { %6127 = vmatprep.subr.bf16.mxu1 %v8658_v41  ;;  %v8722_v41 = vld [vmem:[#allocation10 + $0xc8] sm:$0xff]  }
 0x3e1   :  { %6128 = vmatpush1.bf16.msra.mxu1 %v8656_v23  ;;  %v8723_v23 = vld [vmem:[#allocation10 + $0x88] sm:$0xff]  }
 0x3e2   :  { %6129 = vmatprep.subr.bf16.mxu1 %v8661_v43  ;;  %v8724_v43 = vld [vmem:[#allocation10 + $0xc0] sm:$0xff]  }
 0x3e5   :  { %6130 = vmatpush1.bf16.msra.mxu1 %v8659_v55  ;;  %v8725_v55 = vld [vmem:[#allocation10 + $0x80] sm:$0xff]  }
 0x3e6   :  { %6131 = vmatprep.subr.bf16.mxu1 %v8664_v50 }
 0x3e9   :  { %6132 = vmatpush1.bf16.msra.mxu1 %v8662_v22 }
 0x3ea   :  { %6133 = vmatprep.subr.bf16.mxu1 %v8667_v31 }
 0x3ed   :  { %6134 = vmatpush1.bf16.msra.mxu1 %v8665_v36  ;;  %v5328_v36 = vld [vmem:[#allocation9] sm:$0xf] }
 0x3ee   :  { %6135 = vmatprep.subr.bf16.mxu1 %v8670_v32 }
 0x3f1   :  { %6136 = vmatpush2.bf16.msra.mxu1 %v8668_v63  ;;  %v5337_v63 = vrot.slane %v5328_v36, %v875_v37 }
 0x3f2   :  { %6137 = vmatprep.subr.bf16.mxu1 %v8673_v57  ;;  %v5333_v57 = vrot.slane %v5328_v36, %v871_v19 }
 0x3f5   :  { %6138 = vmatpush2.bf16.msra.mxu1 %v8671_v60 }
 0x3f6   :  { %6139 = vmatprep.subr.bf16.mxu1 %v8676_v16 }
 0x3f9   :  { %6140 = vmatpush2.bf16.msra.mxu1 %v8674_v1 }
 0x3fa   :  { %6141 = vmatprep.subr.bf16.mxu1 %v8679_v25 }
 0x3fd   :  { %6142 = vmatpush2.bf16.msra.mxu1 %v8677_v21 }
 0x3fe   :  { %6143 = vmatprep.subr.bf16.mxu1 %v8682_v2 }
 0x400   :  { %v6024_v50 = vpop.f32.mrf.mxu0 }
 0x401   :  { %6144 = vmatpush2.bf16.msra.mxu1 %v8680_v53  ;;  %v6025_v53 = vadd.f32 %v6024_v50, %v5333_v57 }
 0x402   :  { %6145 = vmatprep.subr.bf16.mxu1 %v8685_v52  ;;  %v6026_v22 = vpop.f32.mrf.mxu0 }
 0x403   :  { %v6027_v21 = vadd.f32 %v6026_v22, %v5337_v63 }
 0x404   :  { %v6028_v31 = vpop.f32.mrf.mxu0 }
 0x405   :  { %6146 = vmatpush2.bf16.msra.mxu1 %v8683_v33  ;;  %v6029_v1 = vadd.f32 %v6028_v31, %v5333_v57 }
 0x406   :  { %6147 = vmatprep.subr.bf16.mxu1 %v8688_v38  ;;  %v6030_v60 = vpop.f32.mrf.mxu0 }
 0x407   :  { %v6031_v2 = vadd.f32 %v6030_v60, %v5337_v63 }
 0x409   :  { %6148 = vmatpush2.bf16.msra.mxu1 %v8686_v35 }
 0x40a   :  { %6149 = vmatprep.subr.bf16.mxu1 %v8691_v49 }
 0x40d   :  { %6150 = vmatpush2.bf16.msra.mxu1 %v8689_v51 }
 0x40e   :  { %7429 = vmatprep.subr.bf16.mxu1 %v8692_v62 }
 0x410   :  { %6152 = vmatmul.mubr.bf16.vlgmr.msra.gmra.mxu1 %v9197_v48  ;;  %v8716_v48 = vld [vmem:[#allocation10 + $0xe0] sm:$0xff]  }
 0x411   :  { %7430 = vmatpush3.bf16.msra.mxu1 %v8693_v56  ;;  %7457 = vmatprep.subr.bf16.mxu0 %v8716_v48 }
 0x412   :  { %7431 = vmatprep.subr.bf16.mxu1 %v8694_v13  ;;  %7458 = vmatpush3.bf16.msra.mxu0 %v8717_v42  ;;  %v7425_v42 = vld [vmem:[#allocation13] ss:$0 sm:$0xff] }
 0x413   :  { %7459 = vmatprep.subr.bf16.mxu0 %v8718_v10 }
 0x415   :  { %7432 = vmatpush3.bf16.msra.mxu1 %v8695_v9  ;;  %v5345_v9 = vrot.slane %v5328_v36, %v883_v54 }
 0x416   :  { %7433 = vmatprep.subr.bf16.mxu1 %v8696_v61  ;;  %7460 = vmatpush3.bf16.msra.mxu0 %v8719_v26  ;;  %v5341_v61 = vrot.slane %v5328_v36, %v879_v46 }
 0x417   :  { %7461 = vmatprep.subr.bf16.mxu0 %v8720_v59 }
 0x419   :  { %7434 = vmatpush3.bf16.msra.mxu1 %v8697_v4 }
 0x41a   :  { %7435 = vmatprep.subr.bf16.mxu1 %v8698_v5  ;;  %7462 = vmatpush3.bf16.msra.mxu0 %v8721_v17 }
 0x41b   :  { %7463 = vmatprep.subr.bf16.mxu0 %v8722_v41 }
 0x41d   :  { %7436 = vmatpush3.bf16.msra.mxu1 %v8699_v29 }
 0x41e   :  { %7437 = vmatprep.subr.bf16.mxu1 %v8700_v47  ;;  %7464 = vmatpush3.bf16.msra.mxu0 %v8723_v23 }
 0x41f   :  { %7465 = vmatprep.subr.bf16.mxu0 %v8724_v43 }
 0x421   :  { %7438 = vmatpush3.bf16.msra.mxu1 %v8701_v27 }
 0x422   :  { %7439 = vmatprep.subr.bf16.mxu1 %v8702_v18  ;;  %7466 = vmatpush3.bf16.msra.mxu0 %v8725_v55 }
 0x425   :  { %7440 = vmatpush3.bf16.msra.mxu1 %v8703_v44 }
 0x426   :  { %7441 = vmatprep.subr.bf16.mxu1 %v8704_v34 }
 0x429   :  { %7442 = vmatpush3.bf16.msra.mxu1 %v8705_v11 }
 0x42a   :  { %7443 = vmatprep.subr.bf16.mxu1 %v8706_v20 }
 0x42d   :  { %7444 = vmatpush3.bf16.msra.mxu1 %v8708_v39 }
 0x440   :  { %v6110_v37 = vpop.f32.mrf.mxu0 }
 0x441   :  { %v6111_v47 = vadd.f32 %v6110_v37, %v5341_v61 }
 0x442   :  { %v6112_v56 = vpop.f32.mrf.mxu0 }
 0x443   :  { %v6113_v12 = vadd.f32 %v6112_v56, %v5345_v9 }
 0x444   :  { %v6114_v13 = vpop.f32.mrf.mxu0 }
 0x445   :  { %v6115_v6 = vadd.f32 %v6114_v13, %v5341_v61 }
 0x446   :  { %v6116_v4 = vpop.f32.mrf.mxu0 }
 0x447   :  { %v6117_v7 = vadd.f32 %v6116_v4, %v5345_v9 }
 0x48e   :  { %v6289_v54 = vpop.f32.mrf.mxu0 }
 0x490   :  { %v6067_v32 = vpop.f32.mrf.mxu1  ;;  %v7479_v58 = vpop.f32.mrf.mxu0 }
 0x491   :  { %v6068_v49 = vadd.f32 %v6067_v32, %v6025_v53 }
 0x492   :  { %v6069_v16 = vpop.f32.mrf.mxu1  ;;  %v6292_v8 = vpop.f32.mrf.mxu0 }
 0x493   :  { %v6070_v38 = vadd.f32 %v6069_v16, %v6027_v21 }
 0x494   :  { %v6071_v25 = vpop.f32.mrf.mxu1  ;;  %v7480_v46 = vpop.f32.mrf.mxu0 }
 0x495   :  { %v6072_v52 = vadd.f32 %v6071_v25, %v6029_v1 }
 0x496   :  { %v6073_v33 = vpop.f32.mrf.mxu1 }
 0x497   :  { %v6074_v35 = vadd.f32 %v6073_v33, %v6031_v2  ;;  %v6162_v62 = vpack.c.bf16 %v6072_v52, %v6068_v49 }
 0x499   :  { %v6163_v51 = vpack.c.bf16 %v6074_v35, %v6070_v38 }
 0x49b   :  { %6520 = vmatprep.mubr.bf16.mxu1 %v6163_v51 }
 0x49c   :  { %6521 = vmatmul.mubr.bf16.vlgmr.msra.gmra.mxu1 %v6162_v62 }
 0x4d0   :  { %v6153_v19 = vpop.f32.mrf.mxu1 }
 0x4d1   :  { %v6154_v45 = vadd.f32 %v6153_v19, %v6111_v47 }
 0x4d2   :  { %v6155_v5 = vpop.f32.mrf.mxu1 }
 0x4d3   :  { %v6156_v15 = vadd.f32 %v6155_v5, %v6113_v12 }
 0x4d4   :  { %v6157_v29 = vpop.f32.mrf.mxu1 }
 0x4d5   :  { %v6158_v0 = vadd.f32 %v6157_v29, %v6115_v6 }
 0x4d6   :  { %v6159_v14 = vpop.f32.mrf.mxu1 }
 0x4d7   :  { %v6160_v27 = vadd.f32 %v6159_v14, %v6117_v7  ;;  %v6164_v18 = vpack.c.bf16 %v6158_v0, %v6154_v45 }
 0x4d9   :  { %v6165_v3 = vpack.c.bf16 %v6160_v27, %v6156_v15 }
 0x4db   :  { %6561 = vmatprep.mubr.bf16.mxu0 %v6165_v3 }
 0x4dc   :  { %6562 = vmatmul.mubr.bf16.vlgmr.msra.gmra.mxu0 %v6164_v18 }
 0x55c   :  { %v7445_v24 = vpop.f32.mrf.mxu1 }
 0x55e   :  { %v7446_v44 = vpop.f32.mrf.mxu1 }
 0x55f   :  { %v7447_v28 = vadd.f32 %v7446_v44, %v7445_v24 }
 0x560   :  { %v7448_v34 = vpop.f32.mrf.mxu1 }
 0x561   :  { %v6523_v40 = vadd.f32 %v7447_v28, %v6289_v54 }
 0x562   :  { %v7449_v30 = vpop.f32.mrf.mxu1 }
 0x563   :  { %v7450_v48 = vadd.f32 %v7449_v30, %v7448_v34 }
 0x565   :  { %v6526_v17 = vadd.f32 %v7450_v48, %v6292_v8 }
 0x59c   :  { %v7467_v11 = vpop.f32.mrf.mxu0 }
 0x59e   :  { %v7468_v20 = vpop.f32.mrf.mxu0 }
 0x59f   :  { %v7469_v39 = vadd.f32 %v7468_v20, %v7467_v11 }
 0x5a0   :  { %v7470_v10 = vpop.f32.mrf.mxu0 }
 0x5a1   :  { %v6564_v26 = vadd.f32 %v7469_v39, %v6523_v40 }
 0x5a2   :  { %v7471_v59 = vpop.f32.mrf.mxu0 }
 0x5a3   :  { %v6577_v41 = vadd.f32 %v7425_v42, %v6564_v26  ;;  %v7472_v23 = vadd.f32 %v7471_v59, %v7470_v10 }
 0x5a5   :  { %6579 = vst [vmem:[%s9231_s9] sm:$0xff] %v6577_v41  ;;  %v6567_v43 = vadd.f32 %v7472_v23, %v6526_v17 }
 0x5a7   :  { %v6578_v55 = vadd.f32 %v7425_v42, %v6567_v43 }
 0x5a9   :  { %6580 = vst [vmem:[%s9231_s9 + $0x8] sm:$0xff] %v6578_v55 }
 0x5aa   :  { %6585 = vsyncpa [#allocation3], 1 }
 0x5ab   :  { %6586 = vsyncpa [#allocation5], 1 }
 0x5ac   :  { %6587 = vsyncpa [#allocation8], 1 }
 0x5ad   :  { %6588 = vsyncpa [#allocation11], 1 }
 0x5ae   :  { %6589 = vsyncpa [#allocation14], 1 }

</bundles_post_ra>
